<compile_context>
chip_gen: v5e
topology: v5e:2x2
jax: 0.10.0
libtpu: 0.0.40
codegen_flags: <defaults>
</compile_context>

<pallas_src>
import functools

import jax
import jax.numpy as jnp
from jax import lax
from jax.experimental import pallas as pl
from jax.experimental.pallas import tpu as pltpu


_VMEM_LIMIT_BYTES = 32 * 1024 * 1024   # <= default scoped on v6e/v7x, raises v5e


# ----------------------------------------------------------------------------
# small helpers
# ----------------------------------------------------------------------------
def _apply_act(y, act):
    if act == "none":
        return y
    if act == "relu":
        return jnp.maximum(y, 0.0)
    if act == "leaky02":            # nn.LeakyReLU(negative_slope=0.2)
        return jnp.where(y >= 0, y, 0.2 * y)
    raise ValueError(act)


@functools.lru_cache(maxsize=None)
def _vmem_tile_budget():
    """Bytes of VMEM one kernel's double-buffered tiles may use."""
    cap = 128 * 1024 * 1024
    try:
        cap = int(getattr(pltpu.get_tpu_info(), "vmem_capacity_bytes", cap))
    except Exception:               # query unavailable -> conservative default
        pass
    # v5e/v6e (128 MiB) -> 24 MiB budget;  v7x (64 MiB) -> 16 MiB budget.
    return max(4 * 1024 * 1024, min(cap // 4, 24 * 1024 * 1024))


def _divisor_tile(rows, target):
    """Largest multiple-of-8 divisor of `rows` that is <= target (else rows)."""
    target = int(max(8, min(target, rows)))
    if rows <= target:
        return rows
    tm = (target // 8) * 8
    while tm >= 8 and rows % tm:
        tm -= 8
    return tm if (tm >= 8 and rows % tm == 0) else rows


def _matmul_tm(row_align, K, N):
    budget = _vmem_tile_budget()
    fixed = 2 * K * N * 4 + 32 * (K + N) * 4     # resident weight + bias/scale/stats
    per_row = 2 * 4 * (K + N)                    # dbl-buffered x row + y row
    cap = (budget - fixed) // per_row if budget > fixed else 8
    return _divisor_tile(row_align, min(512, cap))


def _affine_tm(row_align, C, k=1):
    budget = _vmem_tile_budget()
    per_row = 2 * 4 * ((k + 1) * C)              # dbl-buffered (k in-rows + out row)
    return _divisor_tile(row_align, min(1024, budget // per_row))


# ----------------------------------------------------------------------------
# Pallas kernels
# ----------------------------------------------------------------------------
def _matmul_stats_kernel(*refs, has_bias, has_pre, pre_act):
    i = 0
    x_ref = refs[i]; i += 1
    if has_pre:
        s_ref = refs[i]; t_ref = refs[i + 1]; i += 2
    w_ref = refs[i]; i += 1
    if has_bias:
        b_ref = refs[i]; i += 1
    y_ref, ps_ref, pq_ref = refs[i], refs[i + 1], refs[i + 2]

    x = x_ref[...]
    if has_pre:                      # fused BN-affine + activation of previous layer
        x = _apply_act(x * s_ref[0] + t_ref[0], pre_act)
    # bf16 MXU operands, f32 accumulation; bias / stats math in f32.
    y = jnp.dot(x.astype(jnp.bfloat16), w_ref[...].astype(jnp.bfloat16),
                preferred_element_type=jnp.float32)
    if has_bias:
        y = y + b_ref[...]
    y_ref[...] = y
    ps_ref[...] = jnp.sum(y, axis=0, keepdims=True).reshape(1, 1, -1)
    pq_ref[...] = jnp.sum(y * y, axis=0, keepdims=True).reshape(1, 1, -1)


def matmul_stats(x, w, b=None, row_align=None,
                 pre_scale=None, pre_shift=None, pre_act="none"):
    """y = act(x * pre_scale + pre_shift) @ w (+ b), plus per-tile column stats.

    x: [M, K], w: [K, N], b: [N] or None, pre_scale/pre_shift: [K] or None.
    Returns y [M, N] f32, psum [nt, 1, N], psq [nt, 1, N] with nt = M // tm.
    tm divides `row_align` so tiles never straddle a batch (needed for GN).
    """
    M, K = x.shape
    N = w.shape[1]
    if row_align is None:
        row_align = M
    tm = _matmul_tm(row_align, K, N)
    assert M % tm == 0 and row_align % tm == 0
    nt = M // tm
    has_pre = pre_scale is not None

    in_specs = [pl.BlockSpec((tm, K), lambda i: (i, 0))]
    args = [x]
    if has_pre:
        in_specs += [pl.BlockSpec((1, 1, K), lambda i: (0, 0, 0)),
                     pl.BlockSpec((1, 1, K), lambda i: (0, 0, 0))]
        args += [pre_scale.reshape(1, 1, K), pre_shift.reshape(1, 1, K)]
    in_specs.append(pl.BlockSpec((K, N), lambda i: (0, 0)))
    args.append(w)
    if b is not None:
        in_specs.append(pl.BlockSpec((1, N), lambda i: (0, 0)))
        args.append(b.reshape(1, N))

    y, ps, pq = pl.pallas_call(
        functools.partial(_matmul_stats_kernel, has_bias=b is not None,
                          has_pre=has_pre, pre_act=pre_act),
        out_shape=(jax.ShapeDtypeStruct((M, N), jnp.float32),
                   jax.ShapeDtypeStruct((nt, 1, N), jnp.float32),
                   jax.ShapeDtypeStruct((nt, 1, N), jnp.float32)),
        grid=(nt,),
        in_specs=in_specs,
        out_specs=(pl.BlockSpec((tm, N), lambda i: (i, 0)),
                   pl.BlockSpec((1, 1, N), lambda i: (i, 0, 0)),
                   pl.BlockSpec((1, 1, N), lambda i: (i, 0, 0))),
        compiler_params=pltpu.CompilerParams(
            dimension_semantics=("parallel",),
            vmem_limit_bytes=_VMEM_LIMIT_BYTES),
    )(*args)
    return y, ps, pq


def _affine_act_kernel(y_ref, s_ref, t_ref, o_ref, *, act):
    # s_ref / t_ref are (1, 1, C) resident blocks -> broadcast in-kernel.
    o_ref[...] = _apply_act(y_ref[...] * s_ref[0] + t_ref[0], act)


def affine_act(y, scale_bc, shift_bc, act, rows_per_group):
    """act(y * scale + shift) with per-(group, channel) scale/shift.

    y: [Gb * rows_per_group, C]; scale_bc/shift_bc: [Gb, C] (Gb=1 for BN).
    Only [Gb, C] bytes of scale/shift hit HBM.
    """
    M, C = y.shape
    Gb = scale_bc.shape[0]
    assert Gb * rows_per_group == M
    tm = _affine_tm(rows_per_group, C)
    assert rows_per_group % tm == 0
    nt = rows_per_group // tm

    return pl.pallas_call(
        functools.partial(_affine_act_kernel, act=act),
        out_shape=jax.ShapeDtypeStruct((M, C), jnp.float32),
        grid=(Gb, nt),
        in_specs=[pl.BlockSpec((tm, C), lambda b, t: (b * nt + t, 0)),
                  pl.BlockSpec((1, 1, C), lambda b, t: (b, 0, 0)),
                  pl.BlockSpec((1, 1, C), lambda b, t: (b, 0, 0))],
        out_specs=pl.BlockSpec((tm, C), lambda b, t: (b * nt + t, 0)),
        compiler_params=pltpu.CompilerParams(
            dimension_semantics=("parallel", "parallel"),
            vmem_limit_bytes=_VMEM_LIMIT_BYTES),
    )(y, scale_bc.reshape(Gb, 1, C), shift_bc.reshape(Gb, 1, C))


def _affine_maxk_kernel(y_ref, s_ref, t_ref, o_ref, *, act):
    # y block (k, tm, C); GN affine + activation then max over the k neighbours.
    v = _apply_act(y_ref[...] * s_ref[0] + t_ref[0], act)
    o_ref[...] = jnp.max(v, axis=0)


def affine_act_maxk(y3, scale_bc, shift_bc, act):
    """max_k( act(y * scale + shift) ) fused in one pass.

    y3: [B*k, Nq, C] (rows ordered (b, k, nq)); scale_bc/shift_bc: [B, C].
    Returns [B*Nq, C] (rows ordered (b, nq)).
    """
    BK, Nq, C = y3.shape
    Gb = scale_bc.shape[0]
    k = BK // Gb
    assert Gb * k == BK
    tm = _affine_tm(Nq, C, k=k)
    assert Nq % tm == 0
    nt = Nq // tm

    return pl.pallas_call(
        functools.partial(_affine_maxk_kernel, act=act),
        out_shape=jax.ShapeDtypeStruct((Gb * Nq, C), jnp.float32),
        grid=(Gb, nt),
        in_specs=[pl.BlockSpec((k, tm, C), lambda b, t: (b, t, 0)),
                  pl.BlockSpec((1, 1, C), lambda b, t: (b, 0, 0)),
                  pl.BlockSpec((1, 1, C), lambda b, t: (b, 0, 0))],
        out_specs=pl.BlockSpec((tm, C), lambda b, t: (b * nt + t, 0)),
        compiler_params=pltpu.CompilerParams(
            dimension_semantics=("parallel", "parallel"),
            vmem_limit_bytes=_VMEM_LIMIT_BYTES),
    )(y3, scale_bc.reshape(Gb, 1, C), shift_bc.reshape(Gb, 1, C))


def _mlp_head_kernel(x_ref, w1_ref, b1_ref, w2_ref, b2_ref, o_ref):
    h = jnp.dot(x_ref[...].astype(jnp.bfloat16), w1_ref[...].astype(jnp.bfloat16),
                preferred_element_type=jnp.float32) + b1_ref[...]
    h = jnp.where(h >= 0, h, 0.01 * h)                # F.leaky_relu default slope
    o_ref[...] = jnp.dot(h.astype(jnp.bfloat16), w2_ref[...].astype(jnp.bfloat16),
                         preferred_element_type=jnp.float32) + b2_ref[...]


def mlp_head(x, w1, b1, w2, b2):
    """Fused  leaky_relu(x @ w1 + b1) @ w2 + b2  for the tiny [B, *] head."""
    M, K = x.shape
    H = w1.shape[1]
    O = w2.shape[1]
    return pl.pallas_call(
        _mlp_head_kernel,
        out_shape=jax.ShapeDtypeStruct((M, O), jnp.float32),
        grid=(1,),
        in_specs=[pl.BlockSpec((M, K), lambda i: (0, 0)),
                  pl.BlockSpec((K, H), lambda i: (0, 0)),
                  pl.BlockSpec((1, H), lambda i: (0, 0)),
                  pl.BlockSpec((H, O), lambda i: (0, 0)),
                  pl.BlockSpec((1, O), lambda i: (0, 0))],
        out_specs=pl.BlockSpec((M, O), lambda i: (0, 0)),
        compiler_params=pltpu.CompilerParams(vmem_limit_bytes=_VMEM_LIMIT_BYTES),
    )(x, w1, b1.reshape(1, H), w2, b2.reshape(1, O))


# ----------------------------------------------------------------------------
# normalisation statistics finishing (tiny, plain JAX)
# ----------------------------------------------------------------------------
def _bn_scale_shift(ps, pq, M, gamma, beta, eps=1e-5):
    s = jnp.sum(ps.reshape(-1, ps.shape[-1]), axis=0)
    q = jnp.sum(pq.reshape(-1, pq.shape[-1]), axis=0)
    mean = s / M
    var = jnp.maximum(q / M - mean * mean, 0.0)       # biased var (PyTorch train)
    scale = gamma * lax.rsqrt(var + eps)
    shift = beta - mean * scale
    return scale, shift


def _gn_scale_shift(ps, pq, B, rows, Cout, gamma, beta, groups, eps=1e-5):
    cg = Cout // groups
    cnt = rows * cg
    ps_b = jnp.sum(ps.reshape(B, -1, Cout), axis=1)            # [B, Cout]
    pq_b = jnp.sum(pq.reshape(B, -1, Cout), axis=1)
    mean_g = jnp.sum(ps_b.reshape(B, groups, cg), axis=-1) / cnt
    var_g = jnp.maximum(
        jnp.sum(pq_b.reshape(B, groups, cg), axis=-1) / cnt - mean_g * mean_g, 0.0)
    inv_c = jnp.repeat(lax.rsqrt(var_g + eps), cg, axis=1)     # [B, Cout]
    mean_c = jnp.repeat(mean_g, cg, axis=1)
    scale = gamma[None, :] * inv_c
    shift = beta[None, :] - mean_c * scale
    return scale, shift


# ----------------------------------------------------------------------------
# fused layer helpers
# ----------------------------------------------------------------------------
def _dgcnn_layer(feat, w, gamma, beta, groups=4, eps=1e-5):
    """Conv2d(1x1, no bias) + GroupNorm(groups) + LeakyReLU(0.2) + max over k.

    feat: channels-last graph feature [B, k, Nq, Cin].  Returns [B, Cout, Nq].
    """
    B, k, Nq, Cin = feat.shape
    Cout = w.shape[1]
    rows = k * Nq
    x2d = feat.reshape(B * rows, Cin)
    y2d, ps, pq = matmul_stats(x2d, w, None, row_align=rows)   # no-bias variant
    scale, shift = _gn_scale_shift(ps, pq, B, rows, Cout, gamma, beta, groups, eps)
    # fused GN affine + LeakyReLU + max over the k neighbours (no extra HBM pass)
    out = affine_act_maxk(y2d.reshape(B * k, Nq, Cout), scale, shift, act="leaky02")
    return out.reshape(B, Nq, Cout).transpose(0, 2, 1)         # [B, Cout, Nq]


# ----------------------------------------------------------------------------
# JAX glue: FPS / KNN / gathers
# ----------------------------------------------------------------------------
def square_distance(src, dst):
    # src [B,N,C], dst [B,M,C] -> [B,N,M]
    d = -2.0 * jnp.einsum("bnc,bmc->bnm", src, dst)
    d += jnp.sum(src ** 2, -1)[..., None]
    d += jnp.sum(dst ** 2, -1)[:, None, :]
    return d


def fps_jax(xyz, npoint):
    """Furthest point sampling (starts at index 0, like the CUDA op)."""
    B, N, _ = xyz.shape

    def one(x):
        def body(i, state):
            idxs, dist, last = state
            d = jnp.sum((x - x[last]) ** 2, axis=-1)
            dist = jnp.minimum(dist, d)
            nxt = jnp.argmax(dist).astype(jnp.int32)
            return idxs.at[i].set(nxt), dist, nxt

        idxs0 = jnp.zeros((npoint,), jnp.int32)
        dist0 = jnp.full((N,), 1e10, jnp.float32)
        idxs, _, _ = lax.fori_loop(1, npoint, body, (idxs0, dist0, jnp.int32(0)))
        return idxs

    idx = jax.vmap(one)(xyz)                                    # [B, npoint]
    idx_e = jnp.broadcast_to(idx[:, :, None], (B, npoint, 3))
    return jnp.take_along_axis(xyz, idx_e, axis=1)              # [B, npoint, 3]


def knn_idx(coor_k, coor_q, k):
    """KNN(transpose_mode=False): ref [B,3,Nk], query [B,3,Nq] -> idx [B,k,Nq]."""
    # TODO(synk): tie-breaking may differ from knn_cuda for exactly equal distances.
    src = coor_q.transpose(0, 2, 1)
    dst = coor_k.transpose(0, 2, 1)
    d = square_distance(src, dst)                               # [B, Nq, Nk]
    _, idx = lax.top_k(-d, k)                                   # ascending distance
    return idx.transpose(0, 2, 1)                               # [B, k, Nq]


def get_graph_feature(coor_q, x_q, coor_k, x_k, k):
    """Channels-last graph feature: [B, k, Nq, 2C] (diff channels then x_q)."""
    B, C, Nq = x_q.shape
    idx = knn_idx(coor_k, coor_q, k)                            # [B, k, Nq]
    x_k_t = x_k.transpose(0, 2, 1)                              # [B, Nk, C]
    idx_flat = idx.reshape(B, k * Nq)
    idx_e = jnp.broadcast_to(idx_flat[:, :, None], (B, k * Nq, C))
    gathered = jnp.take_along_axis(x_k_t, idx_e, axis=1)        # [B, k*Nq, C]
    gathered = gathered.reshape(B, k, Nq, C)
    x_q_t = x_q.transpose(0, 2, 1)[:, None]                     # [B, 1, Nq, C]
    feature = jnp.concatenate(
        [gathered - x_q_t, jnp.broadcast_to(x_q_t, gathered.shape)], axis=-1)
    return feature                                              # [B, k, Nq, 2C]


# ----------------------------------------------------------------------------
# module forward passes
# ----------------------------------------------------------------------------
def pointnet_fp(p, xyz1, xyz2, points1, points2, only_first_point=False):
    """PointNetFeaturePropagation.forward (BatchNorm in training mode).

    If `only_first_point`, only point index 0 of the final activation is
    returned (what Critic.forward consumes), while BN statistics still use
    every point."""
    xyz1t = xyz1.transpose(0, 2, 1)        # [B, N, 3]
    xyz2t = xyz2.transpose(0, 2, 1)        # [B, S, 3]
    p2t = points2.transpose(0, 2, 1)       # [B, S, D2]
    B, N, _ = xyz1t.shape
    S = xyz2t.shape[1]
    if S == 1:
        interpolated = jnp.repeat(p2t, N, axis=1)
    else:
        dists = square_distance(xyz1t, xyz2t)                   # [B, N, S]
        negd, idx = lax.top_k(-dists, 3)                        # 3 nearest, ascending
        d3 = -negd
        recip = 1.0 / (d3 + 1e-8)
        norm = jnp.sum(recip, axis=2, keepdims=True)
        weight = recip / norm
        gathered = jax.vmap(lambda pts, ix: pts[ix])(p2t, idx)  # [B, N, 3, D2]
        interpolated = jnp.sum(gathered * weight[..., None], axis=2)
    if points1 is not None:
        new_points = jnp.concatenate(
            [points1.transpose(0, 2, 1), interpolated], axis=-1)
    else:
        new_points = interpolated
    C0 = new_points.shape[-1]
    M = B * N
    x2d = new_points.reshape(M, C0)

    layers = p["layers"]
    # first Conv1d(k=1) + per-tile stats
    w, b, g, be = layers[0]
    y, ps, pq = matmul_stats(x2d, w, b, row_align=M)
    scale, shift = _bn_scale_shift(ps, pq, M, g, be)
    # subsequent layers: fuse previous BN-affine + ReLU into the next matmul
    for (w, b, g, be) in layers[1:]:
        y, ps, pq = matmul_stats(y, w, b, row_align=M,
                                 pre_scale=scale, pre_shift=shift, pre_act="relu")
        scale, shift = _bn_scale_shift(ps, pq, M, g, be)

    if only_first_point:
        y0 = y.reshape(B, N, -1)[:, 0, :]                       # rows for point 0
        return jnp.maximum(y0 * scale[None, :] + shift[None, :], 0.0)   # [B, Cout]

    out2d = affine_act(y, scale[None, :], shift[None, :], act="relu",
                       rows_per_group=M)
    Cout = out2d.shape[-1]
    return out2d.reshape(B, N, Cout).transpose(0, 2, 1)         # [B, Cout, N]


def dgcnn_prop(p, coor, f, coor_q, f_q, k=4):
    feat = get_graph_feature(coor_q, f_q, coor, f, k)
    f_q = _dgcnn_layer(feat, p["w1"], p["g1"], p["b1"])
    feat = get_graph_feature(coor_q, f_q, coor_q, f_q, k)
    f_q = _dgcnn_layer(feat, p["w2"], p["g2"], p["b2"])
    return f_q


def critic_forward(params, pts, center, feature_list, dirs1, dirs2, n1, n2):
    """Critic.forward.  pts [B,N,3], center [B,G,3], feature_list [B,FD,G],
    dirs1/dirs2 [B,3] -> logits [B]."""
    center_level_0 = pts.transpose(0, 2, 1)
    f_level_0 = center_level_0
    # original: fps(pts, 2048) / fps(pts, 1024); scaled to n1/n2 for small shapes
    center_level_1 = fps_jax(pts, n1).transpose(0, 2, 1)
    f_level_1 = center_level_1
    center_level_2 = fps_jax(pts, n2).transpose(0, 2, 1)
    f_level_2 = center_level_2
    center_level_3 = center.transpose(0, 2, 1)
    f_level_3 = feature_list

    f_level_2 = pointnet_fp(params["prop2"], center_level_2, center_level_3,
                            f_level_2, feature_list)
    f_level_1 = pointnet_fp(params["prop1"], center_level_1, center_level_3,
                            f_level_1, feature_list)
    f_level_2 = dgcnn_prop(params["dgcnn2"], center_level_3, f_level_3,
                           center_level_2, f_level_2, k=4)
    f_level_1 = dgcnn_prop(params["dgcnn1"], center_level_2, f_level_2,
                           center_level_1, f_level_1, k=4)
    pixel_feats = pointnet_fp(params["prop0"], center_level_0, center_level_1,
                              f_level_0, f_level_1, only_first_point=True)

    input_queries = jnp.concatenate([dirs1, dirs2], axis=1)     # [B, 6]
    net = jnp.concatenate([pixel_feats, input_queries], axis=-1)
    net = mlp_head(net, params["mlp1_w"], params["mlp1_b"],
                   params["mlp2_w"], params["mlp2_b"])          # fused mlp1+mlp2
    return net[:, 0]                                            # squeeze(-1)


# ----------------------------------------------------------------------------
# deterministic parameter init
# ----------------------------------------------------------------------------
def init_params(key, fd=24, l1=32):
    keys = iter(jax.random.split(key, 64))

    def lin(cin, cout, bias=True):
        w = jax.random.normal(next(keys), (cin, cout), jnp.float32) / jnp.sqrt(
            jnp.float32(cin))
        b = (0.01 * jax.random.normal(next(keys), (cout,), jnp.float32)
             if bias else jnp.zeros((cout,), jnp.float32))
        return w, b

    def norm(cout):
        g = 1.0 + 0.1 * jax.random.normal(next(keys), (cout,), jnp.float32)
        b = 0.1 * jax.random.normal(next(keys), (cout,), jnp.float32)
        return g, b

    def prop(cin, mlp):
        layers = []
        last = cin
        for co in mlp:
            w, b = lin(last, co)
            g, be = norm(co)
            layers.append((w, b, g, be))
            last = co
        return {"layers": layers}

    def dgcnn(c):
        w1, _ = lin(2 * c, l1, bias=False)
        g1, b1 = norm(l1)
        w2, _ = lin(2 * l1, c, bias=False)
        g2, b2 = norm(c)
        return {"w1": w1, "g1": g1, "b1": b1, "w2": w2, "g2": g2, "b2": b2}

    params = {
        "prop2": prop(fd + 3, [fd * 4, fd]),
        "prop1": prop(fd + 3, [fd * 4, fd]),
        "prop0": prop(fd + 3, [fd * 4, fd]),
        "dgcnn2": dgcnn(fd),
        "dgcnn1": dgcnn(fd),
    }
    params["mlp1_w"], params["mlp1_b"] = lin(fd + 6, fd)
    params["mlp2_w"], params["mlp2_b"] = lin(fd, 1)
    return params


# ----------------------------------------------------------------------------
if __name__ == "__main__":
    key = jax.random.PRNGKey(0)
    k_params, k_pts, k_center, k_feat, k_d1, k_d2 = jax.random.split(key, 6)

    FD = 24          # feat_dim (original: 384)
    L1 = 32          # DGCNN layer1 width (original: 512, same ratio)
    B, N, G = 2, 128, 16
    n1, n2 = 64, 32  # fps sample counts (original: 2048, 1024)

    params = init_params(k_params, fd=FD, l1=L1)
    pts = jax.random.normal(k_pts, (B, N, 3), jnp.float32)
    center = jax.random.normal(k_center, (B, G, 3), jnp.float32)
    feature_list = jax.random.normal(k_feat, (B, FD, G), jnp.float32)
    dirs1 = jax.random.normal(k_d1, (B, 3), jnp.float32)
    dirs2 = jax.random.normal(k_d2, (B, 3), jnp.float32)

    fwd = jax.jit(critic_forward, static_argnums=(6, 7))
    out = fwd(params, pts, center, feature_list, dirs1, dirs2, n1, n2)
    out = jax.block_until_ready(out)
    assert out.shape == (B,) and bool(jnp.all(jnp.isfinite(out)))
    print("KERNEL_OK")
</pallas_src>

<mosaic_0001>
module attributes {stable_mosaic.version = 11 : i64} {
  func.func @_matmul_stats_kernel(%arg0: i32, %arg1: memref<64x27xf32, #tpu.memory_space<vmem>>, %arg2: memref<27x96xf32, #tpu.memory_space<vmem>>, %arg3: memref<1x96xf32, #tpu.memory_space<vmem>>, %arg4: memref<64x96xf32, #tpu.memory_space<vmem>>, %arg5: memref<1x1x96xf32, #tpu.memory_space<vmem>>, %arg6: memref<1x1x96xf32, #tpu.memory_space<vmem>>) attributes {dimension_semantics = [#tpu.dimension_semantics<parallel>], iteration_bounds = array<i64: 1>, scalar_prefetch = 0 : i64, scratch_operands = 0 : i64, tpu.core_type = #tpu.core_type<tc>, window_params = [{transform_indices = @transform_0, window_bounds = array<i64: 64, 27>}, {pipeline_mode = #tpu.pipeline_mode<synchronous>, transform_indices = @transform_1, window_bounds = array<i64: 27, 96>}, {pipeline_mode = #tpu.pipeline_mode<synchronous>, transform_indices = @transform_2, window_bounds = array<i64: 1, 96>}, {transform_indices = @transform_3, window_bounds = array<i64: 64, 96>}, {transform_indices = @transform_4, window_bounds = array<i64: 1, 1, 96>}, {transform_indices = @transform_5, window_bounds = array<i64: 1, 1, 96>}]} {
    %c0 = arith.constant 0 : index
    %c0_0 = arith.constant 0 : index
    %0 = vector.load %arg1[%c0, %c0_0] : memref<64x27xf32, #tpu.memory_space<vmem>>, vector<64x27xf32>
    %1 = arith.truncf %0 : vector<64x27xf32> to vector<64x27xbf16>
    %c0_1 = arith.constant 0 : index
    %c0_2 = arith.constant 0 : index
    %2 = vector.load %arg2[%c0_1, %c0_2] : memref<27x96xf32, #tpu.memory_space<vmem>>, vector<27x96xf32>
    %3 = arith.truncf %2 : vector<27x96xf32> to vector<27x96xbf16>
    %cst = arith.constant dense<0.000000e+00> : vector<64x96xf32>
    %4 = tpu.matmul %1, %3, %cst {dimension_numbers = #tpu.dot_dimension_numbers<[1], [0], [0], [1], [0, 0, 1, 1], [], []>} : vector<64x27xbf16>, vector<27x96xbf16>, vector<64x96xf32> -> vector<64x96xf32>
    %c0_3 = arith.constant 0 : index
    %c0_4 = arith.constant 0 : index
    %5 = vector.load %arg3[%c0_3, %c0_4] : memref<1x96xf32, #tpu.memory_space<vmem>>, vector<1x96xf32>
    %6 = vector.broadcast %5 : vector<1x96xf32> to vector<64x96xf32>
    %7 = arith.addf %4, %6 : vector<64x96xf32>
    %c0_5 = arith.constant 0 : index
    %c0_6 = arith.constant 0 : index
    %8 = vector.load %arg4[%c0_5, %c0_6] : memref<64x96xf32, #tpu.memory_space<vmem>>, vector<64x96xf32>
    tpu.vector_store %arg4[%c0_5, %c0_6], %7 {strides = array<i32>} : memref<64x96xf32, #tpu.memory_space<vmem>>, vector<64x96xf32>,
    %cst_7 = arith.constant dense<0.000000e+00> : vector<96xf32>
    %9 = vector.multi_reduction <add>, %7, %cst_7 [0] : vector<64x96xf32> to vector<96xf32>
    %10 = vector.shape_cast %9 : vector<96xf32> to vector<1x96xf32>
    %11 = vector.shape_cast %10 : vector<1x96xf32> to vector<1x1x96xf32>
    %c0_8 = arith.constant 0 : index
    %c0_9 = arith.constant 0 : index
    %c0_10 = arith.constant 0 : index
    %12 = vector.load %arg5[%c0_8, %c0_9, %c0_10] : memref<1x1x96xf32, #tpu.memory_space<vmem>>, vector<1x1x96xf32>
    tpu.vector_store %arg5[%c0_8, %c0_9, %c0_10], %11 {strides = array<i32>} : memref<1x1x96xf32, #tpu.memory_space<vmem>>, vector<1x1x96xf32>,
    %13 = arith.mulf %7, %7 : vector<64x96xf32>
    %cst_11 = arith.constant dense<0.000000e+00> : vector<96xf32>
    %14 = vector.multi_reduction <add>, %13, %cst_11 [0] : vector<64x96xf32> to vector<96xf32>
    %15 = vector.shape_cast %14 : vector<96xf32> to vector<1x96xf32>
    %16 = vector.shape_cast %15 : vector<1x96xf32> to vector<1x1x96xf32>
    %c0_12 = arith.constant 0 : index
    %c0_13 = arith.constant 0 : index
    %c0_14 = arith.constant 0 : index
    %17 = vector.load %arg6[%c0_12, %c0_13, %c0_14] : memref<1x1x96xf32, #tpu.memory_space<vmem>>, vector<1x1x96xf32>
    tpu.vector_store %arg6[%c0_12, %c0_13, %c0_14], %16 {strides = array<i32>} : memref<1x1x96xf32, #tpu.memory_space<vmem>>, vector<1x1x96xf32>,
    return
  }
  func.func @transform_0(%arg0: i32) -> (i32, i32) {
    %c0_i32 = arith.constant 0 : i32
    %c0_i32_0 = arith.constant 0 : i32
    return %arg0, %c0_i32 : i32, i32
  }
  func.func @transform_1(%arg0: i32) -> (i32, i32) {
    %c0_i32 = arith.constant 0 : i32
    %c0_i32_0 = arith.constant 0 : i32
    %c0_i32_1 = arith.constant 0 : i32
    return %c0_i32, %c0_i32_0 : i32, i32
  }
  func.func @transform_2(%arg0: i32) -> (i32, i32) {
    %c0_i32 = arith.constant 0 : i32
    %c0_i32_0 = arith.constant 0 : i32
    %c0_i32_1 = arith.constant 0 : i32
    return %c0_i32, %c0_i32_0 : i32, i32
  }
  func.func @transform_3(%arg0: i32) -> (i32, i32) {
    %c0_i32 = arith.constant 0 : i32
    %c0_i32_0 = arith.constant 0 : i32
    return %arg0, %c0_i32 : i32, i32
  }
  func.func @transform_4(%arg0: i32) -> (i32, i32, i32) {
    %c0_i32 = arith.constant 0 : i32
    %c0_i32_0 = arith.constant 0 : i32
    %c0_i32_1 = arith.constant 0 : i32
    return %arg0, %c0_i32, %c0_i32_0 : i32, i32, i32
  }
  func.func @transform_5(%arg0: i32) -> (i32, i32, i32) {
    %c0_i32 = arith.constant 0 : i32
    %c0_i32_0 = arith.constant 0 : i32
    %c0_i32_1 = arith.constant 0 : i32
    return %arg0, %c0_i32, %c0_i32_0 : i32, i32, i32
  }
}

module attributes {stable_mosaic.version = 11 : i64} {
  func.func @_affine_act_kernel(%arg0: i32, %arg1: i32, %arg2: memref<64x24xf32, #tpu.memory_space<vmem>>, %arg3: memref<1x1x24xf32, #tpu.memory_space<vmem>>, %arg4: memref<1x1x24xf32, #tpu.memory_space<vmem>>, %arg5: memref<64x24xf32, #tpu.memory_space<vmem>>) attributes {dimension_semantics = [#tpu.dimension_semantics<parallel>, #tpu.dimension_semantics<parallel>], iteration_bounds = array<i64: 1, 1>, scalar_prefetch = 0 : i64, scratch_operands = 0 : i64, tpu.core_type = #tpu.core_type<tc>, window_params = [{transform_indices = @transform_0, window_bounds = array<i64: 64, 24>}, {transform_indices = @transform_1, window_bounds = array<i64: 1, 1, 24>}, {transform_indices = @transform_2, window_bounds = array<i64: 1, 1, 24>}, {transform_indices = @transform_3, window_bounds = array<i64: 64, 24>}]} {
    %c0 = arith.constant 0 : index
    %c0_0 = arith.constant 0 : index
    %0 = vector.load %arg2[%c0, %c0_0] : memref<64x24xf32, #tpu.memory_space<vmem>>, vector<64x24xf32>
    %c0_1 = arith.constant 0 : index
    %c0_2 = arith.constant 0 : index
    %c0_3 = arith.constant 0 : index
    %1 = vector.load %arg3[%c0_1, %c0_2, %c0_3] : memref<1x1x24xf32, #tpu.memory_space<vmem>>, vector<1x1x24xf32>
    %2 = vector.shape_cast %1 : vector<1x1x24xf32> to vector<1x24xf32>
    %3 = vector.broadcast %2 : vector<1x24xf32> to vector<64x24xf32>
    %4 = arith.mulf %0, %3 : vector<64x24xf32>
    %c0_4 = arith.constant 0 : index
    %c0_5 = arith.constant 0 : index
    %c0_6 = arith.constant 0 : index
    %5 = vector.load %arg4[%c0_4, %c0_5, %c0_6] : memref<1x1x24xf32, #tpu.memory_space<vmem>>, vector<1x1x24xf32>
    %6 = vector.shape_cast %5 : vector<1x1x24xf32> to vector<1x24xf32>
    %7 = vector.broadcast %6 : vector<1x24xf32> to vector<64x24xf32>
    %8 = arith.addf %4, %7 : vector<64x24xf32>
    %cst = arith.constant 0.000000e+00 : f32
    %9 = vector.broadcast %cst : f32 to vector<64x24xf32>
    %10 = arith.maximumf %8, %9 : vector<64x24xf32>
    %c0_7 = arith.constant 0 : index
    %c0_8 = arith.constant 0 : index
    %11 = vector.load %arg5[%c0_7, %c0_8] : memref<64x24xf32, #tpu.memory_space<vmem>>, vector<64x24xf32>
    tpu.vector_store %arg5[%c0_7, %c0_8], %10 {strides = array<i32>} : memref<64x24xf32, #tpu.memory_space<vmem>>, vector<64x24xf32>,
    return
  }
  func.func @transform_0(%arg0: i32, %arg1: i32) -> (i32, i32) {
    %c1_i32 = arith.constant 1 : i32
    %0 = arith.muli %arg0, %c1_i32 : i32
    %1 = arith.addi %0, %arg1 : i32
    %c0_i32 = arith.constant 0 : i32
    %c0_i32_0 = arith.constant 0 : i32
    return %1, %c0_i32 : i32, i32
  }
  func.func @transform_1(%arg0: i32, %arg1: i32) -> (i32, i32, i32) {
    %c0_i32 = arith.constant 0 : i32
    %c0_i32_0 = arith.constant 0 : i32
    %c0_i32_1 = arith.constant 0 : i32
    return %arg0, %c0_i32, %c0_i32_0 : i32, i32, i32
  }
  func.func @transform_2(%arg0: i32, %arg1: i32) -> (i32, i32, i32) {
    %c0_i32 = arith.constant 0 : i32
    %c0_i32_0 = arith.constant 0 : i32
    %c0_i32_1 = arith.constant 0 : i32
    return %arg0, %c0_i32, %c0_i32_0 : i32, i32, i32
  }
  func.func @transform_3(%arg0: i32, %arg1: i32) -> (i32, i32) {
    %c1_i32 = arith.constant 1 : i32
    %0 = arith.muli %arg0, %c1_i32 : i32
    %1 = arith.addi %0, %arg1 : i32
    %c0_i32 = arith.constant 0 : i32
    %c0_i32_0 = arith.constant 0 : i32
    return %1, %c0_i32 : i32, i32
  }
}

module attributes {stable_mosaic.version = 11 : i64} {
  func.func @_matmul_stats_kernel(%arg0: i32, %arg1: memref<64x96xf32, #tpu.memory_space<vmem>>, %arg2: memref<1x1x96xf32, #tpu.memory_space<vmem>>, %arg3: memref<1x1x96xf32, #tpu.memory_space<vmem>>, %arg4: memref<96x24xf32, #tpu.memory_space<vmem>>, %arg5: memref<1x24xf32, #tpu.memory_space<vmem>>, %arg6: memref<64x24xf32, #tpu.memory_space<vmem>>, %arg7: memref<1x1x24xf32, #tpu.memory_space<vmem>>, %arg8: memref<1x1x24xf32, #tpu.memory_space<vmem>>) attributes {dimension_semantics = [#tpu.dimension_semantics<parallel>], iteration_bounds = array<i64: 1>, scalar_prefetch = 0 : i64, scratch_operands = 0 : i64, tpu.core_type = #tpu.core_type<tc>, window_params = [{transform_indices = @transform_0, window_bounds = array<i64: 64, 96>}, {pipeline_mode = #tpu.pipeline_mode<synchronous>, transform_indices = @transform_1, window_bounds = array<i64: 1, 1, 96>}, {pipeline_mode = #tpu.pipeline_mode<synchronous>, transform_indices = @transform_2, window_bounds = array<i64: 1, 1, 96>}, {pipeline_mode = #tpu.pipeline_mode<synchronous>, transform_indices = @transform_3, window_bounds = array<i64: 96, 24>}, {pipeline_mode = #tpu.pipeline_mode<synchronous>, transform_indices = @transform_4, window_bounds = array<i64: 1, 24>}, {transform_indices = @transform_5, window_bounds = array<i64: 64, 24>}, {transform_indices = @transform_6, window_bounds = array<i64: 1, 1, 24>}, {transform_indices = @transform_7, window_bounds = array<i64: 1, 1, 24>}]} {
    %c0 = arith.constant 0 : index
    %c0_0 = arith.constant 0 : index
    %0 = vector.load %arg1[%c0, %c0_0] : memref<64x96xf32, #tpu.memory_space<vmem>>, vector<64x96xf32>
    %c0_1 = arith.constant 0 : index
    %c0_2 = arith.constant 0 : index
    %c0_3 = arith.constant 0 : index
    %1 = vector.load %arg2[%c0_1, %c0_2, %c0_3] : memref<1x1x96xf32, #tpu.memory_space<vmem>>, vector<1x1x96xf32>
    %2 = vector.shape_cast %1 : vector<1x1x96xf32> to vector<1x96xf32>
    %3 = vector.broadcast %2 : vector<1x96xf32> to vector<64x96xf32>
    %4 = arith.mulf %0, %3 : vector<64x96xf32>
    %c0_4 = arith.constant 0 : index
    %c0_5 = arith.constant 0 : index
    %c0_6 = arith.constant 0 : index
    %5 = vector.load %arg3[%c0_4, %c0_5, %c0_6] : memref<1x1x96xf32, #tpu.memory_space<vmem>>, vector<1x1x96xf32>
    %6 = vector.shape_cast %5 : vector<1x1x96xf32> to vector<1x96xf32>
    %7 = vector.broadcast %6 : vector<1x96xf32> to vector<64x96xf32>
    %8 = arith.addf %4, %7 : vector<64x96xf32>
    %cst = arith.constant 0.000000e+00 : f32
    %9 = vector.broadcast %cst : f32 to vector<64x96xf32>
    %10 = arith.maximumf %8, %9 : vector<64x96xf32>
    %11 = arith.truncf %10 : vector<64x96xf32> to vector<64x96xbf16>
    %c0_7 = arith.constant 0 : index
    %c0_8 = arith.constant 0 : index
    %12 = vector.load %arg4[%c0_7, %c0_8] : memref<96x24xf32, #tpu.memory_space<vmem>>, vector<96x24xf32>
    %13 = arith.truncf %12 : vector<96x24xf32> to vector<96x24xbf16>
    %cst_9 = arith.constant dense<0.000000e+00> : vector<64x24xf32>
    %14 = tpu.matmul %11, %13, %cst_9 {dimension_numbers = #tpu.dot_dimension_numbers<[1], [0], [0], [1], [0, 0, 1, 1], [], []>} : vector<64x96xbf16>, vector<96x24xbf16>, vector<64x24xf32> -> vector<64x24xf32>
    %c0_10 = arith.constant 0 : index
    %c0_11 = arith.constant 0 : index
    %15 = vector.load %arg5[%c0_10, %c0_11] : memref<1x24xf32, #tpu.memory_space<vmem>>, vector<1x24xf32>
    %16 = vector.broadcast %15 : vector<1x24xf32> to vector<64x24xf32>
    %17 = arith.addf %14, %16 : vector<64x24xf32>
    %c0_12 = arith.constant 0 : index
    %c0_13 = arith.constant 0 : index
    %18 = vector.load %arg6[%c0_12, %c0_13] : memref<64x24xf32, #tpu.memory_space<vmem>>, vector<64x24xf32>
    tpu.vector_store %arg6[%c0_12, %c0_13], %17 {strides = array<i32>} : memref<64x24xf32, #tpu.memory_space<vmem>>, vector<64x24xf32>,
    %cst_14 = arith.constant dense<0.000000e+00> : vector<24xf32>
    %19 = vector.multi_reduction <add>, %17, %cst_14 [0] : vector<64x24xf32> to vector<24xf32>
    %20 = vector.shape_cast %19 : vector<24xf32> to vector<1x24xf32>
    %21 = vector.shape_cast %20 : vector<1x24xf32> to vector<1x1x24xf32>
    %c0_15 = arith.constant 0 : index
    %c0_16 = arith.constant 0 : index
    %c0_17 = arith.constant 0 : index
    %22 = vector.load %arg7[%c0_15, %c0_16, %c0_17] : memref<1x1x24xf32, #tpu.memory_space<vmem>>, vector<1x1x24xf32>
    tpu.vector_store %arg7[%c0_15, %c0_16, %c0_17], %21 {strides = array<i32>} : memref<1x1x24xf32, #tpu.memory_space<vmem>>, vector<1x1x24xf32>,
    %23 = arith.mulf %17, %17 : vector<64x24xf32>
    %cst_18 = arith.constant dense<0.000000e+00> : vector<24xf32>
    %24 = vector.multi_reduction <add>, %23, %cst_18 [0] : vector<64x24xf32> to vector<24xf32>
    %25 = vector.shape_cast %24 : vector<24xf32> to vector<1x24xf32>
    %26 = vector.shape_cast %25 : vector<1x24xf32> to vector<1x1x24xf32>
    %c0_19 = arith.constant 0 : index
    %c0_20 = arith.constant 0 : index
    %c0_21 = arith.constant 0 : index
    %27 = vector.load %arg8[%c0_19, %c0_20, %c0_21] : memref<1x1x24xf32, #tpu.memory_space<vmem>>, vector<1x1x24xf32>
    tpu.vector_store %arg8[%c0_19, %c0_20, %c0_21], %26 {strides = array<i32>} : memref<1x1x24xf32, #tpu.memory_space<vmem>>, vector<1x1x24xf32>,
    return
  }
  func.func @transform_0(%arg0: i32) -> (i32, i32) {
    %c0_i32 = arith.constant 0 : i32
    %c0_i32_0 = arith.constant 0 : i32
    return %arg0, %c0_i32 : i32, i32
  }
  func.func @transform_1(%arg0: i32) -> (i32, i32, i32) {
    %c0_i32 = arith.constant 0 : i32
    %c0_i32_0 = arith.constant 0 : i32
    %c0_i32_1 = arith.constant 0 : i32
    %c0_i32_2 = arith.constant 0 : i32
    return %c0_i32, %c0_i32_0, %c0_i32_1 : i32, i32, i32
  }
  func.func @transform_2(%arg0: i32) -> (i32, i32, i32) {
    %c0_i32 = arith.constant 0 : i32
    %c0_i32_0 = arith.constant 0 : i32
    %c0_i32_1 = arith.constant 0 : i32
    %c0_i32_2 = arith.constant 0 : i32
    return %c0_i32, %c0_i32_0, %c0_i32_1 : i32, i32, i32
  }
  func.func @transform_3(%arg0: i32) -> (i32, i32) {
    %c0_i32 = arith.constant 0 : i32
    %c0_i32_0 = arith.constant 0 : i32
    %c0_i32_1 = arith.constant 0 : i32
    return %c0_i32, %c0_i32_0 : i32, i32
  }
  func.func @transform_4(%arg0: i32) -> (i32, i32) {
    %c0_i32 = arith.constant 0 : i32
    %c0_i32_0 = arith.constant 0 : i32
    %c0_i32_1 = arith.constant 0 : i32
    return %c0_i32, %c0_i32_0 : i32, i32
  }
  func.func @transform_5(%arg0: i32) -> (i32, i32) {
    %c0_i32 = arith.constant 0 : i32
    %c0_i32_0 = arith.constant 0 : i32
    return %arg0, %c0_i32 : i32, i32
  }
  func.func @transform_6(%arg0: i32) -> (i32, i32, i32) {
    %c0_i32 = arith.constant 0 : i32
    %c0_i32_0 = arith.constant 0 : i32
    %c0_i32_1 = arith.constant 0 : i32
    return %arg0, %c0_i32, %c0_i32_0 : i32, i32, i32
  }
  func.func @transform_7(%arg0: i32) -> (i32, i32, i32) {
    %c0_i32 = arith.constant 0 : i32
    %c0_i32_0 = arith.constant 0 : i32
    %c0_i32_1 = arith.constant 0 : i32
    return %arg0, %c0_i32, %c0_i32_0 : i32, i32, i32
  }
}

module attributes {stable_mosaic.version = 11 : i64} {
  func.func @_matmul_stats_kernel(%arg0: i32, %arg1: memref<128x48xf32, #tpu.memory_space<vmem>>, %arg2: memref<48x32xf32, #tpu.memory_space<vmem>>, %arg3: memref<128x32xf32, #tpu.memory_space<vmem>>, %arg4: memref<1x1x32xf32, #tpu.memory_space<vmem>>, %arg5: memref<1x1x32xf32, #tpu.memory_space<vmem>>) attributes {dimension_semantics = [#tpu.dimension_semantics<parallel>], iteration_bounds = array<i64: 2>, scalar_prefetch = 0 : i64, scratch_operands = 0 : i64, tpu.core_type = #tpu.core_type<tc>, window_params = [{transform_indices = @transform_0, window_bounds = array<i64: 128, 48>}, {pipeline_mode = #tpu.pipeline_mode<synchronous>, transform_indices = @transform_1, window_bounds = array<i64: 48, 32>}, {transform_indices = @transform_2, window_bounds = array<i64: 128, 32>}, {transform_indices = @transform_3, window_bounds = array<i64: 1, 1, 32>}, {transform_indices = @transform_4, window_bounds = array<i64: 1, 1, 32>}]} {
    %c0 = arith.constant 0 : index
    %c0_0 = arith.constant 0 : index
    %0 = vector.load %arg1[%c0, %c0_0] : memref<128x48xf32, #tpu.memory_space<vmem>>, vector<128x48xf32>
    %1 = arith.truncf %0 : vector<128x48xf32> to vector<128x48xbf16>
    %c0_1 = arith.constant 0 : index
    %c0_2 = arith.constant 0 : index
    %2 = vector.load %arg2[%c0_1, %c0_2] : memref<48x32xf32, #tpu.memory_space<vmem>>, vector<48x32xf32>
    %3 = arith.truncf %2 : vector<48x32xf32> to vector<48x32xbf16>
    %cst = arith.constant dense<0.000000e+00> : vector<128x32xf32>
    %4 = tpu.matmul %1, %3, %cst {dimension_numbers = #tpu.dot_dimension_numbers<[1], [0], [0], [1], [0, 0, 1, 1], [], []>} : vector<128x48xbf16>, vector<48x32xbf16>, vector<128x32xf32> -> vector<128x32xf32>
    %c0_3 = arith.constant 0 : index
    %c0_4 = arith.constant 0 : index
    %5 = vector.load %arg3[%c0_3, %c0_4] : memref<128x32xf32, #tpu.memory_space<vmem>>, vector<128x32xf32>
    tpu.vector_store %arg3[%c0_3, %c0_4], %4 {strides = array<i32>} : memref<128x32xf32, #tpu.memory_space<vmem>>, vector<128x32xf32>,
    %cst_5 = arith.constant dense<0.000000e+00> : vector<32xf32>
    %6 = vector.multi_reduction <add>, %4, %cst_5 [0] : vector<128x32xf32> to vector<32xf32>
    %7 = vector.shape_cast %6 : vector<32xf32> to vector<1x32xf32>
    %8 = vector.shape_cast %7 : vector<1x32xf32> to vector<1x1x32xf32>
    %c0_6 = arith.constant 0 : index
    %c0_7 = arith.constant 0 : index
    %c0_8 = arith.constant 0 : index
    %9 = vector.load %arg4[%c0_6, %c0_7, %c0_8] : memref<1x1x32xf32, #tpu.memory_space<vmem>>, vector<1x1x32xf32>
    tpu.vector_store %arg4[%c0_6, %c0_7, %c0_8], %8 {strides = array<i32>} : memref<1x1x32xf32, #tpu.memory_space<vmem>>, vector<1x1x32xf32>,
    %10 = arith.mulf %4, %4 : vector<128x32xf32>
    %cst_9 = arith.constant dense<0.000000e+00> : vector<32xf32>
    %11 = vector.multi_reduction <add>, %10, %cst_9 [0] : vector<128x32xf32> to vector<32xf32>
    %12 = vector.shape_cast %11 : vector<32xf32> to vector<1x32xf32>
    %13 = vector.shape_cast %12 : vector<1x32xf32> to vector<1x1x32xf32>
    %c0_10 = arith.constant 0 : index
    %c0_11 = arith.constant 0 : index
    %c0_12 = arith.constant 0 : index
    %14 = vector.load %arg5[%c0_10, %c0_11, %c0_12] : memref<1x1x32xf32, #tpu.memory_space<vmem>>, vector<1x1x32xf32>
    tpu.vector_store %arg5[%c0_10, %c0_11, %c0_12], %13 {strides = array<i32>} : memref<1x1x32xf32, #tpu.memory_space<vmem>>, vector<1x1x32xf32>,
    return
  }
  func.func @transform_0(%arg0: i32) -> (i32, i32) {
    %c0_i32 = arith.constant 0 : i32
    %c0_i32_0 = arith.constant 0 : i32
    return %arg0, %c0_i32 : i32, i32
  }
  func.func @transform_1(%arg0: i32) -> (i32, i32) {
    %c0_i32 = arith.constant 0 : i32
    %c0_i32_0 = arith.constant 0 : i32
    %c0_i32_1 = arith.constant 0 : i32
    return %c0_i32, %c0_i32_0 : i32, i32
  }
  func.func @transform_2(%arg0: i32) -> (i32, i32) {
    %c0_i32 = arith.constant 0 : i32
    %c0_i32_0 = arith.constant 0 : i32
    return %arg0, %c0_i32 : i32, i32
  }
  func.func @transform_3(%arg0: i32) -> (i32, i32, i32) {
    %c0_i32 = arith.constant 0 : i32
    %c0_i32_0 = arith.constant 0 : i32
    %c0_i32_1 = arith.constant 0 : i32
    return %arg0, %c0_i32, %c0_i32_0 : i32, i32, i32
  }
  func.func @transform_4(%arg0: i32) -> (i32, i32, i32) {
    %c0_i32 = arith.constant 0 : i32
    %c0_i32_0 = arith.constant 0 : i32
    %c0_i32_1 = arith.constant 0 : i32
    return %arg0, %c0_i32, %c0_i32_0 : i32, i32, i32
  }
}

module attributes {stable_mosaic.version = 11 : i64} {
  func.func @_affine_maxk_kernel(%arg0: i32, %arg1: i32, %arg2: memref<4x32x32xf32, #tpu.memory_space<vmem>>, %arg3: memref<1x1x32xf32, #tpu.memory_space<vmem>>, %arg4: memref<1x1x32xf32, #tpu.memory_space<vmem>>, %arg5: memref<32x32xf32, #tpu.memory_space<vmem>>) attributes {dimension_semantics = [#tpu.dimension_semantics<parallel>, #tpu.dimension_semantics<parallel>], iteration_bounds = array<i64: 2, 1>, scalar_prefetch = 0 : i64, scratch_operands = 0 : i64, tpu.core_type = #tpu.core_type<tc>, window_params = [{transform_indices = @transform_0, window_bounds = array<i64: 4, 32, 32>}, {transform_indices = @transform_1, window_bounds = array<i64: 1, 1, 32>}, {transform_indices = @transform_2, window_bounds = array<i64: 1, 1, 32>}, {transform_indices = @transform_3, window_bounds = array<i64: 32, 32>}]} {
    %c0 = arith.constant 0 : index
    %c0_0 = arith.constant 0 : index
    %c0_1 = arith.constant 0 : index
    %0 = vector.load %arg2[%c0, %c0_0, %c0_1] : memref<4x32x32xf32, #tpu.memory_space<vmem>>, vector<4x32x32xf32>
    %c0_2 = arith.constant 0 : index
    %c0_3 = arith.constant 0 : index
    %c0_4 = arith.constant 0 : index
    %1 = vector.load %arg3[%c0_2, %c0_3, %c0_4] : memref<1x1x32xf32, #tpu.memory_space<vmem>>, vector<1x1x32xf32>
    %2 = vector.shape_cast %1 : vector<1x1x32xf32> to vector<1x32xf32>
    %3 = vector.shape_cast %2 : vector<1x32xf32> to vector<1x1x32xf32>
    %4 = vector.broadcast %3 : vector<1x1x32xf32> to vector<4x32x32xf32>
    %5 = arith.mulf %0, %4 : vector<4x32x32xf32>
    %c0_5 = arith.constant 0 : index
    %c0_6 = arith.constant 0 : index
    %c0_7 = arith.constant 0 : index
    %6 = vector.load %arg4[%c0_5, %c0_6, %c0_7] : memref<1x1x32xf32, #tpu.memory_space<vmem>>, vector<1x1x32xf32>
    %7 = vector.shape_cast %6 : vector<1x1x32xf32> to vector<1x32xf32>
    %8 = vector.shape_cast %7 : vector<1x32xf32> to vector<1x1x32xf32>
    %9 = vector.broadcast %8 : vector<1x1x32xf32> to vector<4x32x32xf32>
    %10 = arith.addf %5, %9 : vector<4x32x32xf32>
    %cst = arith.constant 0.000000e+00 : f32
    %11 = vector.broadcast %cst : f32 to vector<4x32x32xf32>
    %12 = arith.cmpf oge, %10, %11 : vector<4x32x32xf32>
    %cst_8 = arith.constant 2.000000e-01 : f32
    %13 = vector.broadcast %cst_8 : f32 to vector<4x32x32xf32>
    %14 = arith.mulf %13, %10 : vector<4x32x32xf32>
    %15 = arith.select %12, %10, %14 : vector<4x32x32xi1>, vector<4x32x32xf32>
    %cst_9 = arith.constant dense<0xFF800000> : vector<32x32xf32>
    %16 = vector.multi_reduction <maximumf>, %15, %cst_9 [0] : vector<4x32x32xf32> to vector<32x32xf32>
    %c0_10 = arith.constant 0 : index
    %c0_11 = arith.constant 0 : index
    %17 = vector.load %arg5[%c0_10, %c0_11] : memref<32x32xf32, #tpu.memory_space<vmem>>, vector<32x32xf32>
    tpu.vector_store %arg5[%c0_10, %c0_11], %16 {strides = array<i32>} : memref<32x32xf32, #tpu.memory_space<vmem>>, vector<32x32xf32>,
    return
  }
  func.func @transform_0(%arg0: i32, %arg1: i32) -> (i32, i32, i32) {
    %c0_i32 = arith.constant 0 : i32
    %c0_i32_0 = arith.constant 0 : i32
    return %arg0, %arg1, %c0_i32 : i32, i32, i32
  }
  func.func @transform_1(%arg0: i32, %arg1: i32) -> (i32, i32, i32) {
    %c0_i32 = arith.constant 0 : i32
    %c0_i32_0 = arith.constant 0 : i32
    %c0_i32_1 = arith.constant 0 : i32
    return %arg0, %c0_i32, %c0_i32_0 : i32, i32, i32
  }
  func.func @transform_2(%arg0: i32, %arg1: i32) -> (i32, i32, i32) {
    %c0_i32 = arith.constant 0 : i32
    %c0_i32_0 = arith.constant 0 : i32
    %c0_i32_1 = arith.constant 0 : i32
    return %arg0, %c0_i32, %c0_i32_0 : i32, i32, i32
  }
  func.func @transform_3(%arg0: i32, %arg1: i32) -> (i32, i32) {
    %c1_i32 = arith.constant 1 : i32
    %0 = arith.muli %arg0, %c1_i32 : i32
    %1 = arith.addi %0, %arg1 : i32
    %c0_i32 = arith.constant 0 : i32
    %c0_i32_0 = arith.constant 0 : i32
    return %1, %c0_i32 : i32, i32
  }
}

module attributes {stable_mosaic.version = 11 : i64} {
  func.func @_matmul_stats_kernel(%arg0: i32, %arg1: memref<128x64xf32, #tpu.memory_space<vmem>>, %arg2: memref<64x24xf32, #tpu.memory_space<vmem>>, %arg3: memref<128x24xf32, #tpu.memory_space<vmem>>, %arg4: memref<1x1x24xf32, #tpu.memory_space<vmem>>, %arg5: memref<1x1x24xf32, #tpu.memory_space<vmem>>) attributes {dimension_semantics = [#tpu.dimension_semantics<parallel>], iteration_bounds = array<i64: 2>, scalar_prefetch = 0 : i64, scratch_operands = 0 : i64, tpu.core_type = #tpu.core_type<tc>, window_params = [{transform_indices = @transform_0, window_bounds = array<i64: 128, 64>}, {pipeline_mode = #tpu.pipeline_mode<synchronous>, transform_indices = @transform_1, window_bounds = array<i64: 64, 24>}, {transform_indices = @transform_2, window_bounds = array<i64: 128, 24>}, {transform_indices = @transform_3, window_bounds = array<i64: 1, 1, 24>}, {transform_indices = @transform_4, window_bounds = array<i64: 1, 1, 24>}]} {
    %c0 = arith.constant 0 : index
    %c0_0 = arith.constant 0 : index
    %0 = vector.load %arg1[%c0, %c0_0] : memref<128x64xf32, #tpu.memory_space<vmem>>, vector<128x64xf32>
    %1 = arith.truncf %0 : vector<128x64xf32> to vector<128x64xbf16>
    %c0_1 = arith.constant 0 : index
    %c0_2 = arith.constant 0 : index
    %2 = vector.load %arg2[%c0_1, %c0_2] : memref<64x24xf32, #tpu.memory_space<vmem>>, vector<64x24xf32>
    %3 = arith.truncf %2 : vector<64x24xf32> to vector<64x24xbf16>
    %cst = arith.constant dense<0.000000e+00> : vector<128x24xf32>
    %4 = tpu.matmul %1, %3, %cst {dimension_numbers = #tpu.dot_dimension_numbers<[1], [0], [0], [1], [0, 0, 1, 1], [], []>} : vector<128x64xbf16>, vector<64x24xbf16>, vector<128x24xf32> -> vector<128x24xf32>
    %c0_3 = arith.constant 0 : index
    %c0_4 = arith.constant 0 : index
    %5 = vector.load %arg3[%c0_3, %c0_4] : memref<128x24xf32, #tpu.memory_space<vmem>>, vector<128x24xf32>
    tpu.vector_store %arg3[%c0_3, %c0_4], %4 {strides = array<i32>} : memref<128x24xf32, #tpu.memory_space<vmem>>, vector<128x24xf32>,
    %cst_5 = arith.constant dense<0.000000e+00> : vector<24xf32>
    %6 = vector.multi_reduction <add>, %4, %cst_5 [0] : vector<128x24xf32> to vector<24xf32>
    %7 = vector.shape_cast %6 : vector<24xf32> to vector<1x24xf32>
    %8 = vector.shape_cast %7 : vector<1x24xf32> to vector<1x1x24xf32>
    %c0_6 = arith.constant 0 : index
    %c0_7 = arith.constant 0 : index
    %c0_8 = arith.constant 0 : index
    %9 = vector.load %arg4[%c0_6, %c0_7, %c0_8] : memref<1x1x24xf32, #tpu.memory_space<vmem>>, vector<1x1x24xf32>
    tpu.vector_store %arg4[%c0_6, %c0_7, %c0_8], %8 {strides = array<i32>} : memref<1x1x24xf32, #tpu.memory_space<vmem>>, vector<1x1x24xf32>,
    %10 = arith.mulf %4, %4 : vector<128x24xf32>
    %cst_9 = arith.constant dense<0.000000e+00> : vector<24xf32>
    %11 = vector.multi_reduction <add>, %10, %cst_9 [0] : vector<128x24xf32> to vector<24xf32>
    %12 = vector.shape_cast %11 : vector<24xf32> to vector<1x24xf32>
    %13 = vector.shape_cast %12 : vector<1x24xf32> to vector<1x1x24xf32>
    %c0_10 = arith.constant 0 : index
    %c0_11 = arith.constant 0 : index
    %c0_12 = arith.constant 0 : index
    %14 = vector.load %arg5[%c0_10, %c0_11, %c0_12] : memref<1x1x24xf32, #tpu.memory_space<vmem>>, vector<1x1x24xf32>
    tpu.vector_store %arg5[%c0_10, %c0_11, %c0_12], %13 {strides = array<i32>} : memref<1x1x24xf32, #tpu.memory_space<vmem>>, vector<1x1x24xf32>,
    return
  }
  func.func @transform_0(%arg0: i32) -> (i32, i32) {
    %c0_i32 = arith.constant 0 : i32
    %c0_i32_0 = arith.constant 0 : i32
    return %arg0, %c0_i32 : i32, i32
  }
  func.func @transform_1(%arg0: i32) -> (i32, i32) {
    %c0_i32 = arith.constant 0 : i32
    %c0_i32_0 = arith.constant 0 : i32
    %c0_i32_1 = arith.constant 0 : i32
    return %c0_i32, %c0_i32_0 : i32, i32
  }
  func.func @transform_2(%arg0: i32) -> (i32, i32) {
    %c0_i32 = arith.constant 0 : i32
    %c0_i32_0 = arith.constant 0 : i32
    return %arg0, %c0_i32 : i32, i32
  }
  func.func @transform_3(%arg0: i32) -> (i32, i32, i32) {
    %c0_i32 = arith.constant 0 : i32
    %c0_i32_0 = arith.constant 0 : i32
    %c0_i32_1 = arith.constant 0 : i32
    return %arg0, %c0_i32, %c0_i32_0 : i32, i32, i32
  }
  func.func @transform_4(%arg0: i32) -> (i32, i32, i32) {
    %c0_i32 = arith.constant 0 : i32
    %c0_i32_0 = arith.constant 0 : i32
    %c0_i32_1 = arith.constant 0 : i32
    return %arg0, %c0_i32, %c0_i32_0 : i32, i32, i32
  }
}

module attributes {stable_mosaic.version = 11 : i64} {
  func.func @_affine_maxk_kernel(%arg0: i32, %arg1: i32, %arg2: memref<4x32x24xf32, #tpu.memory_space<vmem>>, %arg3: memref<1x1x24xf32, #tpu.memory_space<vmem>>, %arg4: memref<1x1x24xf32, #tpu.memory_space<vmem>>, %arg5: memref<32x24xf32, #tpu.memory_space<vmem>>) attributes {dimension_semantics = [#tpu.dimension_semantics<parallel>, #tpu.dimension_semantics<parallel>], iteration_bounds = array<i64: 2, 1>, scalar_prefetch = 0 : i64, scratch_operands = 0 : i64, tpu.core_type = #tpu.core_type<tc>, window_params = [{transform_indices = @transform_0, window_bounds = array<i64: 4, 32, 24>}, {transform_indices = @transform_1, window_bounds = array<i64: 1, 1, 24>}, {transform_indices = @transform_2, window_bounds = array<i64: 1, 1, 24>}, {transform_indices = @transform_3, window_bounds = array<i64: 32, 24>}]} {
    %c0 = arith.constant 0 : index
    %c0_0 = arith.constant 0 : index
    %c0_1 = arith.constant 0 : index
    %0 = vector.load %arg2[%c0, %c0_0, %c0_1] : memref<4x32x24xf32, #tpu.memory_space<vmem>>, vector<4x32x24xf32>
    %c0_2 = arith.constant 0 : index
    %c0_3 = arith.constant 0 : index
    %c0_4 = arith.constant 0 : index
    %1 = vector.load %arg3[%c0_2, %c0_3, %c0_4] : memref<1x1x24xf32, #tpu.memory_space<vmem>>, vector<1x1x24xf32>
    %2 = vector.shape_cast %1 : vector<1x1x24xf32> to vector<1x24xf32>
    %3 = vector.shape_cast %2 : vector<1x24xf32> to vector<1x1x24xf32>
    %4 = vector.broadcast %3 : vector<1x1x24xf32> to vector<4x32x24xf32>
    %5 = arith.mulf %0, %4 : vector<4x32x24xf32>
    %c0_5 = arith.constant 0 : index
    %c0_6 = arith.constant 0 : index
    %c0_7 = arith.constant 0 : index
    %6 = vector.load %arg4[%c0_5, %c0_6, %c0_7] : memref<1x1x24xf32, #tpu.memory_space<vmem>>, vector<1x1x24xf32>
    %7 = vector.shape_cast %6 : vector<1x1x24xf32> to vector<1x24xf32>
    %8 = vector.shape_cast %7 : vector<1x24xf32> to vector<1x1x24xf32>
    %9 = vector.broadcast %8 : vector<1x1x24xf32> to vector<4x32x24xf32>
    %10 = arith.addf %5, %9 : vector<4x32x24xf32>
    %cst = arith.constant 0.000000e+00 : f32
    %11 = vector.broadcast %cst : f32 to vector<4x32x24xf32>
    %12 = arith.cmpf oge, %10, %11 : vector<4x32x24xf32>
    %cst_8 = arith.constant 2.000000e-01 : f32
    %13 = vector.broadcast %cst_8 : f32 to vector<4x32x24xf32>
    %14 = arith.mulf %13, %10 : vector<4x32x24xf32>
    %15 = arith.select %12, %10, %14 : vector<4x32x24xi1>, vector<4x32x24xf32>
    %cst_9 = arith.constant dense<0xFF800000> : vector<32x24xf32>
    %16 = vector.multi_reduction <maximumf>, %15, %cst_9 [0] : vector<4x32x24xf32> to vector<32x24xf32>
    %c0_10 = arith.constant 0 : index
    %c0_11 = arith.constant 0 : index
    %17 = vector.load %arg5[%c0_10, %c0_11] : memref<32x24xf32, #tpu.memory_space<vmem>>, vector<32x24xf32>
    tpu.vector_store %arg5[%c0_10, %c0_11], %16 {strides = array<i32>} : memref<32x24xf32, #tpu.memory_space<vmem>>, vector<32x24xf32>,
    return
  }
  func.func @transform_0(%arg0: i32, %arg1: i32) -> (i32, i32, i32) {
    %c0_i32 = arith.constant 0 : i32
    %c0_i32_0 = arith.constant 0 : i32
    return %arg0, %arg1, %c0_i32 : i32, i32, i32
  }
  func.func @transform_1(%arg0: i32, %arg1: i32) -> (i32, i32, i32) {
    %c0_i32 = arith.constant 0 : i32
    %c0_i32_0 = arith.constant 0 : i32
    %c0_i32_1 = arith.constant 0 : i32
    return %arg0, %c0_i32, %c0_i32_0 : i32, i32, i32
  }
  func.func @transform_2(%arg0: i32, %arg1: i32) -> (i32, i32, i32) {
    %c0_i32 = arith.constant 0 : i32
    %c0_i32_0 = arith.constant 0 : i32
    %c0_i32_1 = arith.constant 0 : i32
    return %arg0, %c0_i32, %c0_i32_0 : i32, i32, i32
  }
  func.func @transform_3(%arg0: i32, %arg1: i32) -> (i32, i32) {
    %c1_i32 = arith.constant 1 : i32
    %0 = arith.muli %arg0, %c1_i32 : i32
    %1 = arith.addi %0, %arg1 : i32
    %c0_i32 = arith.constant 0 : i32
    %c0_i32_0 = arith.constant 0 : i32
    return %1, %c0_i32 : i32, i32
  }
}

module attributes {stable_mosaic.version = 11 : i64} {
  func.func @_matmul_stats_kernel(%arg0: i32, %arg1: memref<128x27xf32, #tpu.memory_space<vmem>>, %arg2: memref<27x96xf32, #tpu.memory_space<vmem>>, %arg3: memref<1x96xf32, #tpu.memory_space<vmem>>, %arg4: memref<128x96xf32, #tpu.memory_space<vmem>>, %arg5: memref<1x1x96xf32, #tpu.memory_space<vmem>>, %arg6: memref<1x1x96xf32, #tpu.memory_space<vmem>>) attributes {dimension_semantics = [#tpu.dimension_semantics<parallel>], iteration_bounds = array<i64: 1>, scalar_prefetch = 0 : i64, scratch_operands = 0 : i64, tpu.core_type = #tpu.core_type<tc>, window_params = [{transform_indices = @transform_0, window_bounds = array<i64: 128, 27>}, {pipeline_mode = #tpu.pipeline_mode<synchronous>, transform_indices = @transform_1, window_bounds = array<i64: 27, 96>}, {pipeline_mode = #tpu.pipeline_mode<synchronous>, transform_indices = @transform_2, window_bounds = array<i64: 1, 96>}, {transform_indices = @transform_3, window_bounds = array<i64: 128, 96>}, {transform_indices = @transform_4, window_bounds = array<i64: 1, 1, 96>}, {transform_indices = @transform_5, window_bounds = array<i64: 1, 1, 96>}]} {
    %c0 = arith.constant 0 : index
    %c0_0 = arith.constant 0 : index
    %0 = vector.load %arg1[%c0, %c0_0] : memref<128x27xf32, #tpu.memory_space<vmem>>, vector<128x27xf32>
    %1 = arith.truncf %0 : vector<128x27xf32> to vector<128x27xbf16>
    %c0_1 = arith.constant 0 : index
    %c0_2 = arith.constant 0 : index
    %2 = vector.load %arg2[%c0_1, %c0_2] : memref<27x96xf32, #tpu.memory_space<vmem>>, vector<27x96xf32>
    %3 = arith.truncf %2 : vector<27x96xf32> to vector<27x96xbf16>
    %cst = arith.constant dense<0.000000e+00> : vector<128x96xf32>
    %4 = tpu.matmul %1, %3, %cst {dimension_numbers = #tpu.dot_dimension_numbers<[1], [0], [0], [1], [0, 0, 1, 1], [], []>} : vector<128x27xbf16>, vector<27x96xbf16>, vector<128x96xf32> -> vector<128x96xf32>
    %c0_3 = arith.constant 0 : index
    %c0_4 = arith.constant 0 : index
    %5 = vector.load %arg3[%c0_3, %c0_4] : memref<1x96xf32, #tpu.memory_space<vmem>>, vector<1x96xf32>
    %6 = vector.broadcast %5 : vector<1x96xf32> to vector<128x96xf32>
    %7 = arith.addf %4, %6 : vector<128x96xf32>
    %c0_5 = arith.constant 0 : index
    %c0_6 = arith.constant 0 : index
    %8 = vector.load %arg4[%c0_5, %c0_6] : memref<128x96xf32, #tpu.memory_space<vmem>>, vector<128x96xf32>
    tpu.vector_store %arg4[%c0_5, %c0_6], %7 {strides = array<i32>} : memref<128x96xf32, #tpu.memory_space<vmem>>, vector<128x96xf32>,
    %cst_7 = arith.constant dense<0.000000e+00> : vector<96xf32>
    %9 = vector.multi_reduction <add>, %7, %cst_7 [0] : vector<128x96xf32> to vector<96xf32>
    %10 = vector.shape_cast %9 : vector<96xf32> to vector<1x96xf32>
    %11 = vector.shape_cast %10 : vector<1x96xf32> to vector<1x1x96xf32>
    %c0_8 = arith.constant 0 : index
    %c0_9 = arith.constant 0 : index
    %c0_10 = arith.constant 0 : index
    %12 = vector.load %arg5[%c0_8, %c0_9, %c0_10] : memref<1x1x96xf32, #tpu.memory_space<vmem>>, vector<1x1x96xf32>
    tpu.vector_store %arg5[%c0_8, %c0_9, %c0_10], %11 {strides = array<i32>} : memref<1x1x96xf32, #tpu.memory_space<vmem>>, vector<1x1x96xf32>,
    %13 = arith.mulf %7, %7 : vector<128x96xf32>
    %cst_11 = arith.constant dense<0.000000e+00> : vector<96xf32>
    %14 = vector.multi_reduction <add>, %13, %cst_11 [0] : vector<128x96xf32> to vector<96xf32>
    %15 = vector.shape_cast %14 : vector<96xf32> to vector<1x96xf32>
    %16 = vector.shape_cast %15 : vector<1x96xf32> to vector<1x1x96xf32>
    %c0_12 = arith.constant 0 : index
    %c0_13 = arith.constant 0 : index
    %c0_14 = arith.constant 0 : index
    %17 = vector.load %arg6[%c0_12, %c0_13, %c0_14] : memref<1x1x96xf32, #tpu.memory_space<vmem>>, vector<1x1x96xf32>
    tpu.vector_store %arg6[%c0_12, %c0_13, %c0_14], %16 {strides = array<i32>} : memref<1x1x96xf32, #tpu.memory_space<vmem>>, vector<1x1x96xf32>,
    return
  }
  func.func @transform_0(%arg0: i32) -> (i32, i32) {
    %c0_i32 = arith.constant 0 : i32
    %c0_i32_0 = arith.constant 0 : i32
    return %arg0, %c0_i32 : i32, i32
  }
  func.func @transform_1(%arg0: i32) -> (i32, i32) {
    %c0_i32 = arith.constant 0 : i32
    %c0_i32_0 = arith.constant 0 : i32
    %c0_i32_1 = arith.constant 0 : i32
    return %c0_i32, %c0_i32_0 : i32, i32
  }
  func.func @transform_2(%arg0: i32) -> (i32, i32) {
    %c0_i32 = arith.constant 0 : i32
    %c0_i32_0 = arith.constant 0 : i32
    %c0_i32_1 = arith.constant 0 : i32
    return %c0_i32, %c0_i32_0 : i32, i32
  }
  func.func @transform_3(%arg0: i32) -> (i32, i32) {
    %c0_i32 = arith.constant 0 : i32
    %c0_i32_0 = arith.constant 0 : i32
    return %arg0, %c0_i32 : i32, i32
  }
  func.func @transform_4(%arg0: i32) -> (i32, i32, i32) {
    %c0_i32 = arith.constant 0 : i32
    %c0_i32_0 = arith.constant 0 : i32
    %c0_i32_1 = arith.constant 0 : i32
    return %arg0, %c0_i32, %c0_i32_0 : i32, i32, i32
  }
  func.func @transform_5(%arg0: i32) -> (i32, i32, i32) {
    %c0_i32 = arith.constant 0 : i32
    %c0_i32_0 = arith.constant 0 : i32
    %c0_i32_1 = arith.constant 0 : i32
    return %arg0, %c0_i32, %c0_i32_0 : i32, i32, i32
  }
}

module attributes {stable_mosaic.version = 11 : i64} {
  func.func @_affine_act_kernel(%arg0: i32, %arg1: i32, %arg2: memref<128x24xf32, #tpu.memory_space<vmem>>, %arg3: memref<1x1x24xf32, #tpu.memory_space<vmem>>, %arg4: memref<1x1x24xf32, #tpu.memory_space<vmem>>, %arg5: memref<128x24xf32, #tpu.memory_space<vmem>>) attributes {dimension_semantics = [#tpu.dimension_semantics<parallel>, #tpu.dimension_semantics<parallel>], iteration_bounds = array<i64: 1, 1>, scalar_prefetch = 0 : i64, scratch_operands = 0 : i64, tpu.core_type = #tpu.core_type<tc>, window_params = [{transform_indices = @transform_0, window_bounds = array<i64: 128, 24>}, {transform_indices = @transform_1, window_bounds = array<i64: 1, 1, 24>}, {transform_indices = @transform_2, window_bounds = array<i64: 1, 1, 24>}, {transform_indices = @transform_3, window_bounds = array<i64: 128, 24>}]} {
    %c0 = arith.constant 0 : index
    %c0_0 = arith.constant 0 : index
    %0 = vector.load %arg2[%c0, %c0_0] : memref<128x24xf32, #tpu.memory_space<vmem>>, vector<128x24xf32>
    %c0_1 = arith.constant 0 : index
    %c0_2 = arith.constant 0 : index
    %c0_3 = arith.constant 0 : index
    %1 = vector.load %arg3[%c0_1, %c0_2, %c0_3] : memref<1x1x24xf32, #tpu.memory_space<vmem>>, vector<1x1x24xf32>
    %2 = vector.shape_cast %1 : vector<1x1x24xf32> to vector<1x24xf32>
    %3 = vector.broadcast %2 : vector<1x24xf32> to vector<128x24xf32>
    %4 = arith.mulf %0, %3 : vector<128x24xf32>
    %c0_4 = arith.constant 0 : index
    %c0_5 = arith.constant 0 : index
    %c0_6 = arith.constant 0 : index
    %5 = vector.load %arg4[%c0_4, %c0_5, %c0_6] : memref<1x1x24xf32, #tpu.memory_space<vmem>>, vector<1x1x24xf32>
    %6 = vector.shape_cast %5 : vector<1x1x24xf32> to vector<1x24xf32>
    %7 = vector.broadcast %6 : vector<1x24xf32> to vector<128x24xf32>
    %8 = arith.addf %4, %7 : vector<128x24xf32>
    %cst = arith.constant 0.000000e+00 : f32
    %9 = vector.broadcast %cst : f32 to vector<128x24xf32>
    %10 = arith.maximumf %8, %9 : vector<128x24xf32>
    %c0_7 = arith.constant 0 : index
    %c0_8 = arith.constant 0 : index
    %11 = vector.load %arg5[%c0_7, %c0_8] : memref<128x24xf32, #tpu.memory_space<vmem>>, vector<128x24xf32>
    tpu.vector_store %arg5[%c0_7, %c0_8], %10 {strides = array<i32>} : memref<128x24xf32, #tpu.memory_space<vmem>>, vector<128x24xf32>,
    return
  }
  func.func @transform_0(%arg0: i32, %arg1: i32) -> (i32, i32) {
    %c1_i32 = arith.constant 1 : i32
    %0 = arith.muli %arg0, %c1_i32 : i32
    %1 = arith.addi %0, %arg1 : i32
    %c0_i32 = arith.constant 0 : i32
    %c0_i32_0 = arith.constant 0 : i32
    return %1, %c0_i32 : i32, i32
  }
  func.func @transform_1(%arg0: i32, %arg1: i32) -> (i32, i32, i32) {
    %c0_i32 = arith.constant 0 : i32
    %c0_i32_0 = arith.constant 0 : i32
    %c0_i32_1 = arith.constant 0 : i32
    return %arg0, %c0_i32, %c0_i32_0 : i32, i32, i32
  }
  func.func @transform_2(%arg0: i32, %arg1: i32) -> (i32, i32, i32) {
    %c0_i32 = arith.constant 0 : i32
    %c0_i32_0 = arith.constant 0 : i32
    %c0_i32_1 = arith.constant 0 : i32
    return %arg0, %c0_i32, %c0_i32_0 : i32, i32, i32
  }
  func.func @transform_3(%arg0: i32, %arg1: i32) -> (i32, i32) {
    %c1_i32 = arith.constant 1 : i32
    %0 = arith.muli %arg0, %c1_i32 : i32
    %1 = arith.addi %0, %arg1 : i32
    %c0_i32 = arith.constant 0 : i32
    %c0_i32_0 = arith.constant 0 : i32
    return %1, %c0_i32 : i32, i32
  }
}

module attributes {stable_mosaic.version = 11 : i64} {
  func.func @_matmul_stats_kernel(%arg0: i32, %arg1: memref<128x96xf32, #tpu.memory_space<vmem>>, %arg2: memref<1x1x96xf32, #tpu.memory_space<vmem>>, %arg3: memref<1x1x96xf32, #tpu.memory_space<vmem>>, %arg4: memref<96x24xf32, #tpu.memory_space<vmem>>, %arg5: memref<1x24xf32, #tpu.memory_space<vmem>>, %arg6: memref<128x24xf32, #tpu.memory_space<vmem>>, %arg7: memref<1x1x24xf32, #tpu.memory_space<vmem>>, %arg8: memref<1x1x24xf32, #tpu.memory_space<vmem>>) attributes {dimension_semantics = [#tpu.dimension_semantics<parallel>], iteration_bounds = array<i64: 1>, scalar_prefetch = 0 : i64, scratch_operands = 0 : i64, tpu.core_type = #tpu.core_type<tc>, window_params = [{transform_indices = @transform_0, window_bounds = array<i64: 128, 96>}, {pipeline_mode = #tpu.pipeline_mode<synchronous>, transform_indices = @transform_1, window_bounds = array<i64: 1, 1, 96>}, {pipeline_mode = #tpu.pipeline_mode<synchronous>, transform_indices = @transform_2, window_bounds = array<i64: 1, 1, 96>}, {pipeline_mode = #tpu.pipeline_mode<synchronous>, transform_indices = @transform_3, window_bounds = array<i64: 96, 24>}, {pipeline_mode = #tpu.pipeline_mode<synchronous>, transform_indices = @transform_4, window_bounds = array<i64: 1, 24>}, {transform_indices = @transform_5, window_bounds = array<i64: 128, 24>}, {transform_indices = @transform_6, window_bounds = array<i64: 1, 1, 24>}, {transform_indices = @transform_7, window_bounds = array<i64: 1, 1, 24>}]} {
    %c0 = arith.constant 0 : index
    %c0_0 = arith.constant 0 : index
    %0 = vector.load %arg1[%c0, %c0_0] : memref<128x96xf32, #tpu.memory_space<vmem>>, vector<128x96xf32>
    %c0_1 = arith.constant 0 : index
    %c0_2 = arith.constant 0 : index
    %c0_3 = arith.constant 0 : index
    %1 = vector.load %arg2[%c0_1, %c0_2, %c0_3] : memref<1x1x96xf32, #tpu.memory_space<vmem>>, vector<1x1x96xf32>
    %2 = vector.shape_cast %1 : vector<1x1x96xf32> to vector<1x96xf32>
    %3 = vector.broadcast %2 : vector<1x96xf32> to vector<128x96xf32>
    %4 = arith.mulf %0, %3 : vector<128x96xf32>
    %c0_4 = arith.constant 0 : index
    %c0_5 = arith.constant 0 : index
    %c0_6 = arith.constant 0 : index
    %5 = vector.load %arg3[%c0_4, %c0_5, %c0_6] : memref<1x1x96xf32, #tpu.memory_space<vmem>>, vector<1x1x96xf32>
    %6 = vector.shape_cast %5 : vector<1x1x96xf32> to vector<1x96xf32>
    %7 = vector.broadcast %6 : vector<1x96xf32> to vector<128x96xf32>
    %8 = arith.addf %4, %7 : vector<128x96xf32>
    %cst = arith.constant 0.000000e+00 : f32
    %9 = vector.broadcast %cst : f32 to vector<128x96xf32>
    %10 = arith.maximumf %8, %9 : vector<128x96xf32>
    %11 = arith.truncf %10 : vector<128x96xf32> to vector<128x96xbf16>
    %c0_7 = arith.constant 0 : index
    %c0_8 = arith.constant 0 : index
    %12 = vector.load %arg4[%c0_7, %c0_8] : memref<96x24xf32, #tpu.memory_space<vmem>>, vector<96x24xf32>
    %13 = arith.truncf %12 : vector<96x24xf32> to vector<96x24xbf16>
    %cst_9 = arith.constant dense<0.000000e+00> : vector<128x24xf32>
    %14 = tpu.matmul %11, %13, %cst_9 {dimension_numbers = #tpu.dot_dimension_numbers<[1], [0], [0], [1], [0, 0, 1, 1], [], []>} : vector<128x96xbf16>, vector<96x24xbf16>, vector<128x24xf32> -> vector<128x24xf32>
    %c0_10 = arith.constant 0 : index
    %c0_11 = arith.constant 0 : index
    %15 = vector.load %arg5[%c0_10, %c0_11] : memref<1x24xf32, #tpu.memory_space<vmem>>, vector<1x24xf32>
    %16 = vector.broadcast %15 : vector<1x24xf32> to vector<128x24xf32>
    %17 = arith.addf %14, %16 : vector<128x24xf32>
    %c0_12 = arith.constant 0 : index
    %c0_13 = arith.constant 0 : index
    %18 = vector.load %arg6[%c0_12, %c0_13] : memref<128x24xf32, #tpu.memory_space<vmem>>, vector<128x24xf32>
    tpu.vector_store %arg6[%c0_12, %c0_13], %17 {strides = array<i32>} : memref<128x24xf32, #tpu.memory_space<vmem>>, vector<128x24xf32>,
    %cst_14 = arith.constant dense<0.000000e+00> : vector<24xf32>
    %19 = vector.multi_reduction <add>, %17, %cst_14 [0] : vector<128x24xf32> to vector<24xf32>
    %20 = vector.shape_cast %19 : vector<24xf32> to vector<1x24xf32>
    %21 = vector.shape_cast %20 : vector<1x24xf32> to vector<1x1x24xf32>
    %c0_15 = arith.constant 0 : index
    %c0_16 = arith.constant 0 : index
    %c0_17 = arith.constant 0 : index
    %22 = vector.load %arg7[%c0_15, %c0_16, %c0_17] : memref<1x1x24xf32, #tpu.memory_space<vmem>>, vector<1x1x24xf32>
    tpu.vector_store %arg7[%c0_15, %c0_16, %c0_17], %21 {strides = array<i32>} : memref<1x1x24xf32, #tpu.memory_space<vmem>>, vector<1x1x24xf32>,
    %23 = arith.mulf %17, %17 : vector<128x24xf32>
    %cst_18 = arith.constant dense<0.000000e+00> : vector<24xf32>
    %24 = vector.multi_reduction <add>, %23, %cst_18 [0] : vector<128x24xf32> to vector<24xf32>
    %25 = vector.shape_cast %24 : vector<24xf32> to vector<1x24xf32>
    %26 = vector.shape_cast %25 : vector<1x24xf32> to vector<1x1x24xf32>
    %c0_19 = arith.constant 0 : index
    %c0_20 = arith.constant 0 : index
    %c0_21 = arith.constant 0 : index
    %27 = vector.load %arg8[%c0_19, %c0_20, %c0_21] : memref<1x1x24xf32, #tpu.memory_space<vmem>>, vector<1x1x24xf32>
    tpu.vector_store %arg8[%c0_19, %c0_20, %c0_21], %26 {strides = array<i32>} : memref<1x1x24xf32, #tpu.memory_space<vmem>>, vector<1x1x24xf32>,
    return
  }
  func.func @transform_0(%arg0: i32) -> (i32, i32) {
    %c0_i32 = arith.constant 0 : i32
    %c0_i32_0 = arith.constant 0 : i32
    return %arg0, %c0_i32 : i32, i32
  }
  func.func @transform_1(%arg0: i32) -> (i32, i32, i32) {
    %c0_i32 = arith.constant 0 : i32
    %c0_i32_0 = arith.constant 0 : i32
    %c0_i32_1 = arith.constant 0 : i32
    %c0_i32_2 = arith.constant 0 : i32
    return %c0_i32, %c0_i32_0, %c0_i32_1 : i32, i32, i32
  }
  func.func @transform_2(%arg0: i32) -> (i32, i32, i32) {
    %c0_i32 = arith.constant 0 : i32
    %c0_i32_0 = arith.constant 0 : i32
    %c0_i32_1 = arith.constant 0 : i32
    %c0_i32_2 = arith.constant 0 : i32
    return %c0_i32, %c0_i32_0, %c0_i32_1 : i32, i32, i32
  }
  func.func @transform_3(%arg0: i32) -> (i32, i32) {
    %c0_i32 = arith.constant 0 : i32
    %c0_i32_0 = arith.constant 0 : i32
    %c0_i32_1 = arith.constant 0 : i32
    return %c0_i32, %c0_i32_0 : i32, i32
  }
  func.func @transform_4(%arg0: i32) -> (i32, i32) {
    %c0_i32 = arith.constant 0 : i32
    %c0_i32_0 = arith.constant 0 : i32
    %c0_i32_1 = arith.constant 0 : i32
    return %c0_i32, %c0_i32_0 : i32, i32
  }
  func.func @transform_5(%arg0: i32) -> (i32, i32) {
    %c0_i32 = arith.constant 0 : i32
    %c0_i32_0 = arith.constant 0 : i32
    return %arg0, %c0_i32 : i32, i32
  }
  func.func @transform_6(%arg0: i32) -> (i32, i32, i32) {
    %c0_i32 = arith.constant 0 : i32
    %c0_i32_0 = arith.constant 0 : i32
    %c0_i32_1 = arith.constant 0 : i32
    return %arg0, %c0_i32, %c0_i32_0 : i32, i32, i32
  }
  func.func @transform_7(%arg0: i32) -> (i32, i32, i32) {
    %c0_i32 = arith.constant 0 : i32
    %c0_i32_0 = arith.constant 0 : i32
    %c0_i32_1 = arith.constant 0 : i32
    return %arg0, %c0_i32, %c0_i32_0 : i32, i32, i32
  }
}

module attributes {stable_mosaic.version = 11 : i64} {
  func.func @_matmul_stats_kernel(%arg0: i32, %arg1: memref<256x48xf32, #tpu.memory_space<vmem>>, %arg2: memref<48x32xf32, #tpu.memory_space<vmem>>, %arg3: memref<256x32xf32, #tpu.memory_space<vmem>>, %arg4: memref<1x1x32xf32, #tpu.memory_space<vmem>>, %arg5: memref<1x1x32xf32, #tpu.memory_space<vmem>>) attributes {dimension_semantics = [#tpu.dimension_semantics<parallel>], iteration_bounds = array<i64: 2>, scalar_prefetch = 0 : i64, scratch_operands = 0 : i64, tpu.core_type = #tpu.core_type<tc>, window_params = [{transform_indices = @transform_0, window_bounds = array<i64: 256, 48>}, {pipeline_mode = #tpu.pipeline_mode<synchronous>, transform_indices = @transform_1, window_bounds = array<i64: 48, 32>}, {transform_indices = @transform_2, window_bounds = array<i64: 256, 32>}, {transform_indices = @transform_3, window_bounds = array<i64: 1, 1, 32>}, {transform_indices = @transform_4, window_bounds = array<i64: 1, 1, 32>}]} {
    %c0 = arith.constant 0 : index
    %c0_0 = arith.constant 0 : index
    %0 = vector.load %arg1[%c0, %c0_0] : memref<256x48xf32, #tpu.memory_space<vmem>>, vector<256x48xf32>
    %1 = arith.truncf %0 : vector<256x48xf32> to vector<256x48xbf16>
    %c0_1 = arith.constant 0 : index
    %c0_2 = arith.constant 0 : index
    %2 = vector.load %arg2[%c0_1, %c0_2] : memref<48x32xf32, #tpu.memory_space<vmem>>, vector<48x32xf32>
    %3 = arith.truncf %2 : vector<48x32xf32> to vector<48x32xbf16>
    %cst = arith.constant dense<0.000000e+00> : vector<256x32xf32>
    %4 = tpu.matmul %1, %3, %cst {dimension_numbers = #tpu.dot_dimension_numbers<[1], [0], [0], [1], [0, 0, 1, 1], [], []>} : vector<256x48xbf16>, vector<48x32xbf16>, vector<256x32xf32> -> vector<256x32xf32>
    %c0_3 = arith.constant 0 : index
    %c0_4 = arith.constant 0 : index
    %5 = vector.load %arg3[%c0_3, %c0_4] : memref<256x32xf32, #tpu.memory_space<vmem>>, vector<256x32xf32>
    tpu.vector_store %arg3[%c0_3, %c0_4], %4 {strides = array<i32>} : memref<256x32xf32, #tpu.memory_space<vmem>>, vector<256x32xf32>,
    %cst_5 = arith.constant dense<0.000000e+00> : vector<32xf32>
    %6 = vector.multi_reduction <add>, %4, %cst_5 [0] : vector<256x32xf32> to vector<32xf32>
    %7 = vector.shape_cast %6 : vector<32xf32> to vector<1x32xf32>
    %8 = vector.shape_cast %7 : vector<1x32xf32> to vector<1x1x32xf32>
    %c0_6 = arith.constant 0 : index
    %c0_7 = arith.constant 0 : index
    %c0_8 = arith.constant 0 : index
    %9 = vector.load %arg4[%c0_6, %c0_7, %c0_8] : memref<1x1x32xf32, #tpu.memory_space<vmem>>, vector<1x1x32xf32>
    tpu.vector_store %arg4[%c0_6, %c0_7, %c0_8], %8 {strides = array<i32>} : memref<1x1x32xf32, #tpu.memory_space<vmem>>, vector<1x1x32xf32>,
    %10 = arith.mulf %4, %4 : vector<256x32xf32>
    %cst_9 = arith.constant dense<0.000000e+00> : vector<32xf32>
    %11 = vector.multi_reduction <add>, %10, %cst_9 [0] : vector<256x32xf32> to vector<32xf32>
    %12 = vector.shape_cast %11 : vector<32xf32> to vector<1x32xf32>
    %13 = vector.shape_cast %12 : vector<1x32xf32> to vector<1x1x32xf32>
    %c0_10 = arith.constant 0 : index
    %c0_11 = arith.constant 0 : index
    %c0_12 = arith.constant 0 : index
    %14 = vector.load %arg5[%c0_10, %c0_11, %c0_12] : memref<1x1x32xf32, #tpu.memory_space<vmem>>, vector<1x1x32xf32>
    tpu.vector_store %arg5[%c0_10, %c0_11, %c0_12], %13 {strides = array<i32>} : memref<1x1x32xf32, #tpu.memory_space<vmem>>, vector<1x1x32xf32>,
    return
  }
  func.func @transform_0(%arg0: i32) -> (i32, i32) {
    %c0_i32 = arith.constant 0 : i32
    %c0_i32_0 = arith.constant 0 : i32
    return %arg0, %c0_i32 : i32, i32
  }
  func.func @transform_1(%arg0: i32) -> (i32, i32) {
    %c0_i32 = arith.constant 0 : i32
    %c0_i32_0 = arith.constant 0 : i32
    %c0_i32_1 = arith.constant 0 : i32
    return %c0_i32, %c0_i32_0 : i32, i32
  }
  func.func @transform_2(%arg0: i32) -> (i32, i32) {
    %c0_i32 = arith.constant 0 : i32
    %c0_i32_0 = arith.constant 0 : i32
    return %arg0, %c0_i32 : i32, i32
  }
  func.func @transform_3(%arg0: i32) -> (i32, i32, i32) {
    %c0_i32 = arith.constant 0 : i32
    %c0_i32_0 = arith.constant 0 : i32
    %c0_i32_1 = arith.constant 0 : i32
    return %arg0, %c0_i32, %c0_i32_0 : i32, i32, i32
  }
  func.func @transform_4(%arg0: i32) -> (i32, i32, i32) {
    %c0_i32 = arith.constant 0 : i32
    %c0_i32_0 = arith.constant 0 : i32
    %c0_i32_1 = arith.constant 0 : i32
    return %arg0, %c0_i32, %c0_i32_0 : i32, i32, i32
  }
}

module attributes {stable_mosaic.version = 11 : i64} {
  func.func @_affine_maxk_kernel(%arg0: i32, %arg1: i32, %arg2: memref<4x64x32xf32, #tpu.memory_space<vmem>>, %arg3: memref<1x1x32xf32, #tpu.memory_space<vmem>>, %arg4: memref<1x1x32xf32, #tpu.memory_space<vmem>>, %arg5: memref<64x32xf32, #tpu.memory_space<vmem>>) attributes {dimension_semantics = [#tpu.dimension_semantics<parallel>, #tpu.dimension_semantics<parallel>], iteration_bounds = array<i64: 2, 1>, scalar_prefetch = 0 : i64, scratch_operands = 0 : i64, tpu.core_type = #tpu.core_type<tc>, window_params = [{transform_indices = @transform_0, window_bounds = array<i64: 4, 64, 32>}, {transform_indices = @transform_1, window_bounds = array<i64: 1, 1, 32>}, {transform_indices = @transform_2, window_bounds = array<i64: 1, 1, 32>}, {transform_indices = @transform_3, window_bounds = array<i64: 64, 32>}]} {
    %c0 = arith.constant 0 : index
    %c0_0 = arith.constant 0 : index
    %c0_1 = arith.constant 0 : index
    %0 = vector.load %arg2[%c0, %c0_0, %c0_1] : memref<4x64x32xf32, #tpu.memory_space<vmem>>, vector<4x64x32xf32>
    %c0_2 = arith.constant 0 : index
    %c0_3 = arith.constant 0 : index
    %c0_4 = arith.constant 0 : index
    %1 = vector.load %arg3[%c0_2, %c0_3, %c0_4] : memref<1x1x32xf32, #tpu.memory_space<vmem>>, vector<1x1x32xf32>
    %2 = vector.shape_cast %1 : vector<1x1x32xf32> to vector<1x32xf32>
    %3 = vector.shape_cast %2 : vector<1x32xf32> to vector<1x1x32xf32>
    %4 = vector.broadcast %3 : vector<1x1x32xf32> to vector<4x64x32xf32>
    %5 = arith.mulf %0, %4 : vector<4x64x32xf32>
    %c0_5 = arith.constant 0 : index
    %c0_6 = arith.constant 0 : index
    %c0_7 = arith.constant 0 : index
    %6 = vector.load %arg4[%c0_5, %c0_6, %c0_7] : memref<1x1x32xf32, #tpu.memory_space<vmem>>, vector<1x1x32xf32>
    %7 = vector.shape_cast %6 : vector<1x1x32xf32> to vector<1x32xf32>
    %8 = vector.shape_cast %7 : vector<1x32xf32> to vector<1x1x32xf32>
    %9 = vector.broadcast %8 : vector<1x1x32xf32> to vector<4x64x32xf32>
    %10 = arith.addf %5, %9 : vector<4x64x32xf32>
    %cst = arith.constant 0.000000e+00 : f32
    %11 = vector.broadcast %cst : f32 to vector<4x64x32xf32>
    %12 = arith.cmpf oge, %10, %11 : vector<4x64x32xf32>
    %cst_8 = arith.constant 2.000000e-01 : f32
    %13 = vector.broadcast %cst_8 : f32 to vector<4x64x32xf32>
    %14 = arith.mulf %13, %10 : vector<4x64x32xf32>
    %15 = arith.select %12, %10, %14 : vector<4x64x32xi1>, vector<4x64x32xf32>
    %cst_9 = arith.constant dense<0xFF800000> : vector<64x32xf32>
    %16 = vector.multi_reduction <maximumf>, %15, %cst_9 [0] : vector<4x64x32xf32> to vector<64x32xf32>
    %c0_10 = arith.constant 0 : index
    %c0_11 = arith.constant 0 : index
    %17 = vector.load %arg5[%c0_10, %c0_11] : memref<64x32xf32, #tpu.memory_space<vmem>>, vector<64x32xf32>
    tpu.vector_store %arg5[%c0_10, %c0_11], %16 {strides = array<i32>} : memref<64x32xf32, #tpu.memory_space<vmem>>, vector<64x32xf32>,
    return
  }
  func.func @transform_0(%arg0: i32, %arg1: i32) -> (i32, i32, i32) {
    %c0_i32 = arith.constant 0 : i32
    %c0_i32_0 = arith.constant 0 : i32
    return %arg0, %arg1, %c0_i32 : i32, i32, i32
  }
  func.func @transform_1(%arg0: i32, %arg1: i32) -> (i32, i32, i32) {
    %c0_i32 = arith.constant 0 : i32
    %c0_i32_0 = arith.constant 0 : i32
    %c0_i32_1 = arith.constant 0 : i32
    return %arg0, %c0_i32, %c0_i32_0 : i32, i32, i32
  }
  func.func @transform_2(%arg0: i32, %arg1: i32) -> (i32, i32, i32) {
    %c0_i32 = arith.constant 0 : i32
    %c0_i32_0 = arith.constant 0 : i32
    %c0_i32_1 = arith.constant 0 : i32
    return %arg0, %c0_i32, %c0_i32_0 : i32, i32, i32
  }
  func.func @transform_3(%arg0: i32, %arg1: i32) -> (i32, i32) {
    %c1_i32 = arith.constant 1 : i32
    %0 = arith.muli %arg0, %c1_i32 : i32
    %1 = arith.addi %0, %arg1 : i32
    %c0_i32 = arith.constant 0 : i32
    %c0_i32_0 = arith.constant 0 : i32
    return %1, %c0_i32 : i32, i32
  }
}

module attributes {stable_mosaic.version = 11 : i64} {
  func.func @_matmul_stats_kernel(%arg0: i32, %arg1: memref<256x64xf32, #tpu.memory_space<vmem>>, %arg2: memref<64x24xf32, #tpu.memory_space<vmem>>, %arg3: memref<256x24xf32, #tpu.memory_space<vmem>>, %arg4: memref<1x1x24xf32, #tpu.memory_space<vmem>>, %arg5: memref<1x1x24xf32, #tpu.memory_space<vmem>>) attributes {dimension_semantics = [#tpu.dimension_semantics<parallel>], iteration_bounds = array<i64: 2>, scalar_prefetch = 0 : i64, scratch_operands = 0 : i64, tpu.core_type = #tpu.core_type<tc>, window_params = [{transform_indices = @transform_0, window_bounds = array<i64: 256, 64>}, {pipeline_mode = #tpu.pipeline_mode<synchronous>, transform_indices = @transform_1, window_bounds = array<i64: 64, 24>}, {transform_indices = @transform_2, window_bounds = array<i64: 256, 24>}, {transform_indices = @transform_3, window_bounds = array<i64: 1, 1, 24>}, {transform_indices = @transform_4, window_bounds = array<i64: 1, 1, 24>}]} {
    %c0 = arith.constant 0 : index
    %c0_0 = arith.constant 0 : index
    %0 = vector.load %arg1[%c0, %c0_0] : memref<256x64xf32, #tpu.memory_space<vmem>>, vector<256x64xf32>
    %1 = arith.truncf %0 : vector<256x64xf32> to vector<256x64xbf16>
    %c0_1 = arith.constant 0 : index
    %c0_2 = arith.constant 0 : index
    %2 = vector.load %arg2[%c0_1, %c0_2] : memref<64x24xf32, #tpu.memory_space<vmem>>, vector<64x24xf32>
    %3 = arith.truncf %2 : vector<64x24xf32> to vector<64x24xbf16>
    %cst = arith.constant dense<0.000000e+00> : vector<256x24xf32>
    %4 = tpu.matmul %1, %3, %cst {dimension_numbers = #tpu.dot_dimension_numbers<[1], [0], [0], [1], [0, 0, 1, 1], [], []>} : vector<256x64xbf16>, vector<64x24xbf16>, vector<256x24xf32> -> vector<256x24xf32>
    %c0_3 = arith.constant 0 : index
    %c0_4 = arith.constant 0 : index
    %5 = vector.load %arg3[%c0_3, %c0_4] : memref<256x24xf32, #tpu.memory_space<vmem>>, vector<256x24xf32>
    tpu.vector_store %arg3[%c0_3, %c0_4], %4 {strides = array<i32>} : memref<256x24xf32, #tpu.memory_space<vmem>>, vector<256x24xf32>,
    %cst_5 = arith.constant dense<0.000000e+00> : vector<24xf32>
    %6 = vector.multi_reduction <add>, %4, %cst_5 [0] : vector<256x24xf32> to vector<24xf32>
    %7 = vector.shape_cast %6 : vector<24xf32> to vector<1x24xf32>
    %8 = vector.shape_cast %7 : vector<1x24xf32> to vector<1x1x24xf32>
    %c0_6 = arith.constant 0 : index
    %c0_7 = arith.constant 0 : index
    %c0_8 = arith.constant 0 : index
    %9 = vector.load %arg4[%c0_6, %c0_7, %c0_8] : memref<1x1x24xf32, #tpu.memory_space<vmem>>, vector<1x1x24xf32>
    tpu.vector_store %arg4[%c0_6, %c0_7, %c0_8], %8 {strides = array<i32>} : memref<1x1x24xf32, #tpu.memory_space<vmem>>, vector<1x1x24xf32>,
    %10 = arith.mulf %4, %4 : vector<256x24xf32>
    %cst_9 = arith.constant dense<0.000000e+00> : vector<24xf32>
    %11 = vector.multi_reduction <add>, %10, %cst_9 [0] : vector<256x24xf32> to vector<24xf32>
    %12 = vector.shape_cast %11 : vector<24xf32> to vector<1x24xf32>
    %13 = vector.shape_cast %12 : vector<1x24xf32> to vector<1x1x24xf32>
    %c0_10 = arith.constant 0 : index
    %c0_11 = arith.constant 0 : index
    %c0_12 = arith.constant 0 : index
    %14 = vector.load %arg5[%c0_10, %c0_11, %c0_12] : memref<1x1x24xf32, #tpu.memory_space<vmem>>, vector<1x1x24xf32>
    tpu.vector_store %arg5[%c0_10, %c0_11, %c0_12], %13 {strides = array<i32>} : memref<1x1x24xf32, #tpu.memory_space<vmem>>, vector<1x1x24xf32>,
    return
  }
  func.func @transform_0(%arg0: i32) -> (i32, i32) {
    %c0_i32 = arith.constant 0 : i32
    %c0_i32_0 = arith.constant 0 : i32
    return %arg0, %c0_i32 : i32, i32
  }
  func.func @transform_1(%arg0: i32) -> (i32, i32) {
    %c0_i32 = arith.constant 0 : i32
    %c0_i32_0 = arith.constant 0 : i32
    %c0_i32_1 = arith.constant 0 : i32
    return %c0_i32, %c0_i32_0 : i32, i32
  }
  func.func @transform_2(%arg0: i32) -> (i32, i32) {
    %c0_i32 = arith.constant 0 : i32
    %c0_i32_0 = arith.constant 0 : i32
    return %arg0, %c0_i32 : i32, i32
  }
  func.func @transform_3(%arg0: i32) -> (i32, i32, i32) {
    %c0_i32 = arith.constant 0 : i32
    %c0_i32_0 = arith.constant 0 : i32
    %c0_i32_1 = arith.constant 0 : i32
    return %arg0, %c0_i32, %c0_i32_0 : i32, i32, i32
  }
  func.func @transform_4(%arg0: i32) -> (i32, i32, i32) {
    %c0_i32 = arith.constant 0 : i32
    %c0_i32_0 = arith.constant 0 : i32
    %c0_i32_1 = arith.constant 0 : i32
    return %arg0, %c0_i32, %c0_i32_0 : i32, i32, i32
  }
}

module attributes {stable_mosaic.version = 11 : i64} {
  func.func @_affine_maxk_kernel(%arg0: i32, %arg1: i32, %arg2: memref<4x64x24xf32, #tpu.memory_space<vmem>>, %arg3: memref<1x1x24xf32, #tpu.memory_space<vmem>>, %arg4: memref<1x1x24xf32, #tpu.memory_space<vmem>>, %arg5: memref<64x24xf32, #tpu.memory_space<vmem>>) attributes {dimension_semantics = [#tpu.dimension_semantics<parallel>, #tpu.dimension_semantics<parallel>], iteration_bounds = array<i64: 2, 1>, scalar_prefetch = 0 : i64, scratch_operands = 0 : i64, tpu.core_type = #tpu.core_type<tc>, window_params = [{transform_indices = @transform_0, window_bounds = array<i64: 4, 64, 24>}, {transform_indices = @transform_1, window_bounds = array<i64: 1, 1, 24>}, {transform_indices = @transform_2, window_bounds = array<i64: 1, 1, 24>}, {transform_indices = @transform_3, window_bounds = array<i64: 64, 24>}]} {
    %c0 = arith.constant 0 : index
    %c0_0 = arith.constant 0 : index
    %c0_1 = arith.constant 0 : index
    %0 = vector.load %arg2[%c0, %c0_0, %c0_1] : memref<4x64x24xf32, #tpu.memory_space<vmem>>, vector<4x64x24xf32>
    %c0_2 = arith.constant 0 : index
    %c0_3 = arith.constant 0 : index
    %c0_4 = arith.constant 0 : index
    %1 = vector.load %arg3[%c0_2, %c0_3, %c0_4] : memref<1x1x24xf32, #tpu.memory_space<vmem>>, vector<1x1x24xf32>
    %2 = vector.shape_cast %1 : vector<1x1x24xf32> to vector<1x24xf32>
    %3 = vector.shape_cast %2 : vector<1x24xf32> to vector<1x1x24xf32>
    %4 = vector.broadcast %3 : vector<1x1x24xf32> to vector<4x64x24xf32>
    %5 = arith.mulf %0, %4 : vector<4x64x24xf32>
    %c0_5 = arith.constant 0 : index
    %c0_6 = arith.constant 0 : index
    %c0_7 = arith.constant 0 : index
    %6 = vector.load %arg4[%c0_5, %c0_6, %c0_7] : memref<1x1x24xf32, #tpu.memory_space<vmem>>, vector<1x1x24xf32>
    %7 = vector.shape_cast %6 : vector<1x1x24xf32> to vector<1x24xf32>
    %8 = vector.shape_cast %7 : vector<1x24xf32> to vector<1x1x24xf32>
    %9 = vector.broadcast %8 : vector<1x1x24xf32> to vector<4x64x24xf32>
    %10 = arith.addf %5, %9 : vector<4x64x24xf32>
    %cst = arith.constant 0.000000e+00 : f32
    %11 = vector.broadcast %cst : f32 to vector<4x64x24xf32>
    %12 = arith.cmpf oge, %10, %11 : vector<4x64x24xf32>
    %cst_8 = arith.constant 2.000000e-01 : f32
    %13 = vector.broadcast %cst_8 : f32 to vector<4x64x24xf32>
    %14 = arith.mulf %13, %10 : vector<4x64x24xf32>
    %15 = arith.select %12, %10, %14 : vector<4x64x24xi1>, vector<4x64x24xf32>
    %cst_9 = arith.constant dense<0xFF800000> : vector<64x24xf32>
    %16 = vector.multi_reduction <maximumf>, %15, %cst_9 [0] : vector<4x64x24xf32> to vector<64x24xf32>
    %c0_10 = arith.constant 0 : index
    %c0_11 = arith.constant 0 : index
    %17 = vector.load %arg5[%c0_10, %c0_11] : memref<64x24xf32, #tpu.memory_space<vmem>>, vector<64x24xf32>
    tpu.vector_store %arg5[%c0_10, %c0_11], %16 {strides = array<i32>} : memref<64x24xf32, #tpu.memory_space<vmem>>, vector<64x24xf32>,
    return
  }
  func.func @transform_0(%arg0: i32, %arg1: i32) -> (i32, i32, i32) {
    %c0_i32 = arith.constant 0 : i32
    %c0_i32_0 = arith.constant 0 : i32
    return %arg0, %arg1, %c0_i32 : i32, i32, i32
  }
  func.func @transform_1(%arg0: i32, %arg1: i32) -> (i32, i32, i32) {
    %c0_i32 = arith.constant 0 : i32
    %c0_i32_0 = arith.constant 0 : i32
    %c0_i32_1 = arith.constant 0 : i32
    return %arg0, %c0_i32, %c0_i32_0 : i32, i32, i32
  }
  func.func @transform_2(%arg0: i32, %arg1: i32) -> (i32, i32, i32) {
    %c0_i32 = arith.constant 0 : i32
    %c0_i32_0 = arith.constant 0 : i32
    %c0_i32_1 = arith.constant 0 : i32
    return %arg0, %c0_i32, %c0_i32_0 : i32, i32, i32
  }
  func.func @transform_3(%arg0: i32, %arg1: i32) -> (i32, i32) {
    %c1_i32 = arith.constant 1 : i32
    %0 = arith.muli %arg0, %c1_i32 : i32
    %1 = arith.addi %0, %arg1 : i32
    %c0_i32 = arith.constant 0 : i32
    %c0_i32_0 = arith.constant 0 : i32
    return %1, %c0_i32 : i32, i32
  }
}

module attributes {stable_mosaic.version = 11 : i64} {
  func.func @_matmul_stats_kernel(%arg0: i32, %arg1: memref<256x27xf32, #tpu.memory_space<vmem>>, %arg2: memref<27x96xf32, #tpu.memory_space<vmem>>, %arg3: memref<1x96xf32, #tpu.memory_space<vmem>>, %arg4: memref<256x96xf32, #tpu.memory_space<vmem>>, %arg5: memref<1x1x96xf32, #tpu.memory_space<vmem>>, %arg6: memref<1x1x96xf32, #tpu.memory_space<vmem>>) attributes {dimension_semantics = [#tpu.dimension_semantics<parallel>], iteration_bounds = array<i64: 1>, scalar_prefetch = 0 : i64, scratch_operands = 0 : i64, tpu.core_type = #tpu.core_type<tc>, window_params = [{transform_indices = @transform_0, window_bounds = array<i64: 256, 27>}, {pipeline_mode = #tpu.pipeline_mode<synchronous>, transform_indices = @transform_1, window_bounds = array<i64: 27, 96>}, {pipeline_mode = #tpu.pipeline_mode<synchronous>, transform_indices = @transform_2, window_bounds = array<i64: 1, 96>}, {transform_indices = @transform_3, window_bounds = array<i64: 256, 96>}, {transform_indices = @transform_4, window_bounds = array<i64: 1, 1, 96>}, {transform_indices = @transform_5, window_bounds = array<i64: 1, 1, 96>}]} {
    %c0 = arith.constant 0 : index
    %c0_0 = arith.constant 0 : index
    %0 = vector.load %arg1[%c0, %c0_0] : memref<256x27xf32, #tpu.memory_space<vmem>>, vector<256x27xf32>
    %1 = arith.truncf %0 : vector<256x27xf32> to vector<256x27xbf16>
    %c0_1 = arith.constant 0 : index
    %c0_2 = arith.constant 0 : index
    %2 = vector.load %arg2[%c0_1, %c0_2] : memref<27x96xf32, #tpu.memory_space<vmem>>, vector<27x96xf32>
    %3 = arith.truncf %2 : vector<27x96xf32> to vector<27x96xbf16>
    %cst = arith.constant dense<0.000000e+00> : vector<256x96xf32>
    %4 = tpu.matmul %1, %3, %cst {dimension_numbers = #tpu.dot_dimension_numbers<[1], [0], [0], [1], [0, 0, 1, 1], [], []>} : vector<256x27xbf16>, vector<27x96xbf16>, vector<256x96xf32> -> vector<256x96xf32>
    %c0_3 = arith.constant 0 : index
    %c0_4 = arith.constant 0 : index
    %5 = vector.load %arg3[%c0_3, %c0_4] : memref<1x96xf32, #tpu.memory_space<vmem>>, vector<1x96xf32>
    %6 = vector.broadcast %5 : vector<1x96xf32> to vector<256x96xf32>
    %7 = arith.addf %4, %6 : vector<256x96xf32>
    %c0_5 = arith.constant 0 : index
    %c0_6 = arith.constant 0 : index
    %8 = vector.load %arg4[%c0_5, %c0_6] : memref<256x96xf32, #tpu.memory_space<vmem>>, vector<256x96xf32>
    tpu.vector_store %arg4[%c0_5, %c0_6], %7 {strides = array<i32>} : memref<256x96xf32, #tpu.memory_space<vmem>>, vector<256x96xf32>,
    %cst_7 = arith.constant dense<0.000000e+00> : vector<96xf32>
    %9 = vector.multi_reduction <add>, %7, %cst_7 [0] : vector<256x96xf32> to vector<96xf32>
    %10 = vector.shape_cast %9 : vector<96xf32> to vector<1x96xf32>
    %11 = vector.shape_cast %10 : vector<1x96xf32> to vector<1x1x96xf32>
    %c0_8 = arith.constant 0 : index
    %c0_9 = arith.constant 0 : index
    %c0_10 = arith.constant 0 : index
    %12 = vector.load %arg5[%c0_8, %c0_9, %c0_10] : memref<1x1x96xf32, #tpu.memory_space<vmem>>, vector<1x1x96xf32>
    tpu.vector_store %arg5[%c0_8, %c0_9, %c0_10], %11 {strides = array<i32>} : memref<1x1x96xf32, #tpu.memory_space<vmem>>, vector<1x1x96xf32>,
    %13 = arith.mulf %7, %7 : vector<256x96xf32>
    %cst_11 = arith.constant dense<0.000000e+00> : vector<96xf32>
    %14 = vector.multi_reduction <add>, %13, %cst_11 [0] : vector<256x96xf32> to vector<96xf32>
    %15 = vector.shape_cast %14 : vector<96xf32> to vector<1x96xf32>
    %16 = vector.shape_cast %15 : vector<1x96xf32> to vector<1x1x96xf32>
    %c0_12 = arith.constant 0 : index
    %c0_13 = arith.constant 0 : index
    %c0_14 = arith.constant 0 : index
    %17 = vector.load %arg6[%c0_12, %c0_13, %c0_14] : memref<1x1x96xf32, #tpu.memory_space<vmem>>, vector<1x1x96xf32>
    tpu.vector_store %arg6[%c0_12, %c0_13, %c0_14], %16 {strides = array<i32>} : memref<1x1x96xf32, #tpu.memory_space<vmem>>, vector<1x1x96xf32>,
    return
  }
  func.func @transform_0(%arg0: i32) -> (i32, i32) {
    %c0_i32 = arith.constant 0 : i32
    %c0_i32_0 = arith.constant 0 : i32
    return %arg0, %c0_i32 : i32, i32
  }
  func.func @transform_1(%arg0: i32) -> (i32, i32) {
    %c0_i32 = arith.constant 0 : i32
    %c0_i32_0 = arith.constant 0 : i32
    %c0_i32_1 = arith.constant 0 : i32
    return %c0_i32, %c0_i32_0 : i32, i32
  }
  func.func @transform_2(%arg0: i32) -> (i32, i32) {
    %c0_i32 = arith.constant 0 : i32
    %c0_i32_0 = arith.constant 0 : i32
    %c0_i32_1 = arith.constant 0 : i32
    return %c0_i32, %c0_i32_0 : i32, i32
  }
  func.func @transform_3(%arg0: i32) -> (i32, i32) {
    %c0_i32 = arith.constant 0 : i32
    %c0_i32_0 = arith.constant 0 : i32
    return %arg0, %c0_i32 : i32, i32
  }
  func.func @transform_4(%arg0: i32) -> (i32, i32, i32) {
    %c0_i32 = arith.constant 0 : i32
    %c0_i32_0 = arith.constant 0 : i32
    %c0_i32_1 = arith.constant 0 : i32
    return %arg0, %c0_i32, %c0_i32_0 : i32, i32, i32
  }
  func.func @transform_5(%arg0: i32) -> (i32, i32, i32) {
    %c0_i32 = arith.constant 0 : i32
    %c0_i32_0 = arith.constant 0 : i32
    %c0_i32_1 = arith.constant 0 : i32
    return %arg0, %c0_i32, %c0_i32_0 : i32, i32, i32
  }
}

module attributes {stable_mosaic.version = 11 : i64} {
  func.func @_matmul_stats_kernel(%arg0: i32, %arg1: memref<256x96xf32, #tpu.memory_space<vmem>>, %arg2: memref<1x1x96xf32, #tpu.memory_space<vmem>>, %arg3: memref<1x1x96xf32, #tpu.memory_space<vmem>>, %arg4: memref<96x24xf32, #tpu.memory_space<vmem>>, %arg5: memref<1x24xf32, #tpu.memory_space<vmem>>, %arg6: memref<256x24xf32, #tpu.memory_space<vmem>>, %arg7: memref<1x1x24xf32, #tpu.memory_space<vmem>>, %arg8: memref<1x1x24xf32, #tpu.memory_space<vmem>>) attributes {dimension_semantics = [#tpu.dimension_semantics<parallel>], iteration_bounds = array<i64: 1>, scalar_prefetch = 0 : i64, scratch_operands = 0 : i64, tpu.core_type = #tpu.core_type<tc>, window_params = [{transform_indices = @transform_0, window_bounds = array<i64: 256, 96>}, {pipeline_mode = #tpu.pipeline_mode<synchronous>, transform_indices = @transform_1, window_bounds = array<i64: 1, 1, 96>}, {pipeline_mode = #tpu.pipeline_mode<synchronous>, transform_indices = @transform_2, window_bounds = array<i64: 1, 1, 96>}, {pipeline_mode = #tpu.pipeline_mode<synchronous>, transform_indices = @transform_3, window_bounds = array<i64: 96, 24>}, {pipeline_mode = #tpu.pipeline_mode<synchronous>, transform_indices = @transform_4, window_bounds = array<i64: 1, 24>}, {transform_indices = @transform_5, window_bounds = array<i64: 256, 24>}, {transform_indices = @transform_6, window_bounds = array<i64: 1, 1, 24>}, {transform_indices = @transform_7, window_bounds = array<i64: 1, 1, 24>}]} {
    %c0 = arith.constant 0 : index
    %c0_0 = arith.constant 0 : index
    %0 = vector.load %arg1[%c0, %c0_0] : memref<256x96xf32, #tpu.memory_space<vmem>>, vector<256x96xf32>
    %c0_1 = arith.constant 0 : index
    %c0_2 = arith.constant 0 : index
    %c0_3 = arith.constant 0 : index
    %1 = vector.load %arg2[%c0_1, %c0_2, %c0_3] : memref<1x1x96xf32, #tpu.memory_space<vmem>>, vector<1x1x96xf32>
    %2 = vector.shape_cast %1 : vector<1x1x96xf32> to vector<1x96xf32>
    %3 = vector.broadcast %2 : vector<1x96xf32> to vector<256x96xf32>
    %4 = arith.mulf %0, %3 : vector<256x96xf32>
    %c0_4 = arith.constant 0 : index
    %c0_5 = arith.constant 0 : index
    %c0_6 = arith.constant 0 : index
    %5 = vector.load %arg3[%c0_4, %c0_5, %c0_6] : memref<1x1x96xf32, #tpu.memory_space<vmem>>, vector<1x1x96xf32>
    %6 = vector.shape_cast %5 : vector<1x1x96xf32> to vector<1x96xf32>
    %7 = vector.broadcast %6 : vector<1x96xf32> to vector<256x96xf32>
    %8 = arith.addf %4, %7 : vector<256x96xf32>
    %cst = arith.constant 0.000000e+00 : f32
    %9 = vector.broadcast %cst : f32 to vector<256x96xf32>
    %10 = arith.maximumf %8, %9 : vector<256x96xf32>
    %11 = arith.truncf %10 : vector<256x96xf32> to vector<256x96xbf16>
    %c0_7 = arith.constant 0 : index
    %c0_8 = arith.constant 0 : index
    %12 = vector.load %arg4[%c0_7, %c0_8] : memref<96x24xf32, #tpu.memory_space<vmem>>, vector<96x24xf32>
    %13 = arith.truncf %12 : vector<96x24xf32> to vector<96x24xbf16>
    %cst_9 = arith.constant dense<0.000000e+00> : vector<256x24xf32>
    %14 = tpu.matmul %11, %13, %cst_9 {dimension_numbers = #tpu.dot_dimension_numbers<[1], [0], [0], [1], [0, 0, 1, 1], [], []>} : vector<256x96xbf16>, vector<96x24xbf16>, vector<256x24xf32> -> vector<256x24xf32>
    %c0_10 = arith.constant 0 : index
    %c0_11 = arith.constant 0 : index
    %15 = vector.load %arg5[%c0_10, %c0_11] : memref<1x24xf32, #tpu.memory_space<vmem>>, vector<1x24xf32>
    %16 = vector.broadcast %15 : vector<1x24xf32> to vector<256x24xf32>
    %17 = arith.addf %14, %16 : vector<256x24xf32>
    %c0_12 = arith.constant 0 : index
    %c0_13 = arith.constant 0 : index
    %18 = vector.load %arg6[%c0_12, %c0_13] : memref<256x24xf32, #tpu.memory_space<vmem>>, vector<256x24xf32>
    tpu.vector_store %arg6[%c0_12, %c0_13], %17 {strides = array<i32>} : memref<256x24xf32, #tpu.memory_space<vmem>>, vector<256x24xf32>,
    %cst_14 = arith.constant dense<0.000000e+00> : vector<24xf32>
    %19 = vector.multi_reduction <add>, %17, %cst_14 [0] : vector<256x24xf32> to vector<24xf32>
    %20 = vector.shape_cast %19 : vector<24xf32> to vector<1x24xf32>
    %21 = vector.shape_cast %20 : vector<1x24xf32> to vector<1x1x24xf32>
    %c0_15 = arith.constant 0 : index
    %c0_16 = arith.constant 0 : index
    %c0_17 = arith.constant 0 : index
    %22 = vector.load %arg7[%c0_15, %c0_16, %c0_17] : memref<1x1x24xf32, #tpu.memory_space<vmem>>, vector<1x1x24xf32>
    tpu.vector_store %arg7[%c0_15, %c0_16, %c0_17], %21 {strides = array<i32>} : memref<1x1x24xf32, #tpu.memory_space<vmem>>, vector<1x1x24xf32>,
    %23 = arith.mulf %17, %17 : vector<256x24xf32>
    %cst_18 = arith.constant dense<0.000000e+00> : vector<24xf32>
    %24 = vector.multi_reduction <add>, %23, %cst_18 [0] : vector<256x24xf32> to vector<24xf32>
    %25 = vector.shape_cast %24 : vector<24xf32> to vector<1x24xf32>
    %26 = vector.shape_cast %25 : vector<1x24xf32> to vector<1x1x24xf32>
    %c0_19 = arith.constant 0 : index
    %c0_20 = arith.constant 0 : index
    %c0_21 = arith.constant 0 : index
    %27 = vector.load %arg8[%c0_19, %c0_20, %c0_21] : memref<1x1x24xf32, #tpu.memory_space<vmem>>, vector<1x1x24xf32>
    tpu.vector_store %arg8[%c0_19, %c0_20, %c0_21], %26 {strides = array<i32>} : memref<1x1x24xf32, #tpu.memory_space<vmem>>, vector<1x1x24xf32>,
    return
  }
  func.func @transform_0(%arg0: i32) -> (i32, i32) {
    %c0_i32 = arith.constant 0 : i32
    %c0_i32_0 = arith.constant 0 : i32
    return %arg0, %c0_i32 : i32, i32
  }
  func.func @transform_1(%arg0: i32) -> (i32, i32, i32) {
    %c0_i32 = arith.constant 0 : i32
    %c0_i32_0 = arith.constant 0 : i32
    %c0_i32_1 = arith.constant 0 : i32
    %c0_i32_2 = arith.constant 0 : i32
    return %c0_i32, %c0_i32_0, %c0_i32_1 : i32, i32, i32
  }
  func.func @transform_2(%arg0: i32) -> (i32, i32, i32) {
    %c0_i32 = arith.constant 0 : i32
    %c0_i32_0 = arith.constant 0 : i32
    %c0_i32_1 = arith.constant 0 : i32
    %c0_i32_2 = arith.constant 0 : i32
    return %c0_i32, %c0_i32_0, %c0_i32_1 : i32, i32, i32
  }
  func.func @transform_3(%arg0: i32) -> (i32, i32) {
    %c0_i32 = arith.constant 0 : i32
    %c0_i32_0 = arith.constant 0 : i32
    %c0_i32_1 = arith.constant 0 : i32
    return %c0_i32, %c0_i32_0 : i32, i32
  }
  func.func @transform_4(%arg0: i32) -> (i32, i32) {
    %c0_i32 = arith.constant 0 : i32
    %c0_i32_0 = arith.constant 0 : i32
    %c0_i32_1 = arith.constant 0 : i32
    return %c0_i32, %c0_i32_0 : i32, i32
  }
  func.func @transform_5(%arg0: i32) -> (i32, i32) {
    %c0_i32 = arith.constant 0 : i32
    %c0_i32_0 = arith.constant 0 : i32
    return %arg0, %c0_i32 : i32, i32
  }
  func.func @transform_6(%arg0: i32) -> (i32, i32, i32) {
    %c0_i32 = arith.constant 0 : i32
    %c0_i32_0 = arith.constant 0 : i32
    %c0_i32_1 = arith.constant 0 : i32
    return %arg0, %c0_i32, %c0_i32_0 : i32, i32, i32
  }
  func.func @transform_7(%arg0: i32) -> (i32, i32, i32) {
    %c0_i32 = arith.constant 0 : i32
    %c0_i32_0 = arith.constant 0 : i32
    %c0_i32_1 = arith.constant 0 : i32
    return %arg0, %c0_i32, %c0_i32_0 : i32, i32, i32
  }
}

module attributes {stable_mosaic.version = 11 : i64} {
  func.func @_mlp_head_kernel(%arg0: i32, %arg1: memref<2x30xf32, #tpu.memory_space<vmem>>, %arg2: memref<30x24xf32, #tpu.memory_space<vmem>>, %arg3: memref<1x24xf32, #tpu.memory_space<vmem>>, %arg4: memref<24x1xf32, #tpu.memory_space<vmem>>, %arg5: memref<1x1xf32, #tpu.memory_space<vmem>>, %arg6: memref<2x1xf32, #tpu.memory_space<vmem>>) attributes {dimension_semantics = [#tpu.dimension_semantics<arbitrary>], iteration_bounds = array<i64: 1>, scalar_prefetch = 0 : i64, scratch_operands = 0 : i64, tpu.core_type = #tpu.core_type<tc>, window_params = [{pipeline_mode = #tpu.pipeline_mode<synchronous>, transform_indices = @transform_0, window_bounds = array<i64: 2, 30>}, {pipeline_mode = #tpu.pipeline_mode<synchronous>, transform_indices = @transform_1, window_bounds = array<i64: 30, 24>}, {pipeline_mode = #tpu.pipeline_mode<synchronous>, transform_indices = @transform_2, window_bounds = array<i64: 1, 24>}, {pipeline_mode = #tpu.pipeline_mode<synchronous>, transform_indices = @transform_3, window_bounds = array<i64: 24, 1>}, {pipeline_mode = #tpu.pipeline_mode<synchronous>, transform_indices = @transform_4, window_bounds = array<i64: 1, 1>}, {pipeline_mode = #tpu.pipeline_mode<synchronous>, transform_indices = @transform_5, window_bounds = array<i64: 2, 1>}]} {
    %c0 = arith.constant 0 : index
    %c0_0 = arith.constant 0 : index
    %0 = vector.load %arg1[%c0, %c0_0] : memref<2x30xf32, #tpu.memory_space<vmem>>, vector<2x30xf32>
    %1 = arith.truncf %0 : vector<2x30xf32> to vector<2x30xbf16>
    %c0_1 = arith.constant 0 : index
    %c0_2 = arith.constant 0 : index
    %2 = vector.load %arg2[%c0_1, %c0_2] : memref<30x24xf32, #tpu.memory_space<vmem>>, vector<30x24xf32>
    %3 = arith.truncf %2 : vector<30x24xf32> to vector<30x24xbf16>
    %cst = arith.constant dense<0.000000e+00> : vector<2x24xf32>
    %4 = tpu.matmul %1, %3, %cst {dimension_numbers = #tpu.dot_dimension_numbers<[1], [0], [0], [1], [0, 0, 1, 1], [], []>} : vector<2x30xbf16>, vector<30x24xbf16>, vector<2x24xf32> -> vector<2x24xf32>
    %c0_3 = arith.constant 0 : index
    %c0_4 = arith.constant 0 : index
    %5 = vector.load %arg3[%c0_3, %c0_4] : memref<1x24xf32, #tpu.memory_space<vmem>>, vector<1x24xf32>
    %6 = vector.broadcast %5 : vector<1x24xf32> to vector<2x24xf32>
    %7 = arith.addf %4, %6 : vector<2x24xf32>
    %cst_5 = arith.constant 0.000000e+00 : f32
    %8 = vector.broadcast %cst_5 : f32 to vector<2x24xf32>
    %9 = arith.cmpf oge, %7, %8 : vector<2x24xf32>
    %cst_6 = arith.constant 0.00999999977 : f32
    %10 = vector.broadcast %cst_6 : f32 to vector<2x24xf32>
    %11 = arith.mulf %10, %7 : vector<2x24xf32>
    %12 = arith.select %9, %7, %11 : vector<2x24xi1>, vector<2x24xf32>
    %13 = arith.truncf %12 : vector<2x24xf32> to vector<2x24xbf16>
    %c0_7 = arith.constant 0 : index
    %c0_8 = arith.constant 0 : index
    %14 = vector.load %arg4[%c0_7, %c0_8] : memref<24x1xf32, #tpu.memory_space<vmem>>, vector<24x1xf32>
    %15 = arith.truncf %14 : vector<24x1xf32> to vector<24x1xbf16>
    %cst_9 = arith.constant dense<0.000000e+00> : vector<2x1xf32>
    %16 = tpu.matmul %13, %15, %cst_9 {dimension_numbers = #tpu.dot_dimension_numbers<[1], [0], [0], [1], [0, 0, 1, 1], [], []>} : vector<2x24xbf16>, vector<24x1xbf16>, vector<2x1xf32> -> vector<2x1xf32>
    %c0_10 = arith.constant 0 : index
    %c0_11 = arith.constant 0 : index
    %17 = vector.load %arg5[%c0_10, %c0_11] : memref<1x1xf32, #tpu.memory_space<vmem>>, vector<1x1xf32>
    %18 = vector.broadcast %17 : vector<1x1xf32> to vector<2x1xf32>
    %19 = arith.addf %16, %18 : vector<2x1xf32>
    %c0_12 = arith.constant 0 : index
    %c0_13 = arith.constant 0 : index
    %20 = vector.load %arg6[%c0_12, %c0_13] : memref<2x1xf32, #tpu.memory_space<vmem>>, vector<2x1xf32>
    tpu.vector_store %arg6[%c0_12, %c0_13], %19 {strides = array<i32>} : memref<2x1xf32, #tpu.memory_space<vmem>>, vector<2x1xf32>,
    return
  }
  func.func @transform_0(%arg0: i32) -> (i32, i32) {
    %c0_i32 = arith.constant 0 : i32
    %c0_i32_0 = arith.constant 0 : i32
    %c0_i32_1 = arith.constant 0 : i32
    return %c0_i32, %c0_i32_0 : i32, i32
  }
  func.func @transform_1(%arg0: i32) -> (i32, i32) {
    %c0_i32 = arith.constant 0 : i32
    %c0_i32_0 = arith.constant 0 : i32
    %c0_i32_1 = arith.constant 0 : i32
    return %c0_i32, %c0_i32_0 : i32, i32
  }
  func.func @transform_2(%arg0: i32) -> (i32, i32) {
    %c0_i32 = arith.constant 0 : i32
    %c0_i32_0 = arith.constant 0 : i32
    %c0_i32_1 = arith.constant 0 : i32
    return %c0_i32, %c0_i32_0 : i32, i32
  }
  func.func @transform_3(%arg0: i32) -> (i32, i32) {
    %c0_i32 = arith.constant 0 : i32
    %c0_i32_0 = arith.constant 0 : i32
    %c0_i32_1 = arith.constant 0 : i32
    return %c0_i32, %c0_i32_0 : i32, i32
  }
  func.func @transform_4(%arg0: i32) -> (i32, i32) {
    %c0_i32 = arith.constant 0 : i32
    %c0_i32_0 = arith.constant 0 : i32
    %c0_i32_1 = arith.constant 0 : i32
    return %c0_i32, %c0_i32_0 : i32, i32
  }
  func.func @transform_5(%arg0: i32) -> (i32, i32) {
    %c0_i32 = arith.constant 0 : i32
    %c0_i32_0 = arith.constant 0 : i32
    %c0_i32_1 = arith.constant 0 : i32
    return %c0_i32, %c0_i32_0 : i32, i32
  }
}

</mosaic_0001>

<bundles_post_ra>
// kernel: custom-call.23
= control target key start
LH: loop header
LB: loop body
LE: loop exit
PB: predicated region body
PF: predicated region fallthrough
CT: control target
= control target key end

     0   :  { %s6_s0 = inlined_call_operand.vmem [shape: f32[2,128], index: 0, kind: output, shape index: {}]  }

// kernel: critic_forward.19
= control target key start
LH: loop header
LB: loop body
LE: loop exit
PB: predicated region body
PF: predicated region fallthrough
CT: control target
= control target key end

     0   :  { %vm90_vm0 = vcmask 195584   ;;  %s215_s0 = inlined_call_operand.vmem [shape: f32[64,24], index: 0, kind: input, shape index: {}]   ;;  %s216_s1 = inlined_call_operand.vmem [shape: f32[1,1,24], index: 1, kind: input, shape index: {}]   ;;  %s217_s2 = inlined_call_operand.vmem [shape: f32[1,1,24], index: 2, kind: input, shape index: {}]   ;;  %s218_s3 = inlined_call_operand.vmem [shape: f32[64,24], index: 3, kind: output, shape index: {}]  }
   0x1   :  { %v50_v0 = vld [vmem:[%s215_s0] sm:$0xff]  ;;  %v51_v3 = vld [vmem:[%s215_s0 + $0x8] sm:$0xff]  ;;  %v52_v6 = vld [vmem:[%s215_s0 + $0x10] sm:$0xff] }
   0x2   :  { %v131_v1 = vld [vmem:[%s216_s1] ss:$0 sm:$0xff]  ;;  %v53_v7 = vld [vmem:[%s215_s0 + $0x18] sm:$0xff]  ;;  %v55_v12 = vld [vmem:[%s215_s0 + $0x28] sm:$0xff] }
   0x3   :  { %v132_v2 = vld [vmem:[%s217_s2] ss:$0 sm:$0xff]  ;;  %v62_v4 = vmul.f32 %v131_v1, %v50_v0  ;;  %v63_v5 = vmul.f32 %v131_v1, %v51_v3  ;;  %v64_v9 = vmul.f32 %v131_v1, %v52_v6  ;;  %v65_v10 = vmul.f32 %v131_v1, %v53_v7  ;;  %v56_v13 = vld [vmem:[%s215_s0 + $0x30] sm:$0xff]  ;;  %v57_v14 = vld [vmem:[%s215_s0 + $0x38] sm:$0xff] }
   0x4   :  { %v54_v8 = vld [vmem:[%s215_s0 + $0x20] sm:$0xff]  ;;  %v67_v17 = vmul.f32 %v131_v1, %v55_v12  ;;  %v68_v18 = vmul.f32 %v131_v1, %v56_v13  ;;  %v69_v22 = vmul.f32 %v131_v1, %v57_v14 }
   0x5   :  { %v66_v11 = vmul.f32 %v131_v1, %v54_v8  ;;  %v74_v15 = vadd.f32 %v132_v2, %v62_v4  ;;  %v75_v16 = vadd.f32 %v132_v2, %v63_v5  ;;  %v76_v19 = vadd.f32 %v132_v2, %v64_v9 }
   0x6   :  { %v77_v20 = vadd.f32 %v132_v2, %v65_v10  ;;  %v79_v25 = vadd.f32 %v132_v2, %v67_v17  ;;  %v80_v26 = vadd.f32 %v132_v2, %v68_v18  ;;  %v81_v29 = vadd.f32 %v132_v2, %v69_v22 }
   0x7   :  { %v78_v21 = vadd.f32 %v132_v2, %v66_v11  ;;  %v82_v23 = vmax.f32 %v74_v15, 0.0  ;;  %v83_v24 = vmax.f32 %v75_v16, 0.0  ;;  %v84_v27 = vmax.f32 %v76_v19, 0.0 }
   0x8   :  { %v85_v28 = vmax.f32 %v77_v20, 0.0  ;;  %v87_v31 = vmax.f32 %v79_v25, 0.0  ;;  %v88_v32 = vmax.f32 %v80_v26, 0.0  ;;  %v89_v33 = vmax.f32 %v81_v29, 0.0 }
   0x9   :  { %91 = vst.msk [vmem:[%s218_s3] sm:$0xff] %vm90_vm0, %v82_v23  ;;  %v86_v30 = vmax.f32 %v78_v21, 0.0 }
   0xa   :  { %92 = vst.msk [vmem:[%s218_s3 + $0x8] sm:$0xff] %vm90_vm0, %v83_v24 }
   0xb   :  { %93 = vst.msk [vmem:[%s218_s3 + $0x10] sm:$0xff] %vm90_vm0, %v84_v27 }
   0xc   :  { %94 = vst.msk [vmem:[%s218_s3 + $0x18] sm:$0xff] %vm90_vm0, %v85_v28 }
   0xd   :  { %95 = vst.msk [vmem:[%s218_s3 + $0x20] sm:$0xff] %vm90_vm0, %v86_v30 }
   0xe   :  { %96 = vst.msk [vmem:[%s218_s3 + $0x28] sm:$0xff] %vm90_vm0, %v87_v31 }
   0xf   :  { %97 = vst.msk [vmem:[%s218_s3 + $0x30] sm:$0xff] %vm90_vm0, %v88_v32 }
  0x10   :  { %98 = vst.msk [vmem:[%s218_s3 + $0x38] sm:$0xff] %vm90_vm0, %v89_v33 }

// kernel: critic_forward.17
= control target key start
LH: loop header
LB: loop body
LE: loop exit
PB: predicated region body
PF: predicated region fallthrough
CT: control target
= control target key end

     0   :  { %vm53_vm0 = vcmask 1044480   ;;  %vm54_vm1 = vcmask 1045504   ;;  %v175_v2 = vmov 65535   ;;  %vm40_vm2 = vcmask 220160   ;;  %s299_s1 = inlined_call_operand.vmem [shape: f32[27,96], index: 1, kind: input, shape index: {}]   ;;  %s300_s0 = inlined_call_operand.vmem [shape: f32[64,27], index: 0, kind: input, shape index: {}]   ;;  %s301_s2 = inlined_call_operand.vmem [shape: f32[1,96], index: 2, kind: input, shape index: {}]   ;;  %s302_s3 = inlined_call_operand.vmem [shape: f32[64,96], index: 3, kind: output, shape index: {0}]   ;;  %s303_s4 = inlined_call_operand.vmem [shape: f32[1,1,96], index: 4, kind: output, shape index: {1}]   ;;  %s304_s5 = inlined_call_operand.vmem [shape: f32[1,1,96], index: 5, kind: output, shape index: {2}]  }
   0x1   :  { %v32_v0 = vld [vmem:[%s299_s1 + $0x10] sm:$0xff]  ;;  %v33_v1 = vld [vmem:[%s299_s1 + $0x18] sm:$0x7]  ;;  %v55_v3 = vsel %vm53_vm0, 4294967295, %v175_v2  ;;  %v30_v6 = vld [vmem:[%s299_s1] sm:$0xff]  ;;  %vm89_vm3 = vcmask 785408  }
   0x2   :  { %v35_v4 = vpack.c.bf16 %v33_v1, %v32_v0  ;;  %v56_v5 = vsel %vm54_vm1, %v55_v3, 0  ;;  %v31_v7 = vld [vmem:[%s299_s1 + $0x8] sm:$0xff]  ;;  %v18_v9 = vld [vmem:[%s300_s0] sm:$0xff]  ;;  %v20_v12 = vld [vmem:[%s300_s0 + $0x10] sm:$0xff]  ;;  %vm119_vm4 = vcmask 778240  }
   0x3   :  { %v19_v10 = vld [vmem:[%s300_s0 + $0x8] sm:$0xff]  ;;  %v34_v11 = vpack.c.bf16 %v31_v7, %v30_v6  ;;  %v21_v13 = vld [vmem:[%s300_s0 + $0x18] sm:$0xff]  ;;  %v22_v14 = vld [vmem:[%s300_s0 + $0x20] sm:$0xff] }
   0x4   :  { %v58_v8 = vand.u32 %v56_v5, %v35_v4  ;;  %v23_v15 = vld [vmem:[%s300_s0 + $0x28] sm:$0xff]  ;;  %v24_v16 = vld [vmem:[%s300_s0 + $0x30] sm:$0xff]  ;;  %v25_v17 = vld [vmem:[%s300_s0 + $0x38] sm:$0xff]  ;;  %v26_v18 = vpack.c.bf16 %v19_v10, %v18_v9  ;;  %v27_v19 = vpack.c.bf16 %v21_v13, %v20_v12 }
   0x5   :  { %v28_v20 = vpack.c.bf16 %v23_v15, %v22_v14  ;;  %v29_v21 = vpack.c.bf16 %v25_v17, %v24_v16  ;;  %v174_v22 = vld [vmem:[%s301_s2] ss:$0 sm:$0xff] }
   0x6   :  { %66 = vmatpush.bf16.msra.mxu0 %v58_v8  ;;  %167 = vmatpush.bf16.msra.mxu1 %v58_v8 }
   0x7   :  { %168 = vmatpush.bf16.msra.mxu2 %v58_v8  ;;  %169 = vmatpush.bf16.msra.mxu3 %v58_v8 }
   0xa   :  { %67 = vmatpush.bf16.msra.mxu0 %v34_v11  ;;  %170 = vmatpush.bf16.msra.mxu1 %v34_v11 }
   0xb   :  { %171 = vmatpush.bf16.msra.mxu2 %v34_v11  ;;  %172 = vmatpush.bf16.msra.mxu3 %v34_v11 }
   0xd   :  { %163 = vmatmul.msk.bf16.vlgmr.msra.gmra.mxu0 %vm40_vm2, %v26_v18  ;;  %164 = vmatmul.msk.bf16.vlgmr.msra.gmra.mxu1 %vm40_vm2, %v27_v19 }
   0xe   :  { %165 = vmatmul.msk.bf16.vlgmr.msra.gmra.mxu2 %vm40_vm2, %v28_v20  ;;  %166 = vmatmul.msk.bf16.vlgmr.msra.gmra.mxu3 %vm40_vm2, %v29_v21 }
  0x8a   :  { %v69_v23 = vpop.f32.mrf.mxu0  ;;  %v74_v24 = vpop.f32.mrf.mxu1 }
  0x8b   :  { %v70_v25 = vadd.f32 %v174_v22, %v69_v23  ;;  %v75_v26 = vadd.f32 %v174_v22, %v74_v24 }
  0x8d   :  { %90 = vst.msk [vmem:[%s302_s3] sm:$0xff] %vm89_vm3, %v70_v25  ;;  %v121_v33 = vmul.f32 %v70_v25, %v70_v25  ;;  %v98_v36 = vsel %vm89_vm3, %v70_v25, 0.0  ;;  %v123_v37 = vmul.f32 %v75_v26, %v75_v26  ;;  %v101_v42 = vsel %vm89_vm3, %v75_v26, 0.0 }
  0x8e   :  { %92 = vst.msk [vmem:[%s302_s3 + $0x10] sm:$0xff] %vm89_vm3, %v75_v26 }
  0x8f   :  { %v129_v41 = vsel %vm89_vm3, %v121_v33, 0.0  ;;  %v132_v47 = vsel %vm89_vm3, %v123_v37, 0.0 }
  0x91   :  { %v79_v27 = vpop.f32.mrf.mxu2  ;;  %v84_v28 = vpop.f32.mrf.mxu3 }
  0x92   :  { %v80_v29 = vadd.f32 %v174_v22, %v79_v27  ;;  %v85_v30 = vadd.f32 %v174_v22, %v84_v28  ;;  %v71_v31 = vpop.f32.mrf.mxu0  ;;  %v76_v32 = vpop.f32.mrf.mxu1 }
  0x93   :  { %v72_v34 = vadd.f32 %v174_v22, %v71_v31  ;;  %v77_v35 = vadd.f32 %v174_v22, %v76_v32 }
  0x94   :  { %94 = vst.msk [vmem:[%s302_s3 + $0x20] sm:$0xff] %vm89_vm3, %v80_v29  ;;  %v125_v48 = vmul.f32 %v80_v29, %v80_v29  ;;  %v105_v56 = vsel %vm89_vm3, %v80_v29, 0.0  ;;  %v127_v62 = vmul.f32 %v85_v30, %v85_v30  ;;  %v109_v2 = vsel %vm89_vm3, %v85_v30, 0.0 }
  0x95   :  { %96 = vst.msk [vmem:[%s302_s3 + $0x30] sm:$0xff] %vm89_vm3, %v85_v30  ;;  %v99_v38 = vsel %vm89_vm3, %v72_v34, 0.0  ;;  %v122_v39 = vmul.f32 %v72_v34, %v72_v34  ;;  %v124_v44 = vmul.f32 %v77_v35, %v77_v35  ;;  %v103_v49 = vsel %vm89_vm3, %v77_v35, 0.0 }
  0x96   :  { %91 = vst.msk [vmem:[%s302_s3 + $0x8] sm:$0xff] %vm89_vm3, %v72_v34  ;;  %v100_v40 = vadd.f32 %v99_v38, %v98_v36  ;;  %v136_v61 = vsel %vm89_vm3, %v125_v48, 0.0  ;;  %v140_v7 = vsel %vm89_vm3, %v127_v62, 0.0 }
  0x97   :  { %v130_v43 = vsel %vm89_vm3, %v122_v39, 0.0  ;;  %93 = vst.msk [vmem:[%s302_s3 + $0x18] sm:$0xff] %vm89_vm3, %v77_v35  ;;  %v134_v57 = vsel %vm89_vm3, %v124_v44, 0.0 }
  0x98   :  { %v131_v45 = vadd.f32 %v130_v43, %v129_v41  ;;  %v102_v46 = vadd.f32 %v101_v42, %v100_v40 }
  0x99   :  { %v81_v50 = vpop.f32.mrf.mxu2  ;;  %v86_v51 = vpop.f32.mrf.mxu3 }
  0x9a   :  { %v104_v52 = vadd.f32 %v103_v49, %v102_v46  ;;  %v133_v53 = vadd.f32 %v132_v47, %v131_v45  ;;  %v82_v54 = vadd.f32 %v174_v22, %v81_v50  ;;  %v87_v55 = vadd.f32 %v174_v22, %v86_v51 }
  0x9c   :  { %v135_v58 = vadd.f32 %v134_v57, %v133_v53  ;;  %95 = vst.msk [vmem:[%s302_s3 + $0x28] sm:$0xff] %vm89_vm3, %v82_v54  ;;  %v106_v59 = vadd.f32 %v105_v56, %v104_v52  ;;  %v126_v60 = vmul.f32 %v82_v54, %v82_v54  ;;  %v107_v63 = vsel %vm89_vm3, %v82_v54, 0.0 }
  0x9d   :  { %97 = vst.msk [vmem:[%s302_s3 + $0x38] sm:$0xff] %vm89_vm3, %v87_v55  ;;  %v128_v4 = vmul.f32 %v87_v55, %v87_v55  ;;  %v111_v8 = vsel %vm89_vm3, %v87_v55, 0.0 }
  0x9e   :  { %v108_v0 = vadd.f32 %v107_v63, %v106_v59  ;;  %v137_v1 = vadd.f32 %v136_v61, %v135_v58  ;;  %v138_v3 = vsel %vm89_vm3, %v126_v60, 0.0 }
  0x9f   :  { %v142_v11 = vsel %vm89_vm3, %v128_v4, 0.0 }
  0xa0   :  { %v139_v5 = vadd.f32 %v138_v3, %v137_v1  ;;  %v110_v6 = vadd.f32 %v109_v2, %v108_v0 }
  0xa2   :  { %v112_v9 = vadd.f32 %v111_v8, %v110_v6  ;;  %v141_v10 = vadd.f32 %v140_v7, %v139_v5 }
  0xa4   :  { %v113_v12 = vrot.slane %v112_v9, 4  ;;  %v143_v13 = vadd.f32 %v142_v11, %v141_v10 }
  0xa6   :  { %v114_v14 = vadd.f32 %v113_v12, %v112_v9  ;;  %v144_v15 = vrot.slane %v143_v13, 4 }
  0xa8   :  { %v115_v16 = vrot.slane %v114_v14, 2  ;;  %v145_v17 = vadd.f32 %v144_v15, %v143_v13 }
  0xaa   :  { %v116_v18 = vadd.f32 %v115_v16, %v114_v14  ;;  %v146_v19 = vrot.slane %v145_v17, 2 }
  0xac   :  { %v117_v20 = vrot.slane %v116_v18, 1  ;;  %v147_v21 = vadd.f32 %v146_v19, %v145_v17 }
  0xae   :  { %v118_v22 = vadd.f32 %v117_v20, %v116_v18  ;;  %v148_v23 = vrot.slane %v147_v21, 1 }
  0xb0   :  { %120 = vst.msk [vmem:[%s303_s4] sm:$0x1] %vm119_vm4, %v118_v22  ;;  %v149_v24 = vadd.f32 %v148_v23, %v147_v21 }
  0xb2   :  { %150 = vst.msk [vmem:[%s304_s5] sm:$0x1] %vm119_vm4, %v149_v24 }

// kernel: critic_forward.18
= control target key start
LH: loop header
LB: loop body
LE: loop exit
PB: predicated region body
PF: predicated region fallthrough
CT: control target
= control target key end

     0   :  { %vm90_vm0 = vcmask 785408   ;;  %vm132_vm1 = vcmask 195584   ;;  %vm162_vm2 = vcmask 188416   ;;  %s394_s3 = inlined_call_operand.vmem [shape: f32[96,24], index: 3, kind: input, shape index: {}]   ;;  %s395_s1 = inlined_call_operand.vmem [shape: f32[1,1,96], index: 1, kind: input, shape index: {}]   ;;  %s396_s0 = inlined_call_operand.vmem [shape: f32[64,96], index: 0, kind: input, shape index: {}]   ;;  %s397_s2 = inlined_call_operand.vmem [shape: f32[1,1,96], index: 2, kind: input, shape index: {}]   ;;  %s398_s4 = inlined_call_operand.vmem [shape: f32[1,24], index: 4, kind: input, shape index: {}]   ;;  %s399_s5 = inlined_call_operand.vmem [shape: f32[64,24], index: 5, kind: output, shape index: {0}]   ;;  %s400_s6 = inlined_call_operand.vmem [shape: f32[1,1,24], index: 6, kind: output, shape index: {1}]   ;;  %s401_s7 = inlined_call_operand.vmem [shape: f32[1,1,24], index: 7, kind: output, shape index: {2}]  }
   0x1   :  { %v78_v0 = vld [vmem:[%s394_s3 + $0x50] sm:$0xff]  ;;  %v79_v1 = vld [vmem:[%s394_s3 + $0x58] sm:$0xff]  ;;  %v76_v2 = vld [vmem:[%s394_s3 + $0x40] sm:$0xff] }
   0x2   :  { %v85_v3 = vpack.c.bf16 %v79_v1, %v78_v0  ;;  %v77_v4 = vld [vmem:[%s394_s3 + $0x48] sm:$0xff]  ;;  %v74_v6 = vld [vmem:[%s394_s3 + $0x30] sm:$0xff]  ;;  %v75_v7 = vld [vmem:[%s394_s3 + $0x38] sm:$0xff] }
   0x3   :  { %v84_v5 = vpack.c.bf16 %v77_v4, %v76_v2  ;;  %v72_v8 = vld [vmem:[%s394_s3 + $0x20] sm:$0xff]  ;;  %v73_v9 = vld [vmem:[%s394_s3 + $0x28] sm:$0xff]  ;;  %v26_v13 = vld [vmem:[%s396_s0 + $0x10] sm:$0xff]  ;;  %v83_v14 = vpack.c.bf16 %v75_v7, %v74_v6 }
   0x4   :  { %105 = vmatpush.bf16.msra.mxu0 %v85_v3  ;;  %210 = vmatpush.bf16.msra.mxu1 %v85_v3  ;;  %v228_v10 = vld [vmem:[%s395_s1] ss:$0 sm:$0xff]  ;;  %v25_v12 = vld [vmem:[%s396_s0 + $0x8] sm:$0xff]  ;;  %v27_v15 = vld [vmem:[%s396_s0 + $0x18] sm:$0xff]  ;;  %v82_v20 = vpack.c.bf16 %v73_v9, %v72_v8 }
   0x5   :  { %211 = vmatpush.bf16.msra.mxu2 %v85_v3  ;;  %212 = vmatpush.bf16.msra.mxu3 %v85_v3  ;;  %v24_v11 = vld [vmem:[%s396_s0] sm:$0xff]  ;;  %v29_v17 = vld [vmem:[%s396_s0 + $0x28] sm:$0xff]  ;;  %v30_v18 = vld [vmem:[%s396_s0 + $0x30] sm:$0xff]  ;;  %v37_v25 = vmul.f32 %v228_v10, %v25_v12  ;;  %v38_v26 = vmul.f32 %v228_v10, %v26_v13  ;;  %v39_v27 = vmul.f32 %v228_v10, %v27_v15 }
   0x6   :  { %v28_v16 = vld [vmem:[%s396_s0 + $0x20] sm:$0xff]  ;;  %v31_v19 = vld [vmem:[%s396_s0 + $0x38] sm:$0xff]  ;;  %v36_v21 = vmul.f32 %v228_v10, %v24_v11  ;;  %v70_v23 = vld [vmem:[%s394_s3 + $0x10] sm:$0xff]  ;;  %v41_v29 = vmul.f32 %v228_v10, %v29_v17  ;;  %v42_v30 = vmul.f32 %v228_v10, %v30_v18 }
   0x7   :  { %v229_v22 = vld [vmem:[%s397_s2] ss:$0 sm:$0xff]  ;;  %v71_v24 = vld [vmem:[%s394_s3 + $0x18] sm:$0xff]  ;;  %v40_v28 = vmul.f32 %v228_v10, %v28_v16  ;;  %v43_v31 = vmul.f32 %v228_v10, %v31_v19  ;;  %v69_v35 = vld [vmem:[%s394_s3 + $0x8] sm:$0xff] }
   0x8   :  { %106 = vmatpush.bf16.msra.mxu0 %v84_v5  ;;  %213 = vmatpush.bf16.msra.mxu1 %v84_v5  ;;  %v81_v32 = vpack.c.bf16 %v71_v24, %v70_v23  ;;  %v48_v33 = vadd.f32 %v229_v22, %v36_v21  ;;  %v68_v34 = vld [vmem:[%s394_s3] sm:$0xff]  ;;  %v49_v36 = vadd.f32 %v229_v22, %v37_v25 }
   0x9   :  { %214 = vmatpush.bf16.msra.mxu2 %v84_v5  ;;  %215 = vmatpush.bf16.msra.mxu3 %v84_v5  ;;  %v50_v37 = vadd.f32 %v229_v22, %v38_v26  ;;  %v51_v38 = vadd.f32 %v229_v22, %v39_v27  ;;  %v52_v39 = vadd.f32 %v229_v22, %v40_v28  ;;  %v230_v56 = vld [vmem:[%s398_s4] ss:$0 sm:$0xff] }
   0xa   :  { %v53_v40 = vadd.f32 %v229_v22, %v41_v29  ;;  %v54_v41 = vadd.f32 %v229_v22, %v42_v30  ;;  %v55_v42 = vadd.f32 %v229_v22, %v43_v31  ;;  %v80_v43 = vpack.c.bf16 %v69_v35, %v68_v34 }
   0xb   :  { %v56_v44 = vmax.f32 %v48_v33, 0.0  ;;  %v57_v45 = vmax.f32 %v49_v36, 0.0  ;;  %v58_v46 = vmax.f32 %v50_v37, 0.0  ;;  %v59_v47 = vmax.f32 %v51_v38, 0.0 }
   0xc   :  { %107 = vmatpush.bf16.msra.mxu0 %v83_v14  ;;  %216 = vmatpush.bf16.msra.mxu1 %v83_v14  ;;  %v60_v48 = vmax.f32 %v52_v39, 0.0  ;;  %v61_v49 = vmax.f32 %v53_v40, 0.0  ;;  %v62_v50 = vmax.f32 %v54_v41, 0.0  ;;  %v63_v51 = vmax.f32 %v55_v42, 0.0 }
   0xd   :  { %217 = vmatpush.bf16.msra.mxu2 %v83_v14  ;;  %218 = vmatpush.bf16.msra.mxu3 %v83_v14  ;;  %v64_v52 = vpack.c.bf16 %v57_v45, %v56_v44  ;;  %v65_v53 = vpack.c.bf16 %v59_v47, %v58_v46 }
   0xe   :  { %v66_v54 = vpack.c.bf16 %v61_v49, %v60_v48  ;;  %v67_v55 = vpack.c.bf16 %v63_v51, %v62_v50 }
  0x10   :  { %108 = vmatpush.bf16.msra.mxu0 %v82_v20  ;;  %219 = vmatpush.bf16.msra.mxu1 %v82_v20 }
  0x11   :  { %220 = vmatpush.bf16.msra.mxu2 %v82_v20  ;;  %221 = vmatpush.bf16.msra.mxu3 %v82_v20 }
  0x14   :  { %109 = vmatpush.bf16.msra.mxu0 %v81_v32  ;;  %222 = vmatpush.bf16.msra.mxu1 %v81_v32 }
  0x15   :  { %223 = vmatpush.bf16.msra.mxu2 %v81_v32  ;;  %224 = vmatpush.bf16.msra.mxu3 %v81_v32 }
  0x18   :  { %110 = vmatpush.bf16.msra.mxu0 %v80_v43  ;;  %225 = vmatpush.bf16.msra.mxu1 %v80_v43 }
  0x19   :  { %226 = vmatpush.bf16.msra.mxu2 %v80_v43  ;;  %227 = vmatpush.bf16.msra.mxu3 %v80_v43 }
  0x1b   :  { %206 = vmatmul.msk.bf16.vlgmr.msra.gmra.mxu0 %vm90_vm0, %v64_v52  ;;  %207 = vmatmul.msk.bf16.vlgmr.msra.gmra.mxu1 %vm90_vm0, %v65_v53 }
  0x1c   :  { %208 = vmatmul.msk.bf16.vlgmr.msra.gmra.mxu2 %vm90_vm0, %v66_v54  ;;  %209 = vmatmul.msk.bf16.vlgmr.msra.gmra.mxu3 %vm90_vm0, %v67_v55 }
  0x98   :  { %v112_v57 = vpop.f32.mrf.mxu0  ;;  %v117_v58 = vpop.f32.mrf.mxu1 }
  0x99   :  { %v113_v59 = vadd.f32 %v230_v56, %v112_v57  ;;  %v118_v60 = vadd.f32 %v230_v56, %v117_v58 }
  0x9b   :  { %133 = vst.msk [vmem:[%s399_s5] sm:$0xff] %vm132_vm1, %v113_v59  ;;  %v164_v3 = vmul.f32 %v113_v59, %v113_v59  ;;  %v141_v6 = vsel %vm132_vm1, %v113_v59, 0.0  ;;  %v166_v7 = vmul.f32 %v118_v60, %v118_v60  ;;  %v144_v12 = vsel %vm132_vm1, %v118_v60, 0.0 }
  0x9c   :  { %135 = vst.msk [vmem:[%s399_s5 + $0x10] sm:$0xff] %vm132_vm1, %v118_v60 }
  0x9d   :  { %v172_v11 = vsel %vm132_vm1, %v164_v3, 0.0  ;;  %v175_v17 = vsel %vm132_vm1, %v166_v7, 0.0 }
  0x9f   :  { %v122_v61 = vpop.f32.mrf.mxu2  ;;  %v127_v62 = vpop.f32.mrf.mxu3 }
  0xa0   :  { %v123_v63 = vadd.f32 %v230_v56, %v122_v61  ;;  %v128_v0 = vadd.f32 %v230_v56, %v127_v62  ;;  %v114_v1 = vpop.f32.mrf.mxu0  ;;  %v119_v2 = vpop.f32.mrf.mxu1 }
  0xa1   :  { %v115_v4 = vadd.f32 %v230_v56, %v114_v1  ;;  %v120_v5 = vadd.f32 %v230_v56, %v119_v2 }
  0xa2   :  { %137 = vst.msk [vmem:[%s399_s5 + $0x20] sm:$0xff] %vm132_vm1, %v123_v63  ;;  %v168_v18 = vmul.f32 %v123_v63, %v123_v63  ;;  %v148_v26 = vsel %vm132_vm1, %v123_v63, 0.0  ;;  %v170_v32 = vmul.f32 %v128_v0, %v128_v0  ;;  %v152_v36 = vsel %vm132_vm1, %v128_v0, 0.0 }
  0xa3   :  { %139 = vst.msk [vmem:[%s399_s5 + $0x30] sm:$0xff] %vm132_vm1, %v128_v0  ;;  %v142_v8 = vsel %vm132_vm1, %v115_v4, 0.0  ;;  %v165_v9 = vmul.f32 %v115_v4, %v115_v4  ;;  %v167_v14 = vmul.f32 %v120_v5, %v120_v5  ;;  %v146_v19 = vsel %vm132_vm1, %v120_v5, 0.0 }
  0xa4   :  { %134 = vst.msk [vmem:[%s399_s5 + $0x8] sm:$0xff] %vm132_vm1, %v115_v4  ;;  %v143_v10 = vadd.f32 %v142_v8, %v141_v6  ;;  %v179_v31 = vsel %vm132_vm1, %v168_v18, 0.0  ;;  %v183_v41 = vsel %vm132_vm1, %v170_v32, 0.0 }
  0xa5   :  { %v173_v13 = vsel %vm132_vm1, %v165_v9, 0.0  ;;  %136 = vst.msk [vmem:[%s399_s5 + $0x18] sm:$0xff] %vm132_vm1, %v120_v5  ;;  %v177_v27 = vsel %vm132_vm1, %v167_v14, 0.0 }
  0xa6   :  { %v174_v15 = vadd.f32 %v173_v13, %v172_v11  ;;  %v145_v16 = vadd.f32 %v144_v12, %v143_v10 }
  0xa7   :  { %v124_v20 = vpop.f32.mrf.mxu2  ;;  %v129_v21 = vpop.f32.mrf.mxu3 }
  0xa8   :  { %v147_v22 = vadd.f32 %v146_v19, %v145_v16  ;;  %v176_v23 = vadd.f32 %v175_v17, %v174_v15  ;;  %v125_v24 = vadd.f32 %v230_v56, %v124_v20  ;;  %v130_v25 = vadd.f32 %v230_v56, %v129_v21 }
  0xaa   :  { %v178_v28 = vadd.f32 %v177_v27, %v176_v23  ;;  %138 = vst.msk [vmem:[%s399_s5 + $0x28] sm:$0xff] %vm132_vm1, %v125_v24  ;;  %v149_v29 = vadd.f32 %v148_v26, %v147_v22  ;;  %v169_v30 = vmul.f32 %v125_v24, %v125_v24  ;;  %v150_v33 = vsel %vm132_vm1, %v125_v24, 0.0 }
  0xab   :  { %140 = vst.msk [vmem:[%s399_s5 + $0x38] sm:$0xff] %vm132_vm1, %v130_v25  ;;  %v171_v38 = vmul.f32 %v130_v25, %v130_v25  ;;  %v154_v42 = vsel %vm132_vm1, %v130_v25, 0.0 }
  0xac   :  { %v151_v34 = vadd.f32 %v150_v33, %v149_v29  ;;  %v180_v35 = vadd.f32 %v179_v31, %v178_v28  ;;  %v181_v37 = vsel %vm132_vm1, %v169_v30, 0.0 }
  0xad   :  { %v185_v45 = vsel %vm132_vm1, %v171_v38, 0.0 }
  0xae   :  { %v182_v39 = vadd.f32 %v181_v37, %v180_v35  ;;  %v153_v40 = vadd.f32 %v152_v36, %v151_v34 }
  0xb0   :  { %v155_v43 = vadd.f32 %v154_v42, %v153_v40  ;;  %v184_v44 = vadd.f32 %v183_v41, %v182_v39 }
  0xb2   :  { %v156_v46 = vrot.slane %v155_v43, 4  ;;  %v186_v47 = vadd.f32 %v185_v45, %v184_v44 }
  0xb4   :  { %v157_v48 = vadd.f32 %v156_v46, %v155_v43  ;;  %v187_v49 = vrot.slane %v186_v47, 4 }
  0xb6   :  { %v158_v50 = vrot.slane %v157_v48, 2  ;;  %v188_v51 = vadd.f32 %v187_v49, %v186_v47 }
  0xb8   :  { %v159_v52 = vadd.f32 %v158_v50, %v157_v48  ;;  %v189_v53 = vrot.slane %v188_v51, 2 }
  0xba   :  { %v160_v54 = vrot.slane %v159_v52, 1  ;;  %v190_v55 = vadd.f32 %v189_v53, %v188_v51 }
  0xbc   :  { %v161_v56 = vadd.f32 %v160_v54, %v159_v52  ;;  %v191_v57 = vrot.slane %v190_v55, 1 }
  0xbe   :  { %163 = vst.msk [vmem:[%s400_s6] sm:$0x1] %vm162_vm2, %v161_v56  ;;  %v192_v58 = vadd.f32 %v191_v57, %v190_v55 }
  0xc0   :  { %193 = vst.msk [vmem:[%s401_s7] sm:$0x1] %vm162_vm2, %v192_v58 }

// kernel: critic_forward.24
= control target key start
LH: loop header
LB: loop body
LE: loop exit
PB: predicated region body
PF: predicated region fallthrough
CT: control target
= control target key end

     0   :  { %s550_s12 = smov 0   ;;  %s552_s13 = smov 0   ;;  %s676_s0 = inlined_call_operand.vmem [shape: f32[8,32,32], index: 0, kind: input, shape index: {}]   ;;  %s677_s1 = inlined_call_operand.vmem [shape: f32[2,1,32], index: 1, kind: input, shape index: {}]   ;;  %s678_s2 = inlined_call_operand.vmem [shape: f32[2,1,32], index: 2, kind: input, shape index: {}]   ;;  %s679_s3 = inlined_call_operand.vmem [shape: f32[64,32], index: 3, kind: output, shape index: {}]  }
   0x1   :  { %s554_s14 = smov 0  }
   0x2 LB: > { %s25_s15 = sadd.s32 1, %s524_s13  ;;  %p471_p0 = scmp.ge.s32.totalorder %s528_s14, 1  ;;  %s528_s14 = sphi %s554_s14, %s13_s14   ;;  %s524_s13 = sphi %s552_s13, %s681_s13   ;;  %s520_s12 = sphi %s550_s12, %s680_s12  }
   0x3   : > { %p27_p1 = scmp.ge.s32.totalorder %s25_s15, 2  ;;  %p176_p2 = scmp.lt.s32.totalorder %s528_s14, 3 }
   0x5   : > { %s683_s15 = smov (%p27_p1, %s25_s15), 0  ;;  %p177_p3 = pnand %p471_p0, %p176_p2 }
   0x6   : > { %s472_s16 = sshll.u32 (!%p177_p3), %s520_s12, 2  ;;  %p224_p4 = scmp.lt.s32.totalorder (!%p177_p3), %s520_s12, 1 }
   0x7   : > { %180 = sbr.rel (%p177_p3) target bundleno = 51 (0x33), region = 32  ;;  %p214_p5 = scmp.lt.s32.totalorder (!%p177_p3), %s472_s16, 7 }
   0xc   : > { %s685_s12 = smov (!%p224_p4, %s520_s12), 1  ;;  %s687_s16 = smov (!%p214_p5, %s472_s16), 7  ;;  %vm342_vm0 = vcmask 261120  }
   0xd   : > { %s226_s19 = scalar_lea.vmem %s677_s1, %s685_s12  ;;  %s229_s22 = scalar_lea.vmem %s678_s2, %s685_s12 }
   0xe   : > { %s479_s23 = sshll.u32 %s687_s16, 5  ;;  %v577_v0 = vld [vmem:[%s226_s19] ss:$0 sm:$0xff]  ;;  %s476_s27 = sshll.u32 %s687_s16, 3 }
   0xf   : > { %s582_s26 = scalar_lea.vmem %s676_s0, %s479_s23  ;;  %v584_v1 = vld [vmem:[%s229_s22] ss:$0 sm:$0xff]  ;;  %s626_s30 = scalar_lea.vmem %s679_s3, %s476_s27 }
  0x10   : > { %v238_v2 = vld [vmem:[%s582_s26] sm:$0xff]  ;;  %v239_v9 = vld [vmem:[%s582_s26 + $0x8] sm:$0xff]  ;;  %v240_v34 = vld [vmem:[%s582_s26 + $0x10] sm:$0xff] }
  0x11   : > { %v242_v3 = vld [vmem:[%s582_s26 + $0x20] sm:$0xff]  ;;  %v258_v6 = vmul.f32 %v577_v0, %v238_v2  ;;  %v243_v10 = vld [vmem:[%s582_s26 + $0x28] sm:$0xff]  ;;  %v259_v14 = vmul.f32 %v577_v0, %v239_v9  ;;  %v244_v38 = vld [vmem:[%s582_s26 + $0x30] sm:$0xff]  ;;  %v260_v46 = vmul.f32 %v577_v0, %v240_v34 }
  0x12   : > { %v246_v4 = vld [vmem:[%s582_s26 + $0x40] sm:$0xff]  ;;  %v262_v7 = vmul.f32 %v577_v0, %v242_v3  ;;  %v247_v12 = vld [vmem:[%s582_s26 + $0x48] sm:$0xff]  ;;  %v263_v15 = vmul.f32 %v577_v0, %v243_v10  ;;  %v248_v39 = vld [vmem:[%s582_s26 + $0x50] sm:$0xff]  ;;  %v264_v50 = vmul.f32 %v577_v0, %v244_v38 }
  0x13   : > { %v250_v5 = vld [vmem:[%s582_s26 + $0x60] sm:$0xff]  ;;  %v266_v8 = vmul.f32 %v577_v0, %v246_v4  ;;  %v251_v13 = vld [vmem:[%s582_s26 + $0x68] sm:$0xff]  ;;  %v278_v16 = vadd.f32 %v584_v1, %v258_v6  ;;  %v267_v19 = vmul.f32 %v577_v0, %v247_v12  ;;  %v279_v22 = vadd.f32 %v584_v1, %v259_v14  ;;  %v252_v49 = vld [vmem:[%s582_s26 + $0x70] sm:$0xff] }
  0x14   : > { %v270_v11 = vmul.f32 %v577_v0, %v250_v5  ;;  %v282_v17 = vadd.f32 %v584_v1, %v262_v7  ;;  %v271_v21 = vmul.f32 %v577_v0, %v251_v13  ;;  %v283_v23 = vadd.f32 %v584_v1, %v263_v15  ;;  %v241_v56 = vld [vmem:[%s582_s26 + $0x18] sm:$0xff] }
  0x15   : > { %v286_v18 = vadd.f32 %v584_v1, %v266_v8  ;;  %vm294_vm1 = vcmp.ge.f32.partialorder %v278_v16, 0.0  ;;  %v310_v24 = vmul.f32 0.2, %v278_v16  ;;  %v287_v27 = vadd.f32 %v584_v1, %v267_v19  ;;  %v245_v57 = vld [vmem:[%s582_s26 + $0x38] sm:$0xff] }
  0x16   : > { %v290_v20 = vadd.f32 %v584_v1, %v270_v11  ;;  %vm298_vm2 = vcmp.ge.f32.partialorder %v282_v17, 0.0  ;;  %v314_v25 = vmul.f32 0.2, %v282_v17  ;;  %v291_v30 = vadd.f32 %v584_v1, %v271_v21  ;;  %v249_v58 = vld [vmem:[%s582_s26 + $0x58] sm:$0xff] }
  0x17   : > { %vm302_vm3 = vcmp.ge.f32.partialorder %v286_v18, 0.0  ;;  %v318_v26 = vmul.f32 0.2, %v286_v18  ;;  %v326_v29 = vsel %vm294_vm1, %v278_v16, %v310_v24  ;;  %vm295_vm5 = vcmp.ge.f32.partialorder %v279_v22, 0.0  ;;  %v253_v5 = vld [vmem:[%s582_s26 + $0x78] sm:$0xff] }
  0x18   : > { %vm306_vm4 = vcmp.ge.f32.partialorder %v290_v20, 0.0  ;;  %v322_v28 = vmul.f32 0.2, %v290_v20  ;;  %v330_v31 = vsel %vm298_vm2, %v282_v17, %v314_v25  ;;  %v343_v33 = vsel %vm342_vm0, %v326_v29, -inf }
  0x19   : > { %v334_v32 = vsel %vm302_vm3, %v286_v18, %v318_v26  ;;  %vm299_vm6 = vcmp.ge.f32.partialorder %v283_v23, 0.0  ;;  %v344_v36 = vsel %vm342_vm0, %v330_v31, -inf  ;;  %vm303_vm7 = vcmp.ge.f32.partialorder %v287_v27, 0.0 }
  0x1a   : > { %v338_v35 = vsel %vm306_vm4, %v290_v20, %v322_v28  ;;  %v346_v37 = vsel %vm342_vm0, %v334_v32, -inf  ;;  %v345_v40 = vmax.f32 %v343_v33, %v344_v36  ;;  %vm307_vm8 = vcmp.ge.f32.partialorder %v291_v30, 0.0 }
  0x1b   : > { %v348_v41 = vsel %vm342_vm0, %v338_v35, -inf  ;;  %v311_v42 = vmul.f32 0.2, %v279_v22  ;;  %v315_v43 = vmul.f32 0.2, %v283_v23  ;;  %v268_v51 = vmul.f32 %v577_v0, %v248_v39 }
  0x1c   : > { %v319_v44 = vmul.f32 0.2, %v287_v27  ;;  %v323_v45 = vmul.f32 0.2, %v291_v30  ;;  %v347_v47 = vmax.f32 %v345_v40, %v346_v37  ;;  %v272_v2 = vmul.f32 %v577_v0, %v252_v49 }
  0x1d   : > { %v327_v48 = vsel %vm295_vm5, %v279_v22, %v311_v42  ;;  %v331_v52 = vsel %vm299_vm6, %v283_v23, %v315_v43  ;;  %v280_v3 = vadd.f32 %v584_v1, %v260_v46  ;;  %v284_v4 = vadd.f32 %v584_v1, %v264_v50 }
  0x1e   : > { %v335_v53 = vsel %vm303_vm7, %v287_v27, %v319_v44  ;;  %v339_v54 = vsel %vm307_vm8, %v291_v30, %v323_v45  ;;  %v350_v55 = vsel %vm342_vm0, %v327_v48, -inf  ;;  %v349_v59 = vmax.f32 %v347_v47, %v348_v41 }
  0x1f   : > { %v351_v60 = vsel %vm342_vm0, %v331_v52, -inf  ;;  %v353_v61 = vsel %vm342_vm0, %v335_v53, -inf  ;;  %v355_v62 = vsel %vm342_vm0, %v339_v54, -inf  ;;  %v288_v6 = vadd.f32 %v584_v1, %v268_v51 }
  0x20   : > { %v352_v63 = vmax.f32 %v350_v55, %v351_v60  ;;  %371 = vst.msk [vmem:[%s626_s30] sm:$0xff] %vm342_vm0, %v349_v59  ;;  %v261_v7 = vmul.f32 %v577_v0, %v241_v56  ;;  %v265_v8 = vmul.f32 %v577_v0, %v245_v57  ;;  %v269_v9 = vmul.f32 %v577_v0, %v249_v58 }
  0x21   : > { %v292_v11 = vadd.f32 %v584_v1, %v272_v2  ;;  %vm296_vm9 = vcmp.ge.f32.partialorder %v280_v3, 0.0  ;;  %vm300_vm10 = vcmp.ge.f32.partialorder %v284_v4, 0.0  ;;  %vm304_vm11 = vcmp.ge.f32.partialorder %v288_v6, 0.0 }
  0x22   : > { %v354_v10 = vmax.f32 %v352_v63, %v353_v61  ;;  %v312_v12 = vmul.f32 0.2, %v280_v3  ;;  %v316_v13 = vmul.f32 0.2, %v284_v4  ;;  %v273_v14 = vmul.f32 %v577_v0, %v253_v5 }
  0x23   : > { %vm308_vm12 = vcmp.ge.f32.partialorder %v292_v11, 0.0  ;;  %v320_v16 = vmul.f32 0.2, %v288_v6  ;;  %v324_v17 = vmul.f32 0.2, %v292_v11  ;;  %v281_v20 = vadd.f32 %v584_v1, %v261_v7 }
  0x24   : > { %v356_v15 = vmax.f32 %v354_v10, %v355_v62  ;;  %v328_v18 = vsel %vm296_vm9, %v280_v3, %v312_v12  ;;  %v332_v19 = vsel %vm300_vm10, %v284_v4, %v316_v13  ;;  %v285_v21 = vadd.f32 %v584_v1, %v265_v8 }
  0x25   : > { %v336_v22 = vsel %vm304_vm11, %v288_v6, %v320_v16  ;;  %v340_v23 = vsel %vm308_vm12, %v292_v11, %v324_v17  ;;  %v357_v24 = vsel %vm342_vm0, %v328_v18, -inf  ;;  %v358_v25 = vsel %vm342_vm0, %v332_v19, -inf }
  0x26   : > { %372 = vst.msk [vmem:[%s626_s30 + $0x8] sm:$0xff] %vm342_vm0, %v356_v15  ;;  %v359_v26 = vmax.f32 %v357_v24, %v358_v25  ;;  %v360_v0 = vsel %vm342_vm0, %v336_v22, -inf  ;;  %v362_v27 = vsel %vm342_vm0, %v340_v23, -inf  ;;  %v289_v28 = vadd.f32 %v584_v1, %v269_v9 }
  0x27   : > { %v293_v29 = vadd.f32 %v584_v1, %v273_v14  ;;  %vm297_vm13 = vcmp.ge.f32.partialorder %v281_v20, 0.0  ;;  %vm301_vm14 = vcmp.ge.f32.partialorder %v285_v21, 0.0  ;;  %v313_v30 = vmul.f32 0.2, %v281_v20 }
  0x28   : > { %v361_v31 = vmax.f32 %v359_v26, %v360_v0  ;;  %vm305_vm15 = vcmp.ge.f32.partialorder %v289_v28, 0.0  ;;  %v317_v32 = vmul.f32 0.2, %v285_v21  ;;  %v321_v33 = vmul.f32 0.2, %v289_v28 }
  0x29   : > { %vm309_vm1 = vcmp.ge.f32.partialorder %v293_v29, 0.0  ;;  %v325_v34 = vmul.f32 0.2, %v293_v29  ;;  %v329_v35 = vsel %vm297_vm13, %v281_v20, %v313_v30 }
  0x2a   : > { %v363_v36 = vmax.f32 %v361_v31, %v362_v27  ;;  %v333_v37 = vsel %vm301_vm14, %v285_v21, %v317_v32  ;;  %v337_v38 = vsel %vm305_vm15, %v289_v28, %v321_v33  ;;  %v364_v39 = vsel %vm342_vm0, %v329_v35, -inf }
  0x2b   : > { %v341_v40 = vsel %vm309_vm1, %v293_v29, %v325_v34  ;;  %v365_v1 = vsel %vm342_vm0, %v333_v37, -inf  ;;  %v367_v41 = vsel %vm342_vm0, %v337_v38, -inf }
  0x2c   : > { %373 = vst.msk [vmem:[%s626_s30 + $0x10] sm:$0xff] %vm342_vm0, %v363_v36  ;;  %v366_v42 = vmax.f32 %v364_v39, %v365_v1  ;;  %v369_v43 = vsel %vm342_vm0, %v341_v40, -inf }
  0x2e   : > { %v368_v44 = vmax.f32 %v366_v42, %v367_v41 }
  0x30   : > { %v370_v45 = vmax.f32 %v368_v44, %v369_v43 }
  0x32   : > { %374 = vst.msk [vmem:[%s626_s30 + $0x18] sm:$0xff] %vm342_vm0, %v370_v45 }
  0x33 PF: > { %s13_s14 = sadd.s32 1, %s528_s14   ;;  %s680_s12 = smov %s524_s13 }
  0x34   : > { %p10_p6 = scmp.ge.s32.totalorder %s13_s14, 4   ;;  %s681_s13 = smov %s683_s15 }
  0x36   :  { %12 = sbr.rel (!%p10_p6) target bundleno = 2 (0x2), region = 68 }

// kernel: critic_forward.23
= control target key start
LH: loop header
LB: loop body
LE: loop exit
PB: predicated region body
PF: predicated region fallthrough
CT: control target
= control target key end

     0   :  { %s611_s15 = smov 0   ;;  %s786_s0 = inlined_call_operand.vmem [shape: f32[256,48], index: 0, kind: input, shape index: {}]   ;;  %s787_s1 = inlined_call_operand.vmem [shape: f32[48,32], index: 1, kind: input, shape index: {}]   ;;  %s788_s2 = inlined_call_operand.vmem [shape: f32[256,32], index: 2, kind: output, shape index: {0}]   ;;  %s789_s3 = inlined_call_operand.vmem [shape: f32[2,1,32], index: 3, kind: output, shape index: {1}]   ;;  %s790_s4 = inlined_call_operand.vmem [shape: f32[2,1,32], index: 4, kind: output, shape index: {2}]  }
   0x1 LB: > { %s617_s16 = sadd.s32 4294967295, %s584_s15   ;;  %p546_p0 = scmp.ge.s32.totalorder %s584_s15, 1  ;;  %s584_s15 = sphi %s611_s15, %s15_s15  }
   0x2   : > { %p168_p1 = scmp.lt.s32.totalorder %s584_s15, 3 }
   0x4   : > { %p169_p2 = pnand %p546_p0, %p168_p1 }
   0x5   : > { %s547_s23 = sshll.u32 (!%p169_p2), %s617_s16, 4  ;;  %p212_p4 = scmp.lt.s32.totalorder (!%p169_p2), %s617_s16, 1 }
   0x6   : > { %172 = sbr.rel (%p169_p2) target bundleno = 217 (0xd9), region = 28  ;;  %p201_p3 = scmp.lt.s32.totalorder (!%p169_p2), %s547_s23, 31 }
   0xb   : > { %v247_v0 = vld [vmem:[%s787_s1 + $0x20] sm:$0xff]  ;;  %v248_v1 = vld [vmem:[%s787_s1 + $0x28] sm:$0xff]  ;;  %v245_v2 = vld [vmem:[%s787_s1 + $0x10] sm:$0xff]  ;;  %s792_s23 = smov (!%p201_p3, %s547_s23), 31  ;;  %vm252_vm0 = vcmask 392192   ;;  %vm326_vm1 = vcmask 261120  }
   0xc   : > { %v251_v3 = vpack.c.bf16 %v248_v1, %v247_v0  ;;  %v246_v4 = vld [vmem:[%s787_s1 + $0x18] sm:$0xff]  ;;  %v243_v6 = vld [vmem:[%s787_s1] sm:$0xff]  ;;  %v244_v7 = vld [vmem:[%s787_s1 + $0x8] sm:$0xff]  ;;  %s548_s30 = sshll.u32 %s792_s23, 3  ;;  %s794_s16 = smov (!%p212_p4, %s617_s16), 1  ;;  %vm380_vm2 = vcmask 253952  }
   0xd   : > { %v250_v5 = vpack.c.bf16 %v246_v4, %v245_v2  ;;  %s648_s7 = scalar_lea.vmem %s786_s0, %s548_s30  ;;  %v249_v8 = vpack.c.bf16 %v244_v7, %v243_v6  ;;  %s679_s10 = scalar_lea.vmem %s788_s2, %s548_s30 }
   0xe   : > { %282 = vmatpush.bf16.msra.mxu0 %v251_v3  ;;  %561 = vmatpush.bf16.msra.mxu1 %v251_v3  ;;  %v219_v9 = vld [vmem:[%s648_s7] sm:$0xff]  ;;  %v220_v10 = vld [vmem:[%s648_s7 + $0x8] sm:$0xff]  ;;  %v221_v21 = vld [vmem:[%s648_s7 + $0x10] sm:$0xff]  ;;  %s214_s13 = scalar_lea.vmem %s789_s3, %s794_s16  ;;  %s217_s18 = scalar_lea.vmem %s790_s4, %s794_s16 }
   0xf   : > { %562 = vmatpush.bf16.msra.mxu2 %v251_v3  ;;  %563 = vmatpush.bf16.msra.mxu3 %v251_v3  ;;  %v223_v11 = vld [vmem:[%s648_s7 + $0x20] sm:$0xff]  ;;  %v224_v12 = vld [vmem:[%s648_s7 + $0x28] sm:$0xff]  ;;  %v235_v17 = vpack.c.bf16 %v220_v10, %v219_v9  ;;  %v222_v22 = vld [vmem:[%s648_s7 + $0x18] sm:$0xff] }
  0x10   : > { %v227_v13 = vld [vmem:[%s648_s7 + $0x40] sm:$0xff]  ;;  %v228_v14 = vld [vmem:[%s648_s7 + $0x48] sm:$0xff]  ;;  %v237_v18 = vpack.c.bf16 %v224_v12, %v223_v11  ;;  %v225_v23 = vld [vmem:[%s648_s7 + $0x30] sm:$0xff]  ;;  %v236_v29 = vpack.c.bf16 %v222_v22, %v221_v21 }
  0x11   : > { %v231_v15 = vld [vmem:[%s648_s7 + $0x60] sm:$0xff]  ;;  %v232_v16 = vld [vmem:[%s648_s7 + $0x68] sm:$0xff]  ;;  %v239_v19 = vpack.c.bf16 %v228_v14, %v227_v13  ;;  %v226_v24 = vld [vmem:[%s648_s7 + $0x38] sm:$0xff] }
  0x12   : > { %283 = vmatpush.bf16.msra.mxu0 %v250_v5  ;;  %564 = vmatpush.bf16.msra.mxu1 %v250_v5  ;;  %v241_v20 = vpack.c.bf16 %v232_v16, %v231_v15  ;;  %v229_v25 = vld [vmem:[%s648_s7 + $0x50] sm:$0xff]  ;;  %v230_v26 = vld [vmem:[%s648_s7 + $0x58] sm:$0xff]  ;;  %v238_v30 = vpack.c.bf16 %v226_v24, %v225_v23 }
  0x13   : > { %565 = vmatpush.bf16.msra.mxu2 %v250_v5  ;;  %566 = vmatpush.bf16.msra.mxu3 %v250_v5  ;;  %v233_v27 = vld [vmem:[%s648_s7 + $0x70] sm:$0xff]  ;;  %v234_v28 = vld [vmem:[%s648_s7 + $0x78] sm:$0xff]  ;;  %v240_v31 = vpack.c.bf16 %v230_v26, %v229_v25 }
  0x14   : > { %v242_v32 = vpack.c.bf16 %v234_v28, %v233_v27 }
  0x16   : > { %284 = vmatpush.bf16.msra.mxu0 %v249_v8  ;;  %567 = vmatpush.bf16.msra.mxu1 %v249_v8 }
  0x17   : > { %568 = vmatpush.bf16.msra.mxu2 %v249_v8  ;;  %569 = vmatpush.bf16.msra.mxu3 %v249_v8 }
  0x19   : > { %551 = vmatmul.msk.bf16.vlgmr.msra.gmra.mxu0 %vm252_vm0, %v235_v17  ;;  %553 = vmatmul.msk.bf16.vlgmr.msra.gmra.mxu1 %vm252_vm0, %v237_v18 }
  0x1a   : > { %555 = vmatmul.msk.bf16.vlgmr.msra.gmra.mxu2 %vm252_vm0, %v239_v19  ;;  %557 = vmatmul.msk.bf16.vlgmr.msra.gmra.mxu3 %vm252_vm0, %v241_v20 }
  0x29   : > { %552 = vmatmul.msk.bf16.gmra.mxu0 %vm252_vm0, %v236_v29  ;;  %554 = vmatmul.msk.bf16.gmra.mxu1 %vm252_vm0, %v238_v30 }
  0x2a   : > { %556 = vmatmul.msk.bf16.gmra.mxu2 %vm252_vm0, %v240_v31  ;;  %558 = vmatmul.msk.bf16.gmra.mxu3 %vm252_vm0, %v242_v32 }
  0x96   : > { %v286_v33 = vpop.f32.mrf.mxu0  ;;  %v296_v34 = vpop.f32.mrf.mxu1 }
  0x97   : > { %327 = vst.msk [vmem:[%s679_s10] sm:$0xff] %vm326_vm1, %v286_v33  ;;  %v382_v44 = vmul.f32 %v286_v33, %v286_v33  ;;  %v343_v47 = vsel %vm326_vm1, %v286_v33, 0.0  ;;  %v386_v59 = vmul.f32 %v296_v34, %v296_v34  ;;  %v350_v0 = vsel %vm326_vm1, %v296_v34, 0.0 }
  0x98   : > { %331 = vst.msk [vmem:[%s679_s10 + $0x20] sm:$0xff] %vm326_vm1, %v296_v34 }
  0x99   : > { %v398_v51 = vsel %vm326_vm1, %v382_v44, 0.0  ;;  %v405_v5 = vsel %vm326_vm1, %v386_v59, 0.0 }
  0x9d   : > { %v685_v35 = vpop.f32.mrf.mxu2  ;;  %v687_v36 = vpop.f32.mrf.mxu3 }
  0x9e   : > { %v288_v37 = vpop.f32.mrf.mxu0  ;;  %v298_v38 = vpop.f32.mrf.mxu1  ;;  %335 = vst.msk [vmem:[%s679_s10 + $0x40] sm:$0xff] %vm326_vm1, %v685_v35  ;;  %v390_v17 = vmul.f32 %v685_v35, %v685_v35  ;;  %v358_v22 = vsel %vm326_vm1, %v685_v35, 0.0 }
  0x9f   : > { %328 = vst.msk [vmem:[%s679_s10 + $0x8] sm:$0xff] %vm326_vm1, %v288_v37  ;;  %v383_v43 = vmul.f32 %v288_v37, %v288_v37  ;;  %v344_v45 = vsel %vm326_vm1, %v288_v37, 0.0  ;;  %v387_v1 = vmul.f32 %v298_v38, %v298_v38  ;;  %v352_v6 = vsel %vm326_vm1, %v298_v38, 0.0 }
  0xa0   : > { %332 = vst.msk [vmem:[%s679_s10 + $0x28] sm:$0xff] %vm326_vm1, %v298_v38  ;;  %v345_v50 = vadd.f32 %v344_v45, %v343_v47  ;;  %v413_v27 = vsel %vm326_vm1, %v390_v17, 0.0  ;;  %v394_v38 = vmul.f32 %v687_v36, %v687_v36 }
  0xa1   : > { %339 = vst.msk [vmem:[%s679_s10 + $0x60] sm:$0xff] %vm326_vm1, %v687_v36  ;;  %v399_v48 = vsel %vm326_vm1, %v383_v43, 0.0  ;;  %v407_v10 = vsel %vm326_vm1, %v387_v1, 0.0 }
  0xa2   : > { %v400_v55 = vadd.f32 %v399_v48, %v398_v51 }
  0xa5   : > { %v699_v39 = vpop.f32.mrf.mxu2  ;;  %v701_v40 = vpop.f32.mrf.mxu3 }
  0xa6   : > { %v291_v41 = vpop.f32.mrf.mxu0  ;;  %v301_v42 = vpop.f32.mrf.mxu1  ;;  %336 = vst.msk [vmem:[%s679_s10 + $0x48] sm:$0xff] %vm326_vm1, %v699_v39  ;;  %v391_v23 = vmul.f32 %v699_v39, %v699_v39  ;;  %v360_v28 = vsel %vm326_vm1, %v699_v39, 0.0  ;;  %v366_v39 = vsel %vm326_vm1, %v687_v36, 0.0  ;;  %v395_v45 = vmul.f32 %v701_v40, %v701_v40 }
  0xa7   : > { %329 = vst.msk [vmem:[%s679_s10 + $0x10] sm:$0xff] %vm326_vm1, %v291_v41  ;;  %v384_v46 = vmul.f32 %v291_v41, %v291_v41  ;;  %v346_v49 = vsel %vm326_vm1, %v291_v41, 0.0  ;;  %v388_v7 = vmul.f32 %v301_v42, %v301_v42  ;;  %v354_v11 = vsel %vm326_vm1, %v301_v42, 0.0 }
  0xa8   : > { %333 = vst.msk [vmem:[%s679_s10 + $0x30] sm:$0xff] %vm326_vm1, %v301_v42  ;;  %v347_v56 = vadd.f32 %v346_v49, %v345_v50  ;;  %v415_v32 = vsel %vm326_vm1, %v391_v23, 0.0  ;;  %v421_v49 = vsel %vm326_vm1, %v394_v38, 0.0  ;;  %v368_v50 = vsel %vm326_vm1, %v701_v40, 0.0 }
  0xa9   : > { %340 = vst.msk [vmem:[%s679_s10 + $0x68] sm:$0xff] %vm326_vm1, %v701_v40  ;;  %v401_v52 = vsel %vm326_vm1, %v384_v46, 0.0  ;;  %v409_v18 = vsel %vm326_vm1, %v388_v7, 0.0  ;;  %v423_v36 = vsel %vm326_vm1, %v395_v45, 0.0 }
  0xaa   : > { %v402_v62 = vadd.f32 %v401_v52, %v400_v55 }
  0xad   : > { %v311_v53 = vpop.f32.mrf.mxu2  ;;  %v719_v54 = vpop.f32.mrf.mxu3 }
  0xae   : > { %v293_v57 = vpop.f32.mrf.mxu0  ;;  %v303_v58 = vpop.f32.mrf.mxu1  ;;  %337 = vst.msk [vmem:[%s679_s10 + $0x50] sm:$0xff] %vm326_vm1, %v311_v53  ;;  %v392_v29 = vmul.f32 %v311_v53, %v311_v53  ;;  %v362_v33 = vsel %vm326_vm1, %v311_v53, 0.0  ;;  %v396_v51 = vmul.f32 %v719_v54, %v719_v54  ;;  %v370_v55 = vsel %vm326_vm1, %v719_v54, 0.0 }
  0xaf   : > { %330 = vst.msk [vmem:[%s679_s10 + $0x18] sm:$0xff] %vm326_vm1, %v293_v57  ;;  %v348_v60 = vsel %vm326_vm1, %v293_v57, 0.0  ;;  %v385_v61 = vmul.f32 %v293_v57, %v293_v57  ;;  %v389_v12 = vmul.f32 %v303_v58, %v303_v58  ;;  %v356_v19 = vsel %vm326_vm1, %v303_v58, 0.0 }
  0xb0   : > { %v349_v63 = vadd.f32 %v348_v60, %v347_v56  ;;  %334 = vst.msk [vmem:[%s679_s10 + $0x38] sm:$0xff] %vm326_vm1, %v303_v58  ;;  %v417_v41 = vsel %vm326_vm1, %v392_v29, 0.0  ;;  %v425_v59 = vsel %vm326_vm1, %v396_v51, 0.0 }
  0xb1   : > { %v403_v2 = vsel %vm326_vm1, %v385_v61, 0.0  ;;  %341 = vst.msk [vmem:[%s679_s10 + $0x70] sm:$0xff] %vm326_vm1, %v719_v54  ;;  %v411_v24 = vsel %vm326_vm1, %v389_v12, 0.0 }
  0xb2   : > { %v351_v3 = vadd.f32 %v350_v0, %v349_v63  ;;  %v404_v4 = vadd.f32 %v403_v2, %v402_v62 }
  0xb4   : > { %v406_v8 = vadd.f32 %v405_v5, %v404_v4  ;;  %v353_v9 = vadd.f32 %v352_v6, %v351_v3 }
  0xb5   : > { %v313_v13 = vpop.f32.mrf.mxu2  ;;  %v323_v14 = vpop.f32.mrf.mxu3 }
  0xb6   : > { %v355_v15 = vadd.f32 %v354_v11, %v353_v9  ;;  %v408_v16 = vadd.f32 %v407_v10, %v406_v8  ;;  %338 = vst.msk [vmem:[%s679_s10 + $0x58] sm:$0xff] %vm326_vm1, %v313_v13  ;;  %v393_v34 = vmul.f32 %v313_v13, %v313_v13  ;;  %v364_v42 = vsel %vm326_vm1, %v313_v13, 0.0 }
  0xb7   : > { %342 = vst.msk [vmem:[%s679_s10 + $0x78] sm:$0xff] %vm326_vm1, %v323_v14  ;;  %v397_v56 = vmul.f32 %v323_v14, %v323_v14  ;;  %v372_v60 = vsel %vm326_vm1, %v323_v14, 0.0 }
  0xb8   : > { %v357_v20 = vadd.f32 %v356_v19, %v355_v15  ;;  %v410_v21 = vadd.f32 %v409_v18, %v408_v16  ;;  %v419_v46 = vsel %vm326_vm1, %v393_v34, 0.0 }
  0xb9   : > { %v427_v62 = vsel %vm326_vm1, %v397_v56, 0.0 }
  0xba   : > { %v359_v25 = vadd.f32 %v358_v22, %v357_v20  ;;  %v412_v26 = vadd.f32 %v411_v24, %v410_v21 }
  0xbc   : > { %v414_v30 = vadd.f32 %v413_v27, %v412_v26  ;;  %v361_v31 = vadd.f32 %v360_v28, %v359_v25 }
  0xbe   : > { %v363_v35 = vadd.f32 %v362_v33, %v361_v31  ;;  %v416_v37 = vadd.f32 %v415_v32, %v414_v30 }
  0xc0   : > { %v418_v43 = vadd.f32 %v417_v41, %v416_v37  ;;  %v365_v44 = vadd.f32 %v364_v42, %v363_v35 }
  0xc2   : > { %v367_v47 = vadd.f32 %v366_v39, %v365_v44  ;;  %v420_v48 = vadd.f32 %v419_v46, %v418_v43 }
  0xc4   : > { %v422_v52 = vadd.f32 %v421_v49, %v420_v48  ;;  %v369_v53 = vadd.f32 %v368_v50, %v367_v47 }
  0xc6   : > { %v371_v57 = vadd.f32 %v370_v55, %v369_v53  ;;  %v424_v58 = vadd.f32 %v423_v36, %v422_v52 }
  0xc8   : > { %v426_v40 = vadd.f32 %v425_v59, %v424_v58  ;;  %v373_v61 = vadd.f32 %v372_v60, %v371_v57 }
  0xca   : > { %v374_v63 = vrot.slane %v373_v61, 4  ;;  %v428_v0 = vadd.f32 %v427_v62, %v426_v40 }
  0xcc   : > { %v375_v1 = vadd.f32 %v374_v63, %v373_v61  ;;  %v429_v2 = vrot.slane %v428_v0, 4 }
  0xce   : > { %v376_v3 = vrot.slane %v375_v1, 2  ;;  %v430_v4 = vadd.f32 %v429_v2, %v428_v0 }
  0xd0   : > { %v377_v54 = vadd.f32 %v376_v3, %v375_v1  ;;  %v431_v5 = vrot.slane %v430_v4, 2 }
  0xd2   : > { %v378_v6 = vrot.slane %v377_v54, 1  ;;  %v432_v7 = vadd.f32 %v431_v5, %v430_v4 }
  0xd4   : > { %v379_v8 = vadd.f32 %v378_v6, %v377_v54  ;;  %v433_v9 = vrot.slane %v432_v7, 1 }
  0xd6   : > { %381 = vst.msk [vmem:[%s214_s13] sm:$0x1] %vm380_vm2, %v379_v8  ;;  %v434_v10 = vadd.f32 %v433_v9, %v432_v7 }
  0xd8   : > { %435 = vst.msk [vmem:[%s217_s18] sm:$0x1] %vm380_vm2, %v434_v10 }
  0xd9 PF: > { %s15_s15 = sadd.s32 1, %s584_s15  }
  0xda   : > { %p12_p5 = scmp.ge.s32.totalorder %s15_s15, 4  }
  0xdc   :  { %14 = sbr.rel (!%p12_p5) target bundleno = 1 (0x1), region = 82 }

// kernel: critic_forward.25
= control target key start
LH: loop header
LB: loop body
LE: loop exit
PB: predicated region body
PF: predicated region fallthrough
CT: control target
= control target key end

     0   :  { %s617_s15 = smov 0   ;;  %s798_s0 = inlined_call_operand.vmem [shape: f32[256,64], index: 0, kind: input, shape index: {}]   ;;  %s799_s1 = inlined_call_operand.vmem [shape: f32[64,24], index: 1, kind: input, shape index: {}]   ;;  %s800_s2 = inlined_call_operand.vmem [shape: f32[256,24], index: 2, kind: output, shape index: {0}]   ;;  %s801_s3 = inlined_call_operand.vmem [shape: f32[2,1,24], index: 3, kind: output, shape index: {1}]   ;;  %s802_s4 = inlined_call_operand.vmem [shape: f32[2,1,24], index: 4, kind: output, shape index: {2}]  }
   0x1 LB: > { %s623_s16 = sadd.s32 4294967295, %s590_s15   ;;  %p549_p0 = scmp.ge.s32.totalorder %s590_s15, 1  ;;  %s590_s15 = sphi %s617_s15, %s15_s15  }
   0x2   : > { %p168_p1 = scmp.lt.s32.totalorder %s590_s15, 3 }
   0x4   : > { %p169_p2 = pnand %p549_p0, %p168_p1 }
   0x5   : > { %s550_s23 = sshll.u32 (!%p169_p2), %s623_s16, 4  ;;  %p212_p4 = scmp.lt.s32.totalorder (!%p169_p2), %s623_s16, 1 }
   0x6   : > { %172 = sbr.rel (%p169_p2) target bundleno = 221 (0xdd), region = 28  ;;  %p201_p3 = scmp.lt.s32.totalorder (!%p169_p2), %s550_s23, 31 }
   0xb   : > { %v249_v0 = vld [vmem:[%s799_s1 + $0x30] sm:$0xff]  ;;  %v250_v1 = vld [vmem:[%s799_s1 + $0x38] sm:$0xff]  ;;  %v247_v2 = vld [vmem:[%s799_s1 + $0x20] sm:$0xff]  ;;  %s804_s23 = smov (!%p201_p3, %s550_s23), 31  ;;  %vm255_vm0 = vcmask 523264   ;;  %vm329_vm1 = vcmask 195584  }
   0xc   : > { %v254_v3 = vpack.c.bf16 %v250_v1, %v249_v0  ;;  %v248_v4 = vld [vmem:[%s799_s1 + $0x28] sm:$0xff]  ;;  %v245_v6 = vld [vmem:[%s799_s1 + $0x10] sm:$0xff]  ;;  %v246_v7 = vld [vmem:[%s799_s1 + $0x18] sm:$0xff]  ;;  %s551_s30 = sshll.u32 %s804_s23, 3  ;;  %s806_s16 = smov (!%p212_p4, %s623_s16), 1  ;;  %vm383_vm2 = vcmask 188416  }
   0xd   : > { %v253_v5 = vpack.c.bf16 %v248_v4, %v247_v2  ;;  %v252_v8 = vpack.c.bf16 %v246_v7, %v245_v6  ;;  %s654_s7 = scalar_lea.vmem %s798_s0, %s551_s30  ;;  %v243_v9 = vld [vmem:[%s799_s1] sm:$0xff]  ;;  %v244_v10 = vld [vmem:[%s799_s1 + $0x8] sm:$0xff]  ;;  %s691_s14 = scalar_lea.vmem %s800_s2, %s551_s30 }
   0xe   : > { %284 = vmatpush.bf16.msra.mxu0 %v254_v3  ;;  %564 = vmatpush.bf16.msra.mxu1 %v254_v3  ;;  %v219_v11 = vld [vmem:[%s654_s7] sm:$0xff]  ;;  %v220_v12 = vld [vmem:[%s654_s7 + $0x8] sm:$0xff]  ;;  %v251_v13 = vpack.c.bf16 %v244_v10, %v243_v9  ;;  %v221_v24 = vld [vmem:[%s654_s7 + $0x10] sm:$0xff]  ;;  %s214_s19 = scalar_lea.vmem %s801_s3, %s806_s16  ;;  %s217_s22 = scalar_lea.vmem %s802_s4, %s806_s16 }
   0xf   : > { %565 = vmatpush.bf16.msra.mxu2 %v254_v3  ;;  %566 = vmatpush.bf16.msra.mxu3 %v254_v3  ;;  %v223_v14 = vld [vmem:[%s654_s7 + $0x20] sm:$0xff]  ;;  %v224_v15 = vld [vmem:[%s654_s7 + $0x28] sm:$0xff]  ;;  %v235_v20 = vpack.c.bf16 %v220_v12, %v219_v11  ;;  %v222_v25 = vld [vmem:[%s654_s7 + $0x18] sm:$0xff] }
  0x10   : > { %v227_v16 = vld [vmem:[%s654_s7 + $0x40] sm:$0xff]  ;;  %v228_v17 = vld [vmem:[%s654_s7 + $0x48] sm:$0xff]  ;;  %v237_v21 = vpack.c.bf16 %v224_v15, %v223_v14  ;;  %v225_v26 = vld [vmem:[%s654_s7 + $0x30] sm:$0xff]  ;;  %v236_v32 = vpack.c.bf16 %v222_v25, %v221_v24 }
  0x11   : > { %v231_v18 = vld [vmem:[%s654_s7 + $0x60] sm:$0xff]  ;;  %v232_v19 = vld [vmem:[%s654_s7 + $0x68] sm:$0xff]  ;;  %v239_v22 = vpack.c.bf16 %v228_v17, %v227_v16  ;;  %v226_v27 = vld [vmem:[%s654_s7 + $0x38] sm:$0xff] }
  0x12   : > { %285 = vmatpush.bf16.msra.mxu0 %v253_v5  ;;  %567 = vmatpush.bf16.msra.mxu1 %v253_v5  ;;  %v241_v23 = vpack.c.bf16 %v232_v19, %v231_v18  ;;  %v229_v28 = vld [vmem:[%s654_s7 + $0x50] sm:$0xff]  ;;  %v230_v29 = vld [vmem:[%s654_s7 + $0x58] sm:$0xff]  ;;  %v238_v33 = vpack.c.bf16 %v226_v27, %v225_v26 }
  0x13   : > { %568 = vmatpush.bf16.msra.mxu2 %v253_v5  ;;  %569 = vmatpush.bf16.msra.mxu3 %v253_v5  ;;  %v233_v30 = vld [vmem:[%s654_s7 + $0x70] sm:$0xff]  ;;  %v234_v31 = vld [vmem:[%s654_s7 + $0x78] sm:$0xff]  ;;  %v240_v34 = vpack.c.bf16 %v230_v29, %v229_v28 }
  0x14   : > { %v242_v35 = vpack.c.bf16 %v234_v31, %v233_v30 }
  0x16   : > { %286 = vmatpush.bf16.msra.mxu0 %v252_v8  ;;  %570 = vmatpush.bf16.msra.mxu1 %v252_v8 }
  0x17   : > { %571 = vmatpush.bf16.msra.mxu2 %v252_v8  ;;  %572 = vmatpush.bf16.msra.mxu3 %v252_v8 }
  0x1a   : > { %287 = vmatpush.bf16.msra.mxu0 %v251_v13  ;;  %573 = vmatpush.bf16.msra.mxu1 %v251_v13 }
  0x1b   : > { %574 = vmatpush.bf16.msra.mxu2 %v251_v13  ;;  %575 = vmatpush.bf16.msra.mxu3 %v251_v13 }
  0x1d   : > { %554 = vmatmul.msk.bf16.vlgmr.msra.gmra.mxu0 %vm255_vm0, %v235_v20  ;;  %556 = vmatmul.msk.bf16.vlgmr.msra.gmra.mxu1 %vm255_vm0, %v237_v21 }
  0x1e   : > { %558 = vmatmul.msk.bf16.vlgmr.msra.gmra.mxu2 %vm255_vm0, %v239_v22  ;;  %560 = vmatmul.msk.bf16.vlgmr.msra.gmra.mxu3 %vm255_vm0, %v241_v23 }
  0x2d   : > { %555 = vmatmul.msk.bf16.gmra.mxu0 %vm255_vm0, %v236_v32  ;;  %557 = vmatmul.msk.bf16.gmra.mxu1 %vm255_vm0, %v238_v33 }
  0x2e   : > { %559 = vmatmul.msk.bf16.gmra.mxu2 %vm255_vm0, %v240_v34  ;;  %561 = vmatmul.msk.bf16.gmra.mxu3 %vm255_vm0, %v242_v35 }
  0x9a   : > { %v289_v36 = vpop.f32.mrf.mxu0  ;;  %v299_v37 = vpop.f32.mrf.mxu1 }
  0x9b   : > { %330 = vst.msk [vmem:[%s691_s14] sm:$0xff] %vm329_vm1, %v289_v36  ;;  %v385_v47 = vmul.f32 %v289_v36, %v289_v36  ;;  %v346_v50 = vsel %vm329_vm1, %v289_v36, 0.0  ;;  %v389_v62 = vmul.f32 %v299_v37, %v299_v37  ;;  %v353_v3 = vsel %vm329_vm1, %v299_v37, 0.0 }
  0x9c   : > { %334 = vst.msk [vmem:[%s691_s14 + $0x20] sm:$0xff] %vm329_vm1, %v299_v37 }
  0x9d   : > { %v401_v54 = vsel %vm329_vm1, %v385_v47, 0.0  ;;  %v408_v8 = vsel %vm329_vm1, %v389_v62, 0.0 }
  0xa1   : > { %v697_v38 = vpop.f32.mrf.mxu2  ;;  %v699_v39 = vpop.f32.mrf.mxu3 }
  0xa2   : > { %v291_v40 = vpop.f32.mrf.mxu0  ;;  %v301_v41 = vpop.f32.mrf.mxu1  ;;  %338 = vst.msk [vmem:[%s691_s14 + $0x40] sm:$0xff] %vm329_vm1, %v697_v38  ;;  %v393_v20 = vmul.f32 %v697_v38, %v697_v38  ;;  %v361_v25 = vsel %vm329_vm1, %v697_v38, 0.0 }
  0xa3   : > { %331 = vst.msk [vmem:[%s691_s14 + $0x8] sm:$0xff] %vm329_vm1, %v291_v40  ;;  %v386_v46 = vmul.f32 %v291_v40, %v291_v40  ;;  %v347_v48 = vsel %vm329_vm1, %v291_v40, 0.0  ;;  %v390_v4 = vmul.f32 %v301_v41, %v301_v41  ;;  %v355_v9 = vsel %vm329_vm1, %v301_v41, 0.0 }
  0xa4   : > { %335 = vst.msk [vmem:[%s691_s14 + $0x28] sm:$0xff] %vm329_vm1, %v301_v41  ;;  %v348_v53 = vadd.f32 %v347_v48, %v346_v50  ;;  %v416_v30 = vsel %vm329_vm1, %v393_v20, 0.0  ;;  %v397_v41 = vmul.f32 %v699_v39, %v699_v39 }
  0xa5   : > { %342 = vst.msk [vmem:[%s691_s14 + $0x60] sm:$0xff] %vm329_vm1, %v699_v39  ;;  %v402_v51 = vsel %vm329_vm1, %v386_v46, 0.0  ;;  %v410_v13 = vsel %vm329_vm1, %v390_v4, 0.0 }
  0xa6   : > { %v403_v58 = vadd.f32 %v402_v51, %v401_v54 }
  0xa9   : > { %v711_v42 = vpop.f32.mrf.mxu2  ;;  %v713_v43 = vpop.f32.mrf.mxu3 }
  0xaa   : > { %v294_v44 = vpop.f32.mrf.mxu0  ;;  %v304_v45 = vpop.f32.mrf.mxu1  ;;  %339 = vst.msk [vmem:[%s691_s14 + $0x48] sm:$0xff] %vm329_vm1, %v711_v42  ;;  %v394_v26 = vmul.f32 %v711_v42, %v711_v42  ;;  %v363_v31 = vsel %vm329_vm1, %v711_v42, 0.0  ;;  %v369_v42 = vsel %vm329_vm1, %v699_v39, 0.0  ;;  %v398_v48 = vmul.f32 %v713_v43, %v713_v43 }
  0xab   : > { %332 = vst.msk [vmem:[%s691_s14 + $0x10] sm:$0xff] %vm329_vm1, %v294_v44  ;;  %v387_v49 = vmul.f32 %v294_v44, %v294_v44  ;;  %v349_v52 = vsel %vm329_vm1, %v294_v44, 0.0  ;;  %v391_v10 = vmul.f32 %v304_v45, %v304_v45  ;;  %v357_v14 = vsel %vm329_vm1, %v304_v45, 0.0 }
  0xac   : > { %336 = vst.msk [vmem:[%s691_s14 + $0x30] sm:$0xff] %vm329_vm1, %v304_v45  ;;  %v350_v59 = vadd.f32 %v349_v52, %v348_v53  ;;  %v418_v35 = vsel %vm329_vm1, %v394_v26, 0.0  ;;  %v424_v52 = vsel %vm329_vm1, %v397_v41, 0.0  ;;  %v371_v53 = vsel %vm329_vm1, %v713_v43, 0.0 }
  0xad   : > { %343 = vst.msk [vmem:[%s691_s14 + $0x68] sm:$0xff] %vm329_vm1, %v713_v43  ;;  %v404_v55 = vsel %vm329_vm1, %v387_v49, 0.0  ;;  %v412_v21 = vsel %vm329_vm1, %v391_v10, 0.0  ;;  %v426_v39 = vsel %vm329_vm1, %v398_v48, 0.0 }
  0xae   : > { %v405_v1 = vadd.f32 %v404_v55, %v403_v58 }
  0xb1   : > { %v314_v56 = vpop.f32.mrf.mxu2  ;;  %v731_v57 = vpop.f32.mrf.mxu3 }
  0xb2   : > { %v296_v60 = vpop.f32.mrf.mxu0  ;;  %v306_v61 = vpop.f32.mrf.mxu1  ;;  %340 = vst.msk [vmem:[%s691_s14 + $0x50] sm:$0xff] %vm329_vm1, %v314_v56  ;;  %v395_v32 = vmul.f32 %v314_v56, %v314_v56  ;;  %v365_v36 = vsel %vm329_vm1, %v314_v56, 0.0  ;;  %v399_v54 = vmul.f32 %v731_v57, %v731_v57  ;;  %v373_v58 = vsel %vm329_vm1, %v731_v57, 0.0 }
  0xb3   : > { %333 = vst.msk [vmem:[%s691_s14 + $0x18] sm:$0xff] %vm329_vm1, %v296_v60  ;;  %v351_v63 = vsel %vm329_vm1, %v296_v60, 0.0  ;;  %v388_v0 = vmul.f32 %v296_v60, %v296_v60  ;;  %v392_v15 = vmul.f32 %v306_v61, %v306_v61  ;;  %v359_v22 = vsel %vm329_vm1, %v306_v61, 0.0 }
  0xb4   : > { %v352_v2 = vadd.f32 %v351_v63, %v350_v59  ;;  %337 = vst.msk [vmem:[%s691_s14 + $0x38] sm:$0xff] %vm329_vm1, %v306_v61  ;;  %v420_v44 = vsel %vm329_vm1, %v395_v32, 0.0  ;;  %v428_v62 = vsel %vm329_vm1, %v399_v54, 0.0 }
  0xb5   : > { %v406_v5 = vsel %vm329_vm1, %v388_v0, 0.0  ;;  %344 = vst.msk [vmem:[%s691_s14 + $0x70] sm:$0xff] %vm329_vm1, %v731_v57  ;;  %v414_v27 = vsel %vm329_vm1, %v392_v15, 0.0 }
  0xb6   : > { %v354_v6 = vadd.f32 %v353_v3, %v352_v2  ;;  %v407_v7 = vadd.f32 %v406_v5, %v405_v1 }
  0xb8   : > { %v409_v11 = vadd.f32 %v408_v8, %v407_v7  ;;  %v356_v12 = vadd.f32 %v355_v9, %v354_v6 }
  0xb9   : > { %v316_v16 = vpop.f32.mrf.mxu2  ;;  %v326_v17 = vpop.f32.mrf.mxu3 }
  0xba   : > { %v358_v18 = vadd.f32 %v357_v14, %v356_v12  ;;  %v411_v19 = vadd.f32 %v410_v13, %v409_v11  ;;  %341 = vst.msk [vmem:[%s691_s14 + $0x58] sm:$0xff] %vm329_vm1, %v316_v16  ;;  %v396_v37 = vmul.f32 %v316_v16, %v316_v16  ;;  %v367_v45 = vsel %vm329_vm1, %v316_v16, 0.0 }
  0xbb   : > { %345 = vst.msk [vmem:[%s691_s14 + $0x78] sm:$0xff] %vm329_vm1, %v326_v17  ;;  %v400_v59 = vmul.f32 %v326_v17, %v326_v17  ;;  %v375_v63 = vsel %vm329_vm1, %v326_v17, 0.0 }
  0xbc   : > { %v360_v23 = vadd.f32 %v359_v22, %v358_v18  ;;  %v413_v24 = vadd.f32 %v412_v21, %v411_v19  ;;  %v422_v49 = vsel %vm329_vm1, %v396_v37, 0.0 }
  0xbd   : > { %v430_v1 = vsel %vm329_vm1, %v400_v59, 0.0 }
  0xbe   : > { %v362_v28 = vadd.f32 %v361_v25, %v360_v23  ;;  %v415_v29 = vadd.f32 %v414_v27, %v413_v24 }
  0xc0   : > { %v417_v33 = vadd.f32 %v416_v30, %v415_v29  ;;  %v364_v34 = vadd.f32 %v363_v31, %v362_v28 }
  0xc2   : > { %v366_v38 = vadd.f32 %v365_v36, %v364_v34  ;;  %v419_v40 = vadd.f32 %v418_v35, %v417_v33 }
  0xc4   : > { %v421_v46 = vadd.f32 %v420_v44, %v419_v40  ;;  %v368_v47 = vadd.f32 %v367_v45, %v366_v38 }
  0xc6   : > { %v370_v50 = vadd.f32 %v369_v42, %v368_v47  ;;  %v423_v51 = vadd.f32 %v422_v49, %v421_v46 }
  0xc8   : > { %v425_v55 = vadd.f32 %v424_v52, %v423_v51  ;;  %v372_v56 = vadd.f32 %v371_v53, %v370_v50 }
  0xca   : > { %v374_v60 = vadd.f32 %v373_v58, %v372_v56  ;;  %v427_v61 = vadd.f32 %v426_v39, %v425_v55 }
  0xcc   : > { %v429_v43 = vadd.f32 %v428_v62, %v427_v61  ;;  %v376_v0 = vadd.f32 %v375_v63, %v374_v60 }
  0xce   : > { %v377_v2 = vrot.slane %v376_v0, 4  ;;  %v431_v3 = vadd.f32 %v430_v1, %v429_v43 }
  0xd0   : > { %v378_v4 = vadd.f32 %v377_v2, %v376_v0  ;;  %v432_v5 = vrot.slane %v431_v3, 4 }
  0xd2   : > { %v379_v6 = vrot.slane %v378_v4, 2  ;;  %v433_v7 = vadd.f32 %v432_v5, %v431_v3 }
  0xd4   : > { %v380_v57 = vadd.f32 %v379_v6, %v378_v4  ;;  %v434_v8 = vrot.slane %v433_v7, 2 }
  0xd6   : > { %v381_v9 = vrot.slane %v380_v57, 1  ;;  %v435_v10 = vadd.f32 %v434_v8, %v433_v7 }
  0xd8   : > { %v382_v11 = vadd.f32 %v381_v9, %v380_v57  ;;  %v436_v12 = vrot.slane %v435_v10, 1 }
  0xda   : > { %384 = vst.msk [vmem:[%s214_s19] sm:$0x1] %vm383_vm2, %v382_v11  ;;  %v437_v13 = vadd.f32 %v436_v12, %v435_v10 }
  0xdc   : > { %438 = vst.msk [vmem:[%s217_s22] sm:$0x1] %vm383_vm2, %v437_v13 }
  0xdd PF: > { %s15_s15 = sadd.s32 1, %s590_s15  }
  0xde   : > { %p12_p5 = scmp.ge.s32.totalorder %s15_s15, 4  }
  0xe0   :  { %14 = sbr.rel (!%p12_p5) target bundleno = 1 (0x1), region = 82 }

// kernel: critic_forward.26
= control target key start
LH: loop header
LB: loop body
LE: loop exit
PB: predicated region body
PF: predicated region fallthrough
CT: control target
= control target key end

     0   :  { %s550_s12 = smov 0   ;;  %s552_s13 = smov 0   ;;  %s676_s0 = inlined_call_operand.vmem [shape: f32[8,32,24], index: 0, kind: input, shape index: {}]   ;;  %s677_s1 = inlined_call_operand.vmem [shape: f32[2,1,24], index: 1, kind: input, shape index: {}]   ;;  %s678_s2 = inlined_call_operand.vmem [shape: f32[2,1,24], index: 2, kind: input, shape index: {}]   ;;  %s679_s3 = inlined_call_operand.vmem [shape: f32[64,24], index: 3, kind: output, shape index: {}]  }
   0x1   :  { %s554_s14 = smov 0  }
   0x2 LB: > { %s25_s15 = sadd.s32 1, %s524_s13  ;;  %p471_p0 = scmp.ge.s32.totalorder %s528_s14, 1  ;;  %s528_s14 = sphi %s554_s14, %s13_s14   ;;  %s524_s13 = sphi %s552_s13, %s681_s13   ;;  %s520_s12 = sphi %s550_s12, %s680_s12  }
   0x3   : > { %p27_p1 = scmp.ge.s32.totalorder %s25_s15, 2  ;;  %p176_p2 = scmp.lt.s32.totalorder %s528_s14, 3 }
   0x5   : > { %s683_s15 = smov (%p27_p1, %s25_s15), 0  ;;  %p177_p3 = pnand %p471_p0, %p176_p2 }
   0x6   : > { %s472_s16 = sshll.u32 (!%p177_p3), %s520_s12, 2  ;;  %p224_p4 = scmp.lt.s32.totalorder (!%p177_p3), %s520_s12, 1 }
   0x7   : > { %180 = sbr.rel (%p177_p3) target bundleno = 51 (0x33), region = 32  ;;  %p214_p5 = scmp.lt.s32.totalorder (!%p177_p3), %s472_s16, 7 }
   0xc   : > { %s685_s12 = smov (!%p224_p4, %s520_s12), 1  ;;  %s687_s16 = smov (!%p214_p5, %s472_s16), 7  ;;  %vm342_vm0 = vcmask 195584  }
   0xd   : > { %s226_s19 = scalar_lea.vmem %s677_s1, %s685_s12  ;;  %s229_s22 = scalar_lea.vmem %s678_s2, %s685_s12 }
   0xe   : > { %s479_s23 = sshll.u32 %s687_s16, 5  ;;  %v577_v0 = vld [vmem:[%s226_s19] ss:$0 sm:$0xff]  ;;  %s476_s27 = sshll.u32 %s687_s16, 3 }
   0xf   : > { %s582_s26 = scalar_lea.vmem %s676_s0, %s479_s23  ;;  %v584_v1 = vld [vmem:[%s229_s22] ss:$0 sm:$0xff]  ;;  %s626_s30 = scalar_lea.vmem %s679_s3, %s476_s27 }
  0x10   : > { %v238_v2 = vld [vmem:[%s582_s26] sm:$0xff]  ;;  %v239_v9 = vld [vmem:[%s582_s26 + $0x8] sm:$0xff]  ;;  %v240_v34 = vld [vmem:[%s582_s26 + $0x10] sm:$0xff] }
  0x11   : > { %v242_v3 = vld [vmem:[%s582_s26 + $0x20] sm:$0xff]  ;;  %v258_v6 = vmul.f32 %v577_v0, %v238_v2  ;;  %v243_v10 = vld [vmem:[%s582_s26 + $0x28] sm:$0xff]  ;;  %v259_v14 = vmul.f32 %v577_v0, %v239_v9  ;;  %v244_v38 = vld [vmem:[%s582_s26 + $0x30] sm:$0xff]  ;;  %v260_v46 = vmul.f32 %v577_v0, %v240_v34 }
  0x12   : > { %v246_v4 = vld [vmem:[%s582_s26 + $0x40] sm:$0xff]  ;;  %v262_v7 = vmul.f32 %v577_v0, %v242_v3  ;;  %v247_v12 = vld [vmem:[%s582_s26 + $0x48] sm:$0xff]  ;;  %v263_v15 = vmul.f32 %v577_v0, %v243_v10  ;;  %v248_v39 = vld [vmem:[%s582_s26 + $0x50] sm:$0xff]  ;;  %v264_v50 = vmul.f32 %v577_v0, %v244_v38 }
  0x13   : > { %v250_v5 = vld [vmem:[%s582_s26 + $0x60] sm:$0xff]  ;;  %v266_v8 = vmul.f32 %v577_v0, %v246_v4  ;;  %v251_v13 = vld [vmem:[%s582_s26 + $0x68] sm:$0xff]  ;;  %v278_v16 = vadd.f32 %v584_v1, %v258_v6  ;;  %v267_v19 = vmul.f32 %v577_v0, %v247_v12  ;;  %v279_v22 = vadd.f32 %v584_v1, %v259_v14  ;;  %v252_v49 = vld [vmem:[%s582_s26 + $0x70] sm:$0xff] }
  0x14   : > { %v270_v11 = vmul.f32 %v577_v0, %v250_v5  ;;  %v282_v17 = vadd.f32 %v584_v1, %v262_v7  ;;  %v271_v21 = vmul.f32 %v577_v0, %v251_v13  ;;  %v283_v23 = vadd.f32 %v584_v1, %v263_v15  ;;  %v241_v56 = vld [vmem:[%s582_s26 + $0x18] sm:$0xff] }
  0x15   : > { %v286_v18 = vadd.f32 %v584_v1, %v266_v8  ;;  %vm294_vm1 = vcmp.ge.f32.partialorder %v278_v16, 0.0  ;;  %v310_v24 = vmul.f32 0.2, %v278_v16  ;;  %v287_v27 = vadd.f32 %v584_v1, %v267_v19  ;;  %v245_v57 = vld [vmem:[%s582_s26 + $0x38] sm:$0xff] }
  0x16   : > { %v290_v20 = vadd.f32 %v584_v1, %v270_v11  ;;  %vm298_vm2 = vcmp.ge.f32.partialorder %v282_v17, 0.0  ;;  %v314_v25 = vmul.f32 0.2, %v282_v17  ;;  %v291_v30 = vadd.f32 %v584_v1, %v271_v21  ;;  %v249_v58 = vld [vmem:[%s582_s26 + $0x58] sm:$0xff] }
  0x17   : > { %vm302_vm3 = vcmp.ge.f32.partialorder %v286_v18, 0.0  ;;  %v318_v26 = vmul.f32 0.2, %v286_v18  ;;  %v326_v29 = vsel %vm294_vm1, %v278_v16, %v310_v24  ;;  %vm295_vm5 = vcmp.ge.f32.partialorder %v279_v22, 0.0  ;;  %v253_v5 = vld [vmem:[%s582_s26 + $0x78] sm:$0xff] }
  0x18   : > { %vm306_vm4 = vcmp.ge.f32.partialorder %v290_v20, 0.0  ;;  %v322_v28 = vmul.f32 0.2, %v290_v20  ;;  %v330_v31 = vsel %vm298_vm2, %v282_v17, %v314_v25  ;;  %v343_v33 = vsel %vm342_vm0, %v326_v29, -inf }
  0x19   : > { %v334_v32 = vsel %vm302_vm3, %v286_v18, %v318_v26  ;;  %vm299_vm6 = vcmp.ge.f32.partialorder %v283_v23, 0.0  ;;  %v344_v36 = vsel %vm342_vm0, %v330_v31, -inf  ;;  %vm303_vm7 = vcmp.ge.f32.partialorder %v287_v27, 0.0 }
  0x1a   : > { %v338_v35 = vsel %vm306_vm4, %v290_v20, %v322_v28  ;;  %v346_v37 = vsel %vm342_vm0, %v334_v32, -inf  ;;  %v345_v40 = vmax.f32 %v343_v33, %v344_v36  ;;  %vm307_vm8 = vcmp.ge.f32.partialorder %v291_v30, 0.0 }
  0x1b   : > { %v348_v41 = vsel %vm342_vm0, %v338_v35, -inf  ;;  %v311_v42 = vmul.f32 0.2, %v279_v22  ;;  %v315_v43 = vmul.f32 0.2, %v283_v23  ;;  %v268_v51 = vmul.f32 %v577_v0, %v248_v39 }
  0x1c   : > { %v319_v44 = vmul.f32 0.2, %v287_v27  ;;  %v323_v45 = vmul.f32 0.2, %v291_v30  ;;  %v347_v47 = vmax.f32 %v345_v40, %v346_v37  ;;  %v272_v2 = vmul.f32 %v577_v0, %v252_v49 }
  0x1d   : > { %v327_v48 = vsel %vm295_vm5, %v279_v22, %v311_v42  ;;  %v331_v52 = vsel %vm299_vm6, %v283_v23, %v315_v43  ;;  %v280_v3 = vadd.f32 %v584_v1, %v260_v46  ;;  %v284_v4 = vadd.f32 %v584_v1, %v264_v50 }
  0x1e   : > { %v335_v53 = vsel %vm303_vm7, %v287_v27, %v319_v44  ;;  %v339_v54 = vsel %vm307_vm8, %v291_v30, %v323_v45  ;;  %v350_v55 = vsel %vm342_vm0, %v327_v48, -inf  ;;  %v349_v59 = vmax.f32 %v347_v47, %v348_v41 }
  0x1f   : > { %v351_v60 = vsel %vm342_vm0, %v331_v52, -inf  ;;  %v353_v61 = vsel %vm342_vm0, %v335_v53, -inf  ;;  %v355_v62 = vsel %vm342_vm0, %v339_v54, -inf  ;;  %v288_v6 = vadd.f32 %v584_v1, %v268_v51 }
  0x20   : > { %v352_v63 = vmax.f32 %v350_v55, %v351_v60  ;;  %371 = vst.msk [vmem:[%s626_s30] sm:$0xff] %vm342_vm0, %v349_v59  ;;  %v261_v7 = vmul.f32 %v577_v0, %v241_v56  ;;  %v265_v8 = vmul.f32 %v577_v0, %v245_v57  ;;  %v269_v9 = vmul.f32 %v577_v0, %v249_v58 }
  0x21   : > { %v292_v11 = vadd.f32 %v584_v1, %v272_v2  ;;  %vm296_vm9 = vcmp.ge.f32.partialorder %v280_v3, 0.0  ;;  %vm300_vm10 = vcmp.ge.f32.partialorder %v284_v4, 0.0  ;;  %vm304_vm11 = vcmp.ge.f32.partialorder %v288_v6, 0.0 }
  0x22   : > { %v354_v10 = vmax.f32 %v352_v63, %v353_v61  ;;  %v312_v12 = vmul.f32 0.2, %v280_v3  ;;  %v316_v13 = vmul.f32 0.2, %v284_v4  ;;  %v273_v14 = vmul.f32 %v577_v0, %v253_v5 }
  0x23   : > { %vm308_vm12 = vcmp.ge.f32.partialorder %v292_v11, 0.0  ;;  %v320_v16 = vmul.f32 0.2, %v288_v6  ;;  %v324_v17 = vmul.f32 0.2, %v292_v11  ;;  %v281_v20 = vadd.f32 %v584_v1, %v261_v7 }
  0x24   : > { %v356_v15 = vmax.f32 %v354_v10, %v355_v62  ;;  %v328_v18 = vsel %vm296_vm9, %v280_v3, %v312_v12  ;;  %v332_v19 = vsel %vm300_vm10, %v284_v4, %v316_v13  ;;  %v285_v21 = vadd.f32 %v584_v1, %v265_v8 }
  0x25   : > { %v336_v22 = vsel %vm304_vm11, %v288_v6, %v320_v16  ;;  %v340_v23 = vsel %vm308_vm12, %v292_v11, %v324_v17  ;;  %v357_v24 = vsel %vm342_vm0, %v328_v18, -inf  ;;  %v358_v25 = vsel %vm342_vm0, %v332_v19, -inf }
  0x26   : > { %372 = vst.msk [vmem:[%s626_s30 + $0x8] sm:$0xff] %vm342_vm0, %v356_v15  ;;  %v359_v26 = vmax.f32 %v357_v24, %v358_v25  ;;  %v360_v0 = vsel %vm342_vm0, %v336_v22, -inf  ;;  %v362_v27 = vsel %vm342_vm0, %v340_v23, -inf  ;;  %v289_v28 = vadd.f32 %v584_v1, %v269_v9 }
  0x27   : > { %v293_v29 = vadd.f32 %v584_v1, %v273_v14  ;;  %vm297_vm13 = vcmp.ge.f32.partialorder %v281_v20, 0.0  ;;  %vm301_vm14 = vcmp.ge.f32.partialorder %v285_v21, 0.0  ;;  %v313_v30 = vmul.f32 0.2, %v281_v20 }
  0x28   : > { %v361_v31 = vmax.f32 %v359_v26, %v360_v0  ;;  %vm305_vm15 = vcmp.ge.f32.partialorder %v289_v28, 0.0  ;;  %v317_v32 = vmul.f32 0.2, %v285_v21  ;;  %v321_v33 = vmul.f32 0.2, %v289_v28 }
  0x29   : > { %vm309_vm1 = vcmp.ge.f32.partialorder %v293_v29, 0.0  ;;  %v325_v34 = vmul.f32 0.2, %v293_v29  ;;  %v329_v35 = vsel %vm297_vm13, %v281_v20, %v313_v30 }
  0x2a   : > { %v363_v36 = vmax.f32 %v361_v31, %v362_v27  ;;  %v333_v37 = vsel %vm301_vm14, %v285_v21, %v317_v32  ;;  %v337_v38 = vsel %vm305_vm15, %v289_v28, %v321_v33  ;;  %v364_v39 = vsel %vm342_vm0, %v329_v35, -inf }
  0x2b   : > { %v341_v40 = vsel %vm309_vm1, %v293_v29, %v325_v34  ;;  %v365_v1 = vsel %vm342_vm0, %v333_v37, -inf  ;;  %v367_v41 = vsel %vm342_vm0, %v337_v38, -inf }
  0x2c   : > { %373 = vst.msk [vmem:[%s626_s30 + $0x10] sm:$0xff] %vm342_vm0, %v363_v36  ;;  %v366_v42 = vmax.f32 %v364_v39, %v365_v1  ;;  %v369_v43 = vsel %vm342_vm0, %v341_v40, -inf }
  0x2e   : > { %v368_v44 = vmax.f32 %v366_v42, %v367_v41 }
  0x30   : > { %v370_v45 = vmax.f32 %v368_v44, %v369_v43 }
  0x32   : > { %374 = vst.msk [vmem:[%s626_s30 + $0x18] sm:$0xff] %vm342_vm0, %v370_v45 }
  0x33 PF: > { %s13_s14 = sadd.s32 1, %s528_s14   ;;  %s680_s12 = smov %s524_s13 }
  0x34   : > { %p10_p6 = scmp.ge.s32.totalorder %s13_s14, 4   ;;  %s681_s13 = smov %s683_s15 }
  0x36   :  { %12 = sbr.rel (!%p10_p6) target bundleno = 2 (0x2), region = 68 }

// kernel: critic_forward.22
= control target key start
LH: loop header
LB: loop body
LE: loop exit
PB: predicated region body
PF: predicated region fallthrough
CT: control target
= control target key end

     0   :  { %vm122_vm0 = vcmask 195584   ;;  %s329_s0 = inlined_call_operand.vmem [shape: f32[128,24], index: 0, kind: input, shape index: {}]   ;;  %s330_s1 = inlined_call_operand.vmem [shape: f32[1,1,24], index: 1, kind: input, shape index: {}]   ;;  %s331_s2 = inlined_call_operand.vmem [shape: f32[1,1,24], index: 2, kind: input, shape index: {}]   ;;  %s332_s3 = inlined_call_operand.vmem [shape: f32[128,24], index: 3, kind: output, shape index: {}]  }
   0x1   :  { %v50_v0 = vld [vmem:[%s329_s0] sm:$0xff]  ;;  %v51_v3 = vld [vmem:[%s329_s0 + $0x8] sm:$0xff]  ;;  %v52_v6 = vld [vmem:[%s329_s0 + $0x10] sm:$0xff] }
   0x2   :  { %v171_v1 = vld [vmem:[%s330_s1] ss:$0 sm:$0xff]  ;;  %v53_v7 = vld [vmem:[%s329_s0 + $0x18] sm:$0xff]  ;;  %v55_v12 = vld [vmem:[%s329_s0 + $0x28] sm:$0xff] }
   0x3   :  { %v202_v2 = vld [vmem:[%s331_s2] ss:$0 sm:$0xff]  ;;  %v70_v4 = vmul.f32 %v171_v1, %v50_v0  ;;  %v71_v5 = vmul.f32 %v171_v1, %v51_v3  ;;  %v72_v9 = vmul.f32 %v171_v1, %v52_v6  ;;  %v73_v10 = vmul.f32 %v171_v1, %v53_v7  ;;  %v56_v13 = vld [vmem:[%s329_s0 + $0x30] sm:$0xff]  ;;  %v57_v14 = vld [vmem:[%s329_s0 + $0x38] sm:$0xff] }
   0x4   :  { %v54_v8 = vld [vmem:[%s329_s0 + $0x20] sm:$0xff]  ;;  %v75_v17 = vmul.f32 %v171_v1, %v55_v12  ;;  %v76_v18 = vmul.f32 %v171_v1, %v56_v13  ;;  %v77_v22 = vmul.f32 %v171_v1, %v57_v14  ;;  %v59_v24 = vld [vmem:[%s329_s0 + $0x48] sm:$0xff]  ;;  %v60_v29 = vld [vmem:[%s329_s0 + $0x50] sm:$0xff] }
   0x5   :  { %v74_v11 = vmul.f32 %v171_v1, %v54_v8  ;;  %v90_v15 = vadd.f32 %v202_v2, %v70_v4  ;;  %v91_v16 = vadd.f32 %v202_v2, %v71_v5  ;;  %v92_v19 = vadd.f32 %v202_v2, %v72_v9  ;;  %v58_v23 = vld [vmem:[%s329_s0 + $0x40] sm:$0xff]  ;;  %v61_v30 = vld [vmem:[%s329_s0 + $0x58] sm:$0xff]  ;;  %v63_v35 = vld [vmem:[%s329_s0 + $0x68] sm:$0xff] }
   0x6   :  { %v93_v20 = vadd.f32 %v202_v2, %v73_v10  ;;  %v95_v27 = vadd.f32 %v202_v2, %v75_v17  ;;  %v96_v28 = vadd.f32 %v202_v2, %v76_v18  ;;  %v62_v31 = vld [vmem:[%s329_s0 + $0x60] sm:$0xff]  ;;  %v97_v34 = vadd.f32 %v202_v2, %v77_v22  ;;  %v64_v36 = vld [vmem:[%s329_s0 + $0x70] sm:$0xff]  ;;  %v65_v41 = vld [vmem:[%s329_s0 + $0x78] sm:$0xff] }
   0x7   :  { %v94_v21 = vadd.f32 %v202_v2, %v74_v11  ;;  %v106_v25 = vmax.f32 %v90_v15, 0.0  ;;  %v107_v26 = vmax.f32 %v91_v16, 0.0  ;;  %v108_v32 = vmax.f32 %v92_v19, 0.0 }
   0x8   :  { %v109_v33 = vmax.f32 %v93_v20, 0.0  ;;  %v111_v38 = vmax.f32 %v95_v27, 0.0  ;;  %v78_v39 = vmul.f32 %v171_v1, %v58_v23  ;;  %v79_v40 = vmul.f32 %v171_v1, %v59_v24 }
   0x9   :  { %123 = vst.msk [vmem:[%s332_s3] sm:$0xff] %vm122_vm0, %v106_v25  ;;  %v110_v37 = vmax.f32 %v94_v21, 0.0  ;;  %v112_v42 = vmax.f32 %v96_v28, 0.0  ;;  %v80_v43 = vmul.f32 %v171_v1, %v60_v29  ;;  %v81_v44 = vmul.f32 %v171_v1, %v61_v30 }
   0xa   :  { %124 = vst.msk [vmem:[%s332_s3 + $0x8] sm:$0xff] %vm122_vm0, %v107_v26  ;;  %v82_v45 = vmul.f32 %v171_v1, %v62_v31  ;;  %v98_v46 = vadd.f32 %v202_v2, %v78_v39  ;;  %v99_v47 = vadd.f32 %v202_v2, %v79_v40  ;;  %v83_v48 = vmul.f32 %v171_v1, %v63_v35 }
   0xb   :  { %125 = vst.msk [vmem:[%s332_s3 + $0x10] sm:$0xff] %vm122_vm0, %v108_v32  ;;  %v84_v49 = vmul.f32 %v171_v1, %v64_v36  ;;  %v113_v50 = vmax.f32 %v97_v34, 0.0  ;;  %v100_v51 = vadd.f32 %v202_v2, %v80_v43  ;;  %v101_v52 = vadd.f32 %v202_v2, %v81_v44 }
   0xc   :  { %126 = vst.msk [vmem:[%s332_s3 + $0x18] sm:$0xff] %vm122_vm0, %v109_v33  ;;  %v85_v53 = vmul.f32 %v171_v1, %v65_v41  ;;  %v114_v54 = vmax.f32 %v98_v46, 0.0  ;;  %v102_v55 = vadd.f32 %v202_v2, %v82_v45  ;;  %v115_v56 = vmax.f32 %v99_v47, 0.0 }
   0xd   :  { %127 = vst.msk [vmem:[%s332_s3 + $0x20] sm:$0xff] %vm122_vm0, %v110_v37  ;;  %v103_v57 = vadd.f32 %v202_v2, %v83_v48  ;;  %v116_v58 = vmax.f32 %v100_v51, 0.0  ;;  %v104_v59 = vadd.f32 %v202_v2, %v84_v49  ;;  %v117_v60 = vmax.f32 %v101_v52, 0.0 }
   0xe   :  { %128 = vst.msk [vmem:[%s332_s3 + $0x28] sm:$0xff] %vm122_vm0, %v111_v38  ;;  %v105_v61 = vadd.f32 %v202_v2, %v85_v53  ;;  %v118_v62 = vmax.f32 %v102_v55, 0.0 }
   0xf   :  { %129 = vst.msk [vmem:[%s332_s3 + $0x30] sm:$0xff] %vm122_vm0, %v112_v42  ;;  %v119_v63 = vmax.f32 %v103_v57, 0.0  ;;  %v120_v0 = vmax.f32 %v104_v59, 0.0 }
  0x10   :  { %130 = vst.msk [vmem:[%s332_s3 + $0x38] sm:$0xff] %vm122_vm0, %v113_v50  ;;  %v121_v1 = vmax.f32 %v105_v61, 0.0 }
  0x11   :  { %131 = vst.msk [vmem:[%s332_s3 + $0x40] sm:$0xff] %vm122_vm0, %v114_v54 }
  0x12   :  { %132 = vst.msk [vmem:[%s332_s3 + $0x48] sm:$0xff] %vm122_vm0, %v115_v56 }
  0x13   :  { %133 = vst.msk [vmem:[%s332_s3 + $0x50] sm:$0xff] %vm122_vm0, %v116_v58 }
  0x14   :  { %134 = vst.msk [vmem:[%s332_s3 + $0x58] sm:$0xff] %vm122_vm0, %v117_v60 }
  0x15   :  { %135 = vst.msk [vmem:[%s332_s3 + $0x60] sm:$0xff] %vm122_vm0, %v118_v62 }
  0x16   :  { %136 = vst.msk [vmem:[%s332_s3 + $0x68] sm:$0xff] %vm122_vm0, %v119_v63 }
  0x17   :  { %137 = vst.msk [vmem:[%s332_s3 + $0x70] sm:$0xff] %vm122_vm0, %v120_v0 }
  0x18   :  { %138 = vst.msk [vmem:[%s332_s3 + $0x78] sm:$0xff] %vm122_vm0, %v121_v1 }

// kernel: critic_forward.20
= control target key start
LH: loop header
LB: loop body
LE: loop exit
PB: predicated region body
PF: predicated region fallthrough
CT: control target
= control target key end

     0   :  { %vm77_vm0 = vcmask 1044480   ;;  %vm78_vm1 = vcmask 1045504   ;;  %v271_v2 = vmov 65535   ;;  %vm52_vm2 = vcmask 220160   ;;  %s523_s1 = inlined_call_operand.vmem [shape: f32[27,96], index: 1, kind: input, shape index: {}]   ;;  %s524_s0 = inlined_call_operand.vmem [shape: f32[128,27], index: 0, kind: input, shape index: {}]   ;;  %s525_s2 = inlined_call_operand.vmem [shape: f32[1,96], index: 2, kind: input, shape index: {}]   ;;  %s526_s3 = inlined_call_operand.vmem [shape: f32[128,96], index: 3, kind: output, shape index: {0}]   ;;  %s527_s4 = inlined_call_operand.vmem [shape: f32[1,1,96], index: 4, kind: output, shape index: {1}]   ;;  %s528_s5 = inlined_call_operand.vmem [shape: f32[1,1,96], index: 5, kind: output, shape index: {2}]  }
   0x1   :  { %v44_v0 = vld [vmem:[%s523_s1 + $0x10] sm:$0xff]  ;;  %v45_v1 = vld [vmem:[%s523_s1 + $0x18] sm:$0x7]  ;;  %v79_v3 = vsel %vm77_vm0, 4294967295, %v271_v2  ;;  %v42_v6 = vld [vmem:[%s523_s1] sm:$0xff]  ;;  %vm133_vm3 = vcmask 785408  }
   0x2   :  { %v47_v4 = vpack.c.bf16 %v45_v1, %v44_v0  ;;  %v80_v5 = vsel %vm78_vm1, %v79_v3, 0  ;;  %v43_v7 = vld [vmem:[%s523_s1 + $0x8] sm:$0xff]  ;;  %v18_v9 = vld [vmem:[%s524_s0] sm:$0xff]  ;;  %v20_v22 = vld [vmem:[%s524_s0 + $0x10] sm:$0xff]  ;;  %vm187_vm4 = vcmask 778240  }
   0x3   :  { %v19_v10 = vld [vmem:[%s524_s0 + $0x8] sm:$0xff]  ;;  %v22_v11 = vld [vmem:[%s524_s0 + $0x20] sm:$0xff]  ;;  %v46_v12 = vpack.c.bf16 %v43_v7, %v42_v6  ;;  %v21_v23 = vld [vmem:[%s524_s0 + $0x18] sm:$0xff] }
   0x4   :  { %v82_v8 = vand.u32 %v80_v5, %v47_v4  ;;  %v23_v13 = vld [vmem:[%s524_s0 + $0x28] sm:$0xff]  ;;  %v26_v14 = vld [vmem:[%s524_s0 + $0x40] sm:$0xff]  ;;  %v34_v18 = vpack.c.bf16 %v19_v10, %v18_v9  ;;  %v24_v24 = vld [vmem:[%s524_s0 + $0x30] sm:$0xff]  ;;  %v35_v30 = vpack.c.bf16 %v21_v23, %v20_v22 }
   0x5   :  { %v27_v15 = vld [vmem:[%s524_s0 + $0x48] sm:$0xff]  ;;  %v30_v16 = vld [vmem:[%s524_s0 + $0x60] sm:$0xff]  ;;  %v36_v19 = vpack.c.bf16 %v23_v13, %v22_v11  ;;  %v25_v25 = vld [vmem:[%s524_s0 + $0x38] sm:$0xff] }
   0x6   :  { %90 = vmatpush.bf16.msra.mxu0 %v82_v8  ;;  %263 = vmatpush.bf16.msra.mxu1 %v82_v8  ;;  %v31_v17 = vld [vmem:[%s524_s0 + $0x68] sm:$0xff]  ;;  %v38_v20 = vpack.c.bf16 %v27_v15, %v26_v14  ;;  %v28_v26 = vld [vmem:[%s524_s0 + $0x50] sm:$0xff]  ;;  %v29_v27 = vld [vmem:[%s524_s0 + $0x58] sm:$0xff]  ;;  %v37_v31 = vpack.c.bf16 %v25_v25, %v24_v24 }
   0x7   :  { %264 = vmatpush.bf16.msra.mxu2 %v82_v8  ;;  %265 = vmatpush.bf16.msra.mxu3 %v82_v8  ;;  %v40_v21 = vpack.c.bf16 %v31_v17, %v30_v16  ;;  %v32_v28 = vld [vmem:[%s524_s0 + $0x70] sm:$0xff]  ;;  %v33_v29 = vld [vmem:[%s524_s0 + $0x78] sm:$0xff]  ;;  %v39_v32 = vpack.c.bf16 %v29_v27, %v28_v26  ;;  %v373_v34 = vld [vmem:[%s525_s2] ss:$0 sm:$0xff] }
   0x8   :  { %v41_v33 = vpack.c.bf16 %v33_v29, %v32_v28 }
   0xa   :  { %91 = vmatpush.bf16.msra.mxu0 %v46_v12  ;;  %266 = vmatpush.bf16.msra.mxu1 %v46_v12 }
   0xb   :  { %267 = vmatpush.bf16.msra.mxu2 %v46_v12  ;;  %268 = vmatpush.bf16.msra.mxu3 %v46_v12 }
   0xd   :  { %255 = vmatmul.msk.bf16.vlgmr.msra.gmra.mxu0 %vm52_vm2, %v34_v18  ;;  %257 = vmatmul.msk.bf16.vlgmr.msra.gmra.mxu1 %vm52_vm2, %v36_v19 }
   0xe   :  { %259 = vmatmul.msk.bf16.vlgmr.msra.gmra.mxu2 %vm52_vm2, %v38_v20  ;;  %261 = vmatmul.msk.bf16.vlgmr.msra.gmra.mxu3 %vm52_vm2, %v40_v21 }
  0x1d   :  { %256 = vmatmul.msk.bf16.gmra.mxu0 %vm52_vm2, %v35_v30  ;;  %258 = vmatmul.msk.bf16.gmra.mxu1 %vm52_vm2, %v37_v31 }
  0x1e   :  { %260 = vmatmul.msk.bf16.gmra.mxu2 %vm52_vm2, %v39_v32  ;;  %262 = vmatmul.msk.bf16.gmra.mxu3 %vm52_vm2, %v41_v33 }
  0x8a   :  { %v93_v35 = vpop.f32.mrf.mxu0  ;;  %v103_v36 = vpop.f32.mrf.mxu1 }
  0x8b   :  { %v94_v37 = vadd.f32 %v373_v34, %v93_v35  ;;  %v104_v38 = vadd.f32 %v373_v34, %v103_v36 }
  0x8d   :  { %134 = vst.msk [vmem:[%s526_s3] sm:$0xff] %vm133_vm3, %v94_v37  ;;  %v189_v56 = vmul.f32 %v94_v37, %v94_v37  ;;  %v150_v59 = vsel %vm133_vm3, %v94_v37, 0.0  ;;  %v193_v11 = vmul.f32 %v104_v38, %v104_v38  ;;  %v157_v16 = vsel %vm133_vm3, %v104_v38, 0.0 }
  0x8e   :  { %138 = vst.msk [vmem:[%s526_s3 + $0x20] sm:$0xff] %vm133_vm3, %v104_v38 }
  0x8f   :  { %v205_v0 = vsel %vm133_vm3, %v189_v56, 0.0  ;;  %v212_v21 = vsel %vm133_vm3, %v193_v11, 0.0 }
  0x91   :  { %v113_v39 = vpop.f32.mrf.mxu2  ;;  %v123_v40 = vpop.f32.mrf.mxu3 }
  0x92   :  { %v95_v41 = vpop.f32.mrf.mxu0  ;;  %v105_v42 = vpop.f32.mrf.mxu1  ;;  %v386_v43 = vadd.f32 %v373_v34, %v113_v39  ;;  %v391_v46 = vadd.f32 %v373_v34, %v123_v40 }
  0x93   :  { %v96_v44 = vadd.f32 %v373_v34, %v95_v41  ;;  %v106_v45 = vadd.f32 %v373_v34, %v105_v42 }
  0x94   :  { %142 = vst.msk [vmem:[%s526_s3 + $0x40] sm:$0xff] %vm133_vm3, %v386_v43  ;;  %v197_v36 = vmul.f32 %v386_v43, %v386_v43  ;;  %v165_v40 = vsel %vm133_vm3, %v386_v43, 0.0 }
  0x95   :  { %135 = vst.msk [vmem:[%s526_s3 + $0x8] sm:$0xff] %vm133_vm3, %v96_v44  ;;  %v190_v55 = vmul.f32 %v96_v44, %v96_v44  ;;  %v151_v57 = vsel %vm133_vm3, %v96_v44, 0.0  ;;  %v194_v17 = vmul.f32 %v106_v45, %v106_v45  ;;  %v159_v22 = vsel %vm133_vm3, %v106_v45, 0.0 }
  0x96   :  { %139 = vst.msk [vmem:[%s526_s3 + $0x28] sm:$0xff] %vm133_vm3, %v106_v45  ;;  %v152_v1 = vadd.f32 %v151_v57, %v150_v59 }
  0x97   :  { %146 = vst.msk [vmem:[%s526_s3 + $0x60] sm:$0xff] %vm133_vm3, %v391_v46  ;;  %v206_v60 = vsel %vm133_vm3, %v190_v55, 0.0  ;;  %v214_v30 = vsel %vm133_vm3, %v194_v17, 0.0 }
  0x98   :  { %v207_v9 = vadd.f32 %v206_v60, %v205_v0 }
  0x99   :  { %v115_v47 = vpop.f32.mrf.mxu2  ;;  %v125_v48 = vpop.f32.mrf.mxu3 }
  0x9a   :  { %v98_v49 = vpop.f32.mrf.mxu0  ;;  %v108_v50 = vpop.f32.mrf.mxu1  ;;  %v412_v51 = vadd.f32 %v373_v34, %v115_v47  ;;  %v417_v54 = vadd.f32 %v373_v34, %v125_v48  ;;  %v220_v47 = vsel %vm133_vm3, %v197_v36, 0.0 }
  0x9b   :  { %v99_v52 = vadd.f32 %v373_v34, %v98_v49  ;;  %v109_v53 = vadd.f32 %v373_v34, %v108_v50 }
  0x9c   :  { %143 = vst.msk [vmem:[%s526_s3 + $0x48] sm:$0xff] %vm133_vm3, %v412_v51  ;;  %v198_v41 = vmul.f32 %v412_v51, %v412_v51  ;;  %v167_v48 = vsel %vm133_vm3, %v412_v51, 0.0  ;;  %v173_v51 = vsel %vm133_vm3, %v391_v46, 0.0 }
  0x9d   :  { %136 = vst.msk [vmem:[%s526_s3 + $0x10] sm:$0xff] %vm133_vm3, %v99_v52  ;;  %v191_v58 = vmul.f32 %v99_v52, %v99_v52  ;;  %v153_v61 = vsel %vm133_vm3, %v99_v52, 0.0  ;;  %v195_v23 = vmul.f32 %v109_v53, %v109_v53  ;;  %v161_v31 = vsel %vm133_vm3, %v109_v53, 0.0 }
  0x9e   :  { %140 = vst.msk [vmem:[%s526_s3 + $0x30] sm:$0xff] %vm133_vm3, %v109_v53  ;;  %v154_v10 = vadd.f32 %v153_v61, %v152_v1  ;;  %v222_v53 = vsel %vm133_vm3, %v198_v41, 0.0 }
  0x9f   :  { %147 = vst.msk [vmem:[%s526_s3 + $0x68] sm:$0xff] %vm133_vm3, %v417_v54  ;;  %v208_v5 = vsel %vm133_vm3, %v191_v58, 0.0  ;;  %v216_v37 = vsel %vm133_vm3, %v195_v23, 0.0  ;;  %v201_v58 = vmul.f32 %v391_v46, %v391_v46 }
  0xa0   :  { %v209_v14 = vadd.f32 %v208_v5, %v207_v9 }
  0xa1   :  { %v118_v62 = vpop.f32.mrf.mxu2  ;;  %v128_v63 = vpop.f32.mrf.mxu3 }
  0xa2   :  { %v100_v2 = vpop.f32.mrf.mxu0  ;;  %v110_v3 = vpop.f32.mrf.mxu1  ;;  %v119_v4 = vadd.f32 %v373_v34, %v118_v62  ;;  %v447_v8 = vadd.f32 %v373_v34, %v128_v63  ;;  %v202_v63 = vmul.f32 %v417_v54, %v417_v54 }
  0xa3   :  { %v101_v6 = vadd.f32 %v373_v34, %v100_v2  ;;  %v111_v7 = vadd.f32 %v373_v34, %v110_v3  ;;  %v228_v3 = vsel %vm133_vm3, %v201_v58, 0.0 }
  0xa4   :  { %144 = vst.msk [vmem:[%s526_s3 + $0x50] sm:$0xff] %vm133_vm3, %v119_v4  ;;  %v199_v49 = vmul.f32 %v119_v4, %v119_v4  ;;  %v169_v55 = vsel %vm133_vm3, %v119_v4, 0.0  ;;  %v175_v4 = vsel %vm133_vm3, %v417_v54, 0.0  ;;  %v203_v5 = vmul.f32 %v447_v8, %v447_v8 }
  0xa5   :  { %137 = vst.msk [vmem:[%s526_s3 + $0x18] sm:$0xff] %vm133_vm3, %v101_v6  ;;  %v155_v12 = vsel %vm133_vm3, %v101_v6, 0.0  ;;  %v192_v13 = vmul.f32 %v101_v6, %v101_v6  ;;  %v196_v32 = vmul.f32 %v111_v7, %v111_v7  ;;  %v163_v38 = vsel %vm133_vm3, %v111_v7, 0.0 }
  0xa6   :  { %v156_v15 = vadd.f32 %v155_v12, %v154_v10  ;;  %141 = vst.msk [vmem:[%s526_s3 + $0x38] sm:$0xff] %vm133_vm3, %v111_v7  ;;  %v224_v59 = vsel %vm133_vm3, %v199_v49, 0.0  ;;  %v230_v9 = vsel %vm133_vm3, %v202_v63, 0.0  ;;  %v177_v46 = vsel %vm133_vm3, %v447_v8, 0.0 }
  0xa7   :  { %v210_v18 = vsel %vm133_vm3, %v192_v13, 0.0  ;;  %148 = vst.msk [vmem:[%s526_s3 + $0x70] sm:$0xff] %vm133_vm3, %v447_v8  ;;  %v218_v42 = vsel %vm133_vm3, %v196_v32, 0.0  ;;  %v232_v13 = vsel %vm133_vm3, %v203_v5, 0.0 }
  0xa8   :  { %v158_v19 = vadd.f32 %v157_v16, %v156_v15  ;;  %v211_v20 = vadd.f32 %v210_v18, %v209_v14 }
  0xa9   :  { %v120_v24 = vpop.f32.mrf.mxu2  ;;  %v130_v25 = vpop.f32.mrf.mxu3 }
  0xaa   :  { %v213_v26 = vadd.f32 %v212_v21, %v211_v20  ;;  %v160_v27 = vadd.f32 %v159_v22, %v158_v19  ;;  %v121_v28 = vadd.f32 %v373_v34, %v120_v24  ;;  %v131_v29 = vadd.f32 %v373_v34, %v130_v25 }
  0xac   :  { %v162_v33 = vadd.f32 %v161_v31, %v160_v27  ;;  %v215_v35 = vadd.f32 %v214_v30, %v213_v26  ;;  %145 = vst.msk [vmem:[%s526_s3 + $0x58] sm:$0xff] %vm133_vm3, %v121_v28  ;;  %v200_v43 = vmul.f32 %v121_v28, %v121_v28  ;;  %v171_v60 = vsel %vm133_vm3, %v121_v28, 0.0 }
  0xad   :  { %149 = vst.msk [vmem:[%s526_s3 + $0x78] sm:$0xff] %vm133_vm3, %v131_v29  ;;  %v204_v10 = vmul.f32 %v131_v29, %v131_v29  ;;  %v179_v14 = vsel %vm133_vm3, %v131_v29, 0.0 }
  0xae   :  { %v164_v34 = vadd.f32 %v163_v38, %v162_v33  ;;  %v217_v39 = vadd.f32 %v216_v37, %v215_v35  ;;  %v226_v0 = vsel %vm133_vm3, %v200_v43, 0.0 }
  0xaf   :  { %v234_v54 = vsel %vm133_vm3, %v204_v10, 0.0 }
  0xb0   :  { %v166_v44 = vadd.f32 %v165_v40, %v164_v34  ;;  %v219_v45 = vadd.f32 %v218_v42, %v217_v39 }
  0xb2   :  { %v221_v50 = vadd.f32 %v220_v47, %v219_v45  ;;  %v168_v52 = vadd.f32 %v167_v48, %v166_v44 }
  0xb4   :  { %v170_v56 = vadd.f32 %v169_v55, %v168_v52  ;;  %v223_v57 = vadd.f32 %v222_v53, %v221_v50 }
  0xb6   :  { %v225_v61 = vadd.f32 %v224_v59, %v223_v57  ;;  %v172_v62 = vadd.f32 %v171_v60, %v170_v56 }
  0xb8   :  { %v174_v1 = vadd.f32 %v173_v51, %v172_v62  ;;  %v227_v2 = vadd.f32 %v226_v0, %v225_v61 }
  0xba   :  { %v229_v6 = vadd.f32 %v228_v3, %v227_v2  ;;  %v176_v7 = vadd.f32 %v175_v4, %v174_v1 }
  0xbc   :  { %v178_v11 = vadd.f32 %v177_v46, %v176_v7  ;;  %v231_v12 = vadd.f32 %v230_v9, %v229_v6 }
  0xbe   :  { %v233_v15 = vadd.f32 %v232_v13, %v231_v12  ;;  %v180_v16 = vadd.f32 %v179_v14, %v178_v11 }
  0xc0   :  { %v181_v17 = vrot.slane %v180_v16, 4  ;;  %v235_v18 = vadd.f32 %v234_v54, %v233_v15 }
  0xc2   :  { %v182_v19 = vadd.f32 %v181_v17, %v180_v16  ;;  %v236_v20 = vrot.slane %v235_v18, 4 }
  0xc4   :  { %v183_v21 = vrot.slane %v182_v19, 2  ;;  %v237_v22 = vadd.f32 %v236_v20, %v235_v18 }
  0xc6   :  { %v184_v23 = vadd.f32 %v183_v21, %v182_v19  ;;  %v238_v24 = vrot.slane %v237_v22, 2 }
  0xc8   :  { %v185_v8 = vrot.slane %v184_v23, 1  ;;  %v239_v25 = vadd.f32 %v238_v24, %v237_v22 }
  0xca   :  { %v186_v26 = vadd.f32 %v185_v8, %v184_v23  ;;  %v240_v27 = vrot.slane %v239_v25, 1 }
  0xcc   :  { %188 = vst.msk [vmem:[%s527_s4] sm:$0x1] %vm187_vm4, %v186_v26  ;;  %v241_v28 = vadd.f32 %v240_v27, %v239_v25 }
  0xce   :  { %242 = vst.msk [vmem:[%s528_s5] sm:$0x1] %vm187_vm4, %v241_v28 }

// kernel: critic_forward.21
= control target key start
LH: loop header
LB: loop body
LE: loop exit
PB: predicated region body
PF: predicated region fallthrough
CT: control target
= control target key end

     0   :  { %vm126_vm0 = vcmask 785408   ;;  %vm200_vm1 = vcmask 195584   ;;  %vm254_vm2 = vcmask 188416   ;;  %s678_s3 = inlined_call_operand.vmem [shape: f32[96,24], index: 3, kind: input, shape index: {}]   ;;  %s679_s1 = inlined_call_operand.vmem [shape: f32[1,1,96], index: 1, kind: input, shape index: {}]   ;;  %s680_s0 = inlined_call_operand.vmem [shape: f32[128,96], index: 0, kind: input, shape index: {}]   ;;  %s681_s2 = inlined_call_operand.vmem [shape: f32[1,1,96], index: 2, kind: input, shape index: {}]   ;;  %s682_s4 = inlined_call_operand.vmem [shape: f32[1,24], index: 4, kind: input, shape index: {}]   ;;  %s683_s5 = inlined_call_operand.vmem [shape: f32[128,24], index: 5, kind: output, shape index: {0}]   ;;  %s684_s6 = inlined_call_operand.vmem [shape: f32[1,1,24], index: 6, kind: output, shape index: {1}]   ;;  %s685_s7 = inlined_call_operand.vmem [shape: f32[1,1,24], index: 7, kind: output, shape index: {2}]  }
   0x1   :  { %v114_v0 = vld [vmem:[%s678_s3 + $0x50] sm:$0xff]  ;;  %v115_v1 = vld [vmem:[%s678_s3 + $0x58] sm:$0xff]  ;;  %v112_v2 = vld [vmem:[%s678_s3 + $0x40] sm:$0xff] }
   0x2   :  { %v121_v3 = vpack.c.bf16 %v115_v1, %v114_v0  ;;  %v113_v4 = vld [vmem:[%s678_s3 + $0x48] sm:$0xff]  ;;  %v110_v6 = vld [vmem:[%s678_s3 + $0x30] sm:$0xff]  ;;  %v111_v7 = vld [vmem:[%s678_s3 + $0x38] sm:$0xff] }
   0x3   :  { %v120_v5 = vpack.c.bf16 %v113_v4, %v112_v2  ;;  %v108_v8 = vld [vmem:[%s678_s3 + $0x20] sm:$0xff]  ;;  %v109_v10 = vld [vmem:[%s678_s3 + $0x28] sm:$0xff]  ;;  %v119_v13 = vpack.c.bf16 %v111_v7, %v110_v6  ;;  %v106_v23 = vld [vmem:[%s678_s3 + $0x10] sm:$0xff] }
   0x4   :  { %153 = vmatpush.bf16.msra.mxu0 %v121_v3  ;;  %330 = vmatpush.bf16.msra.mxu1 %v121_v3  ;;  %v415_v9 = vld [vmem:[%s679_s1] ss:$0 sm:$0xff]  ;;  %v25_v12 = vld [vmem:[%s680_s0 + $0x8] sm:$0xff]  ;;  %v118_v20 = vpack.c.bf16 %v109_v10, %v108_v8  ;;  %v107_v24 = vld [vmem:[%s678_s3 + $0x18] sm:$0xff] }
   0x5   :  { %331 = vmatpush.bf16.msra.mxu2 %v121_v3  ;;  %332 = vmatpush.bf16.msra.mxu3 %v121_v3  ;;  %v24_v11 = vld [vmem:[%s680_s0] sm:$0xff]  ;;  %v29_v15 = vld [vmem:[%s680_s0 + $0x28] sm:$0xff]  ;;  %v45_v25 = vmul.f32 %v415_v9, %v25_v12  ;;  %v117_v32 = vpack.c.bf16 %v107_v24, %v106_v23  ;;  %v26_v54 = vld [vmem:[%s680_s0 + $0x10] sm:$0xff] }
   0x6   :  { %v28_v14 = vld [vmem:[%s680_s0 + $0x20] sm:$0xff]  ;;  %v33_v17 = vld [vmem:[%s680_s0 + $0x48] sm:$0xff]  ;;  %v44_v21 = vmul.f32 %v415_v9, %v24_v11  ;;  %v49_v27 = vmul.f32 %v415_v9, %v29_v15  ;;  %v27_v55 = vld [vmem:[%s680_s0 + $0x18] sm:$0xff]  ;;  %v46_v0 = vmul.f32 %v415_v9, %v26_v54 }
   0x7   :  { %v32_v16 = vld [vmem:[%s680_s0 + $0x40] sm:$0xff]  ;;  %v37_v19 = vld [vmem:[%s680_s0 + $0x68] sm:$0xff]  ;;  %v48_v26 = vmul.f32 %v415_v9, %v28_v14  ;;  %v53_v29 = vmul.f32 %v415_v9, %v33_v17  ;;  %v30_v58 = vld [vmem:[%s680_s0 + $0x30] sm:$0xff]  ;;  %v47_v1 = vmul.f32 %v415_v9, %v27_v55 }
   0x8   :  { %154 = vmatpush.bf16.msra.mxu0 %v120_v5  ;;  %333 = vmatpush.bf16.msra.mxu1 %v120_v5  ;;  %v36_v18 = vld [vmem:[%s680_s0 + $0x60] sm:$0xff]  ;;  %v52_v28 = vmul.f32 %v415_v9, %v32_v16  ;;  %v57_v31 = vmul.f32 %v415_v9, %v37_v19  ;;  %v105_v35 = vld [vmem:[%s678_s3 + $0x8] sm:$0xff]  ;;  %v31_v59 = vld [vmem:[%s680_s0 + $0x38] sm:$0xff]  ;;  %v50_v2 = vmul.f32 %v415_v9, %v30_v58 }
   0x9   :  { %334 = vmatpush.bf16.msra.mxu2 %v120_v5  ;;  %335 = vmatpush.bf16.msra.mxu3 %v120_v5  ;;  %v448_v22 = vld [vmem:[%s681_s2] ss:$0 sm:$0xff]  ;;  %v56_v30 = vmul.f32 %v415_v9, %v36_v18  ;;  %v34_v60 = vld [vmem:[%s680_s0 + $0x50] sm:$0xff]  ;;  %v35_v61 = vld [vmem:[%s680_s0 + $0x58] sm:$0xff]  ;;  %v51_v3 = vmul.f32 %v415_v9, %v31_v59 }
   0xa   :  { %v64_v33 = vadd.f32 %v448_v22, %v44_v21  ;;  %v104_v34 = vld [vmem:[%s678_s3] sm:$0xff]  ;;  %v65_v36 = vadd.f32 %v448_v22, %v45_v25  ;;  %v68_v37 = vadd.f32 %v448_v22, %v48_v26  ;;  %v69_v38 = vadd.f32 %v448_v22, %v49_v27  ;;  %v38_v62 = vld [vmem:[%s680_s0 + $0x70] sm:$0xff]  ;;  %v39_v63 = vld [vmem:[%s680_s0 + $0x78] sm:$0xff] }
   0xb   :  { %v72_v39 = vadd.f32 %v448_v22, %v52_v28  ;;  %v73_v40 = vadd.f32 %v448_v22, %v53_v29  ;;  %v76_v41 = vadd.f32 %v448_v22, %v56_v30  ;;  %v77_v42 = vadd.f32 %v448_v22, %v57_v31 }
   0xc   :  { %155 = vmatpush.bf16.msra.mxu0 %v119_v13  ;;  %336 = vmatpush.bf16.msra.mxu1 %v119_v13  ;;  %v116_v43 = vpack.c.bf16 %v105_v35, %v104_v34  ;;  %v80_v44 = vmax.f32 %v64_v33, 0.0  ;;  %v81_v45 = vmax.f32 %v65_v36, 0.0  ;;  %v84_v46 = vmax.f32 %v68_v37, 0.0 }
   0xd   :  { %337 = vmatpush.bf16.msra.mxu2 %v119_v13  ;;  %338 = vmatpush.bf16.msra.mxu3 %v119_v13  ;;  %v85_v47 = vmax.f32 %v69_v38, 0.0  ;;  %v88_v48 = vmax.f32 %v72_v39, 0.0  ;;  %v89_v49 = vmax.f32 %v73_v40, 0.0  ;;  %v92_v50 = vmax.f32 %v76_v41, 0.0 }
   0xe   :  { %v93_v51 = vmax.f32 %v77_v42, 0.0  ;;  %v96_v52 = vpack.c.bf16 %v81_v45, %v80_v44  ;;  %v54_v4 = vmul.f32 %v415_v9, %v34_v60  ;;  %v55_v5 = vmul.f32 %v415_v9, %v35_v61 }
   0xf   :  { %v98_v53 = vpack.c.bf16 %v85_v47, %v84_v46  ;;  %v100_v56 = vpack.c.bf16 %v89_v49, %v88_v48  ;;  %v58_v6 = vmul.f32 %v415_v9, %v38_v62  ;;  %v59_v7 = vmul.f32 %v415_v9, %v39_v63 }
  0x10   :  { %156 = vmatpush.bf16.msra.mxu0 %v118_v20  ;;  %339 = vmatpush.bf16.msra.mxu1 %v118_v20  ;;  %v102_v57 = vpack.c.bf16 %v93_v51, %v92_v50  ;;  %v66_v8 = vadd.f32 %v448_v22, %v46_v0  ;;  %v67_v10 = vadd.f32 %v448_v22, %v47_v1 }
  0x11   :  { %340 = vmatpush.bf16.msra.mxu2 %v118_v20  ;;  %341 = vmatpush.bf16.msra.mxu3 %v118_v20  ;;  %v70_v11 = vadd.f32 %v448_v22, %v50_v2  ;;  %v71_v12 = vadd.f32 %v448_v22, %v51_v3  ;;  %v74_v13 = vadd.f32 %v448_v22, %v54_v4 }
  0x12   :  { %v75_v14 = vadd.f32 %v448_v22, %v55_v5  ;;  %v78_v15 = vadd.f32 %v448_v22, %v58_v6  ;;  %v79_v16 = vadd.f32 %v448_v22, %v59_v7  ;;  %v82_v17 = vmax.f32 %v66_v8, 0.0  ;;  %v528_v22 = vld [vmem:[%s682_s4] ss:$0 sm:$0xff] }
  0x13   :  { %v83_v18 = vmax.f32 %v67_v10, 0.0  ;;  %v86_v19 = vmax.f32 %v70_v11, 0.0  ;;  %v87_v9 = vmax.f32 %v71_v12, 0.0  ;;  %v90_v20 = vmax.f32 %v74_v13, 0.0 }
  0x14   :  { %157 = vmatpush.bf16.msra.mxu0 %v117_v32  ;;  %342 = vmatpush.bf16.msra.mxu1 %v117_v32  ;;  %v91_v21 = vmax.f32 %v75_v14, 0.0  ;;  %v94_v23 = vmax.f32 %v78_v15, 0.0  ;;  %v95_v24 = vmax.f32 %v79_v16, 0.0 }
  0x15   :  { %343 = vmatpush.bf16.msra.mxu2 %v117_v32  ;;  %344 = vmatpush.bf16.msra.mxu3 %v117_v32  ;;  %v97_v25 = vpack.c.bf16 %v83_v18, %v82_v17  ;;  %v99_v26 = vpack.c.bf16 %v87_v9, %v86_v19 }
  0x16   :  { %v101_v27 = vpack.c.bf16 %v91_v21, %v90_v20  ;;  %v103_v28 = vpack.c.bf16 %v95_v24, %v94_v23 }
  0x18   :  { %158 = vmatpush.bf16.msra.mxu0 %v116_v43  ;;  %345 = vmatpush.bf16.msra.mxu1 %v116_v43 }
  0x19   :  { %346 = vmatpush.bf16.msra.mxu2 %v116_v43  ;;  %347 = vmatpush.bf16.msra.mxu3 %v116_v43 }
  0x1b   :  { %322 = vmatmul.msk.bf16.vlgmr.msra.gmra.mxu0 %vm126_vm0, %v96_v52  ;;  %324 = vmatmul.msk.bf16.vlgmr.msra.gmra.mxu1 %vm126_vm0, %v98_v53 }
  0x1c   :  { %326 = vmatmul.msk.bf16.vlgmr.msra.gmra.mxu2 %vm126_vm0, %v100_v56  ;;  %328 = vmatmul.msk.bf16.vlgmr.msra.gmra.mxu3 %vm126_vm0, %v102_v57 }
  0x2b   :  { %323 = vmatmul.msk.bf16.gmra.mxu0 %vm126_vm0, %v97_v25  ;;  %325 = vmatmul.msk.bf16.gmra.mxu1 %vm126_vm0, %v99_v26 }
  0x2c   :  { %327 = vmatmul.msk.bf16.gmra.mxu2 %vm126_vm0, %v101_v27  ;;  %329 = vmatmul.msk.bf16.gmra.mxu3 %vm126_vm0, %v103_v28 }
  0x98   :  { %v160_v29 = vpop.f32.mrf.mxu0  ;;  %v170_v30 = vpop.f32.mrf.mxu1 }
  0x99   :  { %v161_v31 = vadd.f32 %v528_v22, %v160_v29  ;;  %v171_v32 = vadd.f32 %v528_v22, %v170_v30 }
  0x9b   :  { %201 = vst.msk [vmem:[%s683_s5] sm:$0xff] %vm200_vm1, %v161_v31  ;;  %v256_v50 = vmul.f32 %v161_v31, %v161_v31  ;;  %v217_v53 = vsel %vm200_vm1, %v161_v31, 0.0  ;;  %v260_v5 = vmul.f32 %v171_v32, %v171_v32  ;;  %v224_v11 = vsel %vm200_vm1, %v171_v32, 0.0 }
  0x9c   :  { %205 = vst.msk [vmem:[%s683_s5 + $0x20] sm:$0xff] %vm200_vm1, %v171_v32 }
  0x9d   :  { %v272_v58 = vsel %vm200_vm1, %v256_v50, 0.0  ;;  %v279_v16 = vsel %vm200_vm1, %v260_v5, 0.0 }
  0x9f   :  { %v180_v33 = vpop.f32.mrf.mxu2  ;;  %v190_v34 = vpop.f32.mrf.mxu3 }
  0xa0   :  { %v162_v35 = vpop.f32.mrf.mxu0  ;;  %v172_v36 = vpop.f32.mrf.mxu1  ;;  %v541_v37 = vadd.f32 %v528_v22, %v180_v33  ;;  %v546_v40 = vadd.f32 %v528_v22, %v190_v34 }
  0xa1   :  { %v163_v38 = vadd.f32 %v528_v22, %v162_v35  ;;  %v173_v39 = vadd.f32 %v528_v22, %v172_v36 }
  0xa2   :  { %209 = vst.msk [vmem:[%s683_s5 + $0x40] sm:$0xff] %vm200_vm1, %v541_v37  ;;  %v264_v30 = vmul.f32 %v541_v37, %v541_v37  ;;  %v232_v34 = vsel %vm200_vm1, %v541_v37, 0.0 }
  0xa3   :  { %202 = vst.msk [vmem:[%s683_s5 + $0x8] sm:$0xff] %vm200_vm1, %v163_v38  ;;  %v257_v49 = vmul.f32 %v163_v38, %v163_v38  ;;  %v218_v51 = vsel %vm200_vm1, %v163_v38, 0.0  ;;  %v261_v12 = vmul.f32 %v173_v39, %v173_v39  ;;  %v226_v17 = vsel %vm200_vm1, %v173_v39, 0.0 }
  0xa4   :  { %206 = vst.msk [vmem:[%s683_s5 + $0x28] sm:$0xff] %vm200_vm1, %v173_v39  ;;  %v219_v59 = vadd.f32 %v218_v51, %v217_v53 }
  0xa5   :  { %213 = vst.msk [vmem:[%s683_s5 + $0x60] sm:$0xff] %vm200_vm1, %v546_v40  ;;  %v273_v54 = vsel %vm200_vm1, %v257_v49, 0.0  ;;  %v281_v25 = vsel %vm200_vm1, %v261_v12, 0.0 }
  0xa6   :  { %v274_v3 = vadd.f32 %v273_v54, %v272_v58 }
  0xa7   :  { %v182_v41 = vpop.f32.mrf.mxu2  ;;  %v192_v42 = vpop.f32.mrf.mxu3 }
  0xa8   :  { %v165_v43 = vpop.f32.mrf.mxu0  ;;  %v175_v44 = vpop.f32.mrf.mxu1  ;;  %v567_v45 = vadd.f32 %v528_v22, %v182_v41  ;;  %v572_v48 = vadd.f32 %v528_v22, %v192_v42  ;;  %v287_v41 = vsel %vm200_vm1, %v264_v30, 0.0 }
  0xa9   :  { %v166_v46 = vadd.f32 %v528_v22, %v165_v43  ;;  %v176_v47 = vadd.f32 %v528_v22, %v175_v44 }
  0xaa   :  { %210 = vst.msk [vmem:[%s683_s5 + $0x48] sm:$0xff] %vm200_vm1, %v567_v45  ;;  %v265_v35 = vmul.f32 %v567_v45, %v567_v45  ;;  %v234_v42 = vsel %vm200_vm1, %v567_v45, 0.0  ;;  %v240_v45 = vsel %vm200_vm1, %v546_v40, 0.0 }
  0xab   :  { %203 = vst.msk [vmem:[%s683_s5 + $0x10] sm:$0xff] %vm200_vm1, %v166_v46  ;;  %v258_v52 = vmul.f32 %v166_v46, %v166_v46  ;;  %v220_v55 = vsel %vm200_vm1, %v166_v46, 0.0  ;;  %v262_v18 = vmul.f32 %v176_v47, %v176_v47  ;;  %v228_v26 = vsel %vm200_vm1, %v176_v47, 0.0 }
  0xac   :  { %207 = vst.msk [vmem:[%s683_s5 + $0x30] sm:$0xff] %vm200_vm1, %v176_v47  ;;  %v221_v4 = vadd.f32 %v220_v55, %v219_v59  ;;  %v289_v47 = vsel %vm200_vm1, %v265_v35, 0.0 }
  0xad   :  { %214 = vst.msk [vmem:[%s683_s5 + $0x68] sm:$0xff] %vm200_vm1, %v572_v48  ;;  %v275_v63 = vsel %vm200_vm1, %v258_v52, 0.0  ;;  %v283_v31 = vsel %vm200_vm1, %v262_v18, 0.0  ;;  %v268_v52 = vmul.f32 %v546_v40, %v546_v40 }
  0xae   :  { %v276_v8 = vadd.f32 %v275_v63, %v274_v3 }
  0xaf   :  { %v185_v56 = vpop.f32.mrf.mxu2  ;;  %v195_v57 = vpop.f32.mrf.mxu3 }
  0xb0   :  { %v167_v60 = vpop.f32.mrf.mxu0  ;;  %v177_v61 = vpop.f32.mrf.mxu1  ;;  %v186_v62 = vadd.f32 %v528_v22, %v185_v56  ;;  %v602_v2 = vadd.f32 %v528_v22, %v195_v57  ;;  %v269_v57 = vmul.f32 %v572_v48, %v572_v48 }
  0xb1   :  { %v168_v0 = vadd.f32 %v528_v22, %v167_v60  ;;  %v178_v1 = vadd.f32 %v528_v22, %v177_v61  ;;  %v295_v61 = vsel %vm200_vm1, %v268_v52, 0.0 }
  0xb2   :  { %211 = vst.msk [vmem:[%s683_s5 + $0x50] sm:$0xff] %vm200_vm1, %v186_v62  ;;  %v266_v43 = vmul.f32 %v186_v62, %v186_v62  ;;  %v236_v49 = vsel %vm200_vm1, %v186_v62, 0.0  ;;  %v242_v62 = vsel %vm200_vm1, %v572_v48, 0.0  ;;  %v270_v63 = vmul.f32 %v602_v2, %v602_v2 }
  0xb3   :  { %204 = vst.msk [vmem:[%s683_s5 + $0x18] sm:$0xff] %vm200_vm1, %v168_v0  ;;  %v222_v6 = vsel %vm200_vm1, %v168_v0, 0.0  ;;  %v259_v7 = vmul.f32 %v168_v0, %v168_v0  ;;  %v263_v27 = vmul.f32 %v178_v1, %v178_v1  ;;  %v230_v32 = vsel %vm200_vm1, %v178_v1, 0.0 }
  0xb4   :  { %v223_v10 = vadd.f32 %v222_v6, %v221_v4  ;;  %208 = vst.msk [vmem:[%s683_s5 + $0x38] sm:$0xff] %vm200_vm1, %v178_v1  ;;  %v291_v53 = vsel %vm200_vm1, %v266_v43, 0.0  ;;  %v297_v3 = vsel %vm200_vm1, %v269_v57, 0.0  ;;  %v244_v40 = vsel %vm200_vm1, %v602_v2, 0.0 }
  0xb5   :  { %v277_v13 = vsel %vm200_vm1, %v259_v7, 0.0  ;;  %215 = vst.msk [vmem:[%s683_s5 + $0x70] sm:$0xff] %vm200_vm1, %v602_v2  ;;  %v285_v36 = vsel %vm200_vm1, %v263_v27, 0.0  ;;  %v299_v7 = vsel %vm200_vm1, %v270_v63, 0.0 }
  0xb6   :  { %v225_v14 = vadd.f32 %v224_v11, %v223_v10  ;;  %v278_v15 = vadd.f32 %v277_v13, %v276_v8 }
  0xb7   :  { %v187_v19 = vpop.f32.mrf.mxu2  ;;  %v197_v9 = vpop.f32.mrf.mxu3 }
  0xb8   :  { %v280_v20 = vadd.f32 %v279_v16, %v278_v15  ;;  %v227_v21 = vadd.f32 %v226_v17, %v225_v14  ;;  %v188_v23 = vadd.f32 %v528_v22, %v187_v19  ;;  %v198_v24 = vadd.f32 %v528_v22, %v197_v9 }
  0xba   :  { %v229_v28 = vadd.f32 %v228_v26, %v227_v21  ;;  %v282_v29 = vadd.f32 %v281_v25, %v280_v20  ;;  %212 = vst.msk [vmem:[%s683_s5 + $0x58] sm:$0xff] %vm200_vm1, %v188_v23  ;;  %v267_v37 = vmul.f32 %v188_v23, %v188_v23  ;;  %v238_v54 = vsel %vm200_vm1, %v188_v23, 0.0 }
  0xbb   :  { %216 = vst.msk [vmem:[%s683_s5 + $0x78] sm:$0xff] %vm200_vm1, %v198_v24  ;;  %v271_v4 = vmul.f32 %v198_v24, %v198_v24  ;;  %v246_v8 = vsel %vm200_vm1, %v198_v24, 0.0 }
  0xbc   :  { %v231_v22 = vadd.f32 %v230_v32, %v229_v28  ;;  %v284_v33 = vadd.f32 %v283_v31, %v282_v29  ;;  %v293_v58 = vsel %vm200_vm1, %v267_v37, 0.0 }
  0xbd   :  { %v301_v48 = vsel %vm200_vm1, %v271_v4, 0.0 }
  0xbe   :  { %v233_v38 = vadd.f32 %v232_v34, %v231_v22  ;;  %v286_v39 = vadd.f32 %v285_v36, %v284_v33 }
  0xc0   :  { %v288_v44 = vadd.f32 %v287_v41, %v286_v39  ;;  %v235_v46 = vadd.f32 %v234_v42, %v233_v38 }
  0xc2   :  { %v237_v50 = vadd.f32 %v236_v49, %v235_v46  ;;  %v290_v51 = vadd.f32 %v289_v47, %v288_v44 }
  0xc4   :  { %v292_v55 = vadd.f32 %v291_v53, %v290_v51  ;;  %v239_v56 = vadd.f32 %v238_v54, %v237_v50 }
  0xc6   :  { %v241_v59 = vadd.f32 %v240_v45, %v239_v56  ;;  %v294_v60 = vadd.f32 %v293_v58, %v292_v55 }
  0xc8   :  { %v296_v0 = vadd.f32 %v295_v61, %v294_v60  ;;  %v243_v1 = vadd.f32 %v242_v62, %v241_v59 }
  0xca   :  { %v245_v5 = vadd.f32 %v244_v40, %v243_v1  ;;  %v298_v6 = vadd.f32 %v297_v3, %v296_v0 }
  0xcc   :  { %v300_v10 = vadd.f32 %v299_v7, %v298_v6  ;;  %v247_v11 = vadd.f32 %v246_v8, %v245_v5 }
  0xce   :  { %v248_v12 = vrot.slane %v247_v11, 4  ;;  %v302_v13 = vadd.f32 %v301_v48, %v300_v10 }
  0xd0   :  { %v249_v14 = vadd.f32 %v248_v12, %v247_v11  ;;  %v303_v15 = vrot.slane %v302_v13, 4 }
  0xd2   :  { %v250_v16 = vrot.slane %v249_v14, 2  ;;  %v304_v17 = vadd.f32 %v303_v15, %v302_v13 }
  0xd4   :  { %v251_v18 = vadd.f32 %v250_v16, %v249_v14  ;;  %v305_v19 = vrot.slane %v304_v17, 2 }
  0xd6   :  { %v252_v2 = vrot.slane %v251_v18, 1  ;;  %v306_v9 = vadd.f32 %v305_v19, %v304_v17 }
  0xd8   :  { %v253_v20 = vadd.f32 %v252_v2, %v251_v18  ;;  %v307_v21 = vrot.slane %v306_v9, 1 }
  0xda   :  { %255 = vst.msk [vmem:[%s684_s6] sm:$0x1] %vm254_vm2, %v253_v20  ;;  %v308_v23 = vadd.f32 %v307_v21, %v306_v9 }
  0xdc   :  { %309 = vst.msk [vmem:[%s685_s7] sm:$0x1] %vm254_vm2, %v308_v23 }

// kernel: critic_forward.27
= control target key start
LH: loop header
LB: loop body
LE: loop exit
PB: predicated region body
PF: predicated region fallthrough
CT: control target
= control target key end

     0   :  { %s803_s15 = smov 0   ;;  %s1174_s0 = inlined_call_operand.vmem [shape: f32[512,48], index: 0, kind: input, shape index: {}]   ;;  %s1175_s1 = inlined_call_operand.vmem [shape: f32[48,32], index: 1, kind: input, shape index: {}]   ;;  %s1176_s2 = inlined_call_operand.vmem [shape: f32[512,32], index: 2, kind: output, shape index: {0}]   ;;  %s1177_s3 = inlined_call_operand.vmem [shape: f32[2,1,32], index: 3, kind: output, shape index: {1}]   ;;  %s1178_s4 = inlined_call_operand.vmem [shape: f32[2,1,32], index: 4, kind: output, shape index: {2}]  }
   0x1 LB: > { %s809_s16 = sadd.s32 4294967295, %s776_s15   ;;  %p730_p0 = scmp.ge.s32.totalorder %s776_s15, 1  ;;  %s776_s15 = sphi %s803_s15, %s15_s15  }
   0x2   : > { %p168_p1 = scmp.lt.s32.totalorder %s776_s15, 3 }
   0x4   : > { %p169_p2 = pnand %p730_p0, %p168_p1 }
   0x5   : > { %s731_s23 = sshll.u32 (!%p169_p2), %s809_s16, 5  ;;  %p212_p4 = scmp.lt.s32.totalorder (!%p169_p2), %s809_s16, 1 }
   0x6   : > { %172 = sbr.rel (%p169_p2) target bundleno = 273 (0x111), region = 28  ;;  %p201_p3 = scmp.lt.s32.totalorder (!%p169_p2), %s731_s23, 63 }
   0xb   : > { %v271_v0 = vld [vmem:[%s1175_s1 + $0x20] sm:$0xff]  ;;  %v272_v1 = vld [vmem:[%s1175_s1 + $0x28] sm:$0xff]  ;;  %v269_v2 = vld [vmem:[%s1175_s1 + $0x10] sm:$0xff]  ;;  %s1180_s23 = smov (!%p201_p3, %s731_s23), 63  ;;  %vm276_vm0 = vcmask 392192   ;;  %vm414_vm1 = vcmask 261120  }
   0xc   : > { %v275_v3 = vpack.c.bf16 %v272_v1, %v271_v0  ;;  %v270_v4 = vld [vmem:[%s1175_s1 + $0x18] sm:$0xff]  ;;  %v267_v6 = vld [vmem:[%s1175_s1] sm:$0xff]  ;;  %v268_v7 = vld [vmem:[%s1175_s1 + $0x8] sm:$0xff]  ;;  %s732_s30 = sshll.u32 %s1180_s23, 3  ;;  %s1182_s16 = smov (!%p212_p4, %s809_s16), 1  ;;  %vm516_vm2 = vcmask 253952  }
   0xd   : > { %v274_v5 = vpack.c.bf16 %v270_v4, %v269_v2  ;;  %s840_s7 = scalar_lea.vmem %s1174_s0, %s732_s30  ;;  %v273_v8 = vpack.c.bf16 %v268_v7, %v267_v6  ;;  %s895_s10 = scalar_lea.vmem %s1176_s2, %s732_s30 }
   0xe   : > { %330 = vmatpush.bf16.msra.mxu0 %v275_v3  ;;  %753 = vmatpush.bf16.msra.mxu1 %v275_v3  ;;  %v219_v9 = vld [vmem:[%s840_s7] sm:$0xff]  ;;  %v220_v10 = vld [vmem:[%s840_s7 + $0x8] sm:$0xff]  ;;  %v221_v21 = vld [vmem:[%s840_s7 + $0x10] sm:$0xff]  ;;  %s214_s13 = scalar_lea.vmem %s1177_s3, %s1182_s16  ;;  %s217_s18 = scalar_lea.vmem %s1178_s4, %s1182_s16 }
   0xf   : > { %754 = vmatpush.bf16.msra.mxu2 %v275_v3  ;;  %755 = vmatpush.bf16.msra.mxu3 %v275_v3  ;;  %v227_v11 = vld [vmem:[%s840_s7 + $0x40] sm:$0xff]  ;;  %v228_v12 = vld [vmem:[%s840_s7 + $0x48] sm:$0xff]  ;;  %v251_v15 = vpack.c.bf16 %v220_v10, %v219_v9  ;;  %v222_v22 = vld [vmem:[%s840_s7 + $0x18] sm:$0xff] }
  0x10   : > { %v235_v13 = vld [vmem:[%s840_s7 + $0x80] sm:$0xff]  ;;  %v236_v14 = vld [vmem:[%s840_s7 + $0x88] sm:$0xff]  ;;  %v255_v16 = vpack.c.bf16 %v228_v12, %v227_v11  ;;  %v229_v23 = vld [vmem:[%s840_s7 + $0x50] sm:$0xff]  ;;  %v252_v27 = vpack.c.bf16 %v222_v22, %v221_v21 }
  0x11   : > { %v259_v17 = vpack.c.bf16 %v236_v14, %v235_v13  ;;  %v243_v18 = vld [vmem:[%s840_s7 + $0xc0] sm:$0xff]  ;;  %v244_v19 = vld [vmem:[%s840_s7 + $0xc8] sm:$0xff]  ;;  %v230_v24 = vld [vmem:[%s840_s7 + $0x58] sm:$0xff] }
  0x12   : > { %331 = vmatpush.bf16.msra.mxu0 %v274_v5  ;;  %756 = vmatpush.bf16.msra.mxu1 %v274_v5  ;;  %v263_v20 = vpack.c.bf16 %v244_v19, %v243_v18  ;;  %v237_v25 = vld [vmem:[%s840_s7 + $0x90] sm:$0xff]  ;;  %v238_v26 = vld [vmem:[%s840_s7 + $0x98] sm:$0xff]  ;;  %v256_v28 = vpack.c.bf16 %v230_v24, %v229_v23  ;;  %v223_v33 = vld [vmem:[%s840_s7 + $0x20] sm:$0xff] }
  0x13   : > { %757 = vmatpush.bf16.msra.mxu2 %v274_v5  ;;  %758 = vmatpush.bf16.msra.mxu3 %v274_v5  ;;  %v260_v29 = vpack.c.bf16 %v238_v26, %v237_v25  ;;  %v245_v30 = vld [vmem:[%s840_s7 + $0xd0] sm:$0xff]  ;;  %v246_v31 = vld [vmem:[%s840_s7 + $0xd8] sm:$0xff]  ;;  %v224_v34 = vld [vmem:[%s840_s7 + $0x28] sm:$0xff] }
  0x14   : > { %v264_v32 = vpack.c.bf16 %v246_v31, %v245_v30  ;;  %v231_v35 = vld [vmem:[%s840_s7 + $0x60] sm:$0xff]  ;;  %v232_v36 = vld [vmem:[%s840_s7 + $0x68] sm:$0xff]  ;;  %v253_v39 = vpack.c.bf16 %v224_v34, %v223_v33  ;;  %v225_v45 = vld [vmem:[%s840_s7 + $0x30] sm:$0xff] }
  0x15   : > { %v239_v37 = vld [vmem:[%s840_s7 + $0xa0] sm:$0xff]  ;;  %v240_v38 = vld [vmem:[%s840_s7 + $0xa8] sm:$0xff]  ;;  %v257_v40 = vpack.c.bf16 %v232_v36, %v231_v35  ;;  %v226_v46 = vld [vmem:[%s840_s7 + $0x38] sm:$0xff] }
  0x16   : > { %332 = vmatpush.bf16.msra.mxu0 %v273_v8  ;;  %759 = vmatpush.bf16.msra.mxu1 %v273_v8  ;;  %v247_v41 = vld [vmem:[%s840_s7 + $0xe0] sm:$0xff]  ;;  %v248_v42 = vld [vmem:[%s840_s7 + $0xe8] sm:$0xff]  ;;  %v261_v43 = vpack.c.bf16 %v240_v38, %v239_v37  ;;  %v233_v47 = vld [vmem:[%s840_s7 + $0x70] sm:$0xff]  ;;  %v254_v51 = vpack.c.bf16 %v226_v46, %v225_v45 }
  0x17   : > { %760 = vmatpush.bf16.msra.mxu2 %v273_v8  ;;  %761 = vmatpush.bf16.msra.mxu3 %v273_v8  ;;  %v265_v44 = vpack.c.bf16 %v248_v42, %v247_v41  ;;  %v234_v48 = vld [vmem:[%s840_s7 + $0x78] sm:$0xff]  ;;  %v241_v49 = vld [vmem:[%s840_s7 + $0xb0] sm:$0xff] }
  0x18   : > { %v242_v50 = vld [vmem:[%s840_s7 + $0xb8] sm:$0xff]  ;;  %v258_v52 = vpack.c.bf16 %v234_v48, %v233_v47  ;;  %v249_v53 = vld [vmem:[%s840_s7 + $0xf0] sm:$0xff] }
  0x19   : > { %735 = vmatmul.msk.bf16.vlgmr.msra.gmra.mxu0 %vm276_vm0, %v251_v15  ;;  %739 = vmatmul.msk.bf16.vlgmr.msra.gmra.mxu1 %vm276_vm0, %v255_v16  ;;  %v250_v54 = vld [vmem:[%s840_s7 + $0xf8] sm:$0xff]  ;;  %v262_v55 = vpack.c.bf16 %v242_v50, %v241_v49 }
  0x1a   : > { %743 = vmatmul.msk.bf16.vlgmr.msra.gmra.mxu2 %vm276_vm0, %v259_v17  ;;  %747 = vmatmul.msk.bf16.vlgmr.msra.gmra.mxu3 %vm276_vm0, %v263_v20  ;;  %v266_v56 = vpack.c.bf16 %v250_v54, %v249_v53 }
  0x29   : > { %736 = vmatmul.msk.bf16.gmra.mxu0 %vm276_vm0, %v252_v27  ;;  %740 = vmatmul.msk.bf16.gmra.mxu1 %vm276_vm0, %v256_v28 }
  0x2a   : > { %744 = vmatmul.msk.bf16.gmra.mxu2 %vm276_vm0, %v260_v29  ;;  %748 = vmatmul.msk.bf16.gmra.mxu3 %vm276_vm0, %v264_v32 }
  0x39   : > { %737 = vmatmul.msk.bf16.gmra.mxu0 %vm276_vm0, %v253_v39  ;;  %741 = vmatmul.msk.bf16.gmra.mxu1 %vm276_vm0, %v257_v40 }
  0x3a   : > { %745 = vmatmul.msk.bf16.gmra.mxu2 %vm276_vm0, %v261_v43  ;;  %749 = vmatmul.msk.bf16.gmra.mxu3 %vm276_vm0, %v265_v44 }
  0x49   : > { %738 = vmatmul.msk.bf16.gmra.mxu0 %vm276_vm0, %v254_v51  ;;  %742 = vmatmul.msk.bf16.gmra.mxu1 %vm276_vm0, %v258_v52 }
  0x4a   : > { %746 = vmatmul.msk.bf16.gmra.mxu2 %vm276_vm0, %v262_v55  ;;  %750 = vmatmul.msk.bf16.gmra.mxu3 %vm276_vm0, %v266_v56 }
  0x96   : > { %v334_v57 = vpop.f32.mrf.mxu0  ;;  %v897_v58 = vpop.f32.mrf.mxu1 }
  0x97   : > { %415 = vst.msk [vmem:[%s895_s10] sm:$0xff] %vm414_vm1, %v334_v57  ;;  %v518_v16 = vmul.f32 %v334_v57, %v334_v57  ;;  %v447_v19 = vsel %vm414_vm1, %v334_v57, 0.0  ;;  %v526_v54 = vmul.f32 %v897_v58, %v897_v58 }
  0x98   : > { %423 = vst.msk [vmem:[%s895_s10 + $0x40] sm:$0xff] %vm414_vm1, %v897_v58 }
  0x99   : > { %v550_v24 = vsel %vm414_vm1, %v518_v16, 0.0 }
  0x9d   : > { %v904_v59 = vpop.f32.mrf.mxu2  ;;  %v913_v62 = vpop.f32.mrf.mxu3 }
  0x9e   : > { %v336_v60 = vpop.f32.mrf.mxu0  ;;  %v906_v61 = vpop.f32.mrf.mxu1  ;;  %431 = vst.msk [vmem:[%s895_s10 + $0x80] sm:$0xff] %vm414_vm1, %v904_v59 }
  0x9f   : > { %416 = vst.msk [vmem:[%s895_s10 + $0x8] sm:$0xff] %vm414_vm1, %v336_v60  ;;  %v519_v14 = vmul.f32 %v336_v60, %v336_v60  ;;  %v448_v17 = vsel %vm414_vm1, %v336_v60, 0.0 }
  0xa0   : > { %424 = vst.msk [vmem:[%s895_s10 + $0x48] sm:$0xff] %vm414_vm1, %v906_v61  ;;  %v449_v23 = vadd.f32 %v448_v17, %v447_v19  ;;  %v565_v17 = vsel %vm414_vm1, %v526_v54, 0.0 }
  0xa1   : > { %439 = vst.msk [vmem:[%s895_s10 + $0xc0] sm:$0xff] %vm414_vm1, %v913_v62  ;;  %v551_v20 = vsel %vm414_vm1, %v519_v14, 0.0 }
  0xa2   : > { %v552_v29 = vadd.f32 %v551_v20, %v550_v24 }
  0xa5   : > { %v921_v63 = vpop.f32.mrf.mxu2  ;;  %v930_v2 = vpop.f32.mrf.mxu3 }
  0xa6   : > { %v339_v0 = vpop.f32.mrf.mxu0  ;;  %v923_v1 = vpop.f32.mrf.mxu1  ;;  %432 = vst.msk [vmem:[%s895_s10 + $0x88] sm:$0xff] %vm414_vm1, %v921_v63  ;;  %v535_v54 = vmul.f32 %v921_v63, %v921_v63 }
  0xa7   : > { %417 = vst.msk [vmem:[%s895_s10 + $0x10] sm:$0xff] %vm414_vm1, %v339_v0  ;;  %v520_v18 = vmul.f32 %v339_v0, %v339_v0  ;;  %v450_v21 = vsel %vm414_vm1, %v339_v0, 0.0  ;;  %v528_v19 = vmul.f32 %v923_v1, %v923_v1 }
  0xa8   : > { %425 = vst.msk [vmem:[%s895_s10 + $0x50] sm:$0xff] %vm414_vm1, %v923_v1  ;;  %v451_v30 = vadd.f32 %v450_v21, %v449_v23 }
  0xa9   : > { %440 = vst.msk [vmem:[%s895_s10 + $0xc8] sm:$0xff] %vm414_vm1, %v930_v2  ;;  %v553_v25 = vsel %vm414_vm1, %v520_v18, 0.0  ;;  %v464_v18 = vsel %vm414_vm1, %v906_v61, 0.0 }
  0xaa   : > { %v554_v37 = vadd.f32 %v553_v25, %v552_v29 }
  0xad   : > { %v938_v3 = vpop.f32.mrf.mxu2  ;;  %v947_v6 = vpop.f32.mrf.mxu3 }
  0xae   : > { %v341_v4 = vpop.f32.mrf.mxu0  ;;  %v940_v5 = vpop.f32.mrf.mxu1  ;;  %433 = vst.msk [vmem:[%s895_s10 + $0x90] sm:$0xff] %vm414_vm1, %v938_v3 }
  0xaf   : > { %418 = vst.msk [vmem:[%s895_s10 + $0x18] sm:$0xff] %vm414_vm1, %v341_v4  ;;  %v521_v22 = vmul.f32 %v341_v4, %v341_v4  ;;  %v452_v26 = vsel %vm414_vm1, %v341_v4, 0.0  ;;  %v462_v4 = vsel %vm414_vm1, %v897_v58, 0.0  ;;  %v529_v23 = vmul.f32 %v940_v5, %v940_v5 }
  0xb0   : > { %426 = vst.msk [vmem:[%s895_s10 + $0x58] sm:$0xff] %vm414_vm1, %v940_v5  ;;  %v453_v38 = vadd.f32 %v452_v26, %v451_v30 }
  0xb1   : > { %441 = vst.msk [vmem:[%s895_s10 + $0xd0] sm:$0xff] %vm414_vm1, %v947_v6  ;;  %v555_v33 = vsel %vm414_vm1, %v521_v22, 0.0  ;;  %v466_v22 = vsel %vm414_vm1, %v923_v1, 0.0 }
  0xb2   : > { %v556_v42 = vadd.f32 %v555_v33, %v554_v37  ;;  %v571_v33 = vsel %vm414_vm1, %v529_v23, 0.0 }
  0xb5   : > { %v955_v7 = vpop.f32.mrf.mxu2  ;;  %v964_v10 = vpop.f32.mrf.mxu3 }
  0xb6   : > { %v344_v8 = vpop.f32.mrf.mxu0  ;;  %v957_v9 = vpop.f32.mrf.mxu1  ;;  %434 = vst.msk [vmem:[%s895_s10 + $0x98] sm:$0xff] %vm414_vm1, %v955_v7 }
  0xb7   : > { %419 = vst.msk [vmem:[%s895_s10 + $0x20] sm:$0xff] %vm414_vm1, %v344_v8  ;;  %v522_v27 = vmul.f32 %v344_v8, %v344_v8  ;;  %v454_v34 = vsel %vm414_vm1, %v344_v8, 0.0  ;;  %v527_v8 = vmul.f32 %v906_v61, %v906_v61  ;;  %v569_v61 = vsel %vm414_vm1, %v528_v19, 0.0 }
  0xb8   : > { %427 = vst.msk [vmem:[%s895_s10 + $0x60] sm:$0xff] %vm414_vm1, %v957_v9  ;;  %v455_v43 = vadd.f32 %v454_v34, %v453_v38  ;;  %v530_v29 = vmul.f32 %v957_v9, %v957_v9  ;;  %v470_v34 = vsel %vm414_vm1, %v957_v9, 0.0 }
  0xb9   : > { %442 = vst.msk [vmem:[%s895_s10 + $0xd8] sm:$0xff] %vm414_vm1, %v964_v10  ;;  %v557_v39 = vsel %vm414_vm1, %v522_v27, 0.0  ;;  %v567_v21 = vsel %vm414_vm1, %v527_v8, 0.0  ;;  %v468_v27 = vsel %vm414_vm1, %v940_v5, 0.0 }
  0xba   : > { %v558_v46 = vadd.f32 %v557_v39, %v556_v42  ;;  %v573_v38 = vsel %vm414_vm1, %v530_v29, 0.0 }
  0xbd   : > { %v972_v11 = vpop.f32.mrf.mxu2  ;;  %v981_v15 = vpop.f32.mrf.mxu3 }
  0xbe   : > { %v346_v12 = vpop.f32.mrf.mxu0  ;;  %v974_v13 = vpop.f32.mrf.mxu1  ;;  %435 = vst.msk [vmem:[%s895_s10 + $0xa0] sm:$0xff] %vm414_vm1, %v972_v11  ;;  %v538_v19 = vmul.f32 %v972_v11, %v972_v11 }
  0xbf   : > { %420 = vst.msk [vmem:[%s895_s10 + $0x28] sm:$0xff] %vm414_vm1, %v346_v12  ;;  %v523_v35 = vmul.f32 %v346_v12, %v346_v12  ;;  %v456_v40 = vsel %vm414_vm1, %v346_v12, 0.0  ;;  %v472_v39 = vsel %vm414_vm1, %v974_v13, 0.0 }
  0xc0   : > { %428 = vst.msk [vmem:[%s895_s10 + $0x68] sm:$0xff] %vm414_vm1, %v974_v13  ;;  %v457_v47 = vadd.f32 %v456_v40, %v455_v43 }
  0xc1   : > { %443 = vst.msk [vmem:[%s895_s10 + $0xe0] sm:$0xff] %vm414_vm1, %v981_v15  ;;  %v559_v44 = vsel %vm414_vm1, %v523_v35, 0.0  ;;  %v531_v35 = vmul.f32 %v974_v13, %v974_v13 }
  0xc2   : > { %v560_v50 = vadd.f32 %v559_v44, %v558_v46 }
  0xc3   : > { %v575_v43 = vsel %vm414_vm1, %v531_v35, 0.0  ;;  %v542_v35 = vmul.f32 %v913_v62, %v913_v62 }
  0xc5   : > { %v996_v28 = vpop.f32.mrf.mxu2  ;;  %v1007_v36 = vpop.f32.mrf.mxu3 }
  0xc6   : > { %v349_v31 = vpop.f32.mrf.mxu0  ;;  %v998_v32 = vpop.f32.mrf.mxu1  ;;  %436 = vst.msk [vmem:[%s895_s10 + $0xa8] sm:$0xff] %vm414_vm1, %v996_v28 }
  0xc7   : > { %421 = vst.msk [vmem:[%s895_s10 + $0x30] sm:$0xff] %vm414_vm1, %v349_v31  ;;  %v524_v41 = vmul.f32 %v349_v31, %v349_v31  ;;  %v458_v45 = vsel %vm414_vm1, %v349_v31, 0.0  ;;  %v532_v40 = vmul.f32 %v998_v32, %v998_v32  ;;  %v474_v9 = vsel %vm414_vm1, %v998_v32, 0.0 }
  0xc8   : > { %429 = vst.msk [vmem:[%s895_s10 + $0x70] sm:$0xff] %vm414_vm1, %v998_v32  ;;  %v459_v51 = vadd.f32 %v458_v45, %v457_v47  ;;  %v534_v47 = vmul.f32 %v904_v59, %v904_v59 }
  0xc9   : > { %444 = vst.msk [vmem:[%s895_s10 + $0xe8] sm:$0xff] %vm414_vm1, %v1007_v36  ;;  %v561_v48 = vsel %vm414_vm1, %v524_v41, 0.0 }
  0xca   : > { %v562_v60 = vadd.f32 %v561_v48, %v560_v50  ;;  %v577_v48 = vsel %vm414_vm1, %v532_v40, 0.0 }
  0xcd   : > { %v1020_v49 = vpop.f32.mrf.mxu2  ;;  %v1030_v57 = vpop.f32.mrf.mxu3 }
  0xce   : > { %v351_v52 = vpop.f32.mrf.mxu0  ;;  %v371_v53 = vpop.f32.mrf.mxu1  ;;  %437 = vst.msk [vmem:[%s895_s10 + $0xb0] sm:$0xff] %vm414_vm1, %v1020_v49 }
  0xcf   : > { %422 = vst.msk [vmem:[%s895_s10 + $0x38] sm:$0xff] %vm414_vm1, %v351_v52  ;;  %v460_v55 = vsel %vm414_vm1, %v351_v52, 0.0  ;;  %v525_v56 = vmul.f32 %v351_v52, %v351_v52  ;;  %v533_v44 = vmul.f32 %v371_v53, %v371_v53  ;;  %v476_v13 = vsel %vm414_vm1, %v371_v53, 0.0 }
  0xd0   : > { %v461_v0 = vadd.f32 %v460_v55, %v459_v51  ;;  %430 = vst.msk [vmem:[%s895_s10 + $0x78] sm:$0xff] %vm414_vm1, %v371_v53  ;;  %v478_v52 = vsel %vm414_vm1, %v904_v59, 0.0  ;;  %v536_v53 = vmul.f32 %v938_v3, %v938_v3  ;;  %v482_v59 = vsel %vm414_vm1, %v938_v3, 0.0 }
  0xd1   : > { %v563_v12 = vsel %vm414_vm1, %v525_v56, 0.0  ;;  %445 = vst.msk [vmem:[%s895_s10 + $0xf0] sm:$0xff] %vm414_vm1, %v1030_v57  ;;  %v579_v32 = vsel %vm414_vm1, %v533_v44, 0.0  ;;  %v486_v3 = vsel %vm414_vm1, %v972_v11, 0.0  ;;  %v490_v11 = vsel %vm414_vm1, %v1020_v49, 0.0 }
  0xd2   : > { %v463_v14 = vadd.f32 %v462_v4, %v461_v0  ;;  %v564_v16 = vadd.f32 %v563_v12, %v562_v60  ;;  %v581_v60 = vsel %vm414_vm1, %v534_v47, 0.0  ;;  %v480_v0 = vsel %vm414_vm1, %v921_v63, 0.0 }
  0xd3   : > { %v583_v12 = vsel %vm414_vm1, %v535_v54, 0.0  ;;  %v484_v63 = vsel %vm414_vm1, %v955_v7, 0.0  ;;  %v545_v47 = vmul.f32 %v964_v10, %v964_v10 }
  0xd4   : > { %v465_v58 = vadd.f32 %v464_v18, %v463_v14  ;;  %v566_v20 = vadd.f32 %v565_v17, %v564_v16  ;;  %v537_v14 = vmul.f32 %v955_v7, %v955_v7  ;;  %v585_v18 = vsel %vm414_vm1, %v536_v53, 0.0 }
  0xd5   : > { %v1052_v24 = vpop.f32.mrf.mxu2  ;;  %v1062_v30 = vpop.f32.mrf.mxu3  ;;  %v488_v7 = vsel %vm414_vm1, %v996_v28, 0.0  ;;  %v548_v53 = vmul.f32 %v1030_v57, %v1030_v57 }
  0xd6   : > { %v467_v25 = vadd.f32 %v466_v22, %v465_v58  ;;  %v568_v26 = vadd.f32 %v567_v21, %v566_v20  ;;  %438 = vst.msk [vmem:[%s895_s10 + $0xb8] sm:$0xff] %vm414_vm1, %v1052_v24  ;;  %v587_v21 = vsel %vm414_vm1, %v537_v14, 0.0  ;;  %v539_v22 = vmul.f32 %v996_v28, %v996_v28 }
  0xd7   : > { %446 = vst.msk [vmem:[%s895_s10 + $0xf8] sm:$0xff] %vm414_vm1, %v1062_v30 }
  0xd8   : > { %v570_v1 = vadd.f32 %v569_v61, %v568_v26  ;;  %v469_v31 = vadd.f32 %v468_v27, %v467_v25  ;;  %v589_v26 = vsel %vm414_vm1, %v538_v19, 0.0  ;;  %v540_v61 = vmul.f32 %v1020_v49, %v1020_v49 }
  0xd9   : > { %v543_v49 = vmul.f32 %v930_v2, %v930_v2 }
  0xda   : > { %v471_v37 = vadd.f32 %v470_v34, %v469_v31  ;;  %v572_v5 = vadd.f32 %v571_v33, %v570_v1  ;;  %v591_v1 = vsel %vm414_vm1, %v539_v22, 0.0  ;;  %v541_v31 = vmul.f32 %v1052_v24, %v1052_v24 }
  0xdb   : > { %v593_v28 = vsel %vm414_vm1, %v540_v61, 0.0 }
  0xdc   : > { %v473_v41 = vadd.f32 %v472_v39, %v471_v37  ;;  %v574_v42 = vadd.f32 %v573_v38, %v572_v5  ;;  %v492_v37 = vsel %vm414_vm1, %v1052_v24, 0.0  ;;  %v494_v39 = vsel %vm414_vm1, %v913_v62, 0.0 }
  0xdd   : > { %v595_v40 = vsel %vm414_vm1, %v541_v31, 0.0  ;;  %v544_v24 = vmul.f32 %v947_v6, %v947_v6  ;;  %v498_v62 = vsel %vm414_vm1, %v947_v6, 0.0  ;;  %v502_v6 = vsel %vm414_vm1, %v981_v15, 0.0 }
  0xde   : > { %v475_v45 = vadd.f32 %v474_v9, %v473_v41  ;;  %v576_v46 = vadd.f32 %v575_v43, %v574_v42  ;;  %v597_v43 = vsel %vm414_vm1, %v542_v35, 0.0  ;;  %v496_v9 = vsel %vm414_vm1, %v930_v2, 0.0 }
  0xdf   : > { %v500_v2 = vsel %vm414_vm1, %v964_v10, 0.0  ;;  %v504_v10 = vsel %vm414_vm1, %v1007_v36, 0.0 }
  0xe0   : > { %v578_v50 = vadd.f32 %v577_v48, %v576_v46  ;;  %v477_v51 = vadd.f32 %v476_v13, %v475_v45  ;;  %v599_v46 = vsel %vm414_vm1, %v543_v49, 0.0 }
  0xe2   : > { %v479_v55 = vadd.f32 %v478_v52, %v477_v51  ;;  %v580_v56 = vadd.f32 %v579_v32, %v578_v50  ;;  %v601_v50 = vsel %vm414_vm1, %v544_v24, 0.0  ;;  %v546_v51 = vmul.f32 %v981_v15, %v981_v15 }
  0xe3   : > { %v603_v32 = vsel %vm414_vm1, %v545_v47, 0.0  ;;  %v506_v15 = vsel %vm414_vm1, %v1030_v57, 0.0 }
  0xe4   : > { %v481_v4 = vadd.f32 %v480_v0, %v479_v55  ;;  %v582_v8 = vadd.f32 %v581_v60, %v580_v56  ;;  %v547_v55 = vmul.f32 %v1007_v36, %v1007_v36  ;;  %v605_v0 = vsel %vm414_vm1, %v546_v51, 0.0 }
  0xe5   : > { %v508_v36 = vsel %vm414_vm1, %v1062_v30, 0.0 }
  0xe6   : > { %v483_v16 = vadd.f32 %v482_v59, %v481_v4  ;;  %v584_v17 = vadd.f32 %v583_v12, %v582_v8  ;;  %v607_v12 = vsel %vm414_vm1, %v547_v55, 0.0  ;;  %v549_v59 = vmul.f32 %v1062_v30, %v1062_v30 }
  0xe8   : > { %v586_v58 = vadd.f32 %v585_v18, %v584_v17  ;;  %v485_v20 = vadd.f32 %v484_v63, %v483_v16  ;;  %v609_v17 = vsel %vm414_vm1, %v548_v53, 0.0  ;;  %v611_v19 = vsel %vm414_vm1, %v549_v59, 0.0 }
  0xea   : > { %v487_v23 = vadd.f32 %v486_v3, %v485_v20  ;;  %v588_v25 = vadd.f32 %v587_v21, %v586_v58 }
  0xec   : > { %v489_v27 = vadd.f32 %v488_v7, %v487_v23  ;;  %v590_v29 = vadd.f32 %v589_v26, %v588_v25 }
  0xee   : > { %v592_v33 = vadd.f32 %v591_v1, %v590_v29  ;;  %v491_v34 = vadd.f32 %v490_v11, %v489_v27 }
  0xf0   : > { %v594_v5 = vadd.f32 %v593_v28, %v592_v33  ;;  %v493_v38 = vadd.f32 %v492_v37, %v491_v34 }
  0xf2   : > { %v495_v41 = vadd.f32 %v494_v39, %v493_v38  ;;  %v596_v42 = vadd.f32 %v595_v40, %v594_v5 }
  0xf4   : > { %v497_v44 = vadd.f32 %v496_v9, %v495_v41  ;;  %v598_v45 = vadd.f32 %v597_v43, %v596_v42 }
  0xf6   : > { %v499_v48 = vadd.f32 %v498_v62, %v497_v44  ;;  %v600_v13 = vadd.f32 %v599_v46, %v598_v45 }
  0xf8   : > { %v602_v52 = vadd.f32 %v601_v50, %v600_v13  ;;  %v501_v54 = vadd.f32 %v500_v2, %v499_v48 }
  0xfa   : > { %v503_v56 = vadd.f32 %v502_v6, %v501_v54  ;;  %v604_v60 = vadd.f32 %v603_v32, %v602_v52 }
  0xfc   : > { %v505_v4 = vadd.f32 %v504_v10, %v503_v56  ;;  %v606_v8 = vadd.f32 %v605_v0, %v604_v60 }
  0xfe   : > { %v608_v14 = vadd.f32 %v607_v12, %v606_v8  ;;  %v507_v16 = vadd.f32 %v506_v15, %v505_v4 }
 0x100   : > { %v610_v18 = vadd.f32 %v609_v17, %v608_v14  ;;  %v509_v63 = vadd.f32 %v508_v36, %v507_v16 }
 0x102   : > { %v510_v58 = vrot.slane %v509_v63, 4  ;;  %v612_v20 = vadd.f32 %v611_v19, %v610_v18 }
 0x104   : > { %v511_v21 = vadd.f32 %v510_v58, %v509_v63  ;;  %v613_v57 = vrot.slane %v612_v20, 4 }
 0x106   : > { %v512_v3 = vrot.slane %v511_v21, 2  ;;  %v614_v22 = vadd.f32 %v613_v57, %v612_v20 }
 0x108   : > { %v513_v23 = vadd.f32 %v512_v3, %v511_v21  ;;  %v615_v25 = vrot.slane %v614_v22, 2 }
 0x10a   : > { %v514_v26 = vrot.slane %v513_v23, 1  ;;  %v616_v7 = vadd.f32 %v615_v25, %v614_v22 }
 0x10c   : > { %v515_v30 = vadd.f32 %v514_v26, %v513_v23  ;;  %v617_v61 = vrot.slane %v616_v7, 1 }
 0x10e   : > { %517 = vst.msk [vmem:[%s214_s13] sm:$0x1] %vm516_vm2, %v515_v30  ;;  %v618_v27 = vadd.f32 %v617_v61, %v616_v7 }
 0x110   : > { %619 = vst.msk [vmem:[%s217_s18] sm:$0x1] %vm516_vm2, %v618_v27 }
 0x111 PF: > { %s15_s15 = sadd.s32 1, %s776_s15  }
 0x112   : > { %p12_p5 = scmp.ge.s32.totalorder %s15_s15, 4  }
 0x114   :  { %14 = sbr.rel (!%p12_p5) target bundleno = 1 (0x1), region = 82 }

// kernel: critic_forward.28
= control target key start
LH: loop header
LB: loop body
LE: loop exit
PB: predicated region body
PF: predicated region fallthrough
CT: control target
= control target key end

     0   :  { %s678_s12 = smov 0   ;;  %s680_s13 = smov 0   ;;  %s891_s0 = inlined_call_operand.vmem [shape: f32[8,64,32], index: 0, kind: input, shape index: {}]   ;;  %s892_s1 = inlined_call_operand.vmem [shape: f32[2,1,32], index: 1, kind: input, shape index: {}]   ;;  %s893_s2 = inlined_call_operand.vmem [shape: f32[2,1,32], index: 2, kind: input, shape index: {}]   ;;  %s894_s3 = inlined_call_operand.vmem [shape: f32[128,32], index: 3, kind: output, shape index: {}]  }
   0x1   :  { %s682_s14 = smov 0  }
   0x2 LB: > { %s25_s15 = sadd.s32 1, %s652_s13  ;;  %p599_p0 = scmp.ge.s32.totalorder %s656_s14, 1  ;;  %s656_s14 = sphi %s682_s14, %s13_s14   ;;  %s652_s13 = sphi %s680_s13, %s897_s13   ;;  %s648_s12 = sphi %s678_s12, %s896_s12  }
   0x3   : > { %p27_p1 = scmp.ge.s32.totalorder %s25_s15, 2  ;;  %p176_p2 = scmp.lt.s32.totalorder %s656_s14, 3 }
   0x5   : > { %s899_s15 = smov (%p27_p1, %s25_s15), 0  ;;  %p177_p3 = pnand %p599_p0, %p176_p2 }
   0x6   : > { %s600_s16 = sshll.u32 (!%p177_p3), %s648_s12, 2  ;;  %p224_p4 = scmp.lt.s32.totalorder (!%p177_p3), %s648_s12, 1 }
   0x7   : > { %180 = sbr.rel (%p177_p3) target bundleno = 79 (0x4f), region = 32  ;;  %p214_p5 = scmp.lt.s32.totalorder (!%p177_p3), %s600_s16, 7 }
   0x8   : > { %s603_s28 = sshll.u32 (!%p177_p3), %s648_s12, 3 }
   0x9   : > { %p728_p6 = scmp.lt.s32.totalorder (!%p177_p3), %s603_s28, 15 }
   0xc   : > { %s225_s17 = scalar_select %p224_p4, %s648_s12, 1  ;;  %vm438_vm0 = vcmask 261120  }
   0xd   : > { %s901_s16 = smov (!%p214_p5, %s600_s16), 7  ;;  %s903_s28 = smov (!%p728_p6, %s603_s28), 15 }
   0xe   : > { %s226_s20 = scalar_lea.vmem %s892_s1, %s225_s17  ;;  %s229_s23 = scalar_lea.vmem %s893_s2, %s225_s17 }
   0xf   : > { %s607_s24 = sshll.u32 %s901_s16, 6  ;;  %v707_v0 = vld [vmem:[%s226_s20] ss:$0 sm:$0xff]  ;;  %s604_s30 = sshll.u32 %s903_s28, 3 }
  0x10   : > { %s712_s27 = scalar_lea.vmem %s891_s0, %s607_s24  ;;  %v715_v1 = vld [vmem:[%s229_s23] ss:$0 sm:$0xff]  ;;  %s769_s6 = scalar_lea.vmem %s894_s3, %s604_s30 }
  0x11   : > { %v238_v2 = vld [vmem:[%s712_s27] sm:$0xff]  ;;  %v239_v9 = vld [vmem:[%s712_s27 + $0x8] sm:$0xff]  ;;  %v240_v34 = vld [vmem:[%s712_s27 + $0x10] sm:$0xff] }
  0x12   : > { %v246_v3 = vld [vmem:[%s712_s27 + $0x40] sm:$0xff]  ;;  %v274_v6 = vmul.f32 %v707_v0, %v238_v2  ;;  %v247_v10 = vld [vmem:[%s712_s27 + $0x48] sm:$0xff]  ;;  %v275_v14 = vmul.f32 %v707_v0, %v239_v9  ;;  %v248_v38 = vld [vmem:[%s712_s27 + $0x50] sm:$0xff]  ;;  %v276_v46 = vmul.f32 %v707_v0, %v240_v34 }
  0x13   : > { %v254_v4 = vld [vmem:[%s712_s27 + $0x80] sm:$0xff]  ;;  %v282_v7 = vmul.f32 %v707_v0, %v246_v3  ;;  %v255_v12 = vld [vmem:[%s712_s27 + $0x88] sm:$0xff]  ;;  %v283_v15 = vmul.f32 %v707_v0, %v247_v10  ;;  %v256_v39 = vld [vmem:[%s712_s27 + $0x90] sm:$0xff]  ;;  %v284_v50 = vmul.f32 %v707_v0, %v248_v38 }
  0x14   : > { %v262_v5 = vld [vmem:[%s712_s27 + $0xc0] sm:$0xff]  ;;  %v290_v8 = vmul.f32 %v707_v0, %v254_v4  ;;  %v263_v13 = vld [vmem:[%s712_s27 + $0xc8] sm:$0xff]  ;;  %v310_v16 = vadd.f32 %v715_v1, %v274_v6  ;;  %v291_v19 = vmul.f32 %v707_v0, %v255_v12  ;;  %v311_v22 = vadd.f32 %v715_v1, %v275_v14  ;;  %v264_v49 = vld [vmem:[%s712_s27 + $0xd0] sm:$0xff] }
  0x15   : > { %v298_v11 = vmul.f32 %v707_v0, %v262_v5  ;;  %v318_v17 = vadd.f32 %v715_v1, %v282_v7  ;;  %v299_v21 = vmul.f32 %v707_v0, %v263_v13  ;;  %v319_v23 = vadd.f32 %v715_v1, %v283_v15  ;;  %v241_v56 = vld [vmem:[%s712_s27 + $0x18] sm:$0xff] }
  0x16   : > { %v326_v18 = vadd.f32 %v715_v1, %v290_v8  ;;  %vm342_vm1 = vcmp.ge.f32.partialorder %v310_v16, 0.0  ;;  %v374_v24 = vmul.f32 0.2, %v310_v16  ;;  %v327_v27 = vadd.f32 %v715_v1, %v291_v19  ;;  %v249_v57 = vld [vmem:[%s712_s27 + $0x58] sm:$0xff] }
  0x17   : > { %v334_v20 = vadd.f32 %v715_v1, %v298_v11  ;;  %vm350_vm2 = vcmp.ge.f32.partialorder %v318_v17, 0.0  ;;  %v382_v25 = vmul.f32 0.2, %v318_v17  ;;  %v335_v30 = vadd.f32 %v715_v1, %v299_v21  ;;  %v257_v58 = vld [vmem:[%s712_s27 + $0x98] sm:$0xff] }
  0x18   : > { %vm358_vm3 = vcmp.ge.f32.partialorder %v326_v18, 0.0  ;;  %v390_v26 = vmul.f32 0.2, %v326_v18  ;;  %v406_v29 = vsel %vm342_vm1, %v310_v16, %v374_v24  ;;  %vm343_vm5 = vcmp.ge.f32.partialorder %v311_v22, 0.0  ;;  %v265_v5 = vld [vmem:[%s712_s27 + $0xd8] sm:$0xff] }
  0x19   : > { %vm366_vm4 = vcmp.ge.f32.partialorder %v334_v20, 0.0  ;;  %v398_v28 = vmul.f32 0.2, %v334_v20  ;;  %v414_v31 = vsel %vm350_vm2, %v318_v17, %v382_v25  ;;  %v439_v33 = vsel %vm438_vm0, %v406_v29, -inf }
  0x1a   : > { %v422_v32 = vsel %vm358_vm3, %v326_v18, %v390_v26  ;;  %vm351_vm6 = vcmp.ge.f32.partialorder %v319_v23, 0.0  ;;  %v440_v36 = vsel %vm438_vm0, %v414_v31, -inf  ;;  %vm359_vm7 = vcmp.ge.f32.partialorder %v327_v27, 0.0 }
  0x1b   : > { %v430_v35 = vsel %vm366_vm4, %v334_v20, %v398_v28  ;;  %v442_v37 = vsel %vm438_vm0, %v422_v32, -inf  ;;  %v441_v40 = vmax.f32 %v439_v33, %v440_v36  ;;  %vm367_vm8 = vcmp.ge.f32.partialorder %v335_v30, 0.0  ;;  %v250_v36 = vld [vmem:[%s712_s27 + $0x60] sm:$0xff] }
  0x1c   : > { %v444_v41 = vsel %vm438_vm0, %v430_v35, -inf  ;;  %v375_v42 = vmul.f32 0.2, %v311_v22  ;;  %v383_v43 = vmul.f32 0.2, %v319_v23  ;;  %v292_v51 = vmul.f32 %v707_v0, %v256_v39  ;;  %v258_v39 = vld [vmem:[%s712_s27 + $0xa0] sm:$0xff] }
  0x1d   : > { %v391_v44 = vmul.f32 0.2, %v327_v27  ;;  %v399_v45 = vmul.f32 0.2, %v335_v30  ;;  %v443_v47 = vmax.f32 %v441_v40, %v442_v37  ;;  %v300_v2 = vmul.f32 %v707_v0, %v264_v49  ;;  %v266_v40 = vld [vmem:[%s712_s27 + $0xe0] sm:$0xff] }
  0x1e   : > { %v407_v48 = vsel %vm343_vm5, %v311_v22, %v375_v42  ;;  %v415_v52 = vsel %vm351_vm6, %v319_v23, %v383_v43  ;;  %v312_v3 = vadd.f32 %v715_v1, %v276_v46  ;;  %v320_v4 = vadd.f32 %v715_v1, %v284_v50  ;;  %v243_v46 = vld [vmem:[%s712_s27 + $0x28] sm:$0xff] }
  0x1f   : > { %v423_v53 = vsel %vm359_vm7, %v327_v27, %v391_v44  ;;  %v431_v54 = vsel %vm367_vm8, %v335_v30, %v399_v45  ;;  %v446_v55 = vsel %vm438_vm0, %v407_v48, -inf  ;;  %v445_v59 = vmax.f32 %v443_v47, %v444_v41  ;;  %v242_v30 = vld [vmem:[%s712_s27 + $0x20] sm:$0xff]  ;;  %v251_v47 = vld [vmem:[%s712_s27 + $0x68] sm:$0xff] }
  0x20   : > { %v447_v60 = vsel %vm438_vm0, %v415_v52, -inf  ;;  %v449_v61 = vsel %vm438_vm0, %v423_v53, -inf  ;;  %v451_v62 = vsel %vm438_vm0, %v431_v54, -inf  ;;  %v328_v6 = vadd.f32 %v715_v1, %v292_v51  ;;  %v259_v52 = vld [vmem:[%s712_s27 + $0xa8] sm:$0xff] }
  0x21   : > { %v448_v63 = vmax.f32 %v446_v55, %v447_v60  ;;  %495 = vst.msk [vmem:[%s769_s6] sm:$0xff] %vm438_vm0, %v445_v59  ;;  %v277_v7 = vmul.f32 %v707_v0, %v241_v56  ;;  %v285_v8 = vmul.f32 %v707_v0, %v249_v57  ;;  %v293_v9 = vmul.f32 %v707_v0, %v257_v58 }
  0x22   : > { %v336_v11 = vadd.f32 %v715_v1, %v300_v2  ;;  %vm344_vm9 = vcmp.ge.f32.partialorder %v312_v3, 0.0  ;;  %vm352_vm10 = vcmp.ge.f32.partialorder %v320_v4, 0.0  ;;  %vm360_vm11 = vcmp.ge.f32.partialorder %v328_v6, 0.0  ;;  %v267_v2 = vld [vmem:[%s712_s27 + $0xe8] sm:$0xff] }
  0x23   : > { %v450_v10 = vmax.f32 %v448_v63, %v449_v61  ;;  %v376_v12 = vmul.f32 0.2, %v312_v3  ;;  %v384_v13 = vmul.f32 0.2, %v320_v4  ;;  %v301_v14 = vmul.f32 %v707_v0, %v265_v5 }
  0x24   : > { %vm368_vm12 = vcmp.ge.f32.partialorder %v336_v11, 0.0  ;;  %v392_v16 = vmul.f32 0.2, %v328_v6  ;;  %v400_v17 = vmul.f32 0.2, %v336_v11  ;;  %v313_v20 = vadd.f32 %v715_v1, %v277_v7 }
  0x25   : > { %v452_v15 = vmax.f32 %v450_v10, %v451_v62  ;;  %v408_v18 = vsel %vm344_vm9, %v312_v3, %v376_v12  ;;  %v416_v19 = vsel %vm352_vm10, %v320_v4, %v384_v13  ;;  %v321_v21 = vadd.f32 %v715_v1, %v285_v8 }
  0x26   : > { %v424_v22 = vsel %vm360_vm11, %v328_v6, %v392_v16  ;;  %v432_v23 = vsel %vm368_vm12, %v336_v11, %v400_v17  ;;  %v453_v24 = vsel %vm438_vm0, %v408_v18, -inf  ;;  %v454_v25 = vsel %vm438_vm0, %v416_v19, -inf }
  0x27   : > { %496 = vst.msk [vmem:[%s769_s6 + $0x8] sm:$0xff] %vm438_vm0, %v452_v15  ;;  %v455_v26 = vmax.f32 %v453_v24, %v454_v25  ;;  %v456_v27 = vsel %vm438_vm0, %v424_v22, -inf  ;;  %v458_v28 = vsel %vm438_vm0, %v432_v23, -inf  ;;  %v329_v29 = vadd.f32 %v715_v1, %v293_v9  ;;  %v244_v23 = vld [vmem:[%s712_s27 + $0x30] sm:$0xff] }
  0x28   : > { %v337_v31 = vadd.f32 %v715_v1, %v301_v14  ;;  %vm345_vm13 = vcmp.ge.f32.partialorder %v313_v20, 0.0  ;;  %vm353_vm14 = vcmp.ge.f32.partialorder %v321_v21, 0.0  ;;  %v377_v32 = vmul.f32 0.2, %v313_v20 }
  0x29   : > { %v457_v33 = vmax.f32 %v455_v26, %v456_v27  ;;  %vm361_vm15 = vcmp.ge.f32.partialorder %v329_v29, 0.0  ;;  %v385_v34 = vmul.f32 0.2, %v321_v21  ;;  %v393_v35 = vmul.f32 0.2, %v329_v29  ;;  %v252_v27 = vld [vmem:[%s712_s27 + $0x70] sm:$0xff] }
  0x2a   : > { %vm369_vm1 = vcmp.ge.f32.partialorder %v337_v31, 0.0  ;;  %v401_v37 = vmul.f32 0.2, %v337_v31  ;;  %v409_v38 = vsel %vm345_vm13, %v313_v20, %v377_v32  ;;  %v278_v41 = vmul.f32 %v707_v0, %v242_v30 }
  0x2b   : > { %v459_v42 = vmax.f32 %v457_v33, %v458_v28  ;;  %v417_v43 = vsel %vm353_vm14, %v321_v21, %v385_v34  ;;  %v425_v44 = vsel %vm361_vm15, %v329_v29, %v393_v35  ;;  %v460_v45 = vsel %vm438_vm0, %v409_v38, -inf  ;;  %v260_v33 = vld [vmem:[%s712_s27 + $0xb0] sm:$0xff] }
  0x2c   : > { %v433_v48 = vsel %vm369_vm1, %v337_v31, %v401_v37  ;;  %v461_v49 = vsel %vm438_vm0, %v417_v43, -inf  ;;  %v463_v50 = vsel %vm438_vm0, %v425_v44, -inf  ;;  %v286_v51 = vmul.f32 %v707_v0, %v250_v36  ;;  %v268_v34 = vld [vmem:[%s712_s27 + $0xf0] sm:$0xff]  ;;  %v245_v36 = vld [vmem:[%s712_s27 + $0x38] sm:$0xff] }
  0x2d   : > { %497 = vst.msk [vmem:[%s769_s6 + $0x10] sm:$0xff] %vm438_vm0, %v459_v42  ;;  %v462_v53 = vmax.f32 %v460_v45, %v461_v49  ;;  %v465_v54 = vsel %vm438_vm0, %v433_v48, -inf  ;;  %v294_v55 = vmul.f32 %v707_v0, %v258_v39  ;;  %v302_v56 = vmul.f32 %v707_v0, %v266_v40  ;;  %v261_v42 = vld [vmem:[%s712_s27 + $0xb8] sm:$0xff] }
  0x2e   : > { %v314_v57 = vadd.f32 %v715_v1, %v278_v41  ;;  %v322_v58 = vadd.f32 %v715_v1, %v286_v51  ;;  %v279_v59 = vmul.f32 %v707_v0, %v243_v46  ;;  %v287_v60 = vmul.f32 %v707_v0, %v251_v47  ;;  %v253_v41 = vld [vmem:[%s712_s27 + $0x78] sm:$0xff] }
  0x2f   : > { %v464_v61 = vmax.f32 %v462_v53, %v463_v50  ;;  %v330_v62 = vadd.f32 %v715_v1, %v294_v55  ;;  %v338_v63 = vadd.f32 %v715_v1, %v302_v56  ;;  %v295_v3 = vmul.f32 %v707_v0, %v259_v52  ;;  %v269_v50 = vld [vmem:[%s712_s27 + $0xf8] sm:$0xff] }
  0x30   : > { %vm346_vm2 = vcmp.ge.f32.partialorder %v314_v57, 0.0  ;;  %vm354_vm3 = vcmp.ge.f32.partialorder %v322_v58, 0.0  ;;  %v378_v4 = vmul.f32 0.2, %v314_v57  ;;  %v386_v5 = vmul.f32 0.2, %v322_v58 }
  0x31   : > { %v466_v6 = vmax.f32 %v464_v61, %v465_v54  ;;  %vm362_vm4 = vcmp.ge.f32.partialorder %v330_v62, 0.0  ;;  %vm370_vm5 = vcmp.ge.f32.partialorder %v338_v63, 0.0  ;;  %v394_v7 = vmul.f32 0.2, %v330_v62 }
  0x32   : > { %v402_v8 = vmul.f32 0.2, %v338_v63  ;;  %v410_v9 = vsel %vm346_vm2, %v314_v57, %v378_v4  ;;  %v418_v10 = vsel %vm354_vm3, %v322_v58, %v386_v5  ;;  %v303_v11 = vmul.f32 %v707_v0, %v267_v2 }
  0x33   : > { %498 = vst.msk [vmem:[%s769_s6 + $0x18] sm:$0xff] %vm438_vm0, %v466_v6  ;;  %v426_v12 = vsel %vm362_vm4, %v330_v62, %v394_v7  ;;  %v467_v13 = vsel %vm438_vm0, %v410_v9, -inf  ;;  %v468_v14 = vsel %vm438_vm0, %v418_v10, -inf  ;;  %v315_v15 = vadd.f32 %v715_v1, %v279_v59 }
  0x34   : > { %v434_v16 = vsel %vm370_vm5, %v338_v63, %v402_v8  ;;  %v469_v17 = vmax.f32 %v467_v13, %v468_v14  ;;  %v470_v18 = vsel %vm438_vm0, %v426_v12, -inf  ;;  %v323_v19 = vadd.f32 %v715_v1, %v287_v60 }
  0x35   : > { %v472_v20 = vsel %vm438_vm0, %v434_v16, -inf  ;;  %v331_v21 = vadd.f32 %v715_v1, %v295_v3  ;;  %v339_v22 = vadd.f32 %v715_v1, %v303_v11  ;;  %vm347_vm6 = vcmp.ge.f32.partialorder %v315_v15, 0.0 }
  0x36   : > { %v471_v24 = vmax.f32 %v469_v17, %v470_v18  ;;  %vm355_vm7 = vcmp.ge.f32.partialorder %v323_v19, 0.0  ;;  %v379_v25 = vmul.f32 0.2, %v315_v15  ;;  %v387_v26 = vmul.f32 0.2, %v323_v19 }
  0x37   : > { %vm363_vm8 = vcmp.ge.f32.partialorder %v331_v21, 0.0  ;;  %vm371_vm9 = vcmp.ge.f32.partialorder %v339_v22, 0.0  ;;  %v395_v28 = vmul.f32 0.2, %v331_v21  ;;  %v403_v29 = vmul.f32 0.2, %v339_v22 }
  0x38   : > { %v473_v30 = vmax.f32 %v471_v24, %v472_v20  ;;  %v411_v31 = vsel %vm347_vm6, %v315_v15, %v379_v25  ;;  %v419_v32 = vsel %vm355_vm7, %v323_v19, %v387_v26  ;;  %v280_v35 = vmul.f32 %v707_v0, %v244_v23 }
  0x39   : > { %v427_v37 = vsel %vm363_vm8, %v331_v21, %v395_v28  ;;  %v435_v38 = vsel %vm371_vm9, %v339_v22, %v403_v29  ;;  %v474_v39 = vsel %vm438_vm0, %v411_v31, -inf  ;;  %v475_v40 = vsel %vm438_vm0, %v419_v32, -inf }
  0x3a   : > { %499 = vst.msk [vmem:[%s769_s6 + $0x20] sm:$0xff] %vm438_vm0, %v473_v30  ;;  %v476_v43 = vmax.f32 %v474_v39, %v475_v40  ;;  %v477_v44 = vsel %vm438_vm0, %v427_v37, -inf  ;;  %v479_v45 = vsel %vm438_vm0, %v435_v38, -inf  ;;  %v288_v46 = vmul.f32 %v707_v0, %v252_v27 }
  0x3b   : > { %v296_v47 = vmul.f32 %v707_v0, %v260_v33  ;;  %v304_v48 = vmul.f32 %v707_v0, %v268_v34  ;;  %v316_v49 = vadd.f32 %v715_v1, %v280_v35  ;;  %v281_v51 = vmul.f32 %v707_v0, %v245_v36 }
  0x3c   : > { %v478_v52 = vmax.f32 %v476_v43, %v477_v44  ;;  %v324_v53 = vadd.f32 %v715_v1, %v288_v46  ;;  %v289_v54 = vmul.f32 %v707_v0, %v253_v41  ;;  %v297_v55 = vmul.f32 %v707_v0, %v261_v42 }
  0x3d   : > { %v332_v56 = vadd.f32 %v715_v1, %v296_v47  ;;  %v340_v57 = vadd.f32 %v715_v1, %v304_v48  ;;  %vm348_vm10 = vcmp.ge.f32.partialorder %v316_v49, 0.0  ;;  %v380_v58 = vmul.f32 0.2, %v316_v49 }
  0x3e   : > { %v480_v59 = vmax.f32 %v478_v52, %v479_v45  ;;  %vm356_vm11 = vcmp.ge.f32.partialorder %v324_v53, 0.0  ;;  %v388_v60 = vmul.f32 0.2, %v324_v53  ;;  %v305_v61 = vmul.f32 %v707_v0, %v269_v50 }
  0x3f   : > { %vm364_vm12 = vcmp.ge.f32.partialorder %v332_v56, 0.0  ;;  %vm372_vm13 = vcmp.ge.f32.partialorder %v340_v57, 0.0  ;;  %v396_v62 = vmul.f32 0.2, %v332_v56  ;;  %v404_v63 = vmul.f32 0.2, %v340_v57 }
  0x40   : > { %500 = vst.msk [vmem:[%s769_s6 + $0x28] sm:$0xff] %vm438_vm0, %v480_v59  ;;  %v412_v2 = vsel %vm348_vm10, %v316_v49, %v380_v58  ;;  %v420_v3 = vsel %vm356_vm11, %v324_v53, %v388_v60  ;;  %v317_v4 = vadd.f32 %v715_v1, %v281_v51  ;;  %v325_v5 = vadd.f32 %v715_v1, %v289_v54 }
  0x41   : > { %v428_v6 = vsel %vm364_vm12, %v332_v56, %v396_v62  ;;  %v436_v7 = vsel %vm372_vm13, %v340_v57, %v404_v63  ;;  %v481_v8 = vsel %vm438_vm0, %v412_v2, -inf  ;;  %v482_v9 = vsel %vm438_vm0, %v420_v3, -inf }
  0x42   : > { %v483_v10 = vmax.f32 %v481_v8, %v482_v9  ;;  %v484_v0 = vsel %vm438_vm0, %v428_v6, -inf  ;;  %v486_v11 = vsel %vm438_vm0, %v436_v7, -inf  ;;  %v333_v12 = vadd.f32 %v715_v1, %v297_v55 }
  0x43   : > { %v341_v13 = vadd.f32 %v715_v1, %v305_v61  ;;  %vm349_vm14 = vcmp.ge.f32.partialorder %v317_v4, 0.0  ;;  %vm357_vm15 = vcmp.ge.f32.partialorder %v325_v5, 0.0  ;;  %v381_v14 = vmul.f32 0.2, %v317_v4 }
  0x44   : > { %v485_v15 = vmax.f32 %v483_v10, %v484_v0  ;;  %vm365_vm1 = vcmp.ge.f32.partialorder %v333_v12, 0.0  ;;  %v389_v16 = vmul.f32 0.2, %v325_v5  ;;  %v397_v17 = vmul.f32 0.2, %v333_v12 }
  0x45   : > { %vm373_vm2 = vcmp.ge.f32.partialorder %v341_v13, 0.0  ;;  %v405_v18 = vmul.f32 0.2, %v341_v13  ;;  %v413_v19 = vsel %vm349_vm14, %v317_v4, %v381_v14 }
  0x46   : > { %v487_v20 = vmax.f32 %v485_v15, %v486_v11  ;;  %v421_v21 = vsel %vm357_vm15, %v325_v5, %v389_v16  ;;  %v429_v22 = vsel %vm365_vm1, %v333_v12, %v397_v17  ;;  %v488_v23 = vsel %vm438_vm0, %v413_v19, -inf }
  0x47   : > { %v437_v24 = vsel %vm373_vm2, %v341_v13, %v405_v18  ;;  %v489_v1 = vsel %vm438_vm0, %v421_v21, -inf  ;;  %v491_v25 = vsel %vm438_vm0, %v429_v22, -inf }
  0x48   : > { %501 = vst.msk [vmem:[%s769_s6 + $0x30] sm:$0xff] %vm438_vm0, %v487_v20  ;;  %v490_v26 = vmax.f32 %v488_v23, %v489_v1  ;;  %v493_v27 = vsel %vm438_vm0, %v437_v24, -inf }
  0x4a   : > { %v492_v28 = vmax.f32 %v490_v26, %v491_v25 }
  0x4c   : > { %v494_v29 = vmax.f32 %v492_v28, %v493_v27 }
  0x4e   : > { %502 = vst.msk [vmem:[%s769_s6 + $0x38] sm:$0xff] %vm438_vm0, %v494_v29 }
  0x4f PF: > { %s13_s14 = sadd.s32 1, %s656_s14   ;;  %s896_s12 = smov %s652_s13 }
  0x50   : > { %p10_p7 = scmp.ge.s32.totalorder %s13_s14, 4   ;;  %s897_s13 = smov %s899_s15 }
  0x52   :  { %12 = sbr.rel (!%p10_p7) target bundleno = 2 (0x2), region = 68 }

// kernel: critic_forward.29
= control target key start
LH: loop header
LB: loop body
LE: loop exit
PB: predicated region body
PF: predicated region fallthrough
CT: control target
= control target key end

     0   :  { %s809_s15 = smov 0   ;;  %s1186_s0 = inlined_call_operand.vmem [shape: f32[512,64], index: 0, kind: input, shape index: {}]   ;;  %s1187_s1 = inlined_call_operand.vmem [shape: f32[64,24], index: 1, kind: input, shape index: {}]   ;;  %s1188_s2 = inlined_call_operand.vmem [shape: f32[512,24], index: 2, kind: output, shape index: {0}]   ;;  %s1189_s3 = inlined_call_operand.vmem [shape: f32[2,1,24], index: 3, kind: output, shape index: {1}]   ;;  %s1190_s4 = inlined_call_operand.vmem [shape: f32[2,1,24], index: 4, kind: output, shape index: {2}]  }
   0x1 LB: > { %s815_s16 = sadd.s32 4294967295, %s782_s15   ;;  %p733_p0 = scmp.ge.s32.totalorder %s782_s15, 1  ;;  %s782_s15 = sphi %s809_s15, %s15_s15  }
   0x2   : > { %p168_p1 = scmp.lt.s32.totalorder %s782_s15, 3 }
   0x4   : > { %p169_p2 = pnand %p733_p0, %p168_p1 }
   0x5   : > { %s734_s23 = sshll.u32 (!%p169_p2), %s815_s16, 5  ;;  %p212_p4 = scmp.lt.s32.totalorder (!%p169_p2), %s815_s16, 1 }
   0x6   : > { %172 = sbr.rel (%p169_p2) target bundleno = 277 (0x115), region = 28  ;;  %p201_p3 = scmp.lt.s32.totalorder (!%p169_p2), %s734_s23, 63 }
   0xb   : > { %v273_v0 = vld [vmem:[%s1187_s1 + $0x30] sm:$0xff]  ;;  %v274_v1 = vld [vmem:[%s1187_s1 + $0x38] sm:$0xff]  ;;  %v271_v2 = vld [vmem:[%s1187_s1 + $0x20] sm:$0xff]  ;;  %s1192_s23 = smov (!%p201_p3, %s734_s23), 63  ;;  %vm279_vm0 = vcmask 523264   ;;  %vm417_vm1 = vcmask 195584  }
   0xc   : > { %v278_v3 = vpack.c.bf16 %v274_v1, %v273_v0  ;;  %v272_v4 = vld [vmem:[%s1187_s1 + $0x28] sm:$0xff]  ;;  %v269_v6 = vld [vmem:[%s1187_s1 + $0x10] sm:$0xff]  ;;  %v270_v7 = vld [vmem:[%s1187_s1 + $0x18] sm:$0xff]  ;;  %s735_s30 = sshll.u32 %s1192_s23, 3  ;;  %s1194_s16 = smov (!%p212_p4, %s815_s16), 1  ;;  %vm519_vm2 = vcmask 188416  }
   0xd   : > { %v277_v5 = vpack.c.bf16 %v272_v4, %v271_v2  ;;  %v276_v8 = vpack.c.bf16 %v270_v7, %v269_v6  ;;  %s846_s7 = scalar_lea.vmem %s1186_s0, %s735_s30  ;;  %v267_v9 = vld [vmem:[%s1187_s1] sm:$0xff]  ;;  %v268_v10 = vld [vmem:[%s1187_s1 + $0x8] sm:$0xff]  ;;  %s907_s14 = scalar_lea.vmem %s1188_s2, %s735_s30 }
   0xe   : > { %332 = vmatpush.bf16.msra.mxu0 %v278_v3  ;;  %756 = vmatpush.bf16.msra.mxu1 %v278_v3  ;;  %v219_v11 = vld [vmem:[%s846_s7] sm:$0xff]  ;;  %v275_v12 = vpack.c.bf16 %v268_v10, %v267_v9  ;;  %v220_v13 = vld [vmem:[%s846_s7 + $0x8] sm:$0xff]  ;;  %v221_v24 = vld [vmem:[%s846_s7 + $0x10] sm:$0xff]  ;;  %s214_s19 = scalar_lea.vmem %s1189_s3, %s1194_s16  ;;  %s217_s22 = scalar_lea.vmem %s1190_s4, %s1194_s16 }
   0xf   : > { %757 = vmatpush.bf16.msra.mxu2 %v278_v3  ;;  %758 = vmatpush.bf16.msra.mxu3 %v278_v3  ;;  %v227_v14 = vld [vmem:[%s846_s7 + $0x40] sm:$0xff]  ;;  %v228_v15 = vld [vmem:[%s846_s7 + $0x48] sm:$0xff]  ;;  %v251_v18 = vpack.c.bf16 %v220_v13, %v219_v11  ;;  %v222_v25 = vld [vmem:[%s846_s7 + $0x18] sm:$0xff] }
  0x10   : > { %v235_v16 = vld [vmem:[%s846_s7 + $0x80] sm:$0xff]  ;;  %v236_v17 = vld [vmem:[%s846_s7 + $0x88] sm:$0xff]  ;;  %v255_v19 = vpack.c.bf16 %v228_v15, %v227_v14  ;;  %v229_v26 = vld [vmem:[%s846_s7 + $0x50] sm:$0xff]  ;;  %v252_v30 = vpack.c.bf16 %v222_v25, %v221_v24 }
  0x11   : > { %v259_v20 = vpack.c.bf16 %v236_v17, %v235_v16  ;;  %v243_v21 = vld [vmem:[%s846_s7 + $0xc0] sm:$0xff]  ;;  %v244_v22 = vld [vmem:[%s846_s7 + $0xc8] sm:$0xff]  ;;  %v230_v27 = vld [vmem:[%s846_s7 + $0x58] sm:$0xff] }
  0x12   : > { %333 = vmatpush.bf16.msra.mxu0 %v277_v5  ;;  %759 = vmatpush.bf16.msra.mxu1 %v277_v5  ;;  %v263_v23 = vpack.c.bf16 %v244_v22, %v243_v21  ;;  %v237_v28 = vld [vmem:[%s846_s7 + $0x90] sm:$0xff]  ;;  %v238_v29 = vld [vmem:[%s846_s7 + $0x98] sm:$0xff]  ;;  %v256_v31 = vpack.c.bf16 %v230_v27, %v229_v26  ;;  %v223_v36 = vld [vmem:[%s846_s7 + $0x20] sm:$0xff] }
  0x13   : > { %760 = vmatpush.bf16.msra.mxu2 %v277_v5  ;;  %761 = vmatpush.bf16.msra.mxu3 %v277_v5  ;;  %v260_v32 = vpack.c.bf16 %v238_v29, %v237_v28  ;;  %v245_v33 = vld [vmem:[%s846_s7 + $0xd0] sm:$0xff]  ;;  %v246_v34 = vld [vmem:[%s846_s7 + $0xd8] sm:$0xff]  ;;  %v224_v37 = vld [vmem:[%s846_s7 + $0x28] sm:$0xff] }
  0x14   : > { %v264_v35 = vpack.c.bf16 %v246_v34, %v245_v33  ;;  %v231_v38 = vld [vmem:[%s846_s7 + $0x60] sm:$0xff]  ;;  %v232_v39 = vld [vmem:[%s846_s7 + $0x68] sm:$0xff]  ;;  %v253_v42 = vpack.c.bf16 %v224_v37, %v223_v36  ;;  %v225_v48 = vld [vmem:[%s846_s7 + $0x30] sm:$0xff] }
  0x15   : > { %v239_v40 = vld [vmem:[%s846_s7 + $0xa0] sm:$0xff]  ;;  %v240_v41 = vld [vmem:[%s846_s7 + $0xa8] sm:$0xff]  ;;  %v257_v43 = vpack.c.bf16 %v232_v39, %v231_v38  ;;  %v226_v49 = vld [vmem:[%s846_s7 + $0x38] sm:$0xff] }
  0x16   : > { %334 = vmatpush.bf16.msra.mxu0 %v276_v8  ;;  %762 = vmatpush.bf16.msra.mxu1 %v276_v8  ;;  %v247_v44 = vld [vmem:[%s846_s7 + $0xe0] sm:$0xff]  ;;  %v248_v45 = vld [vmem:[%s846_s7 + $0xe8] sm:$0xff]  ;;  %v261_v46 = vpack.c.bf16 %v240_v41, %v239_v40  ;;  %v233_v50 = vld [vmem:[%s846_s7 + $0x70] sm:$0xff]  ;;  %v254_v54 = vpack.c.bf16 %v226_v49, %v225_v48 }
  0x17   : > { %763 = vmatpush.bf16.msra.mxu2 %v276_v8  ;;  %764 = vmatpush.bf16.msra.mxu3 %v276_v8  ;;  %v265_v47 = vpack.c.bf16 %v248_v45, %v247_v44  ;;  %v234_v51 = vld [vmem:[%s846_s7 + $0x78] sm:$0xff]  ;;  %v241_v52 = vld [vmem:[%s846_s7 + $0xb0] sm:$0xff] }
  0x18   : > { %v242_v53 = vld [vmem:[%s846_s7 + $0xb8] sm:$0xff]  ;;  %v258_v55 = vpack.c.bf16 %v234_v51, %v233_v50  ;;  %v249_v56 = vld [vmem:[%s846_s7 + $0xf0] sm:$0xff] }
  0x19   : > { %v250_v57 = vld [vmem:[%s846_s7 + $0xf8] sm:$0xff]  ;;  %v262_v58 = vpack.c.bf16 %v242_v53, %v241_v52 }
  0x1a   : > { %335 = vmatpush.bf16.msra.mxu0 %v275_v12  ;;  %765 = vmatpush.bf16.msra.mxu1 %v275_v12  ;;  %v266_v59 = vpack.c.bf16 %v250_v57, %v249_v56 }
  0x1b   : > { %766 = vmatpush.bf16.msra.mxu2 %v275_v12  ;;  %767 = vmatpush.bf16.msra.mxu3 %v275_v12 }
  0x1d   : > { %738 = vmatmul.msk.bf16.vlgmr.msra.gmra.mxu0 %vm279_vm0, %v251_v18  ;;  %742 = vmatmul.msk.bf16.vlgmr.msra.gmra.mxu1 %vm279_vm0, %v255_v19 }
  0x1e   : > { %746 = vmatmul.msk.bf16.vlgmr.msra.gmra.mxu2 %vm279_vm0, %v259_v20  ;;  %750 = vmatmul.msk.bf16.vlgmr.msra.gmra.mxu3 %vm279_vm0, %v263_v23 }
  0x2d   : > { %739 = vmatmul.msk.bf16.gmra.mxu0 %vm279_vm0, %v252_v30  ;;  %743 = vmatmul.msk.bf16.gmra.mxu1 %vm279_vm0, %v256_v31 }
  0x2e   : > { %747 = vmatmul.msk.bf16.gmra.mxu2 %vm279_vm0, %v260_v32  ;;  %751 = vmatmul.msk.bf16.gmra.mxu3 %vm279_vm0, %v264_v35 }
  0x3d   : > { %740 = vmatmul.msk.bf16.gmra.mxu0 %vm279_vm0, %v253_v42  ;;  %744 = vmatmul.msk.bf16.gmra.mxu1 %vm279_vm0, %v257_v43 }
  0x3e   : > { %748 = vmatmul.msk.bf16.gmra.mxu2 %vm279_vm0, %v261_v46  ;;  %752 = vmatmul.msk.bf16.gmra.mxu3 %vm279_vm0, %v265_v47 }
  0x4d   : > { %741 = vmatmul.msk.bf16.gmra.mxu0 %vm279_vm0, %v254_v54  ;;  %745 = vmatmul.msk.bf16.gmra.mxu1 %vm279_vm0, %v258_v55 }
  0x4e   : > { %749 = vmatmul.msk.bf16.gmra.mxu2 %vm279_vm0, %v262_v58  ;;  %753 = vmatmul.msk.bf16.gmra.mxu3 %vm279_vm0, %v266_v59 }
  0x9a   : > { %v337_v60 = vpop.f32.mrf.mxu0  ;;  %v909_v61 = vpop.f32.mrf.mxu1 }
  0x9b   : > { %418 = vst.msk [vmem:[%s907_s14] sm:$0xff] %vm417_vm1, %v337_v60  ;;  %v521_v19 = vmul.f32 %v337_v60, %v337_v60  ;;  %v450_v22 = vsel %vm417_vm1, %v337_v60, 0.0  ;;  %v529_v57 = vmul.f32 %v909_v61, %v909_v61 }
  0x9c   : > { %426 = vst.msk [vmem:[%s907_s14 + $0x40] sm:$0xff] %vm417_vm1, %v909_v61 }
  0x9d   : > { %v553_v27 = vsel %vm417_vm1, %v521_v19, 0.0 }
  0xa1   : > { %v916_v62 = vpop.f32.mrf.mxu2  ;;  %v925_v1 = vpop.f32.mrf.mxu3 }
  0xa2   : > { %v339_v63 = vpop.f32.mrf.mxu0  ;;  %v918_v0 = vpop.f32.mrf.mxu1  ;;  %434 = vst.msk [vmem:[%s907_s14 + $0x80] sm:$0xff] %vm417_vm1, %v916_v62 }
  0xa3   : > { %419 = vst.msk [vmem:[%s907_s14 + $0x8] sm:$0xff] %vm417_vm1, %v339_v63  ;;  %v522_v17 = vmul.f32 %v339_v63, %v339_v63  ;;  %v451_v20 = vsel %vm417_vm1, %v339_v63, 0.0 }
  0xa4   : > { %427 = vst.msk [vmem:[%s907_s14 + $0x48] sm:$0xff] %vm417_vm1, %v918_v0  ;;  %v452_v26 = vadd.f32 %v451_v20, %v450_v22  ;;  %v568_v20 = vsel %vm417_vm1, %v529_v57, 0.0 }
  0xa5   : > { %442 = vst.msk [vmem:[%s907_s14 + $0xc0] sm:$0xff] %vm417_vm1, %v925_v1  ;;  %v554_v23 = vsel %vm417_vm1, %v522_v17, 0.0 }
  0xa6   : > { %v555_v32 = vadd.f32 %v554_v23, %v553_v27 }
  0xa9   : > { %v933_v2 = vpop.f32.mrf.mxu2  ;;  %v942_v5 = vpop.f32.mrf.mxu3 }
  0xaa   : > { %v342_v3 = vpop.f32.mrf.mxu0  ;;  %v935_v4 = vpop.f32.mrf.mxu1  ;;  %435 = vst.msk [vmem:[%s907_s14 + $0x88] sm:$0xff] %vm417_vm1, %v933_v2  ;;  %v538_v57 = vmul.f32 %v933_v2, %v933_v2 }
  0xab   : > { %420 = vst.msk [vmem:[%s907_s14 + $0x10] sm:$0xff] %vm417_vm1, %v342_v3  ;;  %v523_v21 = vmul.f32 %v342_v3, %v342_v3  ;;  %v453_v24 = vsel %vm417_vm1, %v342_v3, 0.0  ;;  %v531_v22 = vmul.f32 %v935_v4, %v935_v4 }
  0xac   : > { %428 = vst.msk [vmem:[%s907_s14 + $0x50] sm:$0xff] %vm417_vm1, %v935_v4  ;;  %v454_v33 = vadd.f32 %v453_v24, %v452_v26 }
  0xad   : > { %443 = vst.msk [vmem:[%s907_s14 + $0xc8] sm:$0xff] %vm417_vm1, %v942_v5  ;;  %v556_v28 = vsel %vm417_vm1, %v523_v21, 0.0  ;;  %v467_v21 = vsel %vm417_vm1, %v918_v0, 0.0 }
  0xae   : > { %v557_v40 = vadd.f32 %v556_v28, %v555_v32 }
  0xb1   : > { %v950_v6 = vpop.f32.mrf.mxu2  ;;  %v959_v9 = vpop.f32.mrf.mxu3 }
  0xb2   : > { %v344_v7 = vpop.f32.mrf.mxu0  ;;  %v952_v8 = vpop.f32.mrf.mxu1  ;;  %436 = vst.msk [vmem:[%s907_s14 + $0x90] sm:$0xff] %vm417_vm1, %v950_v6 }
  0xb3   : > { %421 = vst.msk [vmem:[%s907_s14 + $0x18] sm:$0xff] %vm417_vm1, %v344_v7  ;;  %v524_v25 = vmul.f32 %v344_v7, %v344_v7  ;;  %v455_v29 = vsel %vm417_vm1, %v344_v7, 0.0  ;;  %v465_v7 = vsel %vm417_vm1, %v909_v61, 0.0  ;;  %v532_v26 = vmul.f32 %v952_v8, %v952_v8 }
  0xb4   : > { %429 = vst.msk [vmem:[%s907_s14 + $0x58] sm:$0xff] %vm417_vm1, %v952_v8  ;;  %v456_v41 = vadd.f32 %v455_v29, %v454_v33 }
  0xb5   : > { %444 = vst.msk [vmem:[%s907_s14 + $0xd0] sm:$0xff] %vm417_vm1, %v959_v9  ;;  %v558_v36 = vsel %vm417_vm1, %v524_v25, 0.0  ;;  %v469_v25 = vsel %vm417_vm1, %v935_v4, 0.0 }
  0xb6   : > { %v559_v45 = vadd.f32 %v558_v36, %v557_v40  ;;  %v574_v36 = vsel %vm417_vm1, %v532_v26, 0.0 }
  0xb9   : > { %v967_v10 = vpop.f32.mrf.mxu2  ;;  %v976_v13 = vpop.f32.mrf.mxu3 }
  0xba   : > { %v347_v11 = vpop.f32.mrf.mxu0  ;;  %v969_v12 = vpop.f32.mrf.mxu1  ;;  %437 = vst.msk [vmem:[%s907_s14 + $0x98] sm:$0xff] %vm417_vm1, %v967_v10 }
  0xbb   : > { %422 = vst.msk [vmem:[%s907_s14 + $0x20] sm:$0xff] %vm417_vm1, %v347_v11  ;;  %v525_v30 = vmul.f32 %v347_v11, %v347_v11  ;;  %v457_v37 = vsel %vm417_vm1, %v347_v11, 0.0  ;;  %v530_v11 = vmul.f32 %v918_v0, %v918_v0  ;;  %v572_v0 = vsel %vm417_vm1, %v531_v22, 0.0 }
  0xbc   : > { %430 = vst.msk [vmem:[%s907_s14 + $0x60] sm:$0xff] %vm417_vm1, %v969_v12  ;;  %v458_v46 = vadd.f32 %v457_v37, %v456_v41  ;;  %v533_v32 = vmul.f32 %v969_v12, %v969_v12  ;;  %v473_v37 = vsel %vm417_vm1, %v969_v12, 0.0 }
  0xbd   : > { %445 = vst.msk [vmem:[%s907_s14 + $0xd8] sm:$0xff] %vm417_vm1, %v976_v13  ;;  %v560_v42 = vsel %vm417_vm1, %v525_v30, 0.0  ;;  %v570_v24 = vsel %vm417_vm1, %v530_v11, 0.0  ;;  %v471_v30 = vsel %vm417_vm1, %v952_v8, 0.0 }
  0xbe   : > { %v561_v49 = vadd.f32 %v560_v42, %v559_v45  ;;  %v576_v41 = vsel %vm417_vm1, %v533_v32, 0.0 }
  0xc1   : > { %v984_v14 = vpop.f32.mrf.mxu2  ;;  %v993_v18 = vpop.f32.mrf.mxu3 }
  0xc2   : > { %v349_v15 = vpop.f32.mrf.mxu0  ;;  %v986_v16 = vpop.f32.mrf.mxu1  ;;  %438 = vst.msk [vmem:[%s907_s14 + $0xa0] sm:$0xff] %vm417_vm1, %v984_v14  ;;  %v541_v22 = vmul.f32 %v984_v14, %v984_v14 }
  0xc3   : > { %423 = vst.msk [vmem:[%s907_s14 + $0x28] sm:$0xff] %vm417_vm1, %v349_v15  ;;  %v526_v38 = vmul.f32 %v349_v15, %v349_v15  ;;  %v459_v43 = vsel %vm417_vm1, %v349_v15, 0.0  ;;  %v475_v42 = vsel %vm417_vm1, %v986_v16, 0.0 }
  0xc4   : > { %431 = vst.msk [vmem:[%s907_s14 + $0x68] sm:$0xff] %vm417_vm1, %v986_v16  ;;  %v460_v50 = vadd.f32 %v459_v43, %v458_v46 }
  0xc5   : > { %446 = vst.msk [vmem:[%s907_s14 + $0xe0] sm:$0xff] %vm417_vm1, %v993_v18  ;;  %v562_v47 = vsel %vm417_vm1, %v526_v38, 0.0  ;;  %v534_v38 = vmul.f32 %v986_v16, %v986_v16 }
  0xc6   : > { %v563_v53 = vadd.f32 %v562_v47, %v561_v49 }
  0xc7   : > { %v578_v46 = vsel %vm417_vm1, %v534_v38, 0.0  ;;  %v545_v38 = vmul.f32 %v925_v1, %v925_v1 }
  0xc9   : > { %v1008_v31 = vpop.f32.mrf.mxu2  ;;  %v1019_v39 = vpop.f32.mrf.mxu3 }
  0xca   : > { %v352_v34 = vpop.f32.mrf.mxu0  ;;  %v1010_v35 = vpop.f32.mrf.mxu1  ;;  %439 = vst.msk [vmem:[%s907_s14 + $0xa8] sm:$0xff] %vm417_vm1, %v1008_v31 }
  0xcb   : > { %424 = vst.msk [vmem:[%s907_s14 + $0x30] sm:$0xff] %vm417_vm1, %v352_v34  ;;  %v527_v44 = vmul.f32 %v352_v34, %v352_v34  ;;  %v461_v48 = vsel %vm417_vm1, %v352_v34, 0.0  ;;  %v535_v43 = vmul.f32 %v1010_v35, %v1010_v35  ;;  %v477_v12 = vsel %vm417_vm1, %v1010_v35, 0.0 }
  0xcc   : > { %432 = vst.msk [vmem:[%s907_s14 + $0x70] sm:$0xff] %vm417_vm1, %v1010_v35  ;;  %v462_v54 = vadd.f32 %v461_v48, %v460_v50  ;;  %v537_v50 = vmul.f32 %v916_v62, %v916_v62 }
  0xcd   : > { %447 = vst.msk [vmem:[%s907_s14 + $0xe8] sm:$0xff] %vm417_vm1, %v1019_v39  ;;  %v564_v51 = vsel %vm417_vm1, %v527_v44, 0.0 }
  0xce   : > { %v565_v63 = vadd.f32 %v564_v51, %v563_v53  ;;  %v580_v51 = vsel %vm417_vm1, %v535_v43, 0.0 }
  0xd1   : > { %v1032_v52 = vpop.f32.mrf.mxu2  ;;  %v1042_v60 = vpop.f32.mrf.mxu3 }
  0xd2   : > { %v354_v55 = vpop.f32.mrf.mxu0  ;;  %v374_v56 = vpop.f32.mrf.mxu1  ;;  %440 = vst.msk [vmem:[%s907_s14 + $0xb0] sm:$0xff] %vm417_vm1, %v1032_v52 }
  0xd3   : > { %425 = vst.msk [vmem:[%s907_s14 + $0x38] sm:$0xff] %vm417_vm1, %v354_v55  ;;  %v463_v58 = vsel %vm417_vm1, %v354_v55, 0.0  ;;  %v528_v59 = vmul.f32 %v354_v55, %v354_v55  ;;  %v536_v47 = vmul.f32 %v374_v56, %v374_v56  ;;  %v479_v16 = vsel %vm417_vm1, %v374_v56, 0.0 }
  0xd4   : > { %v464_v3 = vadd.f32 %v463_v58, %v462_v54  ;;  %433 = vst.msk [vmem:[%s907_s14 + $0x78] sm:$0xff] %vm417_vm1, %v374_v56  ;;  %v481_v55 = vsel %vm417_vm1, %v916_v62, 0.0  ;;  %v539_v56 = vmul.f32 %v950_v6, %v950_v6  ;;  %v485_v62 = vsel %vm417_vm1, %v950_v6, 0.0 }
  0xd5   : > { %v566_v15 = vsel %vm417_vm1, %v528_v59, 0.0  ;;  %448 = vst.msk [vmem:[%s907_s14 + $0xf0] sm:$0xff] %vm417_vm1, %v1042_v60  ;;  %v582_v35 = vsel %vm417_vm1, %v536_v47, 0.0  ;;  %v489_v6 = vsel %vm417_vm1, %v984_v14, 0.0  ;;  %v493_v14 = vsel %vm417_vm1, %v1032_v52, 0.0 }
  0xd6   : > { %v466_v17 = vadd.f32 %v465_v7, %v464_v3  ;;  %v567_v19 = vadd.f32 %v566_v15, %v565_v63  ;;  %v584_v63 = vsel %vm417_vm1, %v537_v50, 0.0  ;;  %v483_v3 = vsel %vm417_vm1, %v933_v2, 0.0 }
  0xd7   : > { %v586_v15 = vsel %vm417_vm1, %v538_v57, 0.0  ;;  %v487_v2 = vsel %vm417_vm1, %v967_v10, 0.0  ;;  %v548_v50 = vmul.f32 %v976_v13, %v976_v13 }
  0xd8   : > { %v468_v61 = vadd.f32 %v467_v21, %v466_v17  ;;  %v569_v23 = vadd.f32 %v568_v20, %v567_v19  ;;  %v540_v17 = vmul.f32 %v967_v10, %v967_v10  ;;  %v588_v21 = vsel %vm417_vm1, %v539_v56, 0.0 }
  0xd9   : > { %v1064_v27 = vpop.f32.mrf.mxu2  ;;  %v1074_v33 = vpop.f32.mrf.mxu3  ;;  %v491_v10 = vsel %vm417_vm1, %v1008_v31, 0.0  ;;  %v551_v56 = vmul.f32 %v1042_v60, %v1042_v60 }
  0xda   : > { %v470_v28 = vadd.f32 %v469_v25, %v468_v61  ;;  %v571_v29 = vadd.f32 %v570_v24, %v569_v23  ;;  %441 = vst.msk [vmem:[%s907_s14 + $0xb8] sm:$0xff] %vm417_vm1, %v1064_v27  ;;  %v590_v24 = vsel %vm417_vm1, %v540_v17, 0.0  ;;  %v542_v25 = vmul.f32 %v1008_v31, %v1008_v31 }
  0xdb   : > { %449 = vst.msk [vmem:[%s907_s14 + $0xf8] sm:$0xff] %vm417_vm1, %v1074_v33 }
  0xdc   : > { %v573_v4 = vadd.f32 %v572_v0, %v571_v29  ;;  %v472_v34 = vadd.f32 %v471_v30, %v470_v28  ;;  %v592_v29 = vsel %vm417_vm1, %v541_v22, 0.0  ;;  %v543_v0 = vmul.f32 %v1032_v52, %v1032_v52 }
  0xdd   : > { %v546_v52 = vmul.f32 %v942_v5, %v942_v5 }
  0xde   : > { %v474_v40 = vadd.f32 %v473_v37, %v472_v34  ;;  %v575_v8 = vadd.f32 %v574_v36, %v573_v4  ;;  %v594_v4 = vsel %vm417_vm1, %v542_v25, 0.0  ;;  %v544_v34 = vmul.f32 %v1064_v27, %v1064_v27 }
  0xdf   : > { %v596_v31 = vsel %vm417_vm1, %v543_v0, 0.0 }
  0xe0   : > { %v476_v44 = vadd.f32 %v475_v42, %v474_v40  ;;  %v577_v45 = vadd.f32 %v576_v41, %v575_v8  ;;  %v495_v40 = vsel %vm417_vm1, %v1064_v27, 0.0  ;;  %v497_v42 = vsel %vm417_vm1, %v925_v1, 0.0 }
  0xe1   : > { %v598_v43 = vsel %vm417_vm1, %v544_v34, 0.0  ;;  %v547_v27 = vmul.f32 %v959_v9, %v959_v9  ;;  %v501_v1 = vsel %vm417_vm1, %v959_v9, 0.0  ;;  %v505_v9 = vsel %vm417_vm1, %v993_v18, 0.0 }
  0xe2   : > { %v478_v48 = vadd.f32 %v477_v12, %v476_v44  ;;  %v579_v49 = vadd.f32 %v578_v46, %v577_v45  ;;  %v600_v46 = vsel %vm417_vm1, %v545_v38, 0.0  ;;  %v499_v12 = vsel %vm417_vm1, %v942_v5, 0.0 }
  0xe3   : > { %v503_v5 = vsel %vm417_vm1, %v976_v13, 0.0  ;;  %v507_v13 = vsel %vm417_vm1, %v1019_v39, 0.0 }
  0xe4   : > { %v581_v53 = vadd.f32 %v580_v51, %v579_v49  ;;  %v480_v54 = vadd.f32 %v479_v16, %v478_v48  ;;  %v602_v49 = vsel %vm417_vm1, %v546_v52, 0.0 }
  0xe6   : > { %v482_v58 = vadd.f32 %v481_v55, %v480_v54  ;;  %v583_v59 = vadd.f32 %v582_v35, %v581_v53  ;;  %v604_v53 = vsel %vm417_vm1, %v547_v27, 0.0  ;;  %v549_v54 = vmul.f32 %v993_v18, %v993_v18 }
  0xe7   : > { %v606_v35 = vsel %vm417_vm1, %v548_v50, 0.0  ;;  %v509_v18 = vsel %vm417_vm1, %v1042_v60, 0.0 }
  0xe8   : > { %v484_v7 = vadd.f32 %v483_v3, %v482_v58  ;;  %v585_v11 = vadd.f32 %v584_v63, %v583_v59  ;;  %v550_v58 = vmul.f32 %v1019_v39, %v1019_v39  ;;  %v608_v3 = vsel %vm417_vm1, %v549_v54, 0.0 }
  0xe9   : > { %v511_v39 = vsel %vm417_vm1, %v1074_v33, 0.0 }
  0xea   : > { %v486_v19 = vadd.f32 %v485_v62, %v484_v7  ;;  %v587_v20 = vadd.f32 %v586_v15, %v585_v11  ;;  %v610_v15 = vsel %vm417_vm1, %v550_v58, 0.0  ;;  %v552_v62 = vmul.f32 %v1074_v33, %v1074_v33 }
  0xec   : > { %v589_v61 = vadd.f32 %v588_v21, %v587_v20  ;;  %v488_v23 = vadd.f32 %v487_v2, %v486_v19  ;;  %v612_v20 = vsel %vm417_vm1, %v551_v56, 0.0  ;;  %v614_v22 = vsel %vm417_vm1, %v552_v62, 0.0 }
  0xee   : > { %v490_v26 = vadd.f32 %v489_v6, %v488_v23  ;;  %v591_v28 = vadd.f32 %v590_v24, %v589_v61 }
  0xf0   : > { %v492_v30 = vadd.f32 %v491_v10, %v490_v26  ;;  %v593_v32 = vadd.f32 %v592_v29, %v591_v28 }
  0xf2   : > { %v595_v36 = vadd.f32 %v594_v4, %v593_v32  ;;  %v494_v37 = vadd.f32 %v493_v14, %v492_v30 }
  0xf4   : > { %v597_v8 = vadd.f32 %v596_v31, %v595_v36  ;;  %v496_v41 = vadd.f32 %v495_v40, %v494_v37 }
  0xf6   : > { %v498_v44 = vadd.f32 %v497_v42, %v496_v41  ;;  %v599_v45 = vadd.f32 %v598_v43, %v597_v8 }
  0xf8   : > { %v500_v47 = vadd.f32 %v499_v12, %v498_v44  ;;  %v601_v48 = vadd.f32 %v600_v46, %v599_v45 }
  0xfa   : > { %v502_v51 = vadd.f32 %v501_v1, %v500_v47  ;;  %v603_v16 = vadd.f32 %v602_v49, %v601_v48 }
  0xfc   : > { %v605_v55 = vadd.f32 %v604_v53, %v603_v16  ;;  %v504_v57 = vadd.f32 %v503_v5, %v502_v51 }
  0xfe   : > { %v506_v59 = vadd.f32 %v505_v9, %v504_v57  ;;  %v607_v63 = vadd.f32 %v606_v35, %v605_v55 }
 0x100   : > { %v508_v7 = vadd.f32 %v507_v13, %v506_v59  ;;  %v609_v11 = vadd.f32 %v608_v3, %v607_v63 }
 0x102   : > { %v611_v17 = vadd.f32 %v610_v15, %v609_v11  ;;  %v510_v19 = vadd.f32 %v509_v18, %v508_v7 }
 0x104   : > { %v613_v21 = vadd.f32 %v612_v20, %v611_v17  ;;  %v512_v2 = vadd.f32 %v511_v39, %v510_v19 }
 0x106   : > { %v513_v61 = vrot.slane %v512_v2, 4  ;;  %v615_v23 = vadd.f32 %v614_v22, %v613_v21 }
 0x108   : > { %v514_v24 = vadd.f32 %v513_v61, %v512_v2  ;;  %v616_v60 = vrot.slane %v615_v23, 4 }
 0x10a   : > { %v515_v6 = vrot.slane %v514_v24, 2  ;;  %v617_v25 = vadd.f32 %v616_v60, %v615_v23 }
 0x10c   : > { %v516_v26 = vadd.f32 %v515_v6, %v514_v24  ;;  %v618_v28 = vrot.slane %v617_v25, 2 }
 0x10e   : > { %v517_v29 = vrot.slane %v516_v26, 1  ;;  %v619_v10 = vadd.f32 %v618_v28, %v617_v25 }
 0x110   : > { %v518_v33 = vadd.f32 %v517_v29, %v516_v26  ;;  %v620_v0 = vrot.slane %v619_v10, 1 }
 0x112   : > { %520 = vst.msk [vmem:[%s214_s19] sm:$0x1] %vm519_vm2, %v518_v33  ;;  %v621_v30 = vadd.f32 %v620_v0, %v619_v10 }
 0x114   : > { %622 = vst.msk [vmem:[%s217_s22] sm:$0x1] %vm519_vm2, %v621_v30 }
 0x115 PF: > { %s15_s15 = sadd.s32 1, %s782_s15  }
 0x116   : > { %p12_p5 = scmp.ge.s32.totalorder %s15_s15, 4  }
 0x118   :  { %14 = sbr.rel (!%p12_p5) target bundleno = 1 (0x1), region = 82 }

// kernel: critic_forward.30
= control target key start
LH: loop header
LB: loop body
LE: loop exit
PB: predicated region body
PF: predicated region fallthrough
CT: control target
= control target key end

     0   :  { %s678_s12 = smov 0   ;;  %s680_s13 = smov 0   ;;  %s891_s0 = inlined_call_operand.vmem [shape: f32[8,64,24], index: 0, kind: input, shape index: {}]   ;;  %s892_s1 = inlined_call_operand.vmem [shape: f32[2,1,24], index: 1, kind: input, shape index: {}]   ;;  %s893_s2 = inlined_call_operand.vmem [shape: f32[2,1,24], index: 2, kind: input, shape index: {}]   ;;  %s894_s3 = inlined_call_operand.vmem [shape: f32[128,24], index: 3, kind: output, shape index: {}]  }
   0x1   :  { %s682_s14 = smov 0  }
   0x2 LB: > { %s25_s15 = sadd.s32 1, %s652_s13  ;;  %p599_p0 = scmp.ge.s32.totalorder %s656_s14, 1  ;;  %s656_s14 = sphi %s682_s14, %s13_s14   ;;  %s652_s13 = sphi %s680_s13, %s897_s13   ;;  %s648_s12 = sphi %s678_s12, %s896_s12  }
   0x3   : > { %p27_p1 = scmp.ge.s32.totalorder %s25_s15, 2  ;;  %p176_p2 = scmp.lt.s32.totalorder %s656_s14, 3 }
   0x5   : > { %s899_s15 = smov (%p27_p1, %s25_s15), 0  ;;  %p177_p3 = pnand %p599_p0, %p176_p2 }
   0x6   : > { %s600_s16 = sshll.u32 (!%p177_p3), %s648_s12, 2  ;;  %p224_p4 = scmp.lt.s32.totalorder (!%p177_p3), %s648_s12, 1 }
   0x7   : > { %180 = sbr.rel (%p177_p3) target bundleno = 79 (0x4f), region = 32  ;;  %p214_p5 = scmp.lt.s32.totalorder (!%p177_p3), %s600_s16, 7 }
   0x8   : > { %s603_s28 = sshll.u32 (!%p177_p3), %s648_s12, 3 }
   0x9   : > { %p728_p6 = scmp.lt.s32.totalorder (!%p177_p3), %s603_s28, 15 }
   0xc   : > { %s225_s17 = scalar_select %p224_p4, %s648_s12, 1  ;;  %vm438_vm0 = vcmask 195584  }
   0xd   : > { %s901_s16 = smov (!%p214_p5, %s600_s16), 7  ;;  %s903_s28 = smov (!%p728_p6, %s603_s28), 15 }
   0xe   : > { %s226_s20 = scalar_lea.vmem %s892_s1, %s225_s17  ;;  %s229_s23 = scalar_lea.vmem %s893_s2, %s225_s17 }
   0xf   : > { %s607_s24 = sshll.u32 %s901_s16, 6  ;;  %v707_v0 = vld [vmem:[%s226_s20] ss:$0 sm:$0xff]  ;;  %s604_s30 = sshll.u32 %s903_s28, 3 }
  0x10   : > { %s712_s27 = scalar_lea.vmem %s891_s0, %s607_s24  ;;  %v715_v1 = vld [vmem:[%s229_s23] ss:$0 sm:$0xff]  ;;  %s769_s6 = scalar_lea.vmem %s894_s3, %s604_s30 }
  0x11   : > { %v238_v2 = vld [vmem:[%s712_s27] sm:$0xff]  ;;  %v239_v9 = vld [vmem:[%s712_s27 + $0x8] sm:$0xff]  ;;  %v240_v34 = vld [vmem:[%s712_s27 + $0x10] sm:$0xff] }
  0x12   : > { %v246_v3 = vld [vmem:[%s712_s27 + $0x40] sm:$0xff]  ;;  %v274_v6 = vmul.f32 %v707_v0, %v238_v2  ;;  %v247_v10 = vld [vmem:[%s712_s27 + $0x48] sm:$0xff]  ;;  %v275_v14 = vmul.f32 %v707_v0, %v239_v9  ;;  %v248_v38 = vld [vmem:[%s712_s27 + $0x50] sm:$0xff]  ;;  %v276_v46 = vmul.f32 %v707_v0, %v240_v34 }
  0x13   : > { %v254_v4 = vld [vmem:[%s712_s27 + $0x80] sm:$0xff]  ;;  %v282_v7 = vmul.f32 %v707_v0, %v246_v3  ;;  %v255_v12 = vld [vmem:[%s712_s27 + $0x88] sm:$0xff]  ;;  %v283_v15 = vmul.f32 %v707_v0, %v247_v10  ;;  %v256_v39 = vld [vmem:[%s712_s27 + $0x90] sm:$0xff]  ;;  %v284_v50 = vmul.f32 %v707_v0, %v248_v38 }
  0x14   : > { %v262_v5 = vld [vmem:[%s712_s27 + $0xc0] sm:$0xff]  ;;  %v290_v8 = vmul.f32 %v707_v0, %v254_v4  ;;  %v263_v13 = vld [vmem:[%s712_s27 + $0xc8] sm:$0xff]  ;;  %v310_v16 = vadd.f32 %v715_v1, %v274_v6  ;;  %v291_v19 = vmul.f32 %v707_v0, %v255_v12  ;;  %v311_v22 = vadd.f32 %v715_v1, %v275_v14  ;;  %v264_v49 = vld [vmem:[%s712_s27 + $0xd0] sm:$0xff] }
  0x15   : > { %v298_v11 = vmul.f32 %v707_v0, %v262_v5  ;;  %v318_v17 = vadd.f32 %v715_v1, %v282_v7  ;;  %v299_v21 = vmul.f32 %v707_v0, %v263_v13  ;;  %v319_v23 = vadd.f32 %v715_v1, %v283_v15  ;;  %v241_v56 = vld [vmem:[%s712_s27 + $0x18] sm:$0xff] }
  0x16   : > { %v326_v18 = vadd.f32 %v715_v1, %v290_v8  ;;  %vm342_vm1 = vcmp.ge.f32.partialorder %v310_v16, 0.0  ;;  %v374_v24 = vmul.f32 0.2, %v310_v16  ;;  %v327_v27 = vadd.f32 %v715_v1, %v291_v19  ;;  %v249_v57 = vld [vmem:[%s712_s27 + $0x58] sm:$0xff] }
  0x17   : > { %v334_v20 = vadd.f32 %v715_v1, %v298_v11  ;;  %vm350_vm2 = vcmp.ge.f32.partialorder %v318_v17, 0.0  ;;  %v382_v25 = vmul.f32 0.2, %v318_v17  ;;  %v335_v30 = vadd.f32 %v715_v1, %v299_v21  ;;  %v257_v58 = vld [vmem:[%s712_s27 + $0x98] sm:$0xff] }
  0x18   : > { %vm358_vm3 = vcmp.ge.f32.partialorder %v326_v18, 0.0  ;;  %v390_v26 = vmul.f32 0.2, %v326_v18  ;;  %v406_v29 = vsel %vm342_vm1, %v310_v16, %v374_v24  ;;  %vm343_vm5 = vcmp.ge.f32.partialorder %v311_v22, 0.0  ;;  %v265_v5 = vld [vmem:[%s712_s27 + $0xd8] sm:$0xff] }
  0x19   : > { %vm366_vm4 = vcmp.ge.f32.partialorder %v334_v20, 0.0  ;;  %v398_v28 = vmul.f32 0.2, %v334_v20  ;;  %v414_v31 = vsel %vm350_vm2, %v318_v17, %v382_v25  ;;  %v439_v33 = vsel %vm438_vm0, %v406_v29, -inf }
  0x1a   : > { %v422_v32 = vsel %vm358_vm3, %v326_v18, %v390_v26  ;;  %vm351_vm6 = vcmp.ge.f32.partialorder %v319_v23, 0.0  ;;  %v440_v36 = vsel %vm438_vm0, %v414_v31, -inf  ;;  %vm359_vm7 = vcmp.ge.f32.partialorder %v327_v27, 0.0 }
  0x1b   : > { %v430_v35 = vsel %vm366_vm4, %v334_v20, %v398_v28  ;;  %v442_v37 = vsel %vm438_vm0, %v422_v32, -inf  ;;  %v441_v40 = vmax.f32 %v439_v33, %v440_v36  ;;  %vm367_vm8 = vcmp.ge.f32.partialorder %v335_v30, 0.0  ;;  %v250_v36 = vld [vmem:[%s712_s27 + $0x60] sm:$0xff] }
  0x1c   : > { %v444_v41 = vsel %vm438_vm0, %v430_v35, -inf  ;;  %v375_v42 = vmul.f32 0.2, %v311_v22  ;;  %v383_v43 = vmul.f32 0.2, %v319_v23  ;;  %v292_v51 = vmul.f32 %v707_v0, %v256_v39  ;;  %v258_v39 = vld [vmem:[%s712_s27 + $0xa0] sm:$0xff] }
  0x1d   : > { %v391_v44 = vmul.f32 0.2, %v327_v27  ;;  %v399_v45 = vmul.f32 0.2, %v335_v30  ;;  %v443_v47 = vmax.f32 %v441_v40, %v442_v37  ;;  %v300_v2 = vmul.f32 %v707_v0, %v264_v49  ;;  %v266_v40 = vld [vmem:[%s712_s27 + $0xe0] sm:$0xff] }
  0x1e   : > { %v407_v48 = vsel %vm343_vm5, %v311_v22, %v375_v42  ;;  %v415_v52 = vsel %vm351_vm6, %v319_v23, %v383_v43  ;;  %v312_v3 = vadd.f32 %v715_v1, %v276_v46  ;;  %v320_v4 = vadd.f32 %v715_v1, %v284_v50  ;;  %v243_v46 = vld [vmem:[%s712_s27 + $0x28] sm:$0xff] }
  0x1f   : > { %v423_v53 = vsel %vm359_vm7, %v327_v27, %v391_v44  ;;  %v431_v54 = vsel %vm367_vm8, %v335_v30, %v399_v45  ;;  %v446_v55 = vsel %vm438_vm0, %v407_v48, -inf  ;;  %v445_v59 = vmax.f32 %v443_v47, %v444_v41  ;;  %v242_v30 = vld [vmem:[%s712_s27 + $0x20] sm:$0xff]  ;;  %v251_v47 = vld [vmem:[%s712_s27 + $0x68] sm:$0xff] }
  0x20   : > { %v447_v60 = vsel %vm438_vm0, %v415_v52, -inf  ;;  %v449_v61 = vsel %vm438_vm0, %v423_v53, -inf  ;;  %v451_v62 = vsel %vm438_vm0, %v431_v54, -inf  ;;  %v328_v6 = vadd.f32 %v715_v1, %v292_v51  ;;  %v259_v52 = vld [vmem:[%s712_s27 + $0xa8] sm:$0xff] }
  0x21   : > { %v448_v63 = vmax.f32 %v446_v55, %v447_v60  ;;  %495 = vst.msk [vmem:[%s769_s6] sm:$0xff] %vm438_vm0, %v445_v59  ;;  %v277_v7 = vmul.f32 %v707_v0, %v241_v56  ;;  %v285_v8 = vmul.f32 %v707_v0, %v249_v57  ;;  %v293_v9 = vmul.f32 %v707_v0, %v257_v58 }
  0x22   : > { %v336_v11 = vadd.f32 %v715_v1, %v300_v2  ;;  %vm344_vm9 = vcmp.ge.f32.partialorder %v312_v3, 0.0  ;;  %vm352_vm10 = vcmp.ge.f32.partialorder %v320_v4, 0.0  ;;  %vm360_vm11 = vcmp.ge.f32.partialorder %v328_v6, 0.0  ;;  %v267_v2 = vld [vmem:[%s712_s27 + $0xe8] sm:$0xff] }
  0x23   : > { %v450_v10 = vmax.f32 %v448_v63, %v449_v61  ;;  %v376_v12 = vmul.f32 0.2, %v312_v3  ;;  %v384_v13 = vmul.f32 0.2, %v320_v4  ;;  %v301_v14 = vmul.f32 %v707_v0, %v265_v5 }
  0x24   : > { %vm368_vm12 = vcmp.ge.f32.partialorder %v336_v11, 0.0  ;;  %v392_v16 = vmul.f32 0.2, %v328_v6  ;;  %v400_v17 = vmul.f32 0.2, %v336_v11  ;;  %v313_v20 = vadd.f32 %v715_v1, %v277_v7 }
  0x25   : > { %v452_v15 = vmax.f32 %v450_v10, %v451_v62  ;;  %v408_v18 = vsel %vm344_vm9, %v312_v3, %v376_v12  ;;  %v416_v19 = vsel %vm352_vm10, %v320_v4, %v384_v13  ;;  %v321_v21 = vadd.f32 %v715_v1, %v285_v8 }
  0x26   : > { %v424_v22 = vsel %vm360_vm11, %v328_v6, %v392_v16  ;;  %v432_v23 = vsel %vm368_vm12, %v336_v11, %v400_v17  ;;  %v453_v24 = vsel %vm438_vm0, %v408_v18, -inf  ;;  %v454_v25 = vsel %vm438_vm0, %v416_v19, -inf }
  0x27   : > { %496 = vst.msk [vmem:[%s769_s6 + $0x8] sm:$0xff] %vm438_vm0, %v452_v15  ;;  %v455_v26 = vmax.f32 %v453_v24, %v454_v25  ;;  %v456_v27 = vsel %vm438_vm0, %v424_v22, -inf  ;;  %v458_v28 = vsel %vm438_vm0, %v432_v23, -inf  ;;  %v329_v29 = vadd.f32 %v715_v1, %v293_v9  ;;  %v244_v23 = vld [vmem:[%s712_s27 + $0x30] sm:$0xff] }
  0x28   : > { %v337_v31 = vadd.f32 %v715_v1, %v301_v14  ;;  %vm345_vm13 = vcmp.ge.f32.partialorder %v313_v20, 0.0  ;;  %vm353_vm14 = vcmp.ge.f32.partialorder %v321_v21, 0.0  ;;  %v377_v32 = vmul.f32 0.2, %v313_v20 }
  0x29   : > { %v457_v33 = vmax.f32 %v455_v26, %v456_v27  ;;  %vm361_vm15 = vcmp.ge.f32.partialorder %v329_v29, 0.0  ;;  %v385_v34 = vmul.f32 0.2, %v321_v21  ;;  %v393_v35 = vmul.f32 0.2, %v329_v29  ;;  %v252_v27 = vld [vmem:[%s712_s27 + $0x70] sm:$0xff] }
  0x2a   : > { %vm369_vm1 = vcmp.ge.f32.partialorder %v337_v31, 0.0  ;;  %v401_v37 = vmul.f32 0.2, %v337_v31  ;;  %v409_v38 = vsel %vm345_vm13, %v313_v20, %v377_v32  ;;  %v278_v41 = vmul.f32 %v707_v0, %v242_v30 }
  0x2b   : > { %v459_v42 = vmax.f32 %v457_v33, %v458_v28  ;;  %v417_v43 = vsel %vm353_vm14, %v321_v21, %v385_v34  ;;  %v425_v44 = vsel %vm361_vm15, %v329_v29, %v393_v35  ;;  %v460_v45 = vsel %vm438_vm0, %v409_v38, -inf  ;;  %v260_v33 = vld [vmem:[%s712_s27 + $0xb0] sm:$0xff] }
  0x2c   : > { %v433_v48 = vsel %vm369_vm1, %v337_v31, %v401_v37  ;;  %v461_v49 = vsel %vm438_vm0, %v417_v43, -inf  ;;  %v463_v50 = vsel %vm438_vm0, %v425_v44, -inf  ;;  %v286_v51 = vmul.f32 %v707_v0, %v250_v36  ;;  %v268_v34 = vld [vmem:[%s712_s27 + $0xf0] sm:$0xff]  ;;  %v245_v36 = vld [vmem:[%s712_s27 + $0x38] sm:$0xff] }
  0x2d   : > { %497 = vst.msk [vmem:[%s769_s6 + $0x10] sm:$0xff] %vm438_vm0, %v459_v42  ;;  %v462_v53 = vmax.f32 %v460_v45, %v461_v49  ;;  %v465_v54 = vsel %vm438_vm0, %v433_v48, -inf  ;;  %v294_v55 = vmul.f32 %v707_v0, %v258_v39  ;;  %v302_v56 = vmul.f32 %v707_v0, %v266_v40  ;;  %v261_v42 = vld [vmem:[%s712_s27 + $0xb8] sm:$0xff] }
  0x2e   : > { %v314_v57 = vadd.f32 %v715_v1, %v278_v41  ;;  %v322_v58 = vadd.f32 %v715_v1, %v286_v51  ;;  %v279_v59 = vmul.f32 %v707_v0, %v243_v46  ;;  %v287_v60 = vmul.f32 %v707_v0, %v251_v47  ;;  %v253_v41 = vld [vmem:[%s712_s27 + $0x78] sm:$0xff] }
  0x2f   : > { %v464_v61 = vmax.f32 %v462_v53, %v463_v50  ;;  %v330_v62 = vadd.f32 %v715_v1, %v294_v55  ;;  %v338_v63 = vadd.f32 %v715_v1, %v302_v56  ;;  %v295_v3 = vmul.f32 %v707_v0, %v259_v52  ;;  %v269_v50 = vld [vmem:[%s712_s27 + $0xf8] sm:$0xff] }
  0x30   : > { %vm346_vm2 = vcmp.ge.f32.partialorder %v314_v57, 0.0  ;;  %vm354_vm3 = vcmp.ge.f32.partialorder %v322_v58, 0.0  ;;  %v378_v4 = vmul.f32 0.2, %v314_v57  ;;  %v386_v5 = vmul.f32 0.2, %v322_v58 }
  0x31   : > { %v466_v6 = vmax.f32 %v464_v61, %v465_v54  ;;  %vm362_vm4 = vcmp.ge.f32.partialorder %v330_v62, 0.0  ;;  %vm370_vm5 = vcmp.ge.f32.partialorder %v338_v63, 0.0  ;;  %v394_v7 = vmul.f32 0.2, %v330_v62 }
  0x32   : > { %v402_v8 = vmul.f32 0.2, %v338_v63  ;;  %v410_v9 = vsel %vm346_vm2, %v314_v57, %v378_v4  ;;  %v418_v10 = vsel %vm354_vm3, %v322_v58, %v386_v5  ;;  %v303_v11 = vmul.f32 %v707_v0, %v267_v2 }
  0x33   : > { %498 = vst.msk [vmem:[%s769_s6 + $0x18] sm:$0xff] %vm438_vm0, %v466_v6  ;;  %v426_v12 = vsel %vm362_vm4, %v330_v62, %v394_v7  ;;  %v467_v13 = vsel %vm438_vm0, %v410_v9, -inf  ;;  %v468_v14 = vsel %vm438_vm0, %v418_v10, -inf  ;;  %v315_v15 = vadd.f32 %v715_v1, %v279_v59 }
  0x34   : > { %v434_v16 = vsel %vm370_vm5, %v338_v63, %v402_v8  ;;  %v469_v17 = vmax.f32 %v467_v13, %v468_v14  ;;  %v470_v18 = vsel %vm438_vm0, %v426_v12, -inf  ;;  %v323_v19 = vadd.f32 %v715_v1, %v287_v60 }
  0x35   : > { %v472_v20 = vsel %vm438_vm0, %v434_v16, -inf  ;;  %v331_v21 = vadd.f32 %v715_v1, %v295_v3  ;;  %v339_v22 = vadd.f32 %v715_v1, %v303_v11  ;;  %vm347_vm6 = vcmp.ge.f32.partialorder %v315_v15, 0.0 }
  0x36   : > { %v471_v24 = vmax.f32 %v469_v17, %v470_v18  ;;  %vm355_vm7 = vcmp.ge.f32.partialorder %v323_v19, 0.0  ;;  %v379_v25 = vmul.f32 0.2, %v315_v15  ;;  %v387_v26 = vmul.f32 0.2, %v323_v19 }
  0x37   : > { %vm363_vm8 = vcmp.ge.f32.partialorder %v331_v21, 0.0  ;;  %vm371_vm9 = vcmp.ge.f32.partialorder %v339_v22, 0.0  ;;  %v395_v28 = vmul.f32 0.2, %v331_v21  ;;  %v403_v29 = vmul.f32 0.2, %v339_v22 }
  0x38   : > { %v473_v30 = vmax.f32 %v471_v24, %v472_v20  ;;  %v411_v31 = vsel %vm347_vm6, %v315_v15, %v379_v25  ;;  %v419_v32 = vsel %vm355_vm7, %v323_v19, %v387_v26  ;;  %v280_v35 = vmul.f32 %v707_v0, %v244_v23 }
  0x39   : > { %v427_v37 = vsel %vm363_vm8, %v331_v21, %v395_v28  ;;  %v435_v38 = vsel %vm371_vm9, %v339_v22, %v403_v29  ;;  %v474_v39 = vsel %vm438_vm0, %v411_v31, -inf  ;;  %v475_v40 = vsel %vm438_vm0, %v419_v32, -inf }
  0x3a   : > { %499 = vst.msk [vmem:[%s769_s6 + $0x20] sm:$0xff] %vm438_vm0, %v473_v30  ;;  %v476_v43 = vmax.f32 %v474_v39, %v475_v40  ;;  %v477_v44 = vsel %vm438_vm0, %v427_v37, -inf  ;;  %v479_v45 = vsel %vm438_vm0, %v435_v38, -inf  ;;  %v288_v46 = vmul.f32 %v707_v0, %v252_v27 }
  0x3b   : > { %v296_v47 = vmul.f32 %v707_v0, %v260_v33  ;;  %v304_v48 = vmul.f32 %v707_v0, %v268_v34  ;;  %v316_v49 = vadd.f32 %v715_v1, %v280_v35  ;;  %v281_v51 = vmul.f32 %v707_v0, %v245_v36 }
  0x3c   : > { %v478_v52 = vmax.f32 %v476_v43, %v477_v44  ;;  %v324_v53 = vadd.f32 %v715_v1, %v288_v46  ;;  %v289_v54 = vmul.f32 %v707_v0, %v253_v41  ;;  %v297_v55 = vmul.f32 %v707_v0, %v261_v42 }
  0x3d   : > { %v332_v56 = vadd.f32 %v715_v1, %v296_v47  ;;  %v340_v57 = vadd.f32 %v715_v1, %v304_v48  ;;  %vm348_vm10 = vcmp.ge.f32.partialorder %v316_v49, 0.0  ;;  %v380_v58 = vmul.f32 0.2, %v316_v49 }
  0x3e   : > { %v480_v59 = vmax.f32 %v478_v52, %v479_v45  ;;  %vm356_vm11 = vcmp.ge.f32.partialorder %v324_v53, 0.0  ;;  %v388_v60 = vmul.f32 0.2, %v324_v53  ;;  %v305_v61 = vmul.f32 %v707_v0, %v269_v50 }
  0x3f   : > { %vm364_vm12 = vcmp.ge.f32.partialorder %v332_v56, 0.0  ;;  %vm372_vm13 = vcmp.ge.f32.partialorder %v340_v57, 0.0  ;;  %v396_v62 = vmul.f32 0.2, %v332_v56  ;;  %v404_v63 = vmul.f32 0.2, %v340_v57 }
  0x40   : > { %500 = vst.msk [vmem:[%s769_s6 + $0x28] sm:$0xff] %vm438_vm0, %v480_v59  ;;  %v412_v2 = vsel %vm348_vm10, %v316_v49, %v380_v58  ;;  %v420_v3 = vsel %vm356_vm11, %v324_v53, %v388_v60  ;;  %v317_v4 = vadd.f32 %v715_v1, %v281_v51  ;;  %v325_v5 = vadd.f32 %v715_v1, %v289_v54 }
  0x41   : > { %v428_v6 = vsel %vm364_vm12, %v332_v56, %v396_v62  ;;  %v436_v7 = vsel %vm372_vm13, %v340_v57, %v404_v63  ;;  %v481_v8 = vsel %vm438_vm0, %v412_v2, -inf  ;;  %v482_v9 = vsel %vm438_vm0, %v420_v3, -inf }
  0x42   : > { %v483_v10 = vmax.f32 %v481_v8, %v482_v9  ;;  %v484_v0 = vsel %vm438_vm0, %v428_v6, -inf  ;;  %v486_v11 = vsel %vm438_vm0, %v436_v7, -inf  ;;  %v333_v12 = vadd.f32 %v715_v1, %v297_v55 }
  0x43   : > { %v341_v13 = vadd.f32 %v715_v1, %v305_v61  ;;  %vm349_vm14 = vcmp.ge.f32.partialorder %v317_v4, 0.0  ;;  %vm357_vm15 = vcmp.ge.f32.partialorder %v325_v5, 0.0  ;;  %v381_v14 = vmul.f32 0.2, %v317_v4 }
  0x44   : > { %v485_v15 = vmax.f32 %v483_v10, %v484_v0  ;;  %vm365_vm1 = vcmp.ge.f32.partialorder %v333_v12, 0.0  ;;  %v389_v16 = vmul.f32 0.2, %v325_v5  ;;  %v397_v17 = vmul.f32 0.2, %v333_v12 }
  0x45   : > { %vm373_vm2 = vcmp.ge.f32.partialorder %v341_v13, 0.0  ;;  %v405_v18 = vmul.f32 0.2, %v341_v13  ;;  %v413_v19 = vsel %vm349_vm14, %v317_v4, %v381_v14 }
  0x46   : > { %v487_v20 = vmax.f32 %v485_v15, %v486_v11  ;;  %v421_v21 = vsel %vm357_vm15, %v325_v5, %v389_v16  ;;  %v429_v22 = vsel %vm365_vm1, %v333_v12, %v397_v17  ;;  %v488_v23 = vsel %vm438_vm0, %v413_v19, -inf }
  0x47   : > { %v437_v24 = vsel %vm373_vm2, %v341_v13, %v405_v18  ;;  %v489_v1 = vsel %vm438_vm0, %v421_v21, -inf  ;;  %v491_v25 = vsel %vm438_vm0, %v429_v22, -inf }
  0x48   : > { %501 = vst.msk [vmem:[%s769_s6 + $0x30] sm:$0xff] %vm438_vm0, %v487_v20  ;;  %v490_v26 = vmax.f32 %v488_v23, %v489_v1  ;;  %v493_v27 = vsel %vm438_vm0, %v437_v24, -inf }
  0x4a   : > { %v492_v28 = vmax.f32 %v490_v26, %v491_v25 }
  0x4c   : > { %v494_v29 = vmax.f32 %v492_v28, %v493_v27 }
  0x4e   : > { %502 = vst.msk [vmem:[%s769_s6 + $0x38] sm:$0xff] %vm438_vm0, %v494_v29 }
  0x4f PF: > { %s13_s14 = sadd.s32 1, %s656_s14   ;;  %s896_s12 = smov %s652_s13 }
  0x50   : > { %p10_p7 = scmp.ge.s32.totalorder %s13_s14, 4   ;;  %s897_s13 = smov %s899_s15 }
  0x52   :  { %12 = sbr.rel (!%p10_p7) target bundleno = 2 (0x2), region = 68 }

// kernel: critic_forward.31
= control target key start
LH: loop header
LB: loop body
LE: loop exit
PB: predicated region body
PF: predicated region fallthrough
CT: control target
= control target key end

     0   :  { %vm125_vm0 = vcmask 1044480   ;;  %vm126_vm1 = vcmask 1045504   ;;  %v463_v2 = vmov 65535   ;;  %vm76_vm2 = vcmask 220160   ;;  %s997_s1 = inlined_call_operand.vmem [shape: f32[27,96], index: 1, kind: input, shape index: {}]   ;;  %s998_s0 = inlined_call_operand.vmem [shape: f32[256,27], index: 0, kind: input, shape index: {}]   ;;  %s999_s2 = inlined_call_operand.vmem [shape: f32[1,96], index: 2, kind: input, shape index: {}]   ;;  %s1000_s3 = inlined_call_operand.vmem [shape: f32[256,96], index: 3, kind: output, shape index: {0}]   ;;  %s1001_s4 = inlined_call_operand.vmem [shape: f32[1,1,96], index: 4, kind: output, shape index: {1}]   ;;  %s1002_s5 = inlined_call_operand.vmem [shape: f32[1,1,96], index: 5, kind: output, shape index: {2}]  }
   0x1   :  { %v68_v0 = vld [vmem:[%s997_s1 + $0x10] sm:$0xff]  ;;  %v69_v1 = vld [vmem:[%s997_s1 + $0x18] sm:$0x7]  ;;  %v127_v3 = vsel %vm125_vm0, 4294967295, %v463_v2  ;;  %v66_v6 = vld [vmem:[%s997_s1] sm:$0xff]  ;;  %vm221_vm3 = vcmask 785408  }
   0x2   :  { %v71_v4 = vpack.c.bf16 %v69_v1, %v68_v0  ;;  %v128_v5 = vsel %vm126_vm1, %v127_v3, 0  ;;  %v67_v7 = vld [vmem:[%s997_s1 + $0x8] sm:$0xff]  ;;  %v18_v9 = vld [vmem:[%s998_s0] sm:$0xff]  ;;  %v20_v22 = vld [vmem:[%s998_s0 + $0x10] sm:$0xff]  ;;  %vm323_vm4 = vcmask 778240  }
   0x3   :  { %v19_v10 = vld [vmem:[%s998_s0 + $0x8] sm:$0xff]  ;;  %v70_v11 = vpack.c.bf16 %v67_v7, %v66_v6  ;;  %v26_v12 = vld [vmem:[%s998_s0 + $0x40] sm:$0xff]  ;;  %v21_v23 = vld [vmem:[%s998_s0 + $0x18] sm:$0xff] }
   0x4   :  { %v130_v8 = vand.u32 %v128_v5, %v71_v4  ;;  %v27_v13 = vld [vmem:[%s998_s0 + $0x48] sm:$0xff]  ;;  %v34_v14 = vld [vmem:[%s998_s0 + $0x80] sm:$0xff]  ;;  %v50_v16 = vpack.c.bf16 %v19_v10, %v18_v9  ;;  %v28_v24 = vld [vmem:[%s998_s0 + $0x50] sm:$0xff]  ;;  %v51_v28 = vpack.c.bf16 %v21_v23, %v20_v22 }
   0x5   :  { %v35_v15 = vld [vmem:[%s998_s0 + $0x88] sm:$0xff]  ;;  %v54_v17 = vpack.c.bf16 %v27_v13, %v26_v12  ;;  %v42_v19 = vld [vmem:[%s998_s0 + $0xc0] sm:$0xff]  ;;  %v29_v25 = vld [vmem:[%s998_s0 + $0x58] sm:$0xff] }
   0x6   :  { %138 = vmatpush.bf16.msra.mxu0 %v130_v8  ;;  %455 = vmatpush.bf16.msra.mxu1 %v130_v8  ;;  %v58_v18 = vpack.c.bf16 %v35_v15, %v34_v14  ;;  %v43_v20 = vld [vmem:[%s998_s0 + $0xc8] sm:$0xff]  ;;  %v36_v26 = vld [vmem:[%s998_s0 + $0x90] sm:$0xff]  ;;  %v37_v27 = vld [vmem:[%s998_s0 + $0x98] sm:$0xff]  ;;  %v55_v29 = vpack.c.bf16 %v29_v25, %v28_v24 }
   0x7   :  { %456 = vmatpush.bf16.msra.mxu2 %v130_v8  ;;  %457 = vmatpush.bf16.msra.mxu3 %v130_v8  ;;  %v62_v21 = vpack.c.bf16 %v43_v20, %v42_v19  ;;  %v59_v30 = vpack.c.bf16 %v37_v27, %v36_v26  ;;  %v44_v31 = vld [vmem:[%s998_s0 + $0xd0] sm:$0xff]  ;;  %v45_v32 = vld [vmem:[%s998_s0 + $0xd8] sm:$0xff]  ;;  %v22_v34 = vld [vmem:[%s998_s0 + $0x20] sm:$0xff] }
   0x8   :  { %v63_v33 = vpack.c.bf16 %v45_v32, %v44_v31  ;;  %v23_v35 = vld [vmem:[%s998_s0 + $0x28] sm:$0xff]  ;;  %v30_v36 = vld [vmem:[%s998_s0 + $0x60] sm:$0xff]  ;;  %v24_v46 = vld [vmem:[%s998_s0 + $0x30] sm:$0xff] }
   0x9   :  { %v31_v37 = vld [vmem:[%s998_s0 + $0x68] sm:$0xff]  ;;  %v38_v38 = vld [vmem:[%s998_s0 + $0xa0] sm:$0xff]  ;;  %v52_v40 = vpack.c.bf16 %v23_v35, %v22_v34  ;;  %v25_v47 = vld [vmem:[%s998_s0 + $0x38] sm:$0xff] }
   0xa   :  { %139 = vmatpush.bf16.msra.mxu0 %v70_v11  ;;  %458 = vmatpush.bf16.msra.mxu1 %v70_v11  ;;  %v39_v39 = vld [vmem:[%s998_s0 + $0xa8] sm:$0xff]  ;;  %v56_v41 = vpack.c.bf16 %v31_v37, %v30_v36  ;;  %v46_v42 = vld [vmem:[%s998_s0 + $0xe0] sm:$0xff]  ;;  %v32_v48 = vld [vmem:[%s998_s0 + $0x70] sm:$0xff]  ;;  %v53_v52 = vpack.c.bf16 %v25_v47, %v24_v46 }
   0xb   :  { %459 = vmatpush.bf16.msra.mxu2 %v70_v11  ;;  %460 = vmatpush.bf16.msra.mxu3 %v70_v11  ;;  %v47_v43 = vld [vmem:[%s998_s0 + $0xe8] sm:$0xff]  ;;  %v60_v44 = vpack.c.bf16 %v39_v39, %v38_v38  ;;  %v33_v49 = vld [vmem:[%s998_s0 + $0x78] sm:$0xff]  ;;  %v40_v50 = vld [vmem:[%s998_s0 + $0xb0] sm:$0xff] }
   0xc   :  { %v64_v45 = vpack.c.bf16 %v47_v43, %v46_v42  ;;  %v41_v51 = vld [vmem:[%s998_s0 + $0xb8] sm:$0xff]  ;;  %v57_v53 = vpack.c.bf16 %v33_v49, %v32_v48  ;;  %v48_v54 = vld [vmem:[%s998_s0 + $0xf0] sm:$0xff]  ;;  %v621_v58 = vld [vmem:[%s999_s2] ss:$0 sm:$0xff] }
   0xd   :  { %439 = vmatmul.msk.bf16.vlgmr.msra.gmra.mxu0 %vm76_vm2, %v50_v16  ;;  %443 = vmatmul.msk.bf16.vlgmr.msra.gmra.mxu1 %vm76_vm2, %v54_v17  ;;  %v49_v55 = vld [vmem:[%s998_s0 + $0xf8] sm:$0xff]  ;;  %v61_v56 = vpack.c.bf16 %v41_v51, %v40_v50 }
   0xe   :  { %447 = vmatmul.msk.bf16.vlgmr.msra.gmra.mxu2 %vm76_vm2, %v58_v18  ;;  %451 = vmatmul.msk.bf16.vlgmr.msra.gmra.mxu3 %vm76_vm2, %v62_v21  ;;  %v65_v57 = vpack.c.bf16 %v49_v55, %v48_v54 }
  0x1d   :  { %440 = vmatmul.msk.bf16.gmra.mxu0 %vm76_vm2, %v51_v28  ;;  %444 = vmatmul.msk.bf16.gmra.mxu1 %vm76_vm2, %v55_v29 }
  0x1e   :  { %448 = vmatmul.msk.bf16.gmra.mxu2 %vm76_vm2, %v59_v30  ;;  %452 = vmatmul.msk.bf16.gmra.mxu3 %vm76_vm2, %v63_v33 }
  0x2d   :  { %441 = vmatmul.msk.bf16.gmra.mxu0 %vm76_vm2, %v52_v40  ;;  %445 = vmatmul.msk.bf16.gmra.mxu1 %vm76_vm2, %v56_v41 }
  0x2e   :  { %449 = vmatmul.msk.bf16.gmra.mxu2 %vm76_vm2, %v60_v44  ;;  %453 = vmatmul.msk.bf16.gmra.mxu3 %vm76_vm2, %v64_v45 }
  0x3d   :  { %442 = vmatmul.msk.bf16.gmra.mxu0 %vm76_vm2, %v53_v52  ;;  %446 = vmatmul.msk.bf16.gmra.mxu1 %vm76_vm2, %v57_v53 }
  0x3e   :  { %450 = vmatmul.msk.bf16.gmra.mxu2 %vm76_vm2, %v61_v56  ;;  %454 = vmatmul.msk.bf16.gmra.mxu3 %vm76_vm2, %v65_v57 }
  0x8a   :  { %v141_v59 = vpop.f32.mrf.mxu0  ;;  %v161_v60 = vpop.f32.mrf.mxu1 }
  0x8b   :  { %v624_v61 = vadd.f32 %v621_v58, %v141_v59  ;;  %v627_v62 = vadd.f32 %v621_v58, %v161_v60 }
  0x8d   :  { %222 = vst.msk [vmem:[%s1000_s3] sm:$0xff] %vm221_vm3, %v624_v61  ;;  %v325_v38 = vmul.f32 %v624_v61, %v624_v61  ;;  %v254_v42 = vsel %vm221_vm3, %v624_v61, 0.0 }
  0x8e   :  { %230 = vst.msk [vmem:[%s1000_s3 + $0x40] sm:$0xff] %vm221_vm3, %v627_v62 }
  0x8f   :  { %v357_v43 = vsel %vm221_vm3, %v325_v38, 0.0  ;;  %v333_v38 = vmul.f32 %v627_v62, %v627_v62 }
  0x91   :  { %v181_v63 = vpop.f32.mrf.mxu2  ;;  %v201_v5 = vpop.f32.mrf.mxu3 }
  0x92   :  { %v143_v0 = vpop.f32.mrf.mxu0  ;;  %v163_v1 = vpop.f32.mrf.mxu1  ;;  %v640_v2 = vadd.f32 %v621_v58, %v181_v63  ;;  %v661_v6 = vadd.f32 %v621_v58, %v201_v5 }
  0x93   :  { %v144_v3 = vadd.f32 %v621_v58, %v143_v0  ;;  %v644_v4 = vadd.f32 %v621_v58, %v163_v1 }
  0x94   :  { %238 = vst.msk [vmem:[%s1000_s3 + $0x80] sm:$0xff] %vm221_vm3, %v640_v2 }
  0x95   :  { %223 = vst.msk [vmem:[%s1000_s3 + $0x8] sm:$0xff] %vm221_vm3, %v144_v3  ;;  %v326_v39 = vmul.f32 %v144_v3, %v144_v3  ;;  %v255_v41 = vsel %vm221_vm3, %v144_v3, 0.0 }
  0x96   :  { %231 = vst.msk [vmem:[%s1000_s3 + $0x48] sm:$0xff] %vm221_vm3, %v644_v4  ;;  %v256_v48 = vadd.f32 %v255_v41, %v254_v42 }
  0x97   :  { %246 = vst.msk [vmem:[%s1000_s3 + $0xc0] sm:$0xff] %vm221_vm3, %v661_v6  ;;  %v358_v44 = vsel %vm221_vm3, %v326_v39, 0.0 }
  0x98   :  { %v359_v60 = vadd.f32 %v358_v44, %v357_v43  ;;  %v269_v43 = vsel %vm221_vm3, %v627_v62, 0.0  ;;  %v334_v44 = vmul.f32 %v644_v4, %v644_v4 }
  0x99   :  { %v183_v7 = vpop.f32.mrf.mxu2  ;;  %v203_v13 = vpop.f32.mrf.mxu3 }
  0x9a   :  { %v146_v8 = vpop.f32.mrf.mxu0  ;;  %v166_v9 = vpop.f32.mrf.mxu1  ;;  %v664_v10 = vadd.f32 %v621_v58, %v183_v7  ;;  %v681_v14 = vadd.f32 %v621_v58, %v203_v13 }
  0x9b   :  { %v147_v11 = vadd.f32 %v621_v58, %v146_v8  ;;  %v673_v12 = vadd.f32 %v621_v58, %v166_v9 }
  0x9c   :  { %239 = vst.msk [vmem:[%s1000_s3 + $0x88] sm:$0xff] %vm221_vm3, %v664_v10 }
  0x9d   :  { %224 = vst.msk [vmem:[%s1000_s3 + $0x10] sm:$0xff] %vm221_vm3, %v147_v11  ;;  %v327_v40 = vmul.f32 %v147_v11, %v147_v11  ;;  %v257_v45 = vsel %vm221_vm3, %v147_v11, 0.0 }
  0x9e   :  { %232 = vst.msk [vmem:[%s1000_s3 + $0x50] sm:$0xff] %vm221_vm3, %v673_v12  ;;  %v258_v61 = vadd.f32 %v257_v45, %v256_v48  ;;  %v372_v48 = vsel %vm221_vm3, %v333_v38, 0.0 }
  0x9f   :  { %247 = vst.msk [vmem:[%s1000_s3 + $0xc8] sm:$0xff] %vm221_vm3, %v681_v14  ;;  %v360_v49 = vsel %vm221_vm3, %v327_v40, 0.0 }
  0xa0   :  { %v361_v5 = vadd.f32 %v360_v49, %v359_v60  ;;  %v271_v49 = vsel %vm221_vm3, %v644_v4, 0.0 }
  0xa1   :  { %v186_v15 = vpop.f32.mrf.mxu2  ;;  %v206_v21 = vpop.f32.mrf.mxu3 }
  0xa2   :  { %v148_v16 = vpop.f32.mrf.mxu0  ;;  %v168_v17 = vpop.f32.mrf.mxu1  ;;  %v698_v18 = vadd.f32 %v621_v58, %v186_v15  ;;  %v726_v28 = vadd.f32 %v621_v58, %v206_v21 }
  0xa3   :  { %v149_v19 = vadd.f32 %v621_v58, %v148_v16  ;;  %v702_v20 = vadd.f32 %v621_v58, %v168_v17 }
  0xa4   :  { %240 = vst.msk [vmem:[%s1000_s3 + $0x90] sm:$0xff] %vm221_vm3, %v698_v18 }
  0xa5   :  { %225 = vst.msk [vmem:[%s1000_s3 + $0x18] sm:$0xff] %vm221_vm3, %v149_v19  ;;  %v328_v46 = vmul.f32 %v149_v19, %v149_v19  ;;  %v259_v50 = vsel %vm221_vm3, %v149_v19, 0.0  ;;  %v336_v60 = vmul.f32 %v702_v20, %v702_v20 }
  0xa6   :  { %233 = vst.msk [vmem:[%s1000_s3 + $0x58] sm:$0xff] %vm221_vm3, %v702_v20  ;;  %v260_v7 = vadd.f32 %v259_v50, %v258_v61  ;;  %v335_v50 = vmul.f32 %v673_v12, %v673_v12 }
  0xa7   :  { %248 = vst.msk [vmem:[%s1000_s3 + $0xd0] sm:$0xff] %vm221_vm3, %v726_v28  ;;  %v362_v0 = vsel %vm221_vm3, %v328_v46, 0.0 }
  0xa8   :  { %v363_v13 = vadd.f32 %v362_v0, %v361_v5 }
  0xa9   :  { %v188_v22 = vpop.f32.mrf.mxu2  ;;  %v208_v29 = vpop.f32.mrf.mxu3 }
  0xaa   :  { %v151_v23 = vpop.f32.mrf.mxu0  ;;  %v171_v24 = vpop.f32.mrf.mxu1  ;;  %v719_v25 = vadd.f32 %v621_v58, %v188_v22  ;;  %v734_v30 = vadd.f32 %v621_v58, %v208_v29 }
  0xab   :  { %v152_v26 = vadd.f32 %v621_v58, %v151_v23  ;;  %v723_v27 = vadd.f32 %v621_v58, %v171_v24 }
  0xac   :  { %241 = vst.msk [vmem:[%s1000_s3 + $0x98] sm:$0xff] %vm221_vm3, %v719_v25 }
  0xad   :  { %226 = vst.msk [vmem:[%s1000_s3 + $0x20] sm:$0xff] %vm221_vm3, %v152_v26  ;;  %v329_v54 = vmul.f32 %v152_v26, %v152_v26  ;;  %v261_v1 = vsel %vm221_vm3, %v152_v26, 0.0  ;;  %v337_v5 = vmul.f32 %v723_v27, %v723_v27 }
  0xae   :  { %234 = vst.msk [vmem:[%s1000_s3 + $0x60] sm:$0xff] %vm221_vm3, %v723_v27  ;;  %v262_v15 = vadd.f32 %v261_v1, %v260_v7 }
  0xaf   :  { %249 = vst.msk [vmem:[%s1000_s3 + $0xd8] sm:$0xff] %vm221_vm3, %v734_v30  ;;  %v364_v8 = vsel %vm221_vm3, %v329_v54, 0.0 }
  0xb0   :  { %v365_v21 = vadd.f32 %v364_v8, %v363_v13  ;;  %v277_v13 = vsel %vm221_vm3, %v723_v27, 0.0 }
  0xb1   :  { %v191_v31 = vpop.f32.mrf.mxu2  ;;  %v211_v37 = vpop.f32.mrf.mxu3 }
  0xb2   :  { %v153_v32 = vpop.f32.mrf.mxu0  ;;  %v173_v33 = vpop.f32.mrf.mxu1  ;;  %v756_v34 = vadd.f32 %v621_v58, %v191_v31  ;;  %v794_v57 = vadd.f32 %v621_v58, %v211_v37 }
  0xb3   :  { %v154_v35 = vadd.f32 %v621_v58, %v153_v32  ;;  %v760_v36 = vadd.f32 %v621_v58, %v173_v33 }
  0xb4   :  { %242 = vst.msk [vmem:[%s1000_s3 + $0xa0] sm:$0xff] %vm221_vm3, %v756_v34 }
  0xb5   :  { %227 = vst.msk [vmem:[%s1000_s3 + $0x28] sm:$0xff] %vm221_vm3, %v154_v35  ;;  %v330_v3 = vmul.f32 %v154_v35, %v154_v35  ;;  %v263_v9 = vsel %vm221_vm3, %v154_v35, 0.0 }
  0xb6   :  { %235 = vst.msk [vmem:[%s1000_s3 + $0x68] sm:$0xff] %vm221_vm3, %v760_v36  ;;  %v264_v22 = vadd.f32 %v263_v9, %v262_v15 }
  0xb7   :  { %250 = vst.msk [vmem:[%s1000_s3 + $0xe0] sm:$0xff] %vm221_vm3, %v794_v57  ;;  %v366_v16 = vsel %vm221_vm3, %v330_v3, 0.0  ;;  %v376_v3 = vsel %vm221_vm3, %v335_v50, 0.0 }
  0xb8   :  { %v367_v35 = vadd.f32 %v366_v16, %v365_v21 }
  0xb9   :  { %v193_v47 = vpop.f32.mrf.mxu2  ;;  %v213_v59 = vpop.f32.mrf.mxu3 }
  0xba   :  { %v156_v51 = vpop.f32.mrf.mxu0  ;;  %v176_v52 = vpop.f32.mrf.mxu1  ;;  %v787_v53 = vadd.f32 %v621_v58, %v193_v47  ;;  %v802_v63 = vadd.f32 %v621_v58, %v213_v59  ;;  %v273_v59 = vsel %vm221_vm3, %v673_v12, 0.0  ;;  %v275_v12 = vsel %vm221_vm3, %v702_v20, 0.0 }
  0xbb   :  { %v157_v55 = vadd.f32 %v621_v58, %v156_v51  ;;  %v791_v56 = vadd.f32 %v621_v58, %v176_v52  ;;  %v338_v20 = vmul.f32 %v760_v36, %v760_v36 }
  0xbc   :  { %243 = vst.msk [vmem:[%s1000_s3 + $0xa8] sm:$0xff] %vm221_vm3, %v787_v53 }
  0xbd   :  { %228 = vst.msk [vmem:[%s1000_s3 + $0x30] sm:$0xff] %vm221_vm3, %v157_v55  ;;  %v331_v11 = vmul.f32 %v157_v55, %v157_v55  ;;  %v265_v17 = vsel %vm221_vm3, %v157_v55, 0.0  ;;  %v374_v55 = vsel %vm221_vm3, %v334_v44, 0.0  ;;  %v287_v44 = vsel %vm221_vm3, %v664_v10, 0.0 }
  0xbe   :  { %236 = vst.msk [vmem:[%s1000_s3 + $0x70] sm:$0xff] %vm221_vm3, %v791_v56  ;;  %v266_v37 = vadd.f32 %v265_v17, %v264_v22  ;;  %v279_v17 = vsel %vm221_vm3, %v760_v36, 0.0  ;;  %v382_v22 = vsel %vm221_vm3, %v338_v20, 0.0  ;;  %v349_v20 = vmul.f32 %v661_v6, %v661_v6 }
  0xbf   :  { %251 = vst.msk [vmem:[%s1000_s3 + $0xe8] sm:$0xff] %vm221_vm3, %v802_v63  ;;  %v368_v29 = vsel %vm221_vm3, %v331_v11, 0.0  ;;  %v378_v11 = vsel %vm221_vm3, %v336_v60, 0.0  ;;  %v346_v60 = vmul.f32 %v787_v53, %v787_v53 }
  0xc0   :  { %v369_v41 = vadd.f32 %v368_v29, %v367_v35 }
  0xc1   :  { %v196_v19 = vpop.f32.mrf.mxu2  ;;  %v216_v33 = vpop.f32.mrf.mxu3 }
  0xc2   :  { %v158_v23 = vpop.f32.mrf.mxu0  ;;  %v178_v24 = vpop.f32.mrf.mxu1  ;;  %v830_v26 = vadd.f32 %v621_v58, %v196_v19  ;;  %v870_v61 = vadd.f32 %v621_v58, %v216_v33  ;;  %v339_v19 = vmul.f32 %v791_v56, %v791_v56  ;;  %v341_v33 = vmul.f32 %v640_v2, %v640_v2 }
  0xc3   :  { %v159_v31 = vadd.f32 %v621_v58, %v158_v23  ;;  %v179_v32 = vadd.f32 %v621_v58, %v178_v24  ;;  %v281_v23 = vsel %vm221_vm3, %v791_v56, 0.0 }
  0xc4   :  { %244 = vst.msk [vmem:[%s1000_s3 + $0xb0] sm:$0xff] %vm221_vm3, %v830_v26  ;;  %v384_v35 = vsel %vm221_vm3, %v339_v19, 0.0 }
  0xc5   :  { %229 = vst.msk [vmem:[%s1000_s3 + $0x38] sm:$0xff] %vm221_vm3, %v159_v31  ;;  %v267_v39 = vsel %vm221_vm3, %v159_v31, 0.0  ;;  %v332_v40 = vmul.f32 %v159_v31, %v159_v31  ;;  %v340_v24 = vmul.f32 %v179_v32, %v179_v32  ;;  %v283_v36 = vsel %vm221_vm3, %v179_v32, 0.0 }
  0xc6   :  { %v268_v42 = vadd.f32 %v267_v39, %v266_v37  ;;  %237 = vst.msk [vmem:[%s1000_s3 + $0x78] sm:$0xff] %vm221_vm3, %v179_v32  ;;  %v285_v39 = vsel %vm221_vm3, %v640_v2, 0.0  ;;  %v343_v32 = vmul.f32 %v698_v18, %v698_v18  ;;  %v289_v2 = vsel %vm221_vm3, %v698_v18, 0.0 }
  0xc7   :  { %v370_v45 = vsel %vm221_vm3, %v332_v40, 0.0  ;;  %252 = vst.msk [vmem:[%s1000_s3 + $0xf0] sm:$0xff] %vm221_vm3, %v870_v61  ;;  %v342_v40 = vmul.f32 %v664_v10, %v664_v10  ;;  %v386_v56 = vsel %vm221_vm3, %v340_v24, 0.0  ;;  %v291_v10 = vsel %vm221_vm3, %v719_v25, 0.0 }
  0xc8   :  { %v270_v46 = vadd.f32 %v269_v43, %v268_v42  ;;  %v371_v47 = vadd.f32 %v370_v45, %v369_v41  ;;  %v388_v43 = vsel %vm221_vm3, %v341_v33, 0.0  ;;  %v293_v18 = vsel %vm221_vm3, %v756_v34, 0.0 }
  0xc9   :  { %v198_v51 = vpop.f32.mrf.mxu2  ;;  %v218_v4 = vpop.f32.mrf.mxu3  ;;  %v352_v33 = vmul.f32 %v734_v30, %v734_v30 }
  0xca   :  { %v272_v52 = vadd.f32 %v271_v49, %v270_v46  ;;  %v373_v54 = vadd.f32 %v372_v48, %v371_v47  ;;  %v862_v62 = vadd.f32 %v621_v58, %v198_v51  ;;  %v888_v7 = vadd.f32 %v621_v58, %v218_v4 }
  0xcb   :  { %v380_v58 = vsel %vm221_vm3, %v337_v5, 0.0  ;;  %v390_v47 = vsel %vm221_vm3, %v342_v40, 0.0  ;;  %v344_v48 = vmul.f32 %v719_v25, %v719_v25  ;;  %v392_v51 = vsel %vm221_vm3, %v343_v32, 0.0 }
  0xcc   :  { %v274_v0 = vadd.f32 %v273_v59, %v272_v52  ;;  %v375_v1 = vadd.f32 %v374_v55, %v373_v54  ;;  %245 = vst.msk [vmem:[%s1000_s3 + $0xb8] sm:$0xff] %vm221_vm3, %v862_v62  ;;  %v345_v52 = vmul.f32 %v756_v34, %v756_v34  ;;  %v295_v25 = vsel %vm221_vm3, %v787_v53, 0.0 }
  0xcd   :  { %253 = vst.msk [vmem:[%s1000_s3 + $0xf8] sm:$0xff] %vm221_vm3, %v888_v7  ;;  %v394_v59 = vsel %vm221_vm3, %v344_v48, 0.0  ;;  %v297_v34 = vsel %vm221_vm3, %v830_v26, 0.0  ;;  %v355_v32 = vmul.f32 %v870_v61, %v870_v61 }
  0xce   :  { %v377_v8 = vadd.f32 %v376_v3, %v375_v1  ;;  %v276_v9 = vadd.f32 %v275_v12, %v274_v0  ;;  %v396_v1 = vsel %vm221_vm3, %v345_v52, 0.0  ;;  %v347_v3 = vmul.f32 %v830_v26, %v830_v26 }
  0xcf   :  { %v350_v26 = vmul.f32 %v681_v14, %v681_v14 }
  0xd0   :  { %v278_v15 = vadd.f32 %v277_v13, %v276_v9  ;;  %v379_v16 = vadd.f32 %v378_v11, %v377_v8  ;;  %v398_v8 = vsel %vm221_vm3, %v346_v60, 0.0  ;;  %v348_v9 = vmul.f32 %v862_v62, %v862_v62 }
  0xd1   :  { %v400_v53 = vsel %vm221_vm3, %v347_v3, 0.0 }
  0xd2   :  { %v280_v27 = vadd.f32 %v279_v17, %v278_v15  ;;  %v381_v21 = vadd.f32 %v380_v58, %v379_v16  ;;  %v299_v15 = vsel %vm221_vm3, %v862_v62, 0.0  ;;  %v301_v17 = vsel %vm221_vm3, %v661_v6, 0.0 }
  0xd3   :  { %v402_v19 = vsel %vm221_vm3, %v348_v9, 0.0  ;;  %v351_v62 = vmul.f32 %v726_v28, %v726_v28  ;;  %v305_v6 = vsel %vm221_vm3, %v726_v28, 0.0  ;;  %v309_v28 = vsel %vm221_vm3, %v794_v57, 0.0 }
  0xd4   :  { %v282_v29 = vadd.f32 %v281_v23, %v280_v27  ;;  %v383_v31 = vadd.f32 %v382_v22, %v381_v21  ;;  %v404_v22 = vsel %vm221_vm3, %v349_v20, 0.0  ;;  %v303_v23 = vsel %vm221_vm3, %v681_v14, 0.0 }
  0xd5   :  { %v307_v14 = vsel %vm221_vm3, %v734_v30, 0.0  ;;  %v311_v30 = vsel %vm221_vm3, %v802_v63, 0.0 }
  0xd6   :  { %v385_v37 = vadd.f32 %v384_v35, %v383_v31  ;;  %v284_v38 = vadd.f32 %v283_v36, %v282_v29  ;;  %v406_v31 = vsel %vm221_vm3, %v350_v26, 0.0 }
  0xd8   :  { %v286_v41 = vadd.f32 %v285_v39, %v284_v38  ;;  %v387_v42 = vadd.f32 %v386_v56, %v385_v37  ;;  %v408_v37 = vsel %vm221_vm3, %v351_v62, 0.0  ;;  %v353_v38 = vmul.f32 %v794_v57, %v794_v57 }
  0xd9   :  { %v410_v56 = vsel %vm221_vm3, %v352_v33, 0.0  ;;  %v313_v57 = vsel %vm221_vm3, %v870_v61, 0.0 }
  0xda   :  { %v288_v45 = vadd.f32 %v287_v44, %v286_v41  ;;  %v389_v46 = vadd.f32 %v388_v43, %v387_v42  ;;  %v354_v41 = vmul.f32 %v802_v63, %v802_v63  ;;  %v412_v44 = vsel %vm221_vm3, %v353_v38, 0.0 }
  0xdb   :  { %v315_v63 = vsel %vm221_vm3, %v888_v7, 0.0 }
  0xdc   :  { %v391_v49 = vadd.f32 %v390_v47, %v389_v46  ;;  %v290_v50 = vadd.f32 %v289_v2, %v288_v45  ;;  %v414_v47 = vsel %vm221_vm3, %v354_v41, 0.0  ;;  %v356_v2 = vmul.f32 %v888_v7, %v888_v7 }
  0xde   :  { %v292_v54 = vadd.f32 %v291_v10, %v290_v50  ;;  %v393_v55 = vadd.f32 %v392_v51, %v391_v49  ;;  %v416_v50 = vsel %vm221_vm3, %v355_v32, 0.0  ;;  %v418_v52 = vsel %vm221_vm3, %v356_v2, 0.0 }
  0xe0   :  { %v294_v4 = vadd.f32 %v293_v18, %v292_v54  ;;  %v395_v0 = vadd.f32 %v394_v59, %v393_v55 }
  0xe2   :  { %v296_v12 = vadd.f32 %v295_v25, %v294_v4  ;;  %v397_v5 = vadd.f32 %v396_v1, %v395_v0 }
  0xe4   :  { %v399_v11 = vadd.f32 %v398_v8, %v397_v5  ;;  %v298_v13 = vadd.f32 %v297_v34, %v296_v12 }
  0xe6   :  { %v401_v16 = vadd.f32 %v400_v53, %v399_v11  ;;  %v300_v58 = vadd.f32 %v299_v15, %v298_v13 }
  0xe8   :  { %v302_v27 = vadd.f32 %v301_v17, %v300_v58  ;;  %v403_v21 = vadd.f32 %v402_v19, %v401_v16 }
  0xea   :  { %v304_v24 = vadd.f32 %v303_v23, %v302_v27  ;;  %v405_v29 = vadd.f32 %v404_v22, %v403_v21 }
  0xec   :  { %v407_v35 = vadd.f32 %v406_v31, %v405_v29  ;;  %v306_v36 = vadd.f32 %v305_v6, %v304_v24 }
  0xee   :  { %v308_v39 = vadd.f32 %v307_v14, %v306_v36  ;;  %v409_v40 = vadd.f32 %v408_v37, %v407_v35 }
  0xf0   :  { %v310_v42 = vadd.f32 %v309_v28, %v308_v39  ;;  %v411_v43 = vadd.f32 %v410_v56, %v409_v40 }
  0xf2   :  { %v312_v45 = vadd.f32 %v311_v30, %v310_v42  ;;  %v413_v46 = vadd.f32 %v412_v44, %v411_v43 }
  0xf4   :  { %v415_v48 = vadd.f32 %v414_v47, %v413_v46  ;;  %v314_v49 = vadd.f32 %v313_v57, %v312_v45 }
  0xf6   :  { %v417_v51 = vadd.f32 %v416_v50, %v415_v48  ;;  %v316_v10 = vadd.f32 %v315_v63, %v314_v49 }
  0xf8   :  { %v317_v54 = vrot.slane %v316_v10, 4  ;;  %v419_v55 = vadd.f32 %v418_v52, %v417_v51 }
  0xfa   :  { %v318_v59 = vadd.f32 %v317_v54, %v316_v10  ;;  %v420_v18 = vrot.slane %v419_v55, 4 }
  0xfc   :  { %v319_v60 = vrot.slane %v318_v59, 2  ;;  %v421_v61 = vadd.f32 %v420_v18, %v419_v55 }
  0xfe   :  { %v320_v4 = vadd.f32 %v319_v60, %v318_v59  ;;  %v422_v0 = vrot.slane %v421_v61, 2 }
 0x100   :  { %v321_v1 = vrot.slane %v320_v4, 1  ;;  %v423_v25 = vadd.f32 %v422_v0, %v421_v61 }
 0x102   :  { %v322_v3 = vadd.f32 %v321_v1, %v320_v4  ;;  %v424_v12 = vrot.slane %v423_v25, 1 }
 0x104   :  { %324 = vst.msk [vmem:[%s1001_s4] sm:$0x1] %vm323_vm4, %v322_v3  ;;  %v425_v7 = vadd.f32 %v424_v12, %v423_v25 }
 0x106   :  { %426 = vst.msk [vmem:[%s1002_s5] sm:$0x1] %vm323_vm4, %v425_v7 }

// kernel: critic_forward.32
= control target key start
LH: loop header
LB: loop body
LE: loop exit
PB: predicated region body
PF: predicated region fallthrough
CT: control target
= control target key end

     0   :  { %vm198_vm0 = vcmask 785408   ;;  %vm336_vm1 = vcmask 195584   ;;  %vm438_vm2 = vcmask 188416   ;;  %s1232_s3 = inlined_call_operand.vmem [shape: f32[96,24], index: 3, kind: input, shape index: {}]   ;;  %s1233_s0 = inlined_call_operand.vmem [shape: f32[256,96], index: 0, kind: input, shape index: {}]   ;;  %s1234_s1 = inlined_call_operand.vmem [shape: f32[1,1,96], index: 1, kind: input, shape index: {}]   ;;  %s1235_s2 = inlined_call_operand.vmem [shape: f32[1,1,96], index: 2, kind: input, shape index: {}]   ;;  %s1236_s4 = inlined_call_operand.vmem [shape: f32[1,24], index: 4, kind: input, shape index: {}]   ;;  %s1237_s5 = inlined_call_operand.vmem [shape: f32[256,24], index: 5, kind: output, shape index: {0}]   ;;  %s1238_s6 = inlined_call_operand.vmem [shape: f32[1,1,24], index: 6, kind: output, shape index: {1}]   ;;  %s1239_s7 = inlined_call_operand.vmem [shape: f32[1,1,24], index: 7, kind: output, shape index: {2}]  }
   0x1   :  { %v186_v0 = vld [vmem:[%s1232_s3 + $0x50] sm:$0xff]  ;;  %v187_v1 = vld [vmem:[%s1232_s3 + $0x58] sm:$0xff]  ;;  %v184_v2 = vld [vmem:[%s1232_s3 + $0x40] sm:$0xff] }
   0x2   :  { %v193_v3 = vpack.c.bf16 %v187_v1, %v186_v0  ;;  %v185_v4 = vld [vmem:[%s1232_s3 + $0x48] sm:$0xff]  ;;  %v182_v6 = vld [vmem:[%s1232_s3 + $0x30] sm:$0xff]  ;;  %v183_v7 = vld [vmem:[%s1232_s3 + $0x38] sm:$0xff] }
   0x3   :  { %v192_v5 = vpack.c.bf16 %v185_v4, %v184_v2  ;;  %v180_v8 = vld [vmem:[%s1232_s3 + $0x20] sm:$0xff]  ;;  %v181_v9 = vld [vmem:[%s1232_s3 + $0x28] sm:$0xff]  ;;  %v191_v12 = vpack.c.bf16 %v183_v7, %v182_v6  ;;  %v178_v26 = vld [vmem:[%s1232_s3 + $0x10] sm:$0xff] }
   0x4   :  { %249 = vmatpush.bf16.msra.mxu0 %v193_v3  ;;  %570 = vmatpush.bf16.msra.mxu1 %v193_v3  ;;  %v24_v10 = vld [vmem:[%s1233_s0] sm:$0xff]  ;;  %v25_v13 = vld [vmem:[%s1233_s0 + $0x8] sm:$0xff]  ;;  %v190_v23 = vpack.c.bf16 %v181_v9, %v180_v8  ;;  %v179_v27 = vld [vmem:[%s1232_s3 + $0x18] sm:$0xff] }
   0x5   :  { %571 = vmatpush.bf16.msra.mxu2 %v193_v3  ;;  %572 = vmatpush.bf16.msra.mxu3 %v193_v3  ;;  %v661_v11 = vld [vmem:[%s1234_s1] ss:$0 sm:$0xff]  ;;  %v33_v15 = vld [vmem:[%s1233_s0 + $0x48] sm:$0xff]  ;;  %v189_v32 = vpack.c.bf16 %v179_v27, %v178_v26  ;;  %v26_v50 = vld [vmem:[%s1233_s0 + $0x10] sm:$0xff] }
   0x6   :  { %v32_v14 = vld [vmem:[%s1233_s0 + $0x40] sm:$0xff]  ;;  %v41_v17 = vld [vmem:[%s1233_s0 + $0x88] sm:$0xff]  ;;  %v60_v18 = vmul.f32 %v661_v11, %v24_v10  ;;  %v61_v19 = vmul.f32 %v661_v11, %v25_v13  ;;  %v69_v22 = vmul.f32 %v661_v11, %v33_v15  ;;  %v27_v52 = vld [vmem:[%s1233_s0 + $0x18] sm:$0xff]  ;;  %v62_v60 = vmul.f32 %v661_v11, %v26_v50 }
   0x7   :  { %v40_v16 = vld [vmem:[%s1233_s0 + $0x80] sm:$0xff]  ;;  %v68_v21 = vmul.f32 %v661_v11, %v32_v14  ;;  %v77_v25 = vmul.f32 %v661_v11, %v41_v17  ;;  %v177_v36 = vld [vmem:[%s1232_s3 + $0x8] sm:$0xff]  ;;  %v34_v54 = vld [vmem:[%s1233_s0 + $0x50] sm:$0xff]  ;;  %v63_v62 = vmul.f32 %v661_v11, %v27_v52 }
   0x8   :  { %250 = vmatpush.bf16.msra.mxu0 %v192_v5  ;;  %573 = vmatpush.bf16.msra.mxu1 %v192_v5  ;;  %v683_v20 = vld [vmem:[%s1235_s2] ss:$0 sm:$0xff]  ;;  %v76_v24 = vmul.f32 %v661_v11, %v40_v16  ;;  %v49_v45 = vld [vmem:[%s1233_s0 + $0xc8] sm:$0xff]  ;;  %v35_v55 = vld [vmem:[%s1233_s0 + $0x58] sm:$0xff]  ;;  %v70_v63 = vmul.f32 %v661_v11, %v34_v54 }
   0x9   :  { %574 = vmatpush.bf16.msra.mxu2 %v192_v5  ;;  %575 = vmatpush.bf16.msra.mxu3 %v192_v5  ;;  %v96_v28 = vadd.f32 %v683_v20, %v60_v18  ;;  %v97_v29 = vadd.f32 %v683_v20, %v61_v19  ;;  %v104_v30 = vadd.f32 %v683_v20, %v68_v21  ;;  %v176_v35 = vld [vmem:[%s1232_s3] sm:$0xff]  ;;  %v42_v57 = vld [vmem:[%s1233_s0 + $0x90] sm:$0xff]  ;;  %v43_v58 = vld [vmem:[%s1233_s0 + $0x98] sm:$0xff] }
   0xa   :  { %v105_v31 = vadd.f32 %v683_v20, %v69_v22  ;;  %v112_v33 = vadd.f32 %v683_v20, %v76_v24  ;;  %v113_v34 = vadd.f32 %v683_v20, %v77_v25  ;;  %v188_v41 = vpack.c.bf16 %v177_v36, %v176_v35  ;;  %v48_v44 = vld [vmem:[%s1233_s0 + $0xc0] sm:$0xff]  ;;  %v50_v17 = vld [vmem:[%s1233_s0 + $0xd0] sm:$0xff]  ;;  %v51_v18 = vld [vmem:[%s1233_s0 + $0xd8] sm:$0xff] }
   0xb   :  { %v128_v37 = vmax.f32 %v96_v28, 0.0  ;;  %v129_v38 = vmax.f32 %v97_v29, 0.0  ;;  %v136_v39 = vmax.f32 %v104_v30, 0.0  ;;  %v84_v46 = vmul.f32 %v661_v11, %v48_v44  ;;  %v28_v24 = vld [vmem:[%s1233_s0 + $0x20] sm:$0xff]  ;;  %v29_v26 = vld [vmem:[%s1233_s0 + $0x28] sm:$0xff] }
   0xc   :  { %251 = vmatpush.bf16.msra.mxu0 %v191_v12  ;;  %576 = vmatpush.bf16.msra.mxu1 %v191_v12  ;;  %v137_v40 = vmax.f32 %v105_v31, 0.0  ;;  %v144_v42 = vmax.f32 %v112_v33, 0.0  ;;  %v145_v43 = vmax.f32 %v113_v34, 0.0  ;;  %v85_v47 = vmul.f32 %v661_v11, %v49_v45  ;;  %v36_v28 = vld [vmem:[%s1233_s0 + $0x60] sm:$0xff]  ;;  %v37_v29 = vld [vmem:[%s1233_s0 + $0x68] sm:$0xff] }
   0xd   :  { %577 = vmatpush.bf16.msra.mxu2 %v191_v12  ;;  %578 = vmatpush.bf16.msra.mxu3 %v191_v12  ;;  %v160_v48 = vpack.c.bf16 %v129_v38, %v128_v37  ;;  %v120_v51 = vadd.f32 %v683_v20, %v84_v46  ;;  %v71_v0 = vmul.f32 %v661_v11, %v35_v55  ;;  %v44_v31 = vld [vmem:[%s1233_s0 + $0xa0] sm:$0xff] }
   0xe   :  { %v164_v49 = vpack.c.bf16 %v137_v40, %v136_v39  ;;  %v168_v53 = vpack.c.bf16 %v145_v43, %v144_v42  ;;  %v121_v56 = vadd.f32 %v683_v20, %v85_v47  ;;  %v78_v1 = vmul.f32 %v661_v11, %v42_v57  ;;  %v52_v42 = vld [vmem:[%s1233_s0 + $0xe0] sm:$0xff]  ;;  %v53_v43 = vld [vmem:[%s1233_s0 + $0xe8] sm:$0xff] }
   0xf   :  { %v152_v59 = vmax.f32 %v120_v51, 0.0  ;;  %v79_v2 = vmul.f32 %v661_v11, %v43_v58  ;;  %v98_v4 = vadd.f32 %v683_v20, %v62_v60  ;;  %v99_v5 = vadd.f32 %v683_v20, %v63_v62 }
  0x10   :  { %252 = vmatpush.bf16.msra.mxu0 %v190_v23  ;;  %579 = vmatpush.bf16.msra.mxu1 %v190_v23  ;;  %v153_v61 = vmax.f32 %v121_v56, 0.0  ;;  %v106_v6 = vadd.f32 %v683_v20, %v70_v63  ;;  %v107_v7 = vadd.f32 %v683_v20, %v71_v0  ;;  %v114_v8 = vadd.f32 %v683_v20, %v78_v1  ;;  %v30_v0 = vld [vmem:[%s1233_s0 + $0x30] sm:$0xff]  ;;  %v31_v1 = vld [vmem:[%s1233_s0 + $0x38] sm:$0xff] }
  0x11   :  { %580 = vmatpush.bf16.msra.mxu2 %v190_v23  ;;  %581 = vmatpush.bf16.msra.mxu3 %v190_v23  ;;  %v115_v9 = vadd.f32 %v683_v20, %v79_v2  ;;  %v130_v10 = vmax.f32 %v98_v4, 0.0  ;;  %v131_v12 = vmax.f32 %v99_v5, 0.0  ;;  %v86_v19 = vmul.f32 %v661_v11, %v50_v17  ;;  %v39_v4 = vld [vmem:[%s1233_s0 + $0x78] sm:$0xff]  ;;  %v46_v5 = vld [vmem:[%s1233_s0 + $0xb0] sm:$0xff] }
  0x12   :  { %v172_v3 = vpack.c.bf16 %v153_v61, %v152_v59  ;;  %v138_v13 = vmax.f32 %v106_v6, 0.0  ;;  %v139_v14 = vmax.f32 %v107_v7, 0.0  ;;  %v146_v15 = vmax.f32 %v114_v8, 0.0  ;;  %v47_v6 = vld [vmem:[%s1233_s0 + $0xb8] sm:$0xff] }
  0x13   :  { %v147_v16 = vmax.f32 %v115_v9, 0.0  ;;  %v87_v21 = vmul.f32 %v661_v11, %v51_v18  ;;  %v161_v22 = vpack.c.bf16 %v131_v12, %v130_v10  ;;  %v122_v25 = vadd.f32 %v683_v20, %v86_v19 }
  0x14   :  { %253 = vmatpush.bf16.msra.mxu0 %v189_v32  ;;  %582 = vmatpush.bf16.msra.mxu1 %v189_v32  ;;  %v165_v23 = vpack.c.bf16 %v139_v14, %v138_v13  ;;  %v64_v34 = vmul.f32 %v661_v11, %v28_v24  ;;  %v65_v36 = vmul.f32 %v661_v11, %v29_v26  ;;  %v54_v13 = vld [vmem:[%s1233_s0 + $0xf0] sm:$0xff]  ;;  %v55_v14 = vld [vmem:[%s1233_s0 + $0xf8] sm:$0xff] }
  0x15   :  { %583 = vmatpush.bf16.msra.mxu2 %v189_v32  ;;  %584 = vmatpush.bf16.msra.mxu3 %v189_v32  ;;  %v169_v27 = vpack.c.bf16 %v147_v16, %v146_v15  ;;  %v123_v30 = vadd.f32 %v683_v20, %v87_v21  ;;  %v45_v32 = vld [vmem:[%s1233_s0 + $0xa8] sm:$0xff]  ;;  %v154_v33 = vmax.f32 %v122_v25, 0.0  ;;  %v72_v37 = vmul.f32 %v661_v11, %v36_v28 }
  0x16   :  { %v73_v38 = vmul.f32 %v661_v11, %v37_v29  ;;  %v80_v39 = vmul.f32 %v661_v11, %v44_v31  ;;  %v81_v40 = vmul.f32 %v661_v11, %v45_v32  ;;  %v88_v44 = vmul.f32 %v661_v11, %v52_v42 }
  0x17   :  { %v155_v35 = vmax.f32 %v123_v30, 0.0  ;;  %v89_v45 = vmul.f32 %v661_v11, %v53_v43  ;;  %v100_v46 = vadd.f32 %v683_v20, %v64_v34  ;;  %v101_v47 = vadd.f32 %v683_v20, %v65_v36 }
  0x18   :  { %254 = vmatpush.bf16.msra.mxu0 %v188_v41  ;;  %585 = vmatpush.bf16.msra.mxu1 %v188_v41  ;;  %v116_v50 = vadd.f32 %v683_v20, %v80_v39  ;;  %v117_v51 = vadd.f32 %v683_v20, %v81_v40  ;;  %v124_v52 = vadd.f32 %v683_v20, %v88_v44 }
  0x19   :  { %586 = vmatpush.bf16.msra.mxu2 %v188_v41  ;;  %587 = vmatpush.bf16.msra.mxu3 %v188_v41  ;;  %v173_v41 = vpack.c.bf16 %v155_v35, %v154_v33  ;;  %v132_v54 = vmax.f32 %v100_v46, 0.0  ;;  %v133_v55 = vmax.f32 %v101_v47, 0.0  ;;  %v66_v7 = vmul.f32 %v661_v11, %v30_v0 }
  0x1a   :  { %v148_v58 = vmax.f32 %v116_v50, 0.0  ;;  %v149_v59 = vmax.f32 %v117_v51, 0.0  ;;  %v156_v60 = vmax.f32 %v124_v52, 0.0  ;;  %v67_v9 = vmul.f32 %v661_v11, %v31_v1 }
  0x1b   :  { %554 = vmatmul.msk.bf16.vlgmr.msra.gmra.mxu0 %vm198_vm0, %v160_v48  ;;  %558 = vmatmul.msk.bf16.vlgmr.msra.gmra.mxu1 %vm198_vm0, %v164_v49  ;;  %v108_v48 = vadd.f32 %v683_v20, %v72_v37  ;;  %v109_v49 = vadd.f32 %v683_v20, %v73_v38  ;;  %v162_v62 = vpack.c.bf16 %v133_v55, %v132_v54 }
  0x1c   :  { %562 = vmatmul.msk.bf16.vlgmr.msra.gmra.mxu2 %vm198_vm0, %v168_v53  ;;  %566 = vmatmul.msk.bf16.vlgmr.msra.gmra.mxu3 %vm198_vm0, %v172_v3  ;;  %v125_v53 = vadd.f32 %v683_v20, %v89_v45  ;;  %v170_v2 = vpack.c.bf16 %v149_v59, %v148_v58  ;;  %v38_v3 = vld [vmem:[%s1233_s0 + $0x70] sm:$0xff]  ;;  %v75_v12 = vmul.f32 %v661_v11, %v39_v4 }
  0x1d   :  { %v140_v56 = vmax.f32 %v108_v48, 0.0  ;;  %v141_v57 = vmax.f32 %v109_v49, 0.0  ;;  %v74_v10 = vmul.f32 %v661_v11, %v38_v3  ;;  %v82_v15 = vmul.f32 %v661_v11, %v46_v5 }
  0x1e   :  { %v157_v61 = vmax.f32 %v125_v53, 0.0  ;;  %v83_v16 = vmul.f32 %v661_v11, %v47_v6  ;;  %v90_v17 = vmul.f32 %v661_v11, %v54_v13  ;;  %v91_v18 = vmul.f32 %v661_v11, %v55_v14 }
  0x1f   :  { %v166_v63 = vpack.c.bf16 %v141_v57, %v140_v56  ;;  %v102_v19 = vadd.f32 %v683_v20, %v66_v7  ;;  %v103_v21 = vadd.f32 %v683_v20, %v67_v9  ;;  %v118_v24 = vadd.f32 %v683_v20, %v82_v15 }
  0x20   :  { %v174_v8 = vpack.c.bf16 %v157_v61, %v156_v60  ;;  %v119_v25 = vadd.f32 %v683_v20, %v83_v16  ;;  %v126_v26 = vadd.f32 %v683_v20, %v90_v17 }
  0x21   :  { %v134_v28 = vmax.f32 %v102_v19, 0.0  ;;  %v135_v29 = vmax.f32 %v103_v21, 0.0  ;;  %v150_v31 = vmax.f32 %v118_v24, 0.0 }
  0x22   :  { %v151_v32 = vmax.f32 %v119_v25, 0.0  ;;  %v158_v33 = vmax.f32 %v126_v26, 0.0 }
  0x23   :  { %v163_v35 = vpack.c.bf16 %v135_v29, %v134_v28 }
  0x24   :  { %v171_v37 = vpack.c.bf16 %v151_v32, %v150_v31 }
  0x2b   :  { %555 = vmatmul.msk.bf16.gmra.mxu0 %vm198_vm0, %v161_v22  ;;  %559 = vmatmul.msk.bf16.gmra.mxu1 %vm198_vm0, %v165_v23  ;;  %v110_v22 = vadd.f32 %v683_v20, %v74_v10  ;;  %v111_v23 = vadd.f32 %v683_v20, %v75_v12 }
  0x2c   :  { %563 = vmatmul.msk.bf16.gmra.mxu2 %vm198_vm0, %v169_v27  ;;  %567 = vmatmul.msk.bf16.gmra.mxu3 %vm198_vm0, %v173_v41  ;;  %v127_v27 = vadd.f32 %v683_v20, %v91_v18  ;;  %v856_v20 = vld [vmem:[%s1236_s4] ss:$0 sm:$0xff] }
  0x2d   :  { %v142_v30 = vmax.f32 %v110_v22, 0.0  ;;  %v143_v11 = vmax.f32 %v111_v23, 0.0 }
  0x2e   :  { %v159_v34 = vmax.f32 %v127_v27, 0.0 }
  0x2f   :  { %v167_v36 = vpack.c.bf16 %v143_v11, %v142_v30 }
  0x30   :  { %v175_v38 = vpack.c.bf16 %v159_v34, %v158_v33 }
  0x3b   :  { %556 = vmatmul.msk.bf16.gmra.mxu0 %vm198_vm0, %v162_v62  ;;  %560 = vmatmul.msk.bf16.gmra.mxu1 %vm198_vm0, %v166_v63 }
  0x3c   :  { %564 = vmatmul.msk.bf16.gmra.mxu2 %vm198_vm0, %v170_v2  ;;  %568 = vmatmul.msk.bf16.gmra.mxu3 %vm198_vm0, %v174_v8 }
  0x4b   :  { %557 = vmatmul.msk.bf16.gmra.mxu0 %vm198_vm0, %v163_v35  ;;  %561 = vmatmul.msk.bf16.gmra.mxu1 %vm198_vm0, %v167_v36 }
  0x4c   :  { %565 = vmatmul.msk.bf16.gmra.mxu2 %vm198_vm0, %v171_v37  ;;  %569 = vmatmul.msk.bf16.gmra.mxu3 %vm198_vm0, %v175_v38 }
  0x98   :  { %v256_v39 = vpop.f32.mrf.mxu0  ;;  %v276_v40 = vpop.f32.mrf.mxu1 }
  0x99   :  { %v859_v41 = vadd.f32 %v856_v20, %v256_v39  ;;  %v862_v42 = vadd.f32 %v856_v20, %v276_v40 }
  0x9b   :  { %337 = vst.msk [vmem:[%s1237_s5] sm:$0xff] %vm336_vm1, %v859_v41  ;;  %v440_v19 = vmul.f32 %v859_v41, %v859_v41  ;;  %v369_v24 = vsel %vm336_vm1, %v859_v41, 0.0 }
  0x9c   :  { %345 = vst.msk [vmem:[%s1237_s5 + $0x40] sm:$0xff] %vm336_vm1, %v862_v42 }
  0x9d   :  { %v472_v25 = vsel %vm336_vm1, %v440_v19, 0.0  ;;  %v448_v19 = vmul.f32 %v862_v42, %v862_v42 }
  0x9f   :  { %v296_v43 = vpop.f32.mrf.mxu2  ;;  %v316_v49 = vpop.f32.mrf.mxu3 }
  0xa0   :  { %v258_v44 = vpop.f32.mrf.mxu0  ;;  %v278_v45 = vpop.f32.mrf.mxu1  ;;  %v875_v46 = vadd.f32 %v856_v20, %v296_v43  ;;  %v896_v50 = vadd.f32 %v856_v20, %v316_v49 }
  0xa1   :  { %v259_v47 = vadd.f32 %v856_v20, %v258_v44  ;;  %v879_v48 = vadd.f32 %v856_v20, %v278_v45 }
  0xa2   :  { %353 = vst.msk [vmem:[%s1237_s5 + $0x80] sm:$0xff] %vm336_vm1, %v875_v46 }
  0xa3   :  { %338 = vst.msk [vmem:[%s1237_s5 + $0x8] sm:$0xff] %vm336_vm1, %v259_v47  ;;  %v441_v21 = vmul.f32 %v259_v47, %v259_v47  ;;  %v370_v23 = vsel %vm336_vm1, %v259_v47, 0.0 }
  0xa4   :  { %346 = vst.msk [vmem:[%s1237_s5 + $0x48] sm:$0xff] %vm336_vm1, %v879_v48  ;;  %v371_v30 = vadd.f32 %v370_v23, %v369_v24 }
  0xa5   :  { %361 = vst.msk [vmem:[%s1237_s5 + $0xc0] sm:$0xff] %vm336_vm1, %v896_v50  ;;  %v473_v26 = vsel %vm336_vm1, %v441_v21, 0.0 }
  0xa6   :  { %v474_v40 = vadd.f32 %v473_v26, %v472_v25  ;;  %v384_v25 = vsel %vm336_vm1, %v862_v42, 0.0  ;;  %v449_v26 = vmul.f32 %v879_v48, %v879_v48 }
  0xa7   :  { %v298_v51 = vpop.f32.mrf.mxu2  ;;  %v318_v57 = vpop.f32.mrf.mxu3 }
  0xa8   :  { %v261_v52 = vpop.f32.mrf.mxu0  ;;  %v281_v53 = vpop.f32.mrf.mxu1  ;;  %v899_v54 = vadd.f32 %v856_v20, %v298_v51  ;;  %v916_v58 = vadd.f32 %v856_v20, %v318_v57 }
  0xa9   :  { %v262_v55 = vadd.f32 %v856_v20, %v261_v52  ;;  %v908_v56 = vadd.f32 %v856_v20, %v281_v53 }
  0xaa   :  { %354 = vst.msk [vmem:[%s1237_s5 + $0x88] sm:$0xff] %vm336_vm1, %v899_v54 }
  0xab   :  { %339 = vst.msk [vmem:[%s1237_s5 + $0x10] sm:$0xff] %vm336_vm1, %v262_v55  ;;  %v442_v22 = vmul.f32 %v262_v55, %v262_v55  ;;  %v372_v27 = vsel %vm336_vm1, %v262_v55, 0.0 }
  0xac   :  { %347 = vst.msk [vmem:[%s1237_s5 + $0x50] sm:$0xff] %vm336_vm1, %v908_v56  ;;  %v373_v41 = vadd.f32 %v372_v27, %v371_v30  ;;  %v487_v30 = vsel %vm336_vm1, %v448_v19, 0.0 }
  0xad   :  { %362 = vst.msk [vmem:[%s1237_s5 + $0xc8] sm:$0xff] %vm336_vm1, %v916_v58  ;;  %v475_v11 = vsel %vm336_vm1, %v442_v22, 0.0 }
  0xae   :  { %v476_v49 = vadd.f32 %v475_v11, %v474_v40  ;;  %v386_v11 = vsel %vm336_vm1, %v879_v48, 0.0 }
  0xaf   :  { %v301_v59 = vpop.f32.mrf.mxu2  ;;  %v321_v1 = vpop.f32.mrf.mxu3 }
  0xb0   :  { %v263_v60 = vpop.f32.mrf.mxu0  ;;  %v283_v61 = vpop.f32.mrf.mxu1  ;;  %v933_v62 = vadd.f32 %v856_v20, %v301_v59  ;;  %v961_v8 = vadd.f32 %v856_v20, %v321_v1 }
  0xb1   :  { %v264_v63 = vadd.f32 %v856_v20, %v263_v60  ;;  %v937_v0 = vadd.f32 %v856_v20, %v283_v61 }
  0xb2   :  { %355 = vst.msk [vmem:[%s1237_s5 + $0x90] sm:$0xff] %vm336_vm1, %v933_v62 }
  0xb3   :  { %340 = vst.msk [vmem:[%s1237_s5 + $0x18] sm:$0xff] %vm336_vm1, %v264_v63  ;;  %v443_v28 = vmul.f32 %v264_v63, %v264_v63  ;;  %v374_v31 = vsel %vm336_vm1, %v264_v63, 0.0  ;;  %v451_v40 = vmul.f32 %v937_v0, %v937_v0 }
  0xb4   :  { %348 = vst.msk [vmem:[%s1237_s5 + $0x58] sm:$0xff] %vm336_vm1, %v937_v0  ;;  %v375_v51 = vadd.f32 %v374_v31, %v373_v41  ;;  %v450_v31 = vmul.f32 %v908_v56, %v908_v56 }
  0xb5   :  { %363 = vst.msk [vmem:[%s1237_s5 + $0xd0] sm:$0xff] %vm336_vm1, %v961_v8  ;;  %v477_v44 = vsel %vm336_vm1, %v443_v28, 0.0 }
  0xb6   :  { %v478_v57 = vadd.f32 %v477_v44, %v476_v49 }
  0xb7   :  { %v303_v2 = vpop.f32.mrf.mxu2  ;;  %v323_v9 = vpop.f32.mrf.mxu3 }
  0xb8   :  { %v266_v3 = vpop.f32.mrf.mxu0  ;;  %v286_v4 = vpop.f32.mrf.mxu1  ;;  %v954_v5 = vadd.f32 %v856_v20, %v303_v2  ;;  %v969_v10 = vadd.f32 %v856_v20, %v323_v9 }
  0xb9   :  { %v267_v6 = vadd.f32 %v856_v20, %v266_v3  ;;  %v958_v7 = vadd.f32 %v856_v20, %v286_v4 }
  0xba   :  { %356 = vst.msk [vmem:[%s1237_s5 + $0x98] sm:$0xff] %vm336_vm1, %v954_v5 }
  0xbb   :  { %341 = vst.msk [vmem:[%s1237_s5 + $0x20] sm:$0xff] %vm336_vm1, %v267_v6  ;;  %v444_v35 = vmul.f32 %v267_v6, %v267_v6  ;;  %v376_v45 = vsel %vm336_vm1, %v267_v6, 0.0  ;;  %v452_v49 = vmul.f32 %v958_v7, %v958_v7 }
  0xbc   :  { %349 = vst.msk [vmem:[%s1237_s5 + $0x60] sm:$0xff] %vm336_vm1, %v958_v7  ;;  %v377_v59 = vadd.f32 %v376_v45, %v375_v51 }
  0xbd   :  { %364 = vst.msk [vmem:[%s1237_s5 + $0xd8] sm:$0xff] %vm336_vm1, %v969_v10  ;;  %v479_v52 = vsel %vm336_vm1, %v444_v35, 0.0 }
  0xbe   :  { %v480_v1 = vadd.f32 %v479_v52, %v478_v57  ;;  %v392_v57 = vsel %vm336_vm1, %v958_v7, 0.0 }
  0xbf   :  { %v306_v12 = vpop.f32.mrf.mxu2  ;;  %v326_v18 = vpop.f32.mrf.mxu3 }
  0xc0   :  { %v268_v13 = vpop.f32.mrf.mxu0  ;;  %v288_v14 = vpop.f32.mrf.mxu1  ;;  %v991_v15 = vadd.f32 %v856_v20, %v306_v12  ;;  %v1029_v38 = vadd.f32 %v856_v20, %v326_v18 }
  0xc1   :  { %v269_v16 = vadd.f32 %v856_v20, %v268_v13  ;;  %v995_v17 = vadd.f32 %v856_v20, %v288_v14 }
  0xc2   :  { %357 = vst.msk [vmem:[%s1237_s5 + $0xa0] sm:$0xff] %vm336_vm1, %v991_v15 }
  0xc3   :  { %342 = vst.msk [vmem:[%s1237_s5 + $0x28] sm:$0xff] %vm336_vm1, %v269_v16  ;;  %v445_v47 = vmul.f32 %v269_v16, %v269_v16  ;;  %v378_v53 = vsel %vm336_vm1, %v269_v16, 0.0 }
  0xc4   :  { %350 = vst.msk [vmem:[%s1237_s5 + $0x68] sm:$0xff] %vm336_vm1, %v995_v17  ;;  %v379_v2 = vadd.f32 %v378_v53, %v377_v59 }
  0xc5   :  { %365 = vst.msk [vmem:[%s1237_s5 + $0xe0] sm:$0xff] %vm336_vm1, %v1029_v38  ;;  %v481_v60 = vsel %vm336_vm1, %v445_v47, 0.0  ;;  %v491_v47 = vsel %vm336_vm1, %v450_v31, 0.0 }
  0xc6   :  { %v482_v16 = vadd.f32 %v481_v60, %v480_v1 }
  0xc7   :  { %v308_v29 = vpop.f32.mrf.mxu2  ;;  %v328_v39 = vpop.f32.mrf.mxu3 }
  0xc8   :  { %v271_v32 = vpop.f32.mrf.mxu0  ;;  %v291_v33 = vpop.f32.mrf.mxu1  ;;  %v1022_v34 = vadd.f32 %v856_v20, %v308_v29  ;;  %v1037_v43 = vadd.f32 %v856_v20, %v328_v39  ;;  %v388_v39 = vsel %vm336_vm1, %v908_v56, 0.0  ;;  %v390_v56 = vsel %vm336_vm1, %v937_v0, 0.0 }
  0xc9   :  { %v272_v36 = vadd.f32 %v856_v20, %v271_v32  ;;  %v1026_v37 = vadd.f32 %v856_v20, %v291_v33  ;;  %v453_v0 = vmul.f32 %v995_v17, %v995_v17 }
  0xca   :  { %358 = vst.msk [vmem:[%s1237_s5 + $0xa8] sm:$0xff] %vm336_vm1, %v1022_v34 }
  0xcb   :  { %343 = vst.msk [vmem:[%s1237_s5 + $0x30] sm:$0xff] %vm336_vm1, %v272_v36  ;;  %v446_v55 = vmul.f32 %v272_v36, %v272_v36  ;;  %v380_v61 = vsel %vm336_vm1, %v272_v36, 0.0  ;;  %v489_v36 = vsel %vm336_vm1, %v449_v26, 0.0  ;;  %v402_v26 = vsel %vm336_vm1, %v899_v54, 0.0 }
  0xcc   :  { %351 = vst.msk [vmem:[%s1237_s5 + $0x70] sm:$0xff] %vm336_vm1, %v1026_v37  ;;  %v381_v18 = vadd.f32 %v380_v61, %v379_v2  ;;  %v394_v61 = vsel %vm336_vm1, %v995_v17, 0.0  ;;  %v497_v2 = vsel %vm336_vm1, %v453_v0, 0.0  ;;  %v464_v0 = vmul.f32 %v896_v50, %v896_v50 }
  0xcd   :  { %366 = vst.msk [vmem:[%s1237_s5 + $0xe8] sm:$0xff] %vm336_vm1, %v1037_v43  ;;  %v483_v9 = vsel %vm336_vm1, %v446_v55, 0.0  ;;  %v493_v55 = vsel %vm336_vm1, %v451_v40, 0.0  ;;  %v461_v40 = vmul.f32 %v1022_v34, %v1022_v34 }
  0xce   :  { %v484_v23 = vadd.f32 %v483_v9, %v482_v16 }
  0xcf   :  { %v311_v63 = vpop.f32.mrf.mxu2  ;;  %v331_v14 = vpop.f32.mrf.mxu3 }
  0xd0   :  { %v273_v3 = vpop.f32.mrf.mxu0  ;;  %v293_v4 = vpop.f32.mrf.mxu1  ;;  %v1065_v6 = vadd.f32 %v856_v20, %v311_v63  ;;  %v1105_v41 = vadd.f32 %v856_v20, %v331_v14  ;;  %v454_v63 = vmul.f32 %v1026_v37, %v1026_v37  ;;  %v456_v14 = vmul.f32 %v875_v46, %v875_v46 }
  0xd1   :  { %v274_v12 = vadd.f32 %v856_v20, %v273_v3  ;;  %v294_v13 = vadd.f32 %v856_v20, %v293_v4  ;;  %v396_v3 = vsel %vm336_vm1, %v1026_v37, 0.0 }
  0xd2   :  { %359 = vst.msk [vmem:[%s1237_s5 + $0xb0] sm:$0xff] %vm336_vm1, %v1065_v6  ;;  %v499_v16 = vsel %vm336_vm1, %v454_v63, 0.0 }
  0xd3   :  { %344 = vst.msk [vmem:[%s1237_s5 + $0x38] sm:$0xff] %vm336_vm1, %v274_v12  ;;  %v382_v21 = vsel %vm336_vm1, %v274_v12, 0.0  ;;  %v447_v22 = vmul.f32 %v274_v12, %v274_v12  ;;  %v455_v4 = vmul.f32 %v294_v13, %v294_v13  ;;  %v398_v17 = vsel %vm336_vm1, %v294_v13, 0.0 }
  0xd4   :  { %v383_v24 = vadd.f32 %v382_v21, %v381_v18  ;;  %352 = vst.msk [vmem:[%s1237_s5 + $0x78] sm:$0xff] %vm336_vm1, %v294_v13  ;;  %v400_v21 = vsel %vm336_vm1, %v875_v46, 0.0  ;;  %v458_v13 = vmul.f32 %v933_v62, %v933_v62  ;;  %v404_v46 = vsel %vm336_vm1, %v933_v62, 0.0 }
  0xd5   :  { %v485_v27 = vsel %vm336_vm1, %v447_v22, 0.0  ;;  %367 = vst.msk [vmem:[%s1237_s5 + $0xf0] sm:$0xff] %vm336_vm1, %v1105_v41  ;;  %v457_v22 = vmul.f32 %v899_v54, %v899_v54  ;;  %v501_v37 = vsel %vm336_vm1, %v455_v4, 0.0  ;;  %v406_v54 = vsel %vm336_vm1, %v954_v5, 0.0 }
  0xd6   :  { %v385_v28 = vadd.f32 %v384_v25, %v383_v24  ;;  %v486_v29 = vadd.f32 %v485_v27, %v484_v23  ;;  %v503_v25 = vsel %vm336_vm1, %v456_v14, 0.0  ;;  %v408_v62 = vsel %vm336_vm1, %v991_v15, 0.0 }
  0xd7   :  { %v313_v32 = vpop.f32.mrf.mxu2  ;;  %v333_v48 = vpop.f32.mrf.mxu3  ;;  %v467_v14 = vmul.f32 %v969_v10, %v969_v10 }
  0xd8   :  { %v387_v33 = vadd.f32 %v386_v11, %v385_v28  ;;  %v488_v35 = vadd.f32 %v487_v30, %v486_v29  ;;  %v1097_v42 = vadd.f32 %v856_v20, %v313_v32  ;;  %v1123_v51 = vadd.f32 %v856_v20, %v333_v48 }
  0xd9   :  { %v495_v20 = vsel %vm336_vm1, %v452_v49, 0.0  ;;  %v505_v29 = vsel %vm336_vm1, %v457_v22, 0.0  ;;  %v459_v30 = vmul.f32 %v954_v5, %v954_v5  ;;  %v507_v32 = vsel %vm336_vm1, %v458_v13, 0.0 }
  0xda   :  { %v389_v44 = vadd.f32 %v388_v39, %v387_v33  ;;  %v490_v45 = vadd.f32 %v489_v36, %v488_v35  ;;  %360 = vst.msk [vmem:[%s1237_s5 + $0xb8] sm:$0xff] %vm336_vm1, %v1097_v42  ;;  %v460_v33 = vmul.f32 %v991_v15, %v991_v15  ;;  %v410_v5 = vsel %vm336_vm1, %v1022_v34, 0.0 }
  0xdb   :  { %368 = vst.msk [vmem:[%s1237_s5 + $0xf8] sm:$0xff] %vm336_vm1, %v1123_v51  ;;  %v509_v39 = vsel %vm336_vm1, %v459_v30, 0.0  ;;  %v412_v15 = vsel %vm336_vm1, %v1065_v6, 0.0  ;;  %v470_v13 = vmul.f32 %v1105_v41, %v1105_v41 }
  0xdc   :  { %v492_v52 = vadd.f32 %v491_v47, %v490_v45  ;;  %v391_v53 = vadd.f32 %v390_v56, %v389_v44  ;;  %v511_v45 = vsel %vm336_vm1, %v460_v33, 0.0  ;;  %v462_v47 = vmul.f32 %v1065_v6, %v1065_v6 }
  0xdd   :  { %v465_v6 = vmul.f32 %v916_v58, %v916_v58 }
  0xde   :  { %v393_v59 = vadd.f32 %v392_v57, %v391_v53  ;;  %v494_v60 = vadd.f32 %v493_v55, %v492_v52  ;;  %v513_v52 = vsel %vm336_vm1, %v461_v40, 0.0  ;;  %v463_v53 = vmul.f32 %v1097_v42, %v1097_v42 }
  0xdf   :  { %v515_v34 = vsel %vm336_vm1, %v462_v47, 0.0 }
  0xe0   :  { %v395_v7 = vadd.f32 %v394_v61, %v393_v59  ;;  %v496_v1 = vadd.f32 %v495_v20, %v494_v60  ;;  %v414_v59 = vsel %vm336_vm1, %v1097_v42, 0.0  ;;  %v416_v61 = vsel %vm336_vm1, %v896_v50, 0.0 }
  0xe1   :  { %v517_v63 = vsel %vm336_vm1, %v463_v53, 0.0  ;;  %v466_v42 = vmul.f32 %v961_v8, %v961_v8  ;;  %v420_v50 = vsel %vm336_vm1, %v961_v8, 0.0  ;;  %v424_v8 = vsel %vm336_vm1, %v1029_v38, 0.0 }
  0xe2   :  { %v397_v9 = vadd.f32 %v396_v3, %v395_v7  ;;  %v498_v12 = vadd.f32 %v497_v2, %v496_v1  ;;  %v519_v2 = vsel %vm336_vm1, %v464_v0, 0.0  ;;  %v418_v3 = vsel %vm336_vm1, %v916_v58, 0.0 }
  0xe3   :  { %v422_v58 = vsel %vm336_vm1, %v969_v10, 0.0  ;;  %v426_v10 = vsel %vm336_vm1, %v1037_v43, 0.0 }
  0xe4   :  { %v500_v18 = vadd.f32 %v499_v16, %v498_v12  ;;  %v399_v19 = vadd.f32 %v398_v17, %v397_v9  ;;  %v521_v12 = vsel %vm336_vm1, %v465_v6, 0.0 }
  0xe6   :  { %v401_v23 = vadd.f32 %v400_v21, %v399_v19  ;;  %v502_v24 = vadd.f32 %v501_v37, %v500_v18  ;;  %v523_v18 = vsel %vm336_vm1, %v466_v42, 0.0  ;;  %v468_v19 = vmul.f32 %v1029_v38, %v1029_v38 }
  0xe7   :  { %v525_v37 = vsel %vm336_vm1, %v467_v14, 0.0  ;;  %v428_v38 = vsel %vm336_vm1, %v1105_v41, 0.0 }
  0xe8   :  { %v403_v27 = vadd.f32 %v402_v26, %v401_v23  ;;  %v504_v28 = vadd.f32 %v503_v25, %v502_v24  ;;  %v469_v23 = vmul.f32 %v1037_v43, %v1037_v43  ;;  %v527_v26 = vsel %vm336_vm1, %v468_v19, 0.0 }
  0xe9   :  { %v430_v43 = vsel %vm336_vm1, %v1123_v51, 0.0 }
  0xea   :  { %v506_v11 = vadd.f32 %v505_v29, %v504_v28  ;;  %v405_v31 = vadd.f32 %v404_v46, %v403_v27  ;;  %v529_v29 = vsel %vm336_vm1, %v469_v23, 0.0  ;;  %v471_v46 = vmul.f32 %v1123_v51, %v1123_v51 }
  0xec   :  { %v407_v35 = vadd.f32 %v406_v54, %v405_v31  ;;  %v508_v36 = vadd.f32 %v507_v32, %v506_v11  ;;  %v531_v31 = vsel %vm336_vm1, %v470_v13, 0.0  ;;  %v533_v33 = vsel %vm336_vm1, %v471_v46, 0.0 }
  0xee   :  { %v409_v48 = vadd.f32 %v408_v62, %v407_v35  ;;  %v510_v44 = vadd.f32 %v509_v39, %v508_v36 }
  0xf0   :  { %v411_v56 = vadd.f32 %v410_v5, %v409_v48  ;;  %v512_v49 = vadd.f32 %v511_v45, %v510_v44 }
  0xf2   :  { %v514_v55 = vadd.f32 %v513_v52, %v512_v49  ;;  %v413_v57 = vadd.f32 %v412_v15, %v411_v56 }
  0xf4   :  { %v516_v60 = vadd.f32 %v515_v34, %v514_v55  ;;  %v415_v20 = vadd.f32 %v414_v59, %v413_v57 }
  0xf6   :  { %v417_v7 = vadd.f32 %v416_v61, %v415_v20  ;;  %v518_v1 = vadd.f32 %v517_v63, %v516_v60 }
  0xf8   :  { %v419_v4 = vadd.f32 %v418_v3, %v417_v7  ;;  %v520_v9 = vadd.f32 %v519_v2, %v518_v1 }
  0xfa   :  { %v522_v16 = vadd.f32 %v521_v12, %v520_v9  ;;  %v421_v17 = vadd.f32 %v420_v50, %v419_v4 }
  0xfc   :  { %v423_v21 = vadd.f32 %v422_v58, %v421_v17  ;;  %v524_v22 = vadd.f32 %v523_v18, %v522_v16 }
  0xfe   :  { %v425_v24 = vadd.f32 %v424_v8, %v423_v21  ;;  %v526_v25 = vadd.f32 %v525_v37, %v524_v22 }
 0x100   :  { %v427_v27 = vadd.f32 %v426_v10, %v425_v24  ;;  %v528_v28 = vadd.f32 %v527_v26, %v526_v25 }
 0x102   :  { %v530_v30 = vadd.f32 %v529_v29, %v528_v28  ;;  %v429_v11 = vadd.f32 %v428_v38, %v427_v27 }
 0x104   :  { %v532_v32 = vadd.f32 %v531_v31, %v530_v30  ;;  %v431_v54 = vadd.f32 %v430_v43, %v429_v11 }
 0x106   :  { %v432_v35 = vrot.slane %v431_v54, 4  ;;  %v534_v36 = vadd.f32 %v533_v33, %v532_v32 }
 0x108   :  { %v433_v39 = vadd.f32 %v432_v35, %v431_v54  ;;  %v535_v62 = vrot.slane %v534_v36, 4 }
 0x10a   :  { %v434_v40 = vrot.slane %v433_v39, 2  ;;  %v536_v41 = vadd.f32 %v535_v62, %v534_v36 }
 0x10c   :  { %v435_v48 = vadd.f32 %v434_v40, %v433_v39  ;;  %v537_v44 = vrot.slane %v536_v41, 2 }
 0x10e   :  { %v436_v45 = vrot.slane %v435_v48, 1  ;;  %v538_v5 = vadd.f32 %v537_v44, %v536_v41 }
 0x110   :  { %v437_v47 = vadd.f32 %v436_v45, %v435_v48  ;;  %v539_v56 = vrot.slane %v538_v5, 1 }
 0x112   :  { %439 = vst.msk [vmem:[%s1238_s6] sm:$0x1] %vm438_vm2, %v437_v47  ;;  %v540_v51 = vadd.f32 %v539_v56, %v538_v5 }
 0x114   :  { %541 = vst.msk [vmem:[%s1239_s7] sm:$0x1] %vm438_vm2, %v540_v51 }

// kernel: critic_forward.33
= control target key start
LH: loop header
LB: loop body
LE: loop exit
PB: predicated region body
PF: predicated region fallthrough
CT: control target
= control target key end

     0   :  { %vm39_vm0 = vcmask 1046528   ;;  %vm35_vm1 = vcmask 244736   ;;  %vm73_vm2 = vcmask 1043456   ;;  %vm69_vm4 = vcmask 195584   ;;  %s163_s1 = inlined_call_operand.vmem [shape: f32[30,24], index: 1, kind: input, shape index: {}]   ;;  %s164_s2 = inlined_call_operand.vmem [shape: f32[1,24], index: 2, kind: input, shape index: {}]   ;;  %s165_s0 = inlined_call_operand.vmem [shape: f32[2,30], index: 0, kind: input, shape index: {}]   ;;  %s166_s3 = inlined_call_operand.vmem [shape: f32[24,1], index: 3, kind: input, shape index: {}]   ;;  %s167_s4 = inlined_call_operand.<no memory space> [shape: f32[1,1], index: 4, kind: input, shape index: {}]   ;;  %s168_s5 = inlined_call_operand.vmem [shape: f32[2,1], index: 5, kind: output, shape index: {}]  }
   0x1   :  { %v27_v0 = vld [vmem:[%s163_s1 + $0x10] sm:$0xff]  ;;  %v28_v1 = vld [vmem:[%s163_s1 + $0x18] sm:$0x3f]  ;;  %v25_v3 = vld [vmem:[%s163_s1] sm:$0xff]  ;;  %v10_v15 = vstv %s167_s4  ;;  %vm90_vm5 = vcmask 1024  }
   0x2   :  { %v30_v2 = vpack.c.bf16 %v28_v1, %v27_v0  ;;  %v26_v4 = vld [vmem:[%s163_s1 + $0x8] sm:$0xff]  ;;  %v23_v7 = vld [vmem:[%s165_s0] sm:$0x3]  ;;  %v62_v9 = vld [vmem:[%s166_s3 + $0x10] sm:$0xff]  ;;  %11 = vst [vmem:[#allocation2] sm:$0x1] %v10_v15 }
   0x3   :  { %v29_v6 = vpack.c.bf16 %v26_v4, %v25_v3  ;;  %v24_v8 = vpack.c.bf16 %v23_v7, %v23_v7  ;;  %v64_v10 = vpack.c.bf16 %v62_v9, %v62_v9  ;;  %v60_v12 = vld [vmem:[%s166_s3] sm:$0xff]  ;;  %v61_v13 = vld [vmem:[%s166_s3 + $0x8] sm:$0xff] }
   0x4   :  { %v41_v5 = vsel %vm39_vm0, %v30_v2, 0  ;;  %v63_v14 = vpack.c.bf16 %v61_v13, %v60_v12  ;;  %v98_v16 = vld [vmem:[%s164_s2] ss:$0 sm:$0xff] }
   0x5   :  { %49 = vmatpush.bf16.msra.mxu0 %v41_v5  ;;  %v75_v11 = vsel %vm73_vm2, %v64_v10, 0 }
   0x6   :  { %83 = vmatpush.bf16.msra.mxu1 %v75_v11 }
   0x9   :  { %50 = vmatpush.bf16.msra.mxu0 %v29_v6  ;;  %v99_v23 = vld [vmem:[#allocation2] ss:$0 sm:$0xff] }
   0xa   :  { %84 = vmatpush.bf16.msra.mxu1 %v63_v14 }
   0xc   :  { %96 = vmatmul.msk.bf16.vlgmr.msra.gmra.mxu0 %vm35_vm1, %v24_v8 }
  0x89   :  { %v52_v17 = vpop.f32.mrf.mxu0 }
  0x8a   :  { %v53_v18 = vadd.f32 %v98_v16, %v52_v17 }
  0x8c   :  { %vm56_vm3 = vcmp.ge.f32.partialorder %v53_v18, 0.0  ;;  %v57_v19 = vmul.f32 0.01, %v53_v18 }
  0x8e   :  { %v58_v20 = vsel %vm56_vm3, %v53_v18, %v57_v19 }
  0x8f   :  { %v59_v21 = vpack.c.bf16 %v58_v20, %v58_v20 }
  0x91   :  { %v54_v22 = vpop.f32.mrf.mxu0  ;;  %97 = vmatmul.msk.bf16.vlgmr.msra.gmra.mxu1 %vm69_vm4, %v59_v21 }
 0x10e   :  { %v86_v24 = vpop.f32.mrf.mxu1 }
 0x10f   :  { %v87_v25 = vadd.f32 %v99_v23, %v86_v24 }
 0x111   :  { %91 = vst.msk [vmem:[%s168_s5] sm:$0x3] %vm90_vm5, %v87_v25 }
 0x116   :  { %v88_v26 = vpop.f32.mrf.mxu1 }

</bundles_post_ra>
